<compile_context>
chip_gen: v7x
topology: tpu7x:2x2x1
jax: 0.10.0
libtpu: 0.0.40
codegen_flags: <defaults>
</compile_context>

<pallas_src>
import functools
import math

import jax
import jax.numpy as jnp
import numpy as np
from jax.experimental import pallas as pl
from jax.experimental.pallas import tpu as pltpu


def _round_up(x, m):
    return ((x + m - 1) // m) * m


def _sublane(itemsize):
    return {1: 32, 2: 16, 4: 8}.get(itemsize, 8)


# ----------------------------------------------------------------------------
# chip generation + generation-aware VMEM budget (review item)
# ----------------------------------------------------------------------------
def _tpu_generation():
    try:
        kind = jax.devices()[0].device_kind.lower()
    except Exception:
        return 0
    for g in (7, 6, 5, 4, 3, 2):
        if ("v%d" % g) in kind or ("tpu%d" % g) in kind:
            return g
    return 0


def _vmem_budget():
    gen = _tpu_generation()
    try:
        cap = int(pltpu.get_tpu_info().vmem_capacity_bytes)
    except Exception:
        cap = (64 if gen >= 7 else 128) * 1024 * 1024
    # ~48 MiB limit on v7x (64 MiB physical), ~96-100 MiB on v5e/v6e (128 MiB)
    return gen, int(min(cap * 3 // 4, 100 * 1024 * 1024))


# ----------------------------------------------------------------------------
# qtorch-style float_quantize (nearest) used by the module for weights / inputs
# ----------------------------------------------------------------------------
def float_quantize(x, exp, man):
    x = x.astype(jnp.float32)
    emax = 2 ** (exp - 1) - 1
    emin = -(2 ** (exp - 1) - 2)
    max_val = (2.0 - 2.0 ** (-man)) * (2.0 ** emax)
    ax = jnp.abs(x)
    sgn = jnp.sign(x)
    e = jnp.floor(jnp.log2(jnp.where(ax > 0, ax, 1.0)))
    e = jnp.clip(e, emin, emax)
    scale = jnp.exp2(e - man)
    q = jnp.round(ax / scale) * scale
    q = jnp.minimum(q, max_val)
    return jnp.where(ax > 0, sgn * q, 0.0)


# ----------------------------------------------------------------------------
# Fused patch-gather conv kernel (stride == 1).
#   x_ref: (th+(k-1)*dil, Wp, C)   w_ref: (k, k, C, tn)
#   b_ref: (1, tn) f32             o_ref: (th*wo_pad, tn) f32
# k*k taps unrolled in-kernel; each tap = static slice + one MXU dot; f32
# local accumulator; single lane-dense store (no scratch, no pl.when).
# ----------------------------------------------------------------------------
def _fused_conv_kernel(x_ref, w_ref, b_ref, o_ref, *, k, dil, th, wo_pad,
                       use_relu):
    c = x_ref.shape[-1]
    acc = None
    for kh in range(k):
        for kw in range(k):
            xs = x_ref[kh * dil:kh * dil + th, kw * dil:kw * dil + wo_pad, :]
            xs = xs.reshape(th * wo_pad, c)
            p = jnp.dot(xs, w_ref[kh, kw], preferred_element_type=jnp.float32)
            acc = p if acc is None else acc + p
    acc = acc + b_ref[...]
    if use_relu:
        acc = jnp.maximum(acc, 0.0)
    o_ref[...] = acc


def _fused_conv_pallas(xhalo, w4, bias_row, use_relu, *, k, dil, th, wo_pad,
                       tn, vmem_limit):
    N, nH, th_in, Wp, C = xhalo.shape
    Coutp = w4.shape[-1]
    nJ = Coutp // tn
    kernel = functools.partial(_fused_conv_kernel, k=k, dil=dil, th=th,
                               wo_pad=wo_pad, use_relu=use_relu)
    return pl.pallas_call(
        kernel,
        out_shape=jax.ShapeDtypeStruct((N, nH * th * wo_pad, Coutp),
                                       jnp.float32),
        grid_spec=pltpu.PrefetchScalarGridSpec(
            num_scalar_prefetch=0,
            # j (Cout tile) OUTER -> weight slab block index is invariant
            # across all (n, i) steps and is DMA'd once per j.
            grid=(nJ, N, nH),
            in_specs=[
                pl.BlockSpec((None, None, th_in, Wp, C),
                             lambda j, n, i: (n, i, 0, 0, 0)),
                pl.BlockSpec((k, k, C, tn),
                             lambda j, n, i: (0, 0, 0, j)),
                pl.BlockSpec((1, tn), lambda j, n, i: (0, j)),
            ],
            out_specs=pl.BlockSpec((None, th * wo_pad, tn),
                                   lambda j, n, i: (n, i, j)),
        ),
        compiler_params=pltpu.CompilerParams(
            dimension_semantics=("parallel", "parallel", "parallel"),
            vmem_limit_bytes=int(vmem_limit)),
    )(xhalo, w4, bias_row)


def _pick_th(Ho, wo_pad, Wp_pad, C, k, dil, tn, xb, wb, budget):
    """Largest output-H tile whose (double-buffered x, resident w, out + local
    f32 acc) footprint fits the VMEM budget."""
    x_row = _round_up(Wp_pad, _sublane(xb)) * _round_up(C, 128) * xb
    w_blk = k * k * _round_up(C, _sublane(wb)) * tn * wb
    o_row = wo_pad * tn * 4
    halo = (k - 1) * dil
    th = Ho
    while th > 1:
        need = 2 * (th + halo) * x_row + 2 * w_blk + 3 * th * o_row + (2 << 20)
        if need <= budget:
            break
        th = (th + 1) // 2
    return max(1, th)


# ----------------------------------------------------------------------------
# Fallback for stride != 1: im2col + resident-weight GEMM (+ bias + ReLU).
# j outer (weight slab resident), tk = Kp (no K grid axis), no scratch.
# ----------------------------------------------------------------------------
def _gemm_bias_relu_kernel(x_ref, w_ref, b_ref, o_ref, *, use_relu):
    acc = jnp.dot(x_ref[...], w_ref[...], preferred_element_type=jnp.float32)
    acc = acc + b_ref[...]
    if use_relu:
        acc = jnp.maximum(acc, 0.0)
    o_ref[...] = acc


def _gemm_bias_relu_pallas(x_col, w_mat, bias_row, use_relu, *, tm, tn,
                           vmem_limit):
    M, Kp = x_col.shape
    Coutp = w_mat.shape[1]
    kernel = functools.partial(_gemm_bias_relu_kernel, use_relu=use_relu)
    return pl.pallas_call(
        kernel,
        out_shape=jax.ShapeDtypeStruct((M, Coutp), jnp.float32),
        grid_spec=pltpu.PrefetchScalarGridSpec(
            num_scalar_prefetch=0,
            grid=(Coutp // tn, M // tm),          # j outer, M-tiles inner
            in_specs=[pl.BlockSpec((tm, Kp), lambda j, i: (i, 0)),
                      pl.BlockSpec((Kp, tn), lambda j, i: (0, j)),
                      pl.BlockSpec((1, tn), lambda j, i: (0, j))],
            out_specs=pl.BlockSpec((tm, tn), lambda j, i: (i, j)),
        ),
        compiler_params=pltpu.CompilerParams(
            dimension_semantics=("parallel", "parallel"),
            vmem_limit_bytes=int(vmem_limit)),
    )(x_col, w_mat, bias_row)


def _pick_tm(M, Kp, tn, xb, wb, budget):
    w_blk = 2 * Kp * tn * wb
    per_row = 2 * Kp * xb + 2 * tn * 4
    tm = (budget - w_blk - (2 << 20)) // per_row
    tm = max(8, min(int(tm), 2048, _round_up(M, 8)))
    tm = max(8, (tm // 8) * 8)
    return tm, _round_up(M, tm)


def _im2col_nhwc(x_nhwc, k, stride, padding, dilation, k_pad_to):
    N, H, W, C = x_nhwc.shape
    xp = jnp.pad(x_nhwc,
                 ((0, 0), (padding, padding), (padding, padding), (0, 0)))
    Ho = (H + 2 * padding - dilation * (k - 1) - 1) // stride + 1
    Wo = (W + 2 * padding - dilation * (k - 1) - 1) // stride + 1
    cols = []
    for kh in range(k):
        for kw in range(k):
            h0 = kh * dilation
            w0 = kw * dilation
            cols.append(xp[:,
                           h0:h0 + stride * (Ho - 1) + 1:stride,
                           w0:w0 + stride * (Wo - 1) + 1:stride, :])
    K = C * k * k
    if k_pad_to > K:
        cols.append(jnp.zeros((N, Ho, Wo, k_pad_to - K), dtype=x_nhwc.dtype))
    col = jnp.concatenate(cols, axis=-1)
    return col.reshape(N * Ho * Wo, k_pad_to), Ho, Wo


# ----------------------------------------------------------------------------
# Forward (jit; cfg is a static tuple of the module hyper-parameters)
# ----------------------------------------------------------------------------
@functools.partial(jax.jit, static_argnums=(3,))
def _hwconv2d_forward(x, weight, bias, cfg):
    (cin, cout, k, stride, padding, dil, use_relu, lp, allow_fp8, max_th) = cfg
    N, C, H, W = x.shape
    gen, vmem_limit = _vmem_budget()
    budget = vmem_limit - 4 * 1024 * 1024

    # ---- module semantics: quantize + mask channels + partial-conv bias ----
    c_tc = cin if cin <= 3 else 8
    c_iter = cin // c_tc
    n_partial = c_iter * k * k
    wlp = float_quantize(weight, 5, 2) if lp else weight.astype(jnp.float32)
    ch_mask = (jnp.arange(cin) < c_iter * c_tc).astype(jnp.float32)
    wlp = wlp * ch_mask[None, :, None, None]
    input_quantized = lp and cin == 3
    xlp = float_quantize(x, 5, 2) if input_quantized else x.astype(jnp.float32)

    # ---- MXU operand dtypes (review: bf16 inputs; fp8 on v7x when lossless) --
    if input_quantized and allow_fp8 and gen >= 7:
        cdtype = jnp.float8_e5m2        # exact for E5M2-quantized x and w
    else:
        cdtype = jnp.bfloat16
    xb = wb = jnp.dtype(cdtype).itemsize

    Ho = (H + 2 * padding - dil * (k - 1) - 1) // stride + 1
    Wo = (W + 2 * padding - dil * (k - 1) - 1) // stride + 1
    Coutp = _round_up(cout, 128)
    tn = 128 if gen == 5 else (256 if Coutp % 256 == 0 else 128)   # v5e: 4x128 MXU
    nJ = Coutp // tn

    bias_row = jnp.pad(float(n_partial) * bias.astype(jnp.float32),
                       (0, Coutp - cout))[None, :]

    if stride == 1:
        # ------------------- fused patch-gather path -------------------------
        wo_pad = _round_up(Wo, 8)
        halo = (k - 1) * dil
        Wp_pad = wo_pad + halo
        th = _pick_th(Ho, wo_pad, Wp_pad, cin, k, dil, tn, xb, wb, budget)
        if max_th is not None:
            th = max(1, min(th, max_th))
        if gen >= 7 and N * nJ == 1 and Ho > 1:
            th = min(th, (Ho + 1) // 2)        # keep both v7x TensorCores busy
        nH = -(-Ho // th)
        Ho_pad = nH * th
        Hp_pad = Ho_pad + halo
        th_in = th + halo

        x_nhwc = xlp.transpose(0, 2, 3, 1).astype(cdtype)
        xp = jnp.pad(x_nhwc, ((0, 0),
                              (padding, Hp_pad - H - padding),
                              (padding, Wp_pad - W - padding),
                              (0, 0)))
        if nH == 1:
            xhalo = xp[:, None]                                   # (N,1,Hp,Wp,C)
        else:
            hidx = jnp.arange(nH)[:, None] * th + jnp.arange(th_in)[None, :]
            xhalo = jnp.take(xp, hidx, axis=1)                    # (N,nH,th_in,Wp,C)

        w4 = jnp.pad(wlp.transpose(2, 3, 1, 0),
                     ((0, 0), (0, 0), (0, 0), (0, Coutp - cout))).astype(cdtype)

        out = _fused_conv_pallas(xhalo, w4, bias_row, use_relu, k=k, dil=dil,
                                 th=th, wo_pad=wo_pad, tn=tn,
                                 vmem_limit=vmem_limit)
        out = out.reshape(N, Ho_pad, wo_pad, Coutp)[:, :Ho, :Wo, :cout]
    else:
        # ----------- strided fallback: im2col + resident-weight GEMM ---------
        Kdim = cin * k * k
        Kp = _round_up(Kdim, 128)
        x_nhwc = xlp.transpose(0, 2, 3, 1).astype(cdtype)
        x_col, Ho, Wo = _im2col_nhwc(x_nhwc, k, stride, padding, dil, Kp)
        M = N * Ho * Wo
        tm, M_pad = _pick_tm(M, Kp, tn, xb, wb, budget)
        if M_pad > M:
            x_col = jnp.pad(x_col, ((0, M_pad - M), (0, 0)))
        w_mat = wlp.transpose(2, 3, 1, 0).reshape(Kdim, cout)
        w_mat = jnp.pad(w_mat, ((0, Kp - Kdim), (0, Coutp - cout))).astype(cdtype)
        out = _gemm_bias_relu_pallas(x_col, w_mat, bias_row, use_relu,
                                     tm=tm, tn=tn, vmem_limit=vmem_limit)
        out = out[:M, :cout].reshape(N, Ho, Wo, cout)

    # TODO(synk): NHWC consumers could take `out` directly and skip this.
    return out.transpose(0, 3, 1, 2)


# ----------------------------------------------------------------------------
# HWconv2d forward-pass module (Pallas)
# ----------------------------------------------------------------------------
class HWConv2dPallas:
    def __init__(self, in_channels, out_channels, kernel_size, stride=1,
                 padding=0, dilation=1, groups=1, bias=False, use_relu=True,
                 low_precision=True, key=None, max_tile_h=None):
        assert groups == 1, "only groups=1 supported"
        self.cin, self.cout, self.k = in_channels, out_channels, kernel_size
        self.stride, self.padding, self.dilation = stride, padding, dilation
        self.use_relu, self.lp = use_relu, low_precision
        self.w_exp, self.w_man = 5, 2
        self.x_exp, self.x_man = 5, 2
        self.c_tc = in_channels if in_channels <= 3 else 8
        self.max_tile_h = max_tile_h

        fan_in = out_channels * kernel_size * kernel_size
        weight_std = math.sqrt(2.0 / fan_in)
        if key is None:
            key = jax.random.PRNGKey(0)
        wkey, bkey = jax.random.split(key)
        self.weight = weight_std * jax.random.normal(
            wkey, (out_channels, in_channels, kernel_size, kernel_size),
            dtype=jnp.float32)
        self.bias = (weight_std * jax.random.normal(bkey, (out_channels,),
                                                    dtype=jnp.float32)
                     if bias else jnp.zeros((out_channels,), jnp.float32))

    def quantized_masked_weight(self):
        c_iter = self.cin // self.c_tc
        n_partial = c_iter * self.k * self.k
        wlp = float_quantize(self.weight, self.w_exp, self.w_man) if self.lp \
            else self.weight
        ch_mask = (jnp.arange(self.cin) < c_iter * self.c_tc).astype(jnp.float32)
        return wlp * ch_mask[None, :, None, None], n_partial

    def _cfg(self, allow_fp8):
        return (self.cin, self.cout, self.k, self.stride, self.padding,
                self.dilation, self.use_relu, self.lp, allow_fp8,
                self.max_tile_h)

    def __call__(self, x):
        try:
            return _hwconv2d_forward(x, self.weight, self.bias, self._cfg(True))
        except Exception:
            # fp8 MXU path unavailable on this chip -> retry with bf16 operands
            return _hwconv2d_forward(x, self.weight, self.bias, self._cfg(False))


# ----------------------------------------------------------------------------
# pure-JAX reference of the exact forward semantics
# ----------------------------------------------------------------------------
def _reference(mod, x):
    wlp, n_partial = mod.quantized_masked_weight()
    xr = float_quantize(x, mod.x_exp, mod.x_man) if (mod.lp and mod.cin == 3) \
        else x.astype(jnp.float32)
    ref = jax.lax.conv_general_dilated(
        xr, wlp, window_strides=(mod.stride, mod.stride),
        padding=[(mod.padding, mod.padding), (mod.padding, mod.padding)],
        rhs_dilation=(mod.dilation, mod.dilation),
        dimension_numbers=("NCHW", "OIHW", "NCHW"),
        precision=jax.lax.Precision.HIGHEST)
    ref = ref + (float(n_partial) * mod.bias)[None, :, None, None]
    if mod.use_relu:
        ref = jnp.maximum(ref, 0.0)
    return ref


# ----------------------------------------------------------------------------
# main
# ----------------------------------------------------------------------------
if __name__ == "__main__":
    ks = jax.random.split(jax.random.PRNGKey(0), 8)

    # case 1: Cin > 3 (input not quantized -> bf16 MXU feed), Cout > 128 so the
    # Cout-tile grid axis has several blocks, no bias.
    x1 = jax.random.normal(ks[0], (2, 8, 16, 16), dtype=jnp.float32)
    m1 = HWConv2dPallas(8, 320, 3, stride=1, padding=1, bias=False, key=ks[1])
    o1 = jax.block_until_ready(m1(x1))
    np.testing.assert_allclose(np.asarray(o1), np.asarray(_reference(m1, x1)),
                               rtol=1e-2, atol=1e-2)   # bf16-input tolerance

    # case 2: Cin == 3 (input E5M2-quantized; fp8 MXU feed on v7x), with bias.
    x2 = jax.random.normal(ks[2], (2, 3, 16, 16), dtype=jnp.float32)
    m2 = HWConv2dPallas(3, 32, 3, stride=1, padding=1, bias=True, key=ks[3])
    o2 = jax.block_until_ready(m2(x2))
    np.testing.assert_allclose(np.asarray(o2), np.asarray(_reference(m2, x2)),
                               rtol=2e-3, atol=2e-3)   # operands exact, f32 acc

    # case 3: odd spatial size, dilation=2, Cout < 128, bias; max_tile_h=8
    # forces nH > 1 so the halo'd H-tiling / garbage-row slicing is exercised.
    x3 = jax.random.normal(ks[4], (1, 16, 15, 15), dtype=jnp.float32)
    m3 = HWConv2dPallas(16, 24, 3, stride=1, padding=2, dilation=2, bias=True,
                        key=ks[5], max_tile_h=8)
    o3 = jax.block_until_ready(m3(x3))
    np.testing.assert_allclose(np.asarray(o3), np.asarray(_reference(m3, x3)),
                               rtol=1e-2, atol=1e-2)

    # case 4: stride 2 -> im2col + resident-weight GEMM fallback path.
    x4 = jax.random.normal(ks[6], (2, 8, 16, 16), dtype=jnp.float32)
    m4 = HWConv2dPallas(8, 16, 3, stride=2, padding=1, bias=True, key=ks[7])
    o4 = jax.block_until_ready(m4(x4))
    np.testing.assert_allclose(np.asarray(o4), np.asarray(_reference(m4, x4)),
                               rtol=1e-2, atol=1e-2)

    print("KERNEL_OK")
</pallas_src>

<mosaic_0001>
module attributes {stable_mosaic.version = 11 : i64} {
  func.func @_fused_conv_kernel(%arg0: i32, %arg1: i32, %arg2: i32, %arg3: memref<1x1x18x18x8xbf16, #tpu.memory_space<vmem>>, %arg4: memref<3x3x8x128xbf16, #tpu.memory_space<vmem>>, %arg5: memref<1x128xf32, #tpu.memory_space<vmem>>, %arg6: memref<1x256x128xf32, #tpu.memory_space<vmem>>) attributes {dimension_semantics = [#tpu.dimension_semantics<parallel>, #tpu.dimension_semantics<parallel>, #tpu.dimension_semantics<parallel>], iteration_bounds = array<i64: 3, 2, 1>, scalar_prefetch = 0 : i64, scratch_operands = 0 : i64, tpu.core_type = #tpu.core_type<tc>, window_params = [{transform_indices = @transform_0, window_bounds = array<i64: 1, 1, 18, 18, 8>}, {transform_indices = @transform_1, window_bounds = array<i64: 3, 3, 8, 128>}, {transform_indices = @transform_2, window_bounds = array<i64: 1, 128>}, {transform_indices = @transform_3, window_bounds = array<i64: 1, 256, 128>}]} {
    %c0 = arith.constant 0 : index
    %c0_0 = arith.constant 0 : index
    %c0_1 = arith.constant 0 : index
    %c0_2 = arith.constant 0 : index
    %c0_3 = arith.constant 0 : index
    %0 = vector.load %arg3[%c0, %c0_0, %c0_1, %c0_2, %c0_3] : memref<1x1x18x18x8xbf16, #tpu.memory_space<vmem>>, vector<1x1x16x16x8xbf16>
    %1 = vector.shape_cast %0 : vector<1x1x16x16x8xbf16> to vector<16x16x8xbf16>
    %2 = vector.shape_cast %1 : vector<16x16x8xbf16> to vector<256x8xbf16>
    %c0_4 = arith.constant 0 : index
    %c0_5 = arith.constant 0 : index
    %c0_6 = arith.constant 0 : index
    %c0_7 = arith.constant 0 : index
    %3 = vector.load %arg4[%c0_4, %c0_5, %c0_6, %c0_7] : memref<3x3x8x128xbf16, #tpu.memory_space<vmem>>, vector<1x1x8x128xbf16>
    %4 = vector.shape_cast %3 : vector<1x1x8x128xbf16> to vector<8x128xbf16>
    %cst = arith.constant dense<0.000000e+00> : vector<256x128xf32>
    %5 = tpu.matmul %2, %4, %cst {dimension_numbers = #tpu.dot_dimension_numbers<[1], [0], [0], [1], [0, 0, 1, 1], [], []>} : vector<256x8xbf16>, vector<8x128xbf16>, vector<256x128xf32> -> vector<256x128xf32>
    %c0_8 = arith.constant 0 : index
    %c0_9 = arith.constant 0 : index
    %c0_10 = arith.constant 0 : index
    %c1 = arith.constant 1 : index
    %c0_11 = arith.constant 0 : index
    %6 = vector.load %arg3[%c0_8, %c0_9, %c0_10, %c1, %c0_11] : memref<1x1x18x18x8xbf16, #tpu.memory_space<vmem>>, vector<1x1x16x16x8xbf16>
    %7 = vector.shape_cast %6 : vector<1x1x16x16x8xbf16> to vector<16x16x8xbf16>
    %8 = vector.shape_cast %7 : vector<16x16x8xbf16> to vector<256x8xbf16>
    %c0_12 = arith.constant 0 : index
    %c1_13 = arith.constant 1 : index
    %c0_14 = arith.constant 0 : index
    %c0_15 = arith.constant 0 : index
    %9 = vector.load %arg4[%c0_12, %c1_13, %c0_14, %c0_15] : memref<3x3x8x128xbf16, #tpu.memory_space<vmem>>, vector<1x1x8x128xbf16>
    %10 = vector.shape_cast %9 : vector<1x1x8x128xbf16> to vector<8x128xbf16>
    %cst_16 = arith.constant dense<0.000000e+00> : vector<256x128xf32>
    %11 = tpu.matmul %8, %10, %cst_16 {dimension_numbers = #tpu.dot_dimension_numbers<[1], [0], [0], [1], [0, 0, 1, 1], [], []>} : vector<256x8xbf16>, vector<8x128xbf16>, vector<256x128xf32> -> vector<256x128xf32>
    %12 = arith.addf %5, %11 : vector<256x128xf32>
    %c0_17 = arith.constant 0 : index
    %c0_18 = arith.constant 0 : index
    %c0_19 = arith.constant 0 : index
    %c2 = arith.constant 2 : index
    %c0_20 = arith.constant 0 : index
    %13 = vector.load %arg3[%c0_17, %c0_18, %c0_19, %c2, %c0_20] : memref<1x1x18x18x8xbf16, #tpu.memory_space<vmem>>, vector<1x1x16x16x8xbf16>
    %14 = vector.shape_cast %13 : vector<1x1x16x16x8xbf16> to vector<16x16x8xbf16>
    %15 = vector.shape_cast %14 : vector<16x16x8xbf16> to vector<256x8xbf16>
    %c0_21 = arith.constant 0 : index
    %c2_22 = arith.constant 2 : index
    %c0_23 = arith.constant 0 : index
    %c0_24 = arith.constant 0 : index
    %16 = vector.load %arg4[%c0_21, %c2_22, %c0_23, %c0_24] : memref<3x3x8x128xbf16, #tpu.memory_space<vmem>>, vector<1x1x8x128xbf16>
    %17 = vector.shape_cast %16 : vector<1x1x8x128xbf16> to vector<8x128xbf16>
    %cst_25 = arith.constant dense<0.000000e+00> : vector<256x128xf32>
    %18 = tpu.matmul %15, %17, %cst_25 {dimension_numbers = #tpu.dot_dimension_numbers<[1], [0], [0], [1], [0, 0, 1, 1], [], []>} : vector<256x8xbf16>, vector<8x128xbf16>, vector<256x128xf32> -> vector<256x128xf32>
    %19 = arith.addf %12, %18 : vector<256x128xf32>
    %c0_26 = arith.constant 0 : index
    %c0_27 = arith.constant 0 : index
    %c1_28 = arith.constant 1 : index
    %c0_29 = arith.constant 0 : index
    %c0_30 = arith.constant 0 : index
    %20 = vector.load %arg3[%c0_26, %c0_27, %c1_28, %c0_29, %c0_30] : memref<1x1x18x18x8xbf16, #tpu.memory_space<vmem>>, vector<1x1x16x16x8xbf16>
    %21 = vector.shape_cast %20 : vector<1x1x16x16x8xbf16> to vector<16x16x8xbf16>
    %22 = vector.shape_cast %21 : vector<16x16x8xbf16> to vector<256x8xbf16>
    %c1_31 = arith.constant 1 : index
    %c0_32 = arith.constant 0 : index
    %c0_33 = arith.constant 0 : index
    %c0_34 = arith.constant 0 : index
    %23 = vector.load %arg4[%c1_31, %c0_32, %c0_33, %c0_34] : memref<3x3x8x128xbf16, #tpu.memory_space<vmem>>, vector<1x1x8x128xbf16>
    %24 = vector.shape_cast %23 : vector<1x1x8x128xbf16> to vector<8x128xbf16>
    %cst_35 = arith.constant dense<0.000000e+00> : vector<256x128xf32>
    %25 = tpu.matmul %22, %24, %cst_35 {dimension_numbers = #tpu.dot_dimension_numbers<[1], [0], [0], [1], [0, 0, 1, 1], [], []>} : vector<256x8xbf16>, vector<8x128xbf16>, vector<256x128xf32> -> vector<256x128xf32>
    %26 = arith.addf %19, %25 : vector<256x128xf32>
    %c0_36 = arith.constant 0 : index
    %c0_37 = arith.constant 0 : index
    %c1_38 = arith.constant 1 : index
    %c1_39 = arith.constant 1 : index
    %c0_40 = arith.constant 0 : index
    %27 = vector.load %arg3[%c0_36, %c0_37, %c1_38, %c1_39, %c0_40] : memref<1x1x18x18x8xbf16, #tpu.memory_space<vmem>>, vector<1x1x16x16x8xbf16>
    %28 = vector.shape_cast %27 : vector<1x1x16x16x8xbf16> to vector<16x16x8xbf16>
    %29 = vector.shape_cast %28 : vector<16x16x8xbf16> to vector<256x8xbf16>
    %c1_41 = arith.constant 1 : index
    %c1_42 = arith.constant 1 : index
    %c0_43 = arith.constant 0 : index
    %c0_44 = arith.constant 0 : index
    %30 = vector.load %arg4[%c1_41, %c1_42, %c0_43, %c0_44] : memref<3x3x8x128xbf16, #tpu.memory_space<vmem>>, vector<1x1x8x128xbf16>
    %31 = vector.shape_cast %30 : vector<1x1x8x128xbf16> to vector<8x128xbf16>
    %cst_45 = arith.constant dense<0.000000e+00> : vector<256x128xf32>
    %32 = tpu.matmul %29, %31, %cst_45 {dimension_numbers = #tpu.dot_dimension_numbers<[1], [0], [0], [1], [0, 0, 1, 1], [], []>} : vector<256x8xbf16>, vector<8x128xbf16>, vector<256x128xf32> -> vector<256x128xf32>
    %33 = arith.addf %26, %32 : vector<256x128xf32>
    %c0_46 = arith.constant 0 : index
    %c0_47 = arith.constant 0 : index
    %c1_48 = arith.constant 1 : index
    %c2_49 = arith.constant 2 : index
    %c0_50 = arith.constant 0 : index
    %34 = vector.load %arg3[%c0_46, %c0_47, %c1_48, %c2_49, %c0_50] : memref<1x1x18x18x8xbf16, #tpu.memory_space<vmem>>, vector<1x1x16x16x8xbf16>
    %35 = vector.shape_cast %34 : vector<1x1x16x16x8xbf16> to vector<16x16x8xbf16>
    %36 = vector.shape_cast %35 : vector<16x16x8xbf16> to vector<256x8xbf16>
    %c1_51 = arith.constant 1 : index
    %c2_52 = arith.constant 2 : index
    %c0_53 = arith.constant 0 : index
    %c0_54 = arith.constant 0 : index
    %37 = vector.load %arg4[%c1_51, %c2_52, %c0_53, %c0_54] : memref<3x3x8x128xbf16, #tpu.memory_space<vmem>>, vector<1x1x8x128xbf16>
    %38 = vector.shape_cast %37 : vector<1x1x8x128xbf16> to vector<8x128xbf16>
    %cst_55 = arith.constant dense<0.000000e+00> : vector<256x128xf32>
    %39 = tpu.matmul %36, %38, %cst_55 {dimension_numbers = #tpu.dot_dimension_numbers<[1], [0], [0], [1], [0, 0, 1, 1], [], []>} : vector<256x8xbf16>, vector<8x128xbf16>, vector<256x128xf32> -> vector<256x128xf32>
    %40 = arith.addf %33, %39 : vector<256x128xf32>
    %c0_56 = arith.constant 0 : index
    %c0_57 = arith.constant 0 : index
    %c2_58 = arith.constant 2 : index
    %c0_59 = arith.constant 0 : index
    %c0_60 = arith.constant 0 : index
    %41 = vector.load %arg3[%c0_56, %c0_57, %c2_58, %c0_59, %c0_60] : memref<1x1x18x18x8xbf16, #tpu.memory_space<vmem>>, vector<1x1x16x16x8xbf16>
    %42 = vector.shape_cast %41 : vector<1x1x16x16x8xbf16> to vector<16x16x8xbf16>
    %43 = vector.shape_cast %42 : vector<16x16x8xbf16> to vector<256x8xbf16>
    %c2_61 = arith.constant 2 : index
    %c0_62 = arith.constant 0 : index
    %c0_63 = arith.constant 0 : index
    %c0_64 = arith.constant 0 : index
    %44 = vector.load %arg4[%c2_61, %c0_62, %c0_63, %c0_64] : memref<3x3x8x128xbf16, #tpu.memory_space<vmem>>, vector<1x1x8x128xbf16>
    %45 = vector.shape_cast %44 : vector<1x1x8x128xbf16> to vector<8x128xbf16>
    %cst_65 = arith.constant dense<0.000000e+00> : vector<256x128xf32>
    %46 = tpu.matmul %43, %45, %cst_65 {dimension_numbers = #tpu.dot_dimension_numbers<[1], [0], [0], [1], [0, 0, 1, 1], [], []>} : vector<256x8xbf16>, vector<8x128xbf16>, vector<256x128xf32> -> vector<256x128xf32>
    %47 = arith.addf %40, %46 : vector<256x128xf32>
    %c0_66 = arith.constant 0 : index
    %c0_67 = arith.constant 0 : index
    %c2_68 = arith.constant 2 : index
    %c1_69 = arith.constant 1 : index
    %c0_70 = arith.constant 0 : index
    %48 = vector.load %arg3[%c0_66, %c0_67, %c2_68, %c1_69, %c0_70] : memref<1x1x18x18x8xbf16, #tpu.memory_space<vmem>>, vector<1x1x16x16x8xbf16>
    %49 = vector.shape_cast %48 : vector<1x1x16x16x8xbf16> to vector<16x16x8xbf16>
    %50 = vector.shape_cast %49 : vector<16x16x8xbf16> to vector<256x8xbf16>
    %c2_71 = arith.constant 2 : index
    %c1_72 = arith.constant 1 : index
    %c0_73 = arith.constant 0 : index
    %c0_74 = arith.constant 0 : index
    %51 = vector.load %arg4[%c2_71, %c1_72, %c0_73, %c0_74] : memref<3x3x8x128xbf16, #tpu.memory_space<vmem>>, vector<1x1x8x128xbf16>
    %52 = vector.shape_cast %51 : vector<1x1x8x128xbf16> to vector<8x128xbf16>
    %cst_75 = arith.constant dense<0.000000e+00> : vector<256x128xf32>
    %53 = tpu.matmul %50, %52, %cst_75 {dimension_numbers = #tpu.dot_dimension_numbers<[1], [0], [0], [1], [0, 0, 1, 1], [], []>} : vector<256x8xbf16>, vector<8x128xbf16>, vector<256x128xf32> -> vector<256x128xf32>
    %54 = arith.addf %47, %53 : vector<256x128xf32>
    %c0_76 = arith.constant 0 : index
    %c0_77 = arith.constant 0 : index
    %c2_78 = arith.constant 2 : index
    %c2_79 = arith.constant 2 : index
    %c0_80 = arith.constant 0 : index
    %55 = vector.load %arg3[%c0_76, %c0_77, %c2_78, %c2_79, %c0_80] : memref<1x1x18x18x8xbf16, #tpu.memory_space<vmem>>, vector<1x1x16x16x8xbf16>
    %56 = vector.shape_cast %55 : vector<1x1x16x16x8xbf16> to vector<16x16x8xbf16>
    %57 = vector.shape_cast %56 : vector<16x16x8xbf16> to vector<256x8xbf16>
    %c2_81 = arith.constant 2 : index
    %c2_82 = arith.constant 2 : index
    %c0_83 = arith.constant 0 : index
    %c0_84 = arith.constant 0 : index
    %58 = vector.load %arg4[%c2_81, %c2_82, %c0_83, %c0_84] : memref<3x3x8x128xbf16, #tpu.memory_space<vmem>>, vector<1x1x8x128xbf16>
    %59 = vector.shape_cast %58 : vector<1x1x8x128xbf16> to vector<8x128xbf16>
    %cst_85 = arith.constant dense<0.000000e+00> : vector<256x128xf32>
    %60 = tpu.matmul %57, %59, %cst_85 {dimension_numbers = #tpu.dot_dimension_numbers<[1], [0], [0], [1], [0, 0, 1, 1], [], []>} : vector<256x8xbf16>, vector<8x128xbf16>, vector<256x128xf32> -> vector<256x128xf32>
    %61 = arith.addf %54, %60 : vector<256x128xf32>
    %c0_86 = arith.constant 0 : index
    %c0_87 = arith.constant 0 : index
    %62 = vector.load %arg5[%c0_86, %c0_87] : memref<1x128xf32, #tpu.memory_space<vmem>>, vector<1x128xf32>
    %63 = vector.broadcast %62 : vector<1x128xf32> to vector<256x128xf32>
    %64 = arith.addf %61, %63 : vector<256x128xf32>
    %cst_88 = arith.constant 0.000000e+00 : f32
    %65 = vector.broadcast %cst_88 : f32 to vector<256x128xf32>
    %66 = arith.maximumf %64, %65 : vector<256x128xf32>
    %c0_89 = arith.constant 0 : index
    %c0_90 = arith.constant 0 : index
    %c0_91 = arith.constant 0 : index
    %67 = vector.load %arg6[%c0_89, %c0_90, %c0_91] : memref<1x256x128xf32, #tpu.memory_space<vmem>>, vector<1x256x128xf32>
    %68 = vector.shape_cast %67 : vector<1x256x128xf32> to vector<256x128xf32>
    %69 = vector.shape_cast %66 : vector<256x128xf32> to vector<1x256x128xf32>
    tpu.vector_store %arg6[%c0_89, %c0_90, %c0_91], %69 {strides = array<i32>} : memref<1x256x128xf32, #tpu.memory_space<vmem>>, vector<1x256x128xf32>,
    return
  }
  func.func @transform_0(%arg0: i32, %arg1: i32, %arg2: i32) -> (i32, i32, i32, i32, i32) {
    %c0_i32 = arith.constant 0 : i32
    %c0_i32_0 = arith.constant 0 : i32
    %c0_i32_1 = arith.constant 0 : i32
    %c0_i32_2 = arith.constant 0 : i32
    return %arg1, %arg2, %c0_i32, %c0_i32_0, %c0_i32_1 : i32, i32, i32, i32, i32
  }
  func.func @transform_1(%arg0: i32, %arg1: i32, %arg2: i32) -> (i32, i32, i32, i32) {
    %c0_i32 = arith.constant 0 : i32
    %c0_i32_0 = arith.constant 0 : i32
    %c0_i32_1 = arith.constant 0 : i32
    %c0_i32_2 = arith.constant 0 : i32
    return %c0_i32, %c0_i32_0, %c0_i32_1, %arg0 : i32, i32, i32, i32
  }
  func.func @transform_2(%arg0: i32, %arg1: i32, %arg2: i32) -> (i32, i32) {
    %c0_i32 = arith.constant 0 : i32
    %c0_i32_0 = arith.constant 0 : i32
    return %c0_i32, %arg0 : i32, i32
  }
  func.func @transform_3(%arg0: i32, %arg1: i32, %arg2: i32) -> (i32, i32, i32) {
    %c0_i32 = arith.constant 0 : i32
    return %arg1, %arg2, %arg0 : i32, i32, i32
  }
}

module attributes {stable_mosaic.version = 11 : i64} {
  func.func @_fused_conv_kernel(%arg0: i32, %arg1: i32, %arg2: i32, %arg3: memref<1x1x18x18x8xbf16, #tpu.memory_space<vmem>>, %arg4: memref<3x3x8x128xbf16, #tpu.memory_space<vmem>>, %arg5: memref<1x128xf32, #tpu.memory_space<vmem>>, %arg6: memref<1x256x128xf32, #tpu.memory_space<vmem>>) attributes {dimension_semantics = [#tpu.dimension_semantics<parallel>, #tpu.dimension_semantics<parallel>, #tpu.dimension_semantics<parallel>], iteration_bounds = array<i64: 3, 2, 1>, scalar_prefetch = 0 : i64, scratch_operands = 0 : i64, tpu.core_type = #tpu.core_type<tc>, window_params = [{transform_indices = @transform_0, window_bounds = array<i64: 1, 1, 18, 18, 8>}, {transform_indices = @transform_1, window_bounds = array<i64: 3, 3, 8, 128>}, {transform_indices = @transform_2, window_bounds = array<i64: 1, 128>}, {transform_indices = @transform_3, window_bounds = array<i64: 1, 256, 128>}]} {
    %c0 = arith.constant 0 : index
    %c0_0 = arith.constant 0 : index
    %c0_1 = arith.constant 0 : index
    %c0_2 = arith.constant 0 : index
    %c0_3 = arith.constant 0 : index
    %0 = vector.load %arg3[%c0, %c0_0, %c0_1, %c0_2, %c0_3] : memref<1x1x18x18x8xbf16, #tpu.memory_space<vmem>>, vector<1x1x16x16x8xbf16>
    %1 = vector.shape_cast %0 : vector<1x1x16x16x8xbf16> to vector<16x16x8xbf16>
    %2 = vector.shape_cast %1 : vector<16x16x8xbf16> to vector<256x8xbf16>
    %c0_4 = arith.constant 0 : index
    %c0_5 = arith.constant 0 : index
    %c0_6 = arith.constant 0 : index
    %c0_7 = arith.constant 0 : index
    %3 = vector.load %arg4[%c0_4, %c0_5, %c0_6, %c0_7] : memref<3x3x8x128xbf16, #tpu.memory_space<vmem>>, vector<1x1x8x128xbf16>
    %4 = vector.shape_cast %3 : vector<1x1x8x128xbf16> to vector<8x128xbf16>
    %cst = arith.constant dense<0.000000e+00> : vector<256x128xf32>
    %5 = tpu.matmul %2, %4, %cst {dimension_numbers = #tpu.dot_dimension_numbers<[1], [0], [0], [1], [0, 0, 1, 1], [], []>} : vector<256x8xbf16>, vector<8x128xbf16>, vector<256x128xf32> -> vector<256x128xf32>
    %c0_8 = arith.constant 0 : index
    %c0_9 = arith.constant 0 : index
    %c0_10 = arith.constant 0 : index
    %c1 = arith.constant 1 : index
    %c0_11 = arith.constant 0 : index
    %6 = vector.load %arg3[%c0_8, %c0_9, %c0_10, %c1, %c0_11] : memref<1x1x18x18x8xbf16, #tpu.memory_space<vmem>>, vector<1x1x16x16x8xbf16>
    %7 = vector.shape_cast %6 : vector<1x1x16x16x8xbf16> to vector<16x16x8xbf16>
    %8 = vector.shape_cast %7 : vector<16x16x8xbf16> to vector<256x8xbf16>
    %c0_12 = arith.constant 0 : index
    %c1_13 = arith.constant 1 : index
    %c0_14 = arith.constant 0 : index
    %c0_15 = arith.constant 0 : index
    %9 = vector.load %arg4[%c0_12, %c1_13, %c0_14, %c0_15] : memref<3x3x8x128xbf16, #tpu.memory_space<vmem>>, vector<1x1x8x128xbf16>
    %10 = vector.shape_cast %9 : vector<1x1x8x128xbf16> to vector<8x128xbf16>
    %cst_16 = arith.constant dense<0.000000e+00> : vector<256x128xf32>
    %11 = tpu.matmul %8, %10, %cst_16 {dimension_numbers = #tpu.dot_dimension_numbers<[1], [0], [0], [1], [0, 0, 1, 1], [], []>} : vector<256x8xbf16>, vector<8x128xbf16>, vector<256x128xf32> -> vector<256x128xf32>
    %12 = arith.addf %5, %11 : vector<256x128xf32>
    %c0_17 = arith.constant 0 : index
    %c0_18 = arith.constant 0 : index
    %c0_19 = arith.constant 0 : index
    %c2 = arith.constant 2 : index
    %c0_20 = arith.constant 0 : index
    %13 = vector.load %arg3[%c0_17, %c0_18, %c0_19, %c2, %c0_20] : memref<1x1x18x18x8xbf16, #tpu.memory_space<vmem>>, vector<1x1x16x16x8xbf16>
    %14 = vector.shape_cast %13 : vector<1x1x16x16x8xbf16> to vector<16x16x8xbf16>
    %15 = vector.shape_cast %14 : vector<16x16x8xbf16> to vector<256x8xbf16>
    %c0_21 = arith.constant 0 : index
    %c2_22 = arith.constant 2 : index
    %c0_23 = arith.constant 0 : index
    %c0_24 = arith.constant 0 : index
    %16 = vector.load %arg4[%c0_21, %c2_22, %c0_23, %c0_24] : memref<3x3x8x128xbf16, #tpu.memory_space<vmem>>, vector<1x1x8x128xbf16>
    %17 = vector.shape_cast %16 : vector<1x1x8x128xbf16> to vector<8x128xbf16>
    %cst_25 = arith.constant dense<0.000000e+00> : vector<256x128xf32>
    %18 = tpu.matmul %15, %17, %cst_25 {dimension_numbers = #tpu.dot_dimension_numbers<[1], [0], [0], [1], [0, 0, 1, 1], [], []>} : vector<256x8xbf16>, vector<8x128xbf16>, vector<256x128xf32> -> vector<256x128xf32>
    %19 = arith.addf %12, %18 : vector<256x128xf32>
    %c0_26 = arith.constant 0 : index
    %c0_27 = arith.constant 0 : index
    %c1_28 = arith.constant 1 : index
    %c0_29 = arith.constant 0 : index
    %c0_30 = arith.constant 0 : index
    %20 = vector.load %arg3[%c0_26, %c0_27, %c1_28, %c0_29, %c0_30] : memref<1x1x18x18x8xbf16, #tpu.memory_space<vmem>>, vector<1x1x16x16x8xbf16>
    %21 = vector.shape_cast %20 : vector<1x1x16x16x8xbf16> to vector<16x16x8xbf16>
    %22 = vector.shape_cast %21 : vector<16x16x8xbf16> to vector<256x8xbf16>
    %c1_31 = arith.constant 1 : index
    %c0_32 = arith.constant 0 : index
    %c0_33 = arith.constant 0 : index
    %c0_34 = arith.constant 0 : index
    %23 = vector.load %arg4[%c1_31, %c0_32, %c0_33, %c0_34] : memref<3x3x8x128xbf16, #tpu.memory_space<vmem>>, vector<1x1x8x128xbf16>
    %24 = vector.shape_cast %23 : vector<1x1x8x128xbf16> to vector<8x128xbf16>
    %cst_35 = arith.constant dense<0.000000e+00> : vector<256x128xf32>
    %25 = tpu.matmul %22, %24, %cst_35 {dimension_numbers = #tpu.dot_dimension_numbers<[1], [0], [0], [1], [0, 0, 1, 1], [], []>} : vector<256x8xbf16>, vector<8x128xbf16>, vector<256x128xf32> -> vector<256x128xf32>
    %26 = arith.addf %19, %25 : vector<256x128xf32>
    %c0_36 = arith.constant 0 : index
    %c0_37 = arith.constant 0 : index
    %c1_38 = arith.constant 1 : index
    %c1_39 = arith.constant 1 : index
    %c0_40 = arith.constant 0 : index
    %27 = vector.load %arg3[%c0_36, %c0_37, %c1_38, %c1_39, %c0_40] : memref<1x1x18x18x8xbf16, #tpu.memory_space<vmem>>, vector<1x1x16x16x8xbf16>
    %28 = vector.shape_cast %27 : vector<1x1x16x16x8xbf16> to vector<16x16x8xbf16>
    %29 = vector.shape_cast %28 : vector<16x16x8xbf16> to vector<256x8xbf16>
    %c1_41 = arith.constant 1 : index
    %c1_42 = arith.constant 1 : index
    %c0_43 = arith.constant 0 : index
    %c0_44 = arith.constant 0 : index
    %30 = vector.load %arg4[%c1_41, %c1_42, %c0_43, %c0_44] : memref<3x3x8x128xbf16, #tpu.memory_space<vmem>>, vector<1x1x8x128xbf16>
    %31 = vector.shape_cast %30 : vector<1x1x8x128xbf16> to vector<8x128xbf16>
    %cst_45 = arith.constant dense<0.000000e+00> : vector<256x128xf32>
    %32 = tpu.matmul %29, %31, %cst_45 {dimension_numbers = #tpu.dot_dimension_numbers<[1], [0], [0], [1], [0, 0, 1, 1], [], []>} : vector<256x8xbf16>, vector<8x128xbf16>, vector<256x128xf32> -> vector<256x128xf32>
    %33 = arith.addf %26, %32 : vector<256x128xf32>
    %c0_46 = arith.constant 0 : index
    %c0_47 = arith.constant 0 : index
    %c1_48 = arith.constant 1 : index
    %c2_49 = arith.constant 2 : index
    %c0_50 = arith.constant 0 : index
    %34 = vector.load %arg3[%c0_46, %c0_47, %c1_48, %c2_49, %c0_50] : memref<1x1x18x18x8xbf16, #tpu.memory_space<vmem>>, vector<1x1x16x16x8xbf16>
    %35 = vector.shape_cast %34 : vector<1x1x16x16x8xbf16> to vector<16x16x8xbf16>
    %36 = vector.shape_cast %35 : vector<16x16x8xbf16> to vector<256x8xbf16>
    %c1_51 = arith.constant 1 : index
    %c2_52 = arith.constant 2 : index
    %c0_53 = arith.constant 0 : index
    %c0_54 = arith.constant 0 : index
    %37 = vector.load %arg4[%c1_51, %c2_52, %c0_53, %c0_54] : memref<3x3x8x128xbf16, #tpu.memory_space<vmem>>, vector<1x1x8x128xbf16>
    %38 = vector.shape_cast %37 : vector<1x1x8x128xbf16> to vector<8x128xbf16>
    %cst_55 = arith.constant dense<0.000000e+00> : vector<256x128xf32>
    %39 = tpu.matmul %36, %38, %cst_55 {dimension_numbers = #tpu.dot_dimension_numbers<[1], [0], [0], [1], [0, 0, 1, 1], [], []>} : vector<256x8xbf16>, vector<8x128xbf16>, vector<256x128xf32> -> vector<256x128xf32>
    %40 = arith.addf %33, %39 : vector<256x128xf32>
    %c0_56 = arith.constant 0 : index
    %c0_57 = arith.constant 0 : index
    %c2_58 = arith.constant 2 : index
    %c0_59 = arith.constant 0 : index
    %c0_60 = arith.constant 0 : index
    %41 = vector.load %arg3[%c0_56, %c0_57, %c2_58, %c0_59, %c0_60] : memref<1x1x18x18x8xbf16, #tpu.memory_space<vmem>>, vector<1x1x16x16x8xbf16>
    %42 = vector.shape_cast %41 : vector<1x1x16x16x8xbf16> to vector<16x16x8xbf16>
    %43 = vector.shape_cast %42 : vector<16x16x8xbf16> to vector<256x8xbf16>
    %c2_61 = arith.constant 2 : index
    %c0_62 = arith.constant 0 : index
    %c0_63 = arith.constant 0 : index
    %c0_64 = arith.constant 0 : index
    %44 = vector.load %arg4[%c2_61, %c0_62, %c0_63, %c0_64] : memref<3x3x8x128xbf16, #tpu.memory_space<vmem>>, vector<1x1x8x128xbf16>
    %45 = vector.shape_cast %44 : vector<1x1x8x128xbf16> to vector<8x128xbf16>
    %cst_65 = arith.constant dense<0.000000e+00> : vector<256x128xf32>
    %46 = tpu.matmul %43, %45, %cst_65 {dimension_numbers = #tpu.dot_dimension_numbers<[1], [0], [0], [1], [0, 0, 1, 1], [], []>} : vector<256x8xbf16>, vector<8x128xbf16>, vector<256x128xf32> -> vector<256x128xf32>
    %47 = arith.addf %40, %46 : vector<256x128xf32>
    %c0_66 = arith.constant 0 : index
    %c0_67 = arith.constant 0 : index
    %c2_68 = arith.constant 2 : index
    %c1_69 = arith.constant 1 : index
    %c0_70 = arith.constant 0 : index
    %48 = vector.load %arg3[%c0_66, %c0_67, %c2_68, %c1_69, %c0_70] : memref<1x1x18x18x8xbf16, #tpu.memory_space<vmem>>, vector<1x1x16x16x8xbf16>
    %49 = vector.shape_cast %48 : vector<1x1x16x16x8xbf16> to vector<16x16x8xbf16>
    %50 = vector.shape_cast %49 : vector<16x16x8xbf16> to vector<256x8xbf16>
    %c2_71 = arith.constant 2 : index
    %c1_72 = arith.constant 1 : index
    %c0_73 = arith.constant 0 : index
    %c0_74 = arith.constant 0 : index
    %51 = vector.load %arg4[%c2_71, %c1_72, %c0_73, %c0_74] : memref<3x3x8x128xbf16, #tpu.memory_space<vmem>>, vector<1x1x8x128xbf16>
    %52 = vector.shape_cast %51 : vector<1x1x8x128xbf16> to vector<8x128xbf16>
    %cst_75 = arith.constant dense<0.000000e+00> : vector<256x128xf32>
    %53 = tpu.matmul %50, %52, %cst_75 {dimension_numbers = #tpu.dot_dimension_numbers<[1], [0], [0], [1], [0, 0, 1, 1], [], []>} : vector<256x8xbf16>, vector<8x128xbf16>, vector<256x128xf32> -> vector<256x128xf32>
    %54 = arith.addf %47, %53 : vector<256x128xf32>
    %c0_76 = arith.constant 0 : index
    %c0_77 = arith.constant 0 : index
    %c2_78 = arith.constant 2 : index
    %c2_79 = arith.constant 2 : index
    %c0_80 = arith.constant 0 : index
    %55 = vector.load %arg3[%c0_76, %c0_77, %c2_78, %c2_79, %c0_80] : memref<1x1x18x18x8xbf16, #tpu.memory_space<vmem>>, vector<1x1x16x16x8xbf16>
    %56 = vector.shape_cast %55 : vector<1x1x16x16x8xbf16> to vector<16x16x8xbf16>
    %57 = vector.shape_cast %56 : vector<16x16x8xbf16> to vector<256x8xbf16>
    %c2_81 = arith.constant 2 : index
    %c2_82 = arith.constant 2 : index
    %c0_83 = arith.constant 0 : index
    %c0_84 = arith.constant 0 : index
    %58 = vector.load %arg4[%c2_81, %c2_82, %c0_83, %c0_84] : memref<3x3x8x128xbf16, #tpu.memory_space<vmem>>, vector<1x1x8x128xbf16>
    %59 = vector.shape_cast %58 : vector<1x1x8x128xbf16> to vector<8x128xbf16>
    %cst_85 = arith.constant dense<0.000000e+00> : vector<256x128xf32>
    %60 = tpu.matmul %57, %59, %cst_85 {dimension_numbers = #tpu.dot_dimension_numbers<[1], [0], [0], [1], [0, 0, 1, 1], [], []>} : vector<256x8xbf16>, vector<8x128xbf16>, vector<256x128xf32> -> vector<256x128xf32>
    %61 = arith.addf %54, %60 : vector<256x128xf32>
    %c0_86 = arith.constant 0 : index
    %c0_87 = arith.constant 0 : index
    %62 = vector.load %arg5[%c0_86, %c0_87] : memref<1x128xf32, #tpu.memory_space<vmem>>, vector<1x128xf32>
    %63 = vector.broadcast %62 : vector<1x128xf32> to vector<256x128xf32>
    %64 = arith.addf %61, %63 : vector<256x128xf32>
    %cst_88 = arith.constant 0.000000e+00 : f32
    %65 = vector.broadcast %cst_88 : f32 to vector<256x128xf32>
    %66 = arith.maximumf %64, %65 : vector<256x128xf32>
    %c0_89 = arith.constant 0 : index
    %c0_90 = arith.constant 0 : index
    %c0_91 = arith.constant 0 : index
    %67 = vector.load %arg6[%c0_89, %c0_90, %c0_91] : memref<1x256x128xf32, #tpu.memory_space<vmem>>, vector<1x256x128xf32>
    %68 = vector.shape_cast %67 : vector<1x256x128xf32> to vector<256x128xf32>
    %69 = vector.shape_cast %66 : vector<256x128xf32> to vector<1x256x128xf32>
    tpu.vector_store %arg6[%c0_89, %c0_90, %c0_91], %69 {strides = array<i32>} : memref<1x256x128xf32, #tpu.memory_space<vmem>>, vector<1x256x128xf32>,
    return
  }
  func.func @transform_0(%arg0: i32, %arg1: i32, %arg2: i32) -> (i32, i32, i32, i32, i32) {
    %c0_i32 = arith.constant 0 : i32
    %c0_i32_0 = arith.constant 0 : i32
    %c0_i32_1 = arith.constant 0 : i32
    %c0_i32_2 = arith.constant 0 : i32
    return %arg1, %arg2, %c0_i32, %c0_i32_0, %c0_i32_1 : i32, i32, i32, i32, i32
  }
  func.func @transform_1(%arg0: i32, %arg1: i32, %arg2: i32) -> (i32, i32, i32, i32) {
    %c0_i32 = arith.constant 0 : i32
    %c0_i32_0 = arith.constant 0 : i32
    %c0_i32_1 = arith.constant 0 : i32
    %c0_i32_2 = arith.constant 0 : i32
    return %c0_i32, %c0_i32_0, %c0_i32_1, %arg0 : i32, i32, i32, i32
  }
  func.func @transform_2(%arg0: i32, %arg1: i32, %arg2: i32) -> (i32, i32) {
    %c0_i32 = arith.constant 0 : i32
    %c0_i32_0 = arith.constant 0 : i32
    return %c0_i32, %arg0 : i32, i32
  }
  func.func @transform_3(%arg0: i32, %arg1: i32, %arg2: i32) -> (i32, i32, i32) {
    %c0_i32 = arith.constant 0 : i32
    return %arg1, %arg2, %arg0 : i32, i32, i32
  }
}

</mosaic_0001>

<bundles_post_ra>
// kernel: _hwconv2d_forward.1
= control target key start
LH: loop header
LB: loop body
LE: loop exit
PB: predicated region body
PF: predicated region fallthrough
CT: control target
= control target key end

     0   :  { %s9072_s0 = inlined_call_operand.hbm [shape: bf16[2,1,18,18,8], index: 0, kind: input, shape index: {}]   ;;  %s9073_s1 = inlined_call_operand.hbm [shape: bf16[3,3,8,384], index: 1, kind: input, shape index: {}]   ;;  %s9074_s2 = inlined_call_operand.hbm [shape: f32[1,384], index: 2, kind: input, shape index: {}]   ;;  %s9075_s3 = inlined_call_operand.hbm [shape: f32[2,256,384], index: 3, kind: output, shape index: {}]  }
   0x1   :  { %9110 = sst [smem:[#allocation42_spill]] %s9073_s1 }
   0x2   :  { %9111 = sst [smem:[#allocation43_spill]] %s9075_s3 }
   0x3   :  { %8 = vsyncpa [#allocation3], 0 }
   0x4   :  { %10 = vsyncpa [#allocation3 + $0x1], 0 }
   0x5   :  { %11 = vsyncpa [#allocation6], 0 }
   0x6   :  { %13 = vsyncpa [#allocation6 + $0x1], 0 }
   0x7   :  { %14 = vsyncpa [#allocation4], 0 }
   0x8   :  { %16 = vsyncpa [#allocation4 + $0x1], 0  ;;  %s6902_s12 = smov 0   ;;  %s6904_s13 = smov 0  }
   0x9   :  { %s6906_s14 = smov 0   ;;  %s6908_s15 = smov 0  }
   0xa   :  { %s6910_s16 = smov 0   ;;  %s6912_s17 = smov 0  }
   0xb   :  { %s6914_s18 = smov 0   ;;  %s6916_s19 = smov 0  }
   0xc   :  { %s6918_s20 = smov 0   ;;  %s6920_s21 = smov 0  }
   0xd   :  { %s6922_s22 = smov 0   ;;  %s6924_s23 = smov 0  }
   0xe   :  { %s6926_s24 = smov 0   ;;  %s6928_s25 = smov 0  }
   0xf LB: > { %9112 = sst [smem:[#allocation12_spill]] %s6826_s14  ;;  %p9078_p0 = scmp.eq.s32.totalorder %s6870_s25, 0  ;;  %s6870_s25 = sphi %s6928_s25, %s22_s25   ;;  %s6866_s24 = sphi %s6926_s24, %s9232_s24   ;;  %s6862_s23 = sphi %s6924_s23, %s9231_s23   ;;  %s6858_s22 = sphi %s6922_s22, %s9230_s22   ;;  %s6854_s21 = sphi %s6920_s21, %s9219_s21   ;;  %s6850_s20 = sphi %s6918_s20, %s9218_s20   ;;  %s6846_s19 = sphi %s6916_s19, %s9229_s19   ;;  %s6842_s18 = sphi %s6914_s18, %s9228_s18   ;;  %s6838_s17 = sphi %s6912_s17, %s9227_s17   ;;  %s6834_s16 = sphi %s6910_s16, %s9226_s16   ;;  %s6830_s15 = sphi %s6908_s15, %s9225_s15   ;;  %s6826_s14 = sphi %s6906_s14, %s9215_s14   ;;  %s6822_s13 = sphi %s6904_s13, %s9224_s13   ;;  %s6818_s12 = sphi %s6902_s12, %s9223_s12  }
  0x10   : > { %9113 = sst [smem:[#allocation13_spill]] %s6850_s20  ;;  %p83_p1 = scmp.ne.s32.totalorder %s6838_s17, %s6834_s16 }
  0x11   : > { %9114 = sst [smem:[#allocation14_spill]] %s6858_s22  ;;  %p9077_p3 = scmp.lt.s32.totalorder %s6870_s25, 6 }
  0x12   : > { %9115 = sst [smem:[#allocation15_spill]] %s6862_s23  ;;  %p85_p4 = por %p83_p1, %p9078_p0 }
  0x13   : > { %s192_s27 = sand.u32 1, %s6870_s25   ;;  %s9076_s28 = sand.u32 1, %s6838_s17  }
  0x14   : > { %s6381_s29 = smul.u32 36, %s9076_s28  ;;  %s5107_s30 = sshll.u32 %s6866_s24, 6 }
  0x15   : > { %s9116_s1 = sld [smem:[#allocation42_spill]]  ;;  %p6993_p5 = pnand %p9077_p3, %p85_p4 }
  0x16   : > { %s196_s8 = scalar_lea.vmem [#allocation5], %s6381_s29  ;;  %p5109_p6 = scmp.ge.s32.totalorder %s6870_s25, 1 }
  0x17   : > { %s202_s9 = sshll.u32 %s196_s8, 4  ;;  %s7000_s10 = scalar_lea.sflag [#allocation6], %s192_s27  ;;  %s6997_s9 = int_to_ptr.vmem [resolvable:$true] %s202_s9 }
  0x18   : > { %p9083_p8 = pneg %p6993_p5 }
  0x1b   : > { %s6989_s6 = scalar_lea.hbm %s9116_s1, %s5107_s30  ;;  %s6635_s5 = scalar_lea.hbm %s9116_s1, 1728 }
  0x1c   : > { %s6630_s11 = scalar_lea.hbm %s6989_s6, 576  ;;  %p6636_p11 = scmp.lt.u32.totalorder %s6989_s6, %s9116_s1 }
  0x1d   : > { %p6631_p7 = scmp.ne.s32.totalorder %s6989_s6, %s6630_s11  ;;  %p6637_p12 = scmp.lt.u32.totalorder %s6635_s5, %s6630_s11 }
  0x1e   : > { %p6639_p1 = scmp.lt.u32.totalorder %s6630_s11, %s6989_s6 }
  0x1f   : > { %p6633_p9 = pnand %p9083_p8, %p6631_p7  ;;  %p6638_p13 = por %p6637_p12, %p6636_p11 }
  0x21   : > { %p6634_p10 = pneg %p6633_p9  ;;  %p6640_p4 = por %p6639_p1, %p6638_p13 }
  0x23   : > { %p6641_p3 = pnand %p6640_p4, %p6634_p10 }
  0x25   : > { %6644 = shalt.err (!%p6641_p3)
}
  0x26   : > { %s6645_s27 = scalar_lea.vmem %s6997_s9, 576  ;;  %s6872_s8 = smov [#allocation5]  }
  0x27   : > { %p6646_p7 = scmp.ne.s32.totalorder %s6997_s9, %s6645_s27  ;;  %s6650_s30 = sshll.u32 %s6872_s8, 4  ;;  %s6651_s30 = int_to_ptr.vmem [resolvable:$false] %s6650_s30 }
  0x28   : > { %s6652_s28 = scalar_lea.vmem %s6651_s30, 1152  ;;  %p6653_p0 = scmp.lt.s32.totalorder %s6997_s9, %s6651_s30 }
  0x29   : > { %p6648_p9 = pnand %p6646_p7, %p9083_p8  ;;  %p6654_p11 = scmp.lt.s32.totalorder %s6652_s28, %s6645_s27 }
  0x2b   : > { %p6649_p2 = pneg %p6648_p9  ;;  %p6655_p12 = por %p6654_p11, %p6653_p0 }
  0x2d   : > { %p6656_p13 = pnand %p6655_p12, %p6649_p2 }
  0x2f   : > { %6659 = shalt.err (!%p6656_p13)
}
  0x30   : > { %s6873_s11 = smov 192   ;;  %s9079_s4 = smov 64  }
  0x31   : > { %s9080_s5 = smov 4   ;;  %p227_p0 = scmp.lt.s32.totalorder %s6870_s25, 7 }
  0x32   : > { %6399 = dma.hbm_to_vmem [thread:$0]  (!%p6993_p5), %s6989_s6, 576, %s6997_s9, %s7000_s10, %s6873_s11, %s9079_s4, %s9080_s5  }
  0x33   : > { %p7033_p2 = pnand %p5109_p6, %p227_p0  ;;  %s7038_s27 = sadd.s32 4294967295, %s6870_s25  }
  0x34   : > { %s5103_s8 = sadd.s32 4294967294, %s6870_s25   ;;  %s37_s30 = sadd.s32 1, %s6862_s23 }
  0x35   : > { %s9118_s29 = scalar_select %p7033_p2, 1, 0 }
  0x36   : > { %s41_s28 = sadd.s32 1, %s6866_s24  ;;  %p39_p3 = scmp.ge.s32.totalorder %s37_s30, 2 }
  0x37   : > { %s50_s26 = sadd.s32 1, %s6850_s20  ;;  %p57_p10 = scmp.ne.s32.totalorder %s6850_s20, %s6846_s19 }
  0x38   : > { %p63_p1 = scmp.ne.s32.totalorder %s6846_s19, %s6842_s18  ;;  %s9234_s30 = smov (%p39_p3, %s37_s30), 0 }
  0x39   : > { %9119 = sst [smem:[#allocation16_spill]] %s9234_s30  ;;  %s9236_s28 = smov (!%p39_p3, %s41_s28), %s6866_s24 }
  0x3a   : > { %s45_s6 = ssub.s32 %s6862_s23, %s9234_s30  ;;  %p9120_p6 = scmp.eq.s32.totalorder %s6870_s25, 0 }
  0x3b   : > { %p43_p7 = scmp.ge.s32.totalorder %s9236_s28, 3  ;;  %p48_p9 = scmp.eq.s32.totalorder %s45_s6, 0 }
  0x3c   : > { %p7055_p4 = por %p9120_p6, %p57_p10  ;;  %p64_p11 = scmp.eq.s32.totalorder %s7038_s27, 0 }
  0x3d   : > { %s132_s18 = sadd.s32 1, %s6826_s14  ;;  %s9238_s28 = smov (%p43_p7, %s9236_s28), 0 }
  0x3e   : > { %9122 = sst [smem:[#allocation17_spill]] %s9238_s28  ;;  %p7066_p12 = por %p64_p11, %p63_p1 }
  0x3f   : > { %s7064_s11 = scalar_select %p48_p9, %s6850_s20, %s50_s26  }
  0x40   : > { %s9124_s4 = scalar_select %p7066_p12, 1, 0 }
  0x41   : > { %9123 = sst [smem:[#allocation18_spill]] %s7064_s11  ;;  %s73_s5 = ssub.s32 %s6866_s24, %s9238_s28 }
  0x42   : > { %p74_p13 = scmp.eq.s32.totalorder %s73_s5, 0  ;;  %p9125_p0 = scmp.ne.s32.totalorder %s6834_s16, %s6830_s15 }
  0x43   : > { %s129_s30 = sor.u32 %s73_s5, %s45_s6  ;;  %p142_p10 = scmp.ne.s32.totalorder %s6826_s14, %s6822_s13 }
  0x44   : > { %p7075_p3 = por %p9125_p0, %p64_p11  ;;  %s9127_s3 = sadd.s32 1, %s6838_s17 }
  0x45   : > { %s7084_s22 = scalar_select %p74_p13, %s6838_s17, %s9127_s3  }
  0x46   : > { %s9126_s1 = scalar_select %p7075_p3, 1, 0 }
  0x47   : > { %9128 = sst [smem:[#allocation19_spill]] %s7084_s22  ;;  %p130_p6 = scmp.eq.s32.totalorder %s129_s30, 0 }
  0x48   : > { %p143_p1 = scmp.eq.s32.totalorder %s7038_s27, 5  ;;  %p148_p7 = scmp.ne.s32.totalorder %s6822_s13, %s6818_s12 }
  0x49   : > { %p149_p9 = scmp.eq.s32.totalorder %s5103_s8, 5  ;;  %s169_s5 = sand.u32 1, %s6850_s20  }
  0x4a   : > { %s7090_s26 = scalar_select %p130_p6, %s6826_s14, %s132_s18  }
  0x4b   : > { %p7092_p8 = por %p143_p1, %p142_p10  ;;  %p7096_p11 = por %p149_p9, %p148_p7 }
  0x4c   : > { %9129 = sst [smem:[#allocation20_spill]] %s7090_s26  ;;  %s6380_s6 = smul.u32 3456, %s6862_s23 }
  0x4d   : > { %s9130_s15 = scalar_select %p7092_p8, 1, 0 }
  0x4e   : > { %s9131_s28 = scalar_select %p7096_p11, 1, 0 }
  0x4f   : > { %s6379_s11 = smul.u32 216, %s169_s5  ;;  %s7105_s30 = scalar_lea.hbm %s9072_s0, %s6380_s6 }
  0x50   : > { %p9132_p13 = scmp.lt.s32.totalorder %s6870_s25, 6  ;;  %s5108_s20 = sshll.u32 %s6866_s24, 4 }
  0x51   : > { %s173_s18 = scalar_lea.vmem [#allocation2], %s6379_s11  ;;  %s7118_s22 = scalar_lea.sflag [#allocation3], %s169_s5 }
  0x52   : > { %p7111_p0 = pnand %p9132_p13, %p7055_p4  ;;  %s182_s23 = sshll.u32 %s173_s18, 4  ;;  %s7115_s23 = int_to_ptr.vmem [resolvable:$true] %s182_s23 }
  0x53   : > { %s6660_s6 = scalar_lea.hbm %s7105_s30, 3456  ;;  %s6665_s26 = scalar_lea.hbm %s9072_s0, 6912 }
  0x54   : > { %p6661_p10 = scmp.ne.s32.totalorder %s7105_s30, %s6660_s6  ;;  %p6662_p6 = pneg %p7111_p0 }
  0x55   : > { %p6666_p7 = scmp.lt.u32.totalorder %s7105_s30, %s9072_s0  ;;  %p6667_p9 = scmp.lt.u32.totalorder %s6665_s26, %s6660_s6 }
  0x56   : > { %p6663_p1 = pnand %p6662_p6, %p6661_p10  ;;  %p6669_p11 = scmp.lt.u32.totalorder %s6660_s6, %s7105_s30 }
  0x57   : > { %p6668_p13 = por %p6667_p9, %p6666_p7 }
  0x58   : > { %p6664_p4 = pneg %p6663_p1 }
  0x59   : > { %p6670_p8 = por %p6669_p11, %p6668_p13 }
  0x5b   : > { %p6671_p3 = pnand %p6670_p8, %p6664_p4 }
  0x5d   : > { %6674 = shalt.err (!%p6671_p3)
}
  0x5e   : > { %s6675_s5 = scalar_lea.vmem %s7115_s23, 3456  ;;  %s6876_s18 = smov [#allocation2]  }
  0x5f   : > { %p6676_p10 = scmp.ne.s32.totalorder %s7115_s23, %s6675_s5  ;;  %s6680_s9 = sshll.u32 %s6876_s18, 4  ;;  %s6681_s9 = int_to_ptr.vmem [resolvable:$false] %s6680_s9 }
  0x60   : > { %s6682_s14 = scalar_lea.vmem %s6681_s9, 6912  ;;  %p6683_p2 = scmp.lt.s32.totalorder %s7115_s23, %s6681_s9 }
  0x61   : > { %p6678_p1 = pnand %p6676_p10, %p6662_p6  ;;  %p6684_p7 = scmp.lt.s32.totalorder %s6682_s14, %s6675_s5 }
  0x63   : > { %p6679_p12 = pneg %p6678_p1  ;;  %p6685_p9 = por %p6684_p7, %p6683_p2 }
  0x65   : > { %p6686_p11 = pnand %p6685_p9, %p6679_p12 }
  0x67   : > { %6689 = shalt.err (!%p6686_p11)
}
  0x68   : > { %s9134_s26 = smov 4   ;;  %s9135_s6 = smov 64  }
  0x69   : > { %6396 = dma.hbm_to_vmem [thread:$0]  (!%p7111_p0), %s7105_s30, 3456, %s7115_s23, %s7118_s22, %s9135_s6, %s9135_s6, %s9134_s26  }
  0x6a   : > { %s7154_s5 = scalar_lea.hbm %s9074_s2, %s5108_s20  ;;  %s9136_s18 = sand.u32 1, %s6838_s17  }
  0x6b   : > { %s215_s8 = scalar_lea.vmem [#allocation7], %s9136_s18  ;;  %s6690_s14 = scalar_lea.hbm %s7154_s5, 16 }
  0x6c   : > { %s222_s9 = sshll.u32 %s215_s8, 4  ;;  %p6691_p8 = scmp.ne.s32.totalorder %s7154_s5, %s6690_s14  ;;  %s223_s9 = int_to_ptr.vmem [resolvable:$true] %s222_s9 }
  0x6d   : > { %p9137_p2 = pneg %p6993_p5  ;;  %s6695_s22 = scalar_lea.hbm %s9074_s2, 48 }
  0x6e   : > { %p6696_p0 = scmp.lt.u32.totalorder %s7154_s5, %s9074_s2  ;;  %p6697_p6 = scmp.lt.u32.totalorder %s6695_s22, %s6690_s14 }
  0x6f   : > { %p6693_p12 = pnand %p6691_p8, %p9137_p2  ;;  %p6699_p13 = scmp.lt.u32.totalorder %s6690_s14, %s7154_s5 }
  0x70   : > { %p6698_p4 = por %p6697_p6, %p6696_p0 }
  0x71   : > { %p6694_p3 = pneg %p6693_p12 }
  0x72   : > { %p6700_p10 = por %p6699_p13, %p6698_p4 }
  0x74   : > { %p6701_p1 = pnand %p6700_p10, %p6694_p3 }
  0x76   : > { %6704 = shalt.err (!%p6701_p1)
}
  0x77   : > { %s6705_s6 = scalar_lea.vmem %s223_s9, 16  ;;  %p9138_p9 = pmov %p9137_p2 }
  0x78   : > { %p6706_p7 = scmp.ne.s32.totalorder %s223_s9, %s6705_s6  ;;  %s6877_s3 = smov [#allocation7]  }
  0x79   : > { %s6710_s11 = sshll.u32 %s6877_s3, 4  ;;  %s6711_s11 = int_to_ptr.vmem [resolvable:$false] %s6710_s11 }
  0x7a   : > { %p6708_p11 = pnand %p6706_p7, %p9138_p9  ;;  %s6712_s18 = scalar_lea.vmem %s6711_s11, 32 }
  0x7b   : > { %p6713_p2 = scmp.lt.s32.totalorder %s223_s9, %s6711_s11  ;;  %p6714_p12 = scmp.lt.s32.totalorder %s6712_s18, %s6705_s6 }
  0x7c   : > { %p6709_p8 = pneg %p6708_p11 }
  0x7d   : > { %p6715_p0 = por %p6714_p12, %p6713_p2 }
  0x7f   : > { %p6716_p6 = pnand %p6715_p0, %p6709_p8 }
  0x81   : > { %6719 = shalt.err (!%p6716_p6)
}
  0x82   : > { %6402 = dma.hbm_to_vmem [thread:$0]  (!%p6993_p5), %s7154_s5, 16, %s223_s9, %s7000_s10  }
  0x83   : > { %p9139_p3 = scmp.ne.s32.totalorder %s9118_s29, 0 }
  0x85   : > { %231 = sbr.rel (%p9139_p3) target bundleno = 736 (0x2e0), region = 32 }
  0x8c   : > { %s233_s8 = sand.u32 1, %s6846_s19   ;;  %p9140_p4 = scmp.ne.s32.totalorder %s9124_s4, 0 }
  0x8d   : > { %s6382_s14 = smul.u32 216, %s233_s8  ;;  %s234_s23 = scalar_lea.sflag [#allocation3], %s233_s8 }
  0x8f   : > { %s7181_s30 = scalar_lea.vmem [#allocation2], %s6382_s14 }
  0x90   : > { %6805 = dma.done.wait (%p9140_p4), %s234_s23, 3456  }
  0x91   : > { %6807 = vsyncadd (%p9140_p4), %s234_s23, 4294963840  ;;  %s242_s7 = sand.u32 1, %s7038_s27   ;;  %s244_s10 = sand.u32 1, %s6834_s16  }
  0x92   : > { %s6383_s29 = smul.u32 36, %s244_s10  ;;  %s243_s5 = scalar_lea.sflag [#allocation6], %s242_s7 }
  0x93   : > { %p9141_p5 = scmp.ne.s32.totalorder %s9126_s1, 0 }
  0x94   : > { %s7191_s9 = scalar_lea.vmem [#allocation5], %s6383_s29 }
  0x95   : > { %6809 = dma.done.wait (%p9141_p5), %s243_s5, 592  }
  0x96   : > { %6811 = vsyncadd (%p9141_p5), %s243_s5, 4294966704  ;;  %vm823_vm0 = vcmask 1043456   ;;  %vm337_vm1 = vsmask.f32 3328  ;;  %vm338_vm2 = vsmask.f32 7440 }
  0x97   : > { %v5111_v0 = vld [vmem:[%s7191_s9 + $0x4] sm:$0xf]  ;;  %v5338_v1 = vld [vmem:[%s7191_s9 + $0x10] sm:$0xf]  ;;  %v289_v5 = vld [vmem:[%s7181_s30 + $0x4] sm:$0xf] }
  0x98   : > { %v288_v2 = vld [vmem:[%s7181_s30] sm:$0xf]  ;;  %6369 = vmatprep.subr.msk.bf16.mxu1 %vm823_vm0, %v5111_v0  ;;  %6373 = vmatprep.subr.msk.bf16.mxu0 %vm823_vm0, %v5338_v1  ;;  %v825_v3 = vsel %vm823_vm0, %v5111_v0, 0  ;;  %v7204_v4 = vsel %vm823_vm0, %v5338_v1, 0  ;;  %v321_v6 = vld [vmem:[%s7181_s30 + $0x8] sm:$0x1]  ;;  %vm7229_vm3 = vmor %vm337_vm1, %vm338_vm2 }
  0x99   : > { %9142 = vst [vmem:[#allocation21_spill] sm:$0xff] %v7204_v4  ;;  %5806 = vmatpush3.bf16.msra.mxu1 %v825_v3  ;;  %5942 = vmatpush3.bf16.msra.mxu0 %v7204_v4  ;;  %v341_v7 = vshrl.u32 %v288_v2, 16  ;;  %v344_v8 = vshll.u32 %v288_v2, 16  ;;  %v350_v9 = vshll.u32 %v289_v5, 16  ;;  %v354_v10 = vshrl.u32 %v289_v5, 16  ;;  %s283_s1 = sand.u32 1, %s6822_s13  }
  0x9a   : > { %v320_v11 = vld [vmem:[%s7191_s9] sm:$0xf]  ;;  %v360_v12 = vshll.u32 %v321_v6, 16  ;;  %v5290_v13 = vld [vmem:[%s7181_s30 + $0xc] sm:$0xf]  ;;  %vm774_vm4 = vcmask 64512  }
  0x9b   : > { %6370 = vmatprep.subr.msk.bf16.mxu1 %vm823_vm0, %v320_v11  ;;  %v7213_v14 = vld [vmem:[%s7181_s30 + $0x10] sm:$0xf]  ;;  %v343_v15 = vrot.slane %v341_v7, 4  ;;  %v346_v16 = vrot.slane %v344_v8, 5  ;;  %v352_v17 = vrot.slane %v350_v9, 5  ;;  %v356_v18 = vrot.slane %v354_v10, 4 }
  0x9c   : > { %v7216_v19 = vld [vmem:[%s7181_s30 + $0x14] sm:$0x1]  ;;  %v362_v20 = vrot.slane %v360_v12, 5  ;;  %v2145_v21 = vshrl.u32 %v5290_v13, 16  ;;  %v2148_v22 = vshll.u32 %v5290_v13, 16  ;;  %v2154_v23 = vshll.u32 %v7213_v14, 16 }
  0x9d   : > { %v7220_v24 = vld [vmem:[%s7191_s9 + $0x14] sm:$0xf]  ;;  %v347_v25 = vor.u32 %v346_v16, %v343_v15  ;;  %v357_v26 = vor.u32 %v356_v18, %v352_v17  ;;  %v2158_v27 = vshrl.u32 %v7213_v14, 16  ;;  %v2164_v28 = vshll.u32 %v7216_v19, 16  ;;  %v290_v29 = vld [vmem:[%s7181_s30 + $0xc] sm:$0xf] }
  0x9e   : > { %6375 = vmatprep.subr.msk.bf16.mxu0 %vm823_vm0, %v7220_v24  ;;  %v2147_v31 = vrot.slane %v2145_v21, 4  ;;  %v2150_v32 = vrot.slane %v2148_v22, 5  ;;  %v2156_v33 = vrot.slane %v2154_v23, 5  ;;  %v291_v34 = vld [vmem:[%s7181_s30 + $0x10] sm:$0xf]  ;;  %v365_v41 = vshrl.u32 %v290_v29, 16 }
  0x9f   : > { %v348_v35 = vrot.slane %v347_v25, 4  ;;  %v358_v36 = vrot.slane %v357_v26, 4  ;;  %v2160_v37 = vrot.slane %v2158_v27, 4  ;;  %v2166_v39 = vrot.slane %v2164_v28, 5  ;;  %v322_v40 = vld [vmem:[%s7181_s30 + $0x14] sm:$0x1] }
  0xa0   : > { %v2151_v38 = vor.u32 %v2150_v32, %v2147_v31  ;;  %v368_v42 = vshll.u32 %v290_v29, 16  ;;  %v374_v46 = vshll.u32 %v291_v34, 16  ;;  %v367_v49 = vrot.slane %v365_v41, 4  ;;  %v5293_v55 = vld [vmem:[%s7181_s30 + $0x18] sm:$0xf]  ;;  %s254_s4 = scalar_lea.vmem [#allocation7], %s244_s10 }
  0xa1   : > { %v353_v43 = vsel %vm7229_vm3, %v348_v35, %v352_v17  ;;  %v363_v44 = vsel %vm7229_vm3, %v358_v36, %v362_v20  ;;  %v2161_v45 = vor.u32 %v2160_v37, %v2156_v33  ;;  %v378_v53 = vshrl.u32 %v291_v34, 16  ;;  %v7246_v60 = vld [vmem:[%s7181_s30 + $0x1c] sm:$0xf]  ;;  %v7249_v61 = vld [vmem:[%s7181_s30 + $0x20] sm:$0x1]  ;;  %s5110_s27 = sshll.u32 %s283_s1, 8 }
  0xa2   : > { %v5112_v47 = vcombine.low %v353_v43, %v363_v44  ;;  %v2152_v48 = vrot.slane %v2151_v38, 4  ;;  %v370_v50 = vrot.slane %v368_v42, 5  ;;  %v376_v52 = vrot.slane %v374_v46, 5  ;;  %v292_v16 = vld [vmem:[%s7181_s30 + $0x18] sm:$0xf]  ;;  %s8918_s22 = scalar_lea.vmem [#allocation8], %s5110_s27 }
  0xa3   : > { %v2162_v51 = vrot.slane %v2161_v45, 4  ;;  %v384_v54 = vshll.u32 %v322_v40, 16  ;;  %v2888_v57 = vrot.slane %v7213_v14, 5  ;;  %v2891_v58 = vrot.slane %v7216_v19, 5  ;;  %v293_v22 = vld [vmem:[%s7181_s30 + $0x1c] sm:$0xf] }
  0xa4   : > { %5807 = vmatprep.mubr.msk.bf16.mxu1 %vm774_vm4, %v5112_v47  ;;  %v2157_v56 = vsel %vm7229_vm3, %v2152_v48, %v2156_v33  ;;  %v371_v59 = vor.u32 %v370_v50, %v367_v49  ;;  %v380_v63 = vrot.slane %v378_v53, 4  ;;  %v1117_v1 = vsel %vm823_vm0, %v320_v11, 0  ;;  %v323_v28 = vld [vmem:[%s7181_s30 + $0x20] sm:$0x1]  ;;  %v5296_v34 = vld [vmem:[%s7181_s30 + $0x24] sm:$0xf] }
  0xa5   : > { %v2167_v62 = vsel %vm7229_vm3, %v2162_v51, %v2166_v39  ;;  %v386_v0 = vrot.slane %v384_v54, 5  ;;  %v2169_v5 = vshrl.u32 %v5293_v55, 16  ;;  %v2172_v6 = vshll.u32 %v5293_v55, 16  ;;  %v7275_v43 = vld [vmem:[%s7181_s30 + $0x28] sm:$0xf]  ;;  %s9209_s20 = sld [smem:[#allocation14_spill]] }
  0xa6   : > { %v5339_v2 = vcombine.low %v2157_v56, %v2167_v62  ;;  %v372_v3 = vrot.slane %v371_v59, 4  ;;  %v381_v7 = vor.u32 %v380_v63, %v376_v52  ;;  %v2178_v8 = vshll.u32 %v7246_v60, 16  ;;  %v7281_v46 = vld [vmem:[%s7181_s30 + $0x2c] sm:$0x1]  ;;  %s6384_s26 = smul.u32 96, %s6854_s21  ;;  %s4968_s3 = sshll.u32 %s8918_s22, 4  ;;  %s8989_s3 = int_to_ptr.vmem [resolvable:$true] %s4968_s3 }
  0xa7   : > { %v2182_v9 = vshrl.u32 %v7246_v60, 16  ;;  %v2188_v10 = vshll.u32 %v7249_v61, 16  ;;  %v2171_v13 = vrot.slane %v2169_v5, 4  ;;  %v2174_v11 = vrot.slane %v2172_v6, 5  ;;  %s9210_s8 = sld [smem:[#allocation43_spill]]  ;;  %s8996_s23 = scalar_lea.sflag [#allocation4], %s283_s1 }
  0xa8   : > { %5943 = vmatprep.mubr.msk.bf16.mxu0 %vm774_vm4, %v5339_v2  ;;  %v377_v12 = vsel %vm7229_vm3, %v372_v3, %v376_v52  ;;  %v2895_v15 = vrot.slane %v7246_v60, 5  ;;  %v382_v17 = vrot.slane %v381_v7, 4  ;;  %v2180_v18 = vrot.slane %v2178_v8, 5  ;;  %v294_v52 = vld [vmem:[%s7181_s30 + $0x24] sm:$0xf]  ;;  %p9211_p10 = scmp.ne.s32.totalorder %s9130_s15, 0 }
  0xa9   : > { %v2184_v20 = vrot.slane %v2182_v9, 4  ;;  %v2190_v21 = vrot.slane %v2188_v10, 5  ;;  %v2175_v23 = vor.u32 %v2174_v11, %v2171_v13  ;;  %v2898_v26 = vrot.slane %v7249_v61, 5  ;;  %v5299_v13 = vld [vmem:[%s7181_s30 + $0x30] sm:$0xf]  ;;  %s6878_s7 = smov [#allocation8]  }
  0xaa   : > { %v7265_v25 = vrot.slane %v2895_v15, 4  ;;  %v3097_v27 = vsel %vm823_vm0, %v7220_v24, 0  ;;  %v387_v29 = vsel %vm7229_vm3, %v382_v17, %v386_v0  ;;  %v389_v32 = vshrl.u32 %v292_v16, 16  ;;  %s6724_s10 = sshll.u32 %s6878_s7, 4  ;;  %s6725_s10 = int_to_ptr.vmem [resolvable:$false] %s6724_s10 }
  0xab   : > { %v2185_v31 = vor.u32 %v2184_v20, %v2180_v18  ;;  %v392_v33 = vshll.u32 %v292_v16, 16  ;;  %v5113_v35 = vcombine.low %v377_v12, %v387_v29  ;;  %v2176_v36 = vrot.slane %v2175_v23, 4  ;;  %v324_v12 = vld [vmem:[%s7181_s30 + $0x2c] sm:$0x1]  ;;  %s4965_s6 = sadd.s32 %s9209_s20, %s6384_s26  ;;  %s6726_s29 = scalar_lea.vmem %s6725_s10, 8192 }
  0xac   : > { %v398_v37 = vshll.u32 %v293_v22, 16  ;;  %v402_v38 = vshrl.u32 %v293_v22, 16  ;;  %v391_v40 = vrot.slane %v389_v32, 4  ;;  %v408_v42 = vshll.u32 %v323_v28, 16  ;;  %s5649_s21 = sshll.u32 %s4965_s6, 7  ;;  %p6727_p9 = scmp.lt.s32.totalorder %s8989_s3, %s6725_s10 }
  0xad   : > { %v2186_v39 = vrot.slane %v2185_v31, 4  ;;  %v394_v41 = vrot.slane %v392_v33, 5  ;;  %5808 = vmatmul.mubr.msk.bf16.vlgmr.msra.gmra.mrb[0].mxu1 %vm774_vm4, %v5113_v35  ;;  %v2181_v24 = vsel %vm7229_vm3, %v2176_v36, %v2180_v18  ;;  %v2193_v47 = vshrl.u32 %v5296_v34, 16  ;;  %v7304_v36 = vld [vmem:[%s7181_s30 + $0x38] sm:$0x1]  ;;  %s8986_s14 = scalar_lea.hbm %s9210_s8, %s5649_s21 }
  0xae   : > { %v400_v44 = vrot.slane %v398_v37, 5  ;;  %v404_v45 = vrot.slane %v402_v38, 4  ;;  %5840 = vmatpush3.bf16.msra.mxu1 %v1117_v1  ;;  %v410_v50 = vrot.slane %v408_v42, 5  ;;  %v2196_v51 = vshll.u32 %v5296_v34, 16  ;;  %v295_v1 = vld [vmem:[%s7181_s30 + $0x28] sm:$0xf] }
  0xaf   : > { %v2191_v48 = vsel %vm7229_vm3, %v2186_v39, %v2190_v21  ;;  %v395_v49 = vor.u32 %v394_v41, %v391_v40  ;;  %v2195_v55 = vrot.slane %v2193_v47, 4  ;;  %v2202_v56 = vshll.u32 %v7275_v43, 16  ;;  %v296_v42 = vld [vmem:[%s7181_s30 + $0x30] sm:$0xf] }
  0xb0   : > { %v5340_v53 = vcombine.low %v2181_v24, %v2191_v48  ;;  %v405_v54 = vor.u32 %v404_v45, %v400_v44  ;;  %v2198_v62 = vrot.slane %v2196_v51, 5  ;;  %v2206_v63 = vshrl.u32 %v7275_v43, 16  ;;  %v297_v48 = vld [vmem:[%s7181_s30 + $0x34] sm:$0xf] }
  0xb1   : > { %v396_v59 = vrot.slane %v395_v49, 4  ;;  %v2212_v0 = vshll.u32 %v7281_v46, 16  ;;  %v2204_v3 = vrot.slane %v2202_v56, 5  ;;  %v413_v5 = vshrl.u32 %v294_v52, 16  ;;  %v325_v56 = vld [vmem:[%s7181_s30 + $0x38] sm:$0x1] }
  0xb2   : > { %5944 = vmatmul.mubr.msk.bf16.vlgmr.msra.gmra.mrb[0].mxu0 %vm774_vm4, %v5340_v53  ;;  %v406_v2 = vrot.slane %v405_v54, 4  ;;  %v416_v6 = vshll.u32 %v294_v52, 16  ;;  %v2199_v8 = vor.u32 %v2198_v62, %v2195_v55  ;;  %v2208_v9 = vrot.slane %v2206_v63, 4 }
  0xb3   : > { %5976 = vmatpush3.bf16.msra.mxu0 %v3097_v27  ;;  %v401_v7 = vsel %vm7229_vm3, %v396_v59, %v400_v44  ;;  %v2214_v10 = vrot.slane %v2212_v0, 5  ;;  %v415_v16 = vrot.slane %v413_v5, 4  ;;  %v422_v18 = vshll.u32 %v295_v1, 16  ;;  %v7298_v27 = vld [vmem:[%s7181_s30 + $0x34] sm:$0xf] }
  0xb4   : > { %v411_v11 = vsel %vm7229_vm3, %v406_v2, %v410_v50  ;;  %v418_v17 = vrot.slane %v416_v6, 5  ;;  %v2200_v21 = vrot.slane %v2199_v8, 4  ;;  %v2209_v22 = vor.u32 %v2208_v9, %v2204_v3  ;;  %v5302_v2 = vld [vmem:[%s7181_s30 + $0x3c] sm:$0xf]  ;;  %v7321_v8 = vld [vmem:[%s7181_s30 + $0x40] sm:$0xf] }
  0xb5   : > { %v5114_v20 = vcombine.low %v401_v7, %v411_v11  ;;  %v426_v23 = vshrl.u32 %v295_v1, 16  ;;  %v424_v29 = vrot.slane %v422_v18, 5  ;;  %v432_v31 = vshll.u32 %v324_v12, 16  ;;  %v7326_v18 = vld [vmem:[%s7181_s30 + $0x44] sm:$0x1] }
  0xb6   : > { %v419_v28 = vor.u32 %v418_v17, %v415_v16  ;;  %v2217_v32 = vshrl.u32 %v5299_v13, 16  ;;  %v2205_v33 = vsel %vm7229_vm3, %v2200_v21, %v2204_v3  ;;  %v2210_v34 = vrot.slane %v2209_v22, 4 }
  0xb7   : > { %5811 = vmatprep.mubr.msk.bf16.mxu1 %vm774_vm4, %v5114_v20  ;;  %v428_v35 = vrot.slane %v426_v23, 4  ;;  %v2220_v37 = vshll.u32 %v5299_v13, 16  ;;  %v434_v39 = vrot.slane %v432_v31, 5  ;;  %v2226_v41 = vshll.u32 %v7298_v27, 16  ;;  %v7332_v31 = vld [vmem:[%s7191_s9 + $0x18] sm:$0xf] }
  0xb8   : > { %v420_v38 = vrot.slane %v419_v28, 4  ;;  %v2219_v40 = vrot.slane %v2217_v32, 4  ;;  %v2215_v24 = vsel %vm7229_vm3, %v2210_v34, %v2214_v10  ;;  %v2230_v47 = vshrl.u32 %v7298_v27, 16  ;;  %6376 = vmatprep.subr.msk.bf16.mxu0 %vm823_vm0, %v7332_v31 }
  0xb9   : > { %v429_v44 = vor.u32 %v428_v35, %v424_v29  ;;  %v2222_v45 = vrot.slane %v2220_v37, 5  ;;  %v5341_v49 = vcombine.low %v2205_v33, %v2215_v24  ;;  %v2228_v51 = vrot.slane %v2226_v41, 5 }
  0xba   : > { %v425_v50 = vsel %vm7229_vm3, %v420_v38, %v424_v29  ;;  %v2236_v52 = vshll.u32 %v7304_v36, 16  ;;  %v2232_v55 = vrot.slane %v2230_v47, 4  ;;  %v437_v59 = vshrl.u32 %v296_v42, 16  ;;  %v298_v29 = vld [vmem:[%s7181_s30 + $0x3c] sm:$0xf] }
  0xbb   : > { %v430_v53 = vrot.slane %v429_v44, 4  ;;  %v2223_v54 = vor.u32 %v2222_v45, %v2219_v40  ;;  %5947 = vmatprep.mubr.msk.bf16.mxu0 %vm774_vm4, %v5341_v49  ;;  %v440_v63 = vshll.u32 %v296_v42, 16  ;;  %v446_v0 = vshll.u32 %v297_v48, 16  ;;  %v299_v44 = vld [vmem:[%s7181_s30 + $0x40] sm:$0xf] }
  0xbc   : > { %v2238_v62 = vrot.slane %v2236_v52, 5  ;;  %v450_v1 = vshrl.u32 %v297_v48, 16  ;;  %v2233_v6 = vor.u32 %v2232_v55, %v2228_v51  ;;  %v439_v7 = vrot.slane %v437_v59, 4  ;;  %v5305_v52 = vld [vmem:[%s7181_s30 + $0x48] sm:$0xf] }
  0xbd   : > { %v435_v3 = vsel %vm7229_vm3, %v430_v53, %v434_v39  ;;  %v2224_v5 = vrot.slane %v2223_v54, 4  ;;  %v442_v10 = vrot.slane %v440_v63, 5  ;;  %v448_v12 = vrot.slane %v446_v0, 5 }
  0xbe   : > { %v5115_v9 = vcombine.low %v425_v50, %v435_v3  ;;  %v452_v13 = vrot.slane %v450_v1, 4  ;;  %v2234_v16 = vrot.slane %v2233_v6, 4  ;;  %v456_v17 = vshll.u32 %v325_v56, 16  ;;  %v326_v50 = vld [vmem:[%s7181_s30 + $0x44] sm:$0x1] }
  0xbf   : > { %v2229_v11 = vsel %vm7229_vm3, %v2224_v5, %v2228_v51  ;;  %v2241_v20 = vshrl.u32 %v5302_v2, 16  ;;  %v443_v21 = vor.u32 %v442_v10, %v439_v7  ;;  %v2244_v23 = vshll.u32 %v5302_v2, 16  ;;  %v7350_v3 = vld [vmem:[%s7181_s30 + $0x4c] sm:$0xf] }
  0xc0   : > { %5812 = vmatmul.mubr.msk.bf16.gmra.mrb[4].mxu1 %vm774_vm4, %v5115_v9  ;;  %v453_v22 = vor.u32 %v452_v13, %v448_v12  ;;  %v2250_v28 = vshll.u32 %v7321_v8, 16  ;;  %v2239_v32 = vsel %vm7229_vm3, %v2234_v16, %v2238_v62  ;;  %v458_v33 = vrot.slane %v456_v17, 5  ;;  %v7355_v13 = vld [vmem:[%s7181_s30 + $0x50] sm:$0x1] }
  0xc1   : > { %v2243_v34 = vrot.slane %v2241_v20, 4  ;;  %v2254_v35 = vshrl.u32 %v7321_v8, 16  ;;  %v5342_v37 = vcombine.low %v2229_v11, %v2239_v32  ;;  %v444_v38 = vrot.slane %v443_v21, 4  ;;  %v7358_v11 = vld [vmem:[%s7181_s30 + $0x48] sm:$0xf] }
  0xc2   : > { %v454_v39 = vrot.slane %v453_v22, 4  ;;  %v2246_v40 = vrot.slane %v2244_v23, 5  ;;  %v2252_v41 = vrot.slane %v2250_v28, 5  ;;  %v2260_v24 = vshll.u32 %v7326_v18, 16 }
  0xc3   : > { %v2256_v42 = vrot.slane %v2254_v35, 4  ;;  %v461_v45 = vshrl.u32 %v298_v29, 16  ;;  %5948 = vmatmul.mubr.msk.bf16.gmra.mrb[4].mxu0 %vm774_vm4, %v5342_v37  ;;  %v449_v47 = vsel %vm7229_vm3, %v444_v38, %v448_v12  ;;  %v464_v51 = vshll.u32 %v298_v29, 16  ;;  %v7366_v35 = vld [vmem:[%s7181_s30 + $0x4c] sm:$0xf] }
  0xc4   : > { %v459_v48 = vsel %vm7229_vm3, %v454_v39, %v458_v33  ;;  %v2247_v49 = vor.u32 %v2246_v40, %v2243_v34  ;;  %v2262_v55 = vrot.slane %v2260_v24, 5  ;;  %v470_v63 = vshll.u32 %v299_v44, 16 }
  0xc5   : > { %v5116_v53 = vcombine.low %v449_v47, %v459_v48  ;;  %v2257_v54 = vor.u32 %v2256_v42, %v2252_v41  ;;  %v463_v56 = vrot.slane %v461_v45, 4  ;;  %v466_v62 = vrot.slane %v464_v51, 5  ;;  %v5308_v48 = vld [vmem:[%s7181_s30 + $0x54] sm:$0xf] }
  0xc6   : > { %v2248_v59 = vrot.slane %v2247_v49, 4  ;;  %v474_v0 = vshrl.u32 %v299_v44, 16  ;;  %v480_v2 = vshll.u32 %v326_v50, 16  ;;  %v2265_v5 = vshrl.u32 %v5305_v52, 16 }
  0xc7   : > { %5815 = vmatprep.mubr.msk.bf16.mxu1 %vm774_vm4, %v5116_v53  ;;  %v2258_v1 = vrot.slane %v2257_v54, 4  ;;  %v2268_v6 = vshll.u32 %v5305_v52, 16  ;;  %v467_v9 = vor.u32 %v466_v62, %v463_v56  ;;  %v472_v10 = vrot.slane %v470_v63, 5  ;;  %v7380_v53 = vld [vmem:[%s7181_s30 + $0x58] sm:$0xf] }
  0xc8   : > { %v2253_v7 = vsel %vm7229_vm3, %v2248_v59, %v2252_v41  ;;  %v476_v12 = vrot.slane %v474_v0, 4  ;;  %v482_v17 = vrot.slane %v480_v2, 5  ;;  %v2267_v20 = vrot.slane %v2265_v5, 4  ;;  %v327_v41 = vld [vmem:[%s7181_s30 + $0x50] sm:$0x1] }
  0xc9   : > { %v2263_v16 = vsel %vm7229_vm3, %v2258_v1, %v2262_v55  ;;  %v2270_v21 = vrot.slane %v2268_v6, 5  ;;  %v468_v23 = vrot.slane %v467_v9, 4  ;;  %v2274_v29 = vshll.u32 %v7350_v3, 16  ;;  %v7385_v1 = vld [vmem:[%s7181_s30 + $0x5c] sm:$0x1] }
  0xca   : > { %v5343_v22 = vcombine.low %v2253_v7, %v2263_v16  ;;  %v477_v28 = vor.u32 %v476_v12, %v472_v10  ;;  %v2278_v33 = vshrl.u32 %v7350_v3, 16  ;;  %v2284_v34 = vshll.u32 %v7355_v13, 16 }
  0xcb   : > { %v2271_v32 = vor.u32 %v2270_v21, %v2267_v20  ;;  %v485_v37 = vshrl.u32 %v7358_v11, 16  ;;  %v473_v38 = vsel %vm7229_vm3, %v468_v23, %v472_v10  ;;  %v2276_v40 = vrot.slane %v2274_v29, 5  ;;  %v7391_v20 = vld [vmem:[%s7181_s30 + $0x54] sm:$0xf]  ;;  %v7397_v29 = vld [vmem:[%s7181_s30 + $0x58] sm:$0xf] }
  0xcc   : > { %5951 = vmatprep.mubr.msk.bf16.mxu0 %vm774_vm4, %v5343_v22  ;;  %v478_v39 = vrot.slane %v477_v28, 4  ;;  %v488_v42 = vshll.u32 %v7358_v11, 16  ;;  %v2280_v44 = vrot.slane %v2278_v33, 4  ;;  %v2286_v45 = vrot.slane %v2284_v34, 5 }
  0xcd   : > { %v2272_v24 = vrot.slane %v2271_v32, 4  ;;  %v487_v47 = vrot.slane %v485_v37, 4  ;;  %v494_v51 = vshll.u32 %v7366_v35, 16  ;;  %v498_v52 = vshrl.u32 %v7366_v35, 16 }
  0xce   : > { %v483_v49 = vsel %vm7229_vm3, %v478_v39, %v482_v17  ;;  %v490_v50 = vrot.slane %v488_v42, 5  ;;  %v2281_v56 = vor.u32 %v2280_v44, %v2276_v40  ;;  %v504_v59 = vshll.u32 %v327_v41, 16 }
  0xcf   : > { %v5117_v54 = vcombine.low %v473_v38, %v483_v49  ;;  %v2277_v55 = vsel %vm7229_vm3, %v2272_v24, %v2276_v40  ;;  %v496_v63 = vrot.slane %v494_v51, 5  ;;  %v500_v0 = vrot.slane %v498_v52, 4  ;;  %v328_v40 = vld [vmem:[%s7181_s30 + $0x5c] sm:$0x1]  ;;  %v7411_v49 = vld [vmem:[%s7191_s9 + $0x8] sm:$0xf] }
  0xd0   : > { %v491_v62 = vor.u32 %v490_v50, %v487_v47  ;;  %v2289_v2 = vshrl.u32 %v5308_v48, 16  ;;  %v2282_v5 = vrot.slane %v2281_v56, 4  ;;  %v506_v6 = vrot.slane %v504_v59, 5  ;;  %6371 = vmatprep.subr.msk.bf16.mxu1 %vm823_vm0, %v7411_v49 }
  0xd1   : > { %5816 = vmatmul.mubr.msk.bf16.gmra.mrb[8].mxu1 %vm774_vm4, %v5117_v54  ;;  %v2292_v7 = vshll.u32 %v5308_v48, 16  ;;  %v2298_v9 = vshll.u32 %v7380_v53, 16  ;;  %v501_v12 = vor.u32 %v500_v0, %v496_v63  ;;  %v2302_v17 = vshrl.u32 %v7380_v53, 16  ;;  %v5311_v48 = vld [vmem:[%s7181_s30 + $0x60] sm:$0xf] }
  0xd2   : > { %v492_v10 = vrot.slane %v491_v62, 4  ;;  %v2291_v16 = vrot.slane %v2289_v2, 4  ;;  %v2287_v21 = vsel %vm7229_vm3, %v2282_v5, %v2286_v45  ;;  %v2308_v28 = vshll.u32 %v7385_v1, 16  ;;  %v7422_v5 = vld [vmem:[%s7181_s30 + $0x68] sm:$0x1] }
  0xd3   : > { %v2294_v22 = vrot.slane %v2292_v7, 5  ;;  %v2300_v23 = vrot.slane %v2298_v9, 5  ;;  %v5344_v32 = vcombine.low %v2277_v55, %v2287_v21  ;;  %v502_v34 = vrot.slane %v501_v12, 4  ;;  %v7414_v55 = vld [vmem:[%s7181_s30 + $0x64] sm:$0xf] }
  0xd4   : > { %v497_v33 = vsel %vm7229_vm3, %v492_v10, %v496_v63  ;;  %v2304_v37 = vrot.slane %v2302_v17, 4  ;;  %v2310_v39 = vrot.slane %v2308_v28, 5  ;;  %v509_v41 = vshrl.u32 %v7391_v20, 16  ;;  %v7428_v17 = vld [vmem:[%s7181_s30 + $0x60] sm:$0xf] }
  0xd5   : > { %v2295_v38 = vor.u32 %v2294_v22, %v2291_v16  ;;  %v512_v42 = vshll.u32 %v7391_v20, 16  ;;  %vm1328_vm5 = vcmask 1042432   ;;  %vm1329_vm6 = vcmask 1046532   ;;  %5952 = vmatmul.mubr.msk.bf16.gmra.mrb[8].mxu0 %vm774_vm4, %v5344_v32 }
  0xd6   : > { %v507_v24 = vsel %vm7229_vm3, %v502_v34, %v506_v6  ;;  %v2305_v44 = vor.u32 %v2304_v37, %v2300_v23  ;;  %v518_v45 = vshll.u32 %v7397_v29, 16  ;;  %v522_v47 = vshrl.u32 %v7397_v29, 16  ;;  %vm7451_vm7 = vmor %vm1328_vm5, %vm1329_vm6 }
  0xd7   : > { %v5118_v50 = vcombine.low %v497_v33, %v507_v24  ;;  %v2296_v51 = vrot.slane %v2295_v38, 4  ;;  %v511_v52 = vrot.slane %v509_v41, 4  ;;  %v514_v54 = vrot.slane %v512_v42, 5  ;;  %v329_v41 = vld [vmem:[%s7181_s30 + $0x68] sm:$0x1] }
  0xd8   : > { %v2306_v56 = vrot.slane %v2305_v44, 4  ;;  %v520_v59 = vrot.slane %v518_v45, 5  ;;  %v524_v62 = vrot.slane %v522_v47, 4  ;;  %v528_v63 = vshll.u32 %v328_v40, 16 }
  0xd9   : > { %5819 = vmatprep.mubr.msk.bf16.mxu1 %vm774_vm4, %v5118_v50  ;;  %v2301_v0 = vsel %vm7229_vm3, %v2296_v51, %v2300_v23  ;;  %v515_v2 = vor.u32 %v514_v54, %v511_v52  ;;  %v2313_v6 = vshrl.u32 %v5311_v48, 16  ;;  %v2316_v7 = vshll.u32 %v5311_v48, 16  ;;  %v7431_v23 = vld [vmem:[%s7181_s30 + $0x64] sm:$0xf]  ;;  %v5371_v50 = vld [vmem:[%s7181_s30 + $0xc] sm:$0xe] }
  0xda   : > { %v2311_v9 = vsel %vm7229_vm3, %v2306_v56, %v2310_v39  ;;  %v525_v10 = vor.u32 %v524_v62, %v520_v59  ;;  %v530_v12 = vrot.slane %v528_v63, 5  ;;  %v2322_v16 = vshll.u32 %v7414_v55, 16 }
  0xdb   : > { %v5345_v21 = vcombine.low %v2301_v0, %v2311_v9  ;;  %v516_v22 = vrot.slane %v515_v2, 4  ;;  %v2315_v28 = vrot.slane %v2313_v6, 4  ;;  %v2318_v32 = vrot.slane %v2316_v7, 5 }
  0xdc   : > { %v526_v33 = vrot.slane %v525_v10, 4  ;;  %v2324_v34 = vrot.slane %v2322_v16, 5  ;;  %v2326_v37 = vshrl.u32 %v7414_v55, 16  ;;  %v2332_v38 = vshll.u32 %v7422_v5, 16 }
  0xdd   : > { %5955 = vmatprep.mubr.msk.bf16.mxu0 %vm774_vm4, %v5345_v21  ;;  %v521_v39 = vsel %vm7229_vm3, %v516_v22, %v520_v59  ;;  %v2319_v40 = vor.u32 %v2318_v32, %v2315_v28  ;;  %v533_v42 = vshrl.u32 %v7428_v17, 16  ;;  %v536_v24 = vshll.u32 %v7428_v17, 16  ;;  %v7446_v59 = vld [vmem:[%s7181_s30 + $0x6c] sm:$0xf]  ;;  %v7461_v28 = vld [vmem:[%s7181_s30 + $0x70] sm:$0xf] }
  0xde   : > { %v531_v44 = vsel %vm7229_vm3, %v526_v33, %v530_v12  ;;  %v2328_v45 = vrot.slane %v2326_v37, 4  ;;  %v2334_v47 = vrot.slane %v2332_v38, 5  ;;  %v542_v48 = vshll.u32 %v7431_v23, 16  ;;  %v330_v38 = vld [vmem:[%s7181_s30 + $0x74] sm:$0x1] }
  0xdf   : > { %v5119_v51 = vcombine.low %v521_v39, %v531_v44  ;;  %v2320_v52 = vrot.slane %v2319_v40, 4  ;;  %v535_v54 = vrot.slane %v533_v42, 4  ;;  %v538_v56 = vrot.slane %v536_v24, 5  ;;  %v5372_v40 = vld [vmem:[%s7181_s30 + $0x18] sm:$0xe] }
  0xe0   : > { %v2329_v62 = vor.u32 %v2328_v45, %v2324_v34  ;;  %v544_v63 = vrot.slane %v542_v48, 5  ;;  %v546_v0 = vshrl.u32 %v7431_v23, 16  ;;  %v552_v2 = vshll.u32 %v329_v41, 16  ;;  %v7484_v48 = vld [vmem:[%s7181_s30 + $0x7c] sm:$0xf] }
  0xe1   : > { %5820 = vmatmul.mubr.msk.bf16.gmra.mrb[12].mxu1 %vm774_vm4, %v5119_v51  ;;  %v2325_v7 = vsel %vm7229_vm3, %v2320_v52, %v2324_v34  ;;  %v539_v9 = vor.u32 %v538_v56, %v535_v54  ;;  %v5387_v10 = vrot.slane %v5371_v50, 9  ;;  %v2890_v12 = vrot.slane %v2888_v57, 4  ;;  %v331_v54 = vld [vmem:[%s7181_s30 + $0x80] sm:$0x1]  ;;  %v5373_v56 = vld [vmem:[%s7181_s30 + $0x24] sm:$0xe] }
  0xe2   : > { %v2330_v16 = vrot.slane %v2329_v62, 4  ;;  %v548_v21 = vrot.slane %v546_v0, 4  ;;  %v554_v22 = vrot.slane %v552_v2, 5  ;;  %v557_v32 = vshrl.u32 %v7446_v59, 16 }
  0xe3   : > { %v540_v33 = vrot.slane %v539_v9, 4  ;;  %v2889_v34 = vsel %vm7451_vm7, %v5387_v10, %v2888_v57  ;;  %v2892_v37 = vsel %vm7451_vm7, %v2890_v12, %v2891_v58  ;;  %v560_v39 = vshll.u32 %v7446_v59, 16  ;;  %v7481_v58 = vld [vmem:[%s7181_s30 + $0x78] sm:$0xf]  ;;  %v7505_v12 = vld [vmem:[%s7181_s30 + $0x84] sm:$0xf] }
  0xe4   : > { %v2335_v41 = vsel %vm7229_vm3, %v2330_v16, %v2334_v47  ;;  %v549_v42 = vor.u32 %v548_v21, %v544_v63  ;;  %v5404_v24 = vcombine.low %v2889_v34, %v2892_v37  ;;  %v559_v14 = vrot.slane %v557_v32, 4 }
  0xe5   : > { %v5346_v44 = vcombine.low %v2325_v7, %v2335_v41  ;;  %v545_v57 = vsel %vm7229_vm3, %v540_v33, %v544_v63  ;;  %v562_v19 = vrot.slane %v560_v39, 5  ;;  %v566_v45 = vshll.u32 %v7461_v28, 16 }
  0xe6   : > { %v550_v50 = vrot.slane %v549_v42, 4  ;;  %v570_v51 = vshrl.u32 %v7461_v28, 16  ;;  %v576_v52 = vshll.u32 %v330_v38, 16  ;;  %v5388_v47 = vrot.slane %v5372_v40, 9  ;;  %v7515_v38 = vld [vmem:[%s7181_s30 + $0x88] sm:$0xf] }
  0xe7   : > { %5956 = vmatmul.mubr.msk.bf16.gmra.mrb[12].mxu0 %vm774_vm4, %v5346_v44  ;;  %v563_v62 = vor.u32 %v562_v19, %v559_v14  ;;  %v568_v0 = vrot.slane %v566_v45, 5  ;;  %v2899_v63 = vsel %vm7451_vm7, %v7265_v25, %v2898_v26  ;;  %v3456_v2 = vsel %vm823_vm0, %v7332_v31, 0  ;;  %v5374_v14 = vld [vmem:[%s7181_s30 + $0x30] sm:$0xe]  ;;  %v7520_v44 = vld [vmem:[%s7191_s9 + $0x1c] sm:$0xf] }
  0xe8   : > { %v555_v7 = vsel %vm7229_vm3, %v550_v50, %v554_v22  ;;  %5977 = vmatprep.mubr.msk.bf16.mxu0 %vm774_vm4, %v5404_v24  ;;  %v572_v9 = vrot.slane %v570_v51, 4  ;;  %v578_v10 = vrot.slane %v576_v52, 5  ;;  %v2896_v61 = vsel %vm7451_vm7, %v5388_v47, %v2895_v15  ;;  %v332_v24 = vld [vmem:[%s7181_s30 + $0x8c] sm:$0x1] }
  0xe9   : > { %v5120_v16 = vcombine.low %v545_v57, %v555_v7  ;;  %v564_v25 = vrot.slane %v563_v62, 4  ;;  %v5405_v26 = vcombine.low %v2896_v61, %v2899_v63  ;;  %v581_v31 = vshrl.u32 %v7481_v58, 16 }
  0xea   : > { %v573_v21 = vor.u32 %v572_v9, %v568_v0  ;;  %v584_v22 = vshll.u32 %v7481_v58, 16  ;;  %v590_v32 = vshll.u32 %v7484_v48, 16  ;;  %v594_v60 = vshrl.u32 %v7484_v48, 16 }
  0xeb   : > { %5823 = vmatprep.mubr.msk.bf16.mxu1 %vm774_vm4, %v5120_v16  ;;  %v569_v15 = vsel %vm7229_vm3, %v564_v25, %v568_v0  ;;  %v583_v33 = vrot.slane %v581_v31, 4  ;;  %v600_v34 = vshll.u32 %v331_v54, 16  ;;  %v5389_v37 = vrot.slane %v5373_v56, 9 }
  0xec   : > { %v574_v39 = vrot.slane %v573_v21, 4  ;;  %v586_v40 = vrot.slane %v584_v22, 5  ;;  %v592_v41 = vrot.slane %v590_v32, 5  ;;  %v596_v42 = vrot.slane %v594_v60, 4  ;;  %v7546_v32 = vld [vmem:[%s7181_s30 + $0x94] sm:$0xf] }
  0xed   : > { %v602_v57 = vrot.slane %v600_v34, 5  ;;  %v2902_v19 = vrot.slane %v7275_v43, 5  ;;  %v2905_v45 = vrot.slane %v7281_v46, 5  ;;  %v605_v50 = vshrl.u32 %v7505_v12, 16  ;;  %v7532_v43 = vld [vmem:[%s7181_s30 + $0x90] sm:$0xf] }
  0xee   : > { %v579_v51 = vsel %vm7229_vm3, %v574_v39, %v578_v10  ;;  %v587_v52 = vor.u32 %v586_v40, %v583_v33  ;;  %v597_v47 = vor.u32 %v596_v42, %v592_v41  ;;  %v608_v54 = vshll.u32 %v7505_v12, 16 }
  0xef   : > { %v5121_v56 = vcombine.low %v569_v15, %v579_v51  ;;  %5978 = vmatmul.mubr.msk.bf16.vlgmr.msra.gmra.mrb[0].mxu0 %vm774_vm4, %v5405_v26  ;;  %v2903_v62 = vsel %vm7451_vm7, %v5389_v37, %v2902_v19  ;;  %v2904_v0 = vrot.slane %v2902_v19, 4  ;;  %v607_v63 = vrot.slane %v605_v50, 4  ;;  %v333_v37 = vld [vmem:[%s7181_s30 + $0x98] sm:$0x1] }
  0xf0   : > { %6010 = vmatpush3.bf16.msra.mxu0 %v3456_v2  ;;  %v588_v46 = vrot.slane %v587_v52, 4  ;;  %v598_v7 = vrot.slane %v597_v47, 4  ;;  %v610_v9 = vrot.slane %v608_v54, 5  ;;  %v614_v10 = vshll.u32 %v7515_v38, 16  ;;  %v7563_v52 = vld [vmem:[%s7181_s30 + $0x9c] sm:$0xf] }
  0xf1   : > { %5824 = vmatmul.mubr.msk.bf16.gmra.mrb[16].mxu1 %vm774_vm4, %v5121_v56  ;;  %v2906_v61 = vsel %vm7451_vm7, %v2904_v0, %v2905_v45  ;;  %v618_v16 = vshrl.u32 %v7515_v38, 16  ;;  %v624_v25 = vshll.u32 %v332_v24, 16  ;;  %v5390_v26 = vrot.slane %v5374_v14, 9  ;;  %6377 = vmatprep.subr.msk.bf16.mxu0 %vm823_vm0, %v7520_v44  ;;  %v5375_v45 = vld [vmem:[%s7181_s30 + $0x3c] sm:$0xe] }
  0xf2   : > { %v593_v2 = vsel %vm7229_vm3, %v588_v46, %v592_v41  ;;  %v603_v31 = vsel %vm7229_vm3, %v598_v7, %v602_v57  ;;  %v5406_v21 = vcombine.low %v2903_v62, %v2906_v61  ;;  %v611_v22 = vor.u32 %v610_v9, %v607_v63  ;;  %v7566_v0 = vld [vmem:[%s7181_s30 + $0xa0] sm:$0xf] }
  0xf3   : > { %v5122_v60 = vcombine.low %v593_v2, %v603_v31  ;;  %v616_v15 = vrot.slane %v614_v10, 5  ;;  %v620_v33 = vrot.slane %v618_v16, 4  ;;  %v626_v34 = vrot.slane %v624_v25, 5 }
  0xf4   : > { %5981 = vmatprep.mubr.msk.bf16.mxu0 %vm774_vm4, %v5406_v21  ;;  %v612_v39 = vrot.slane %v611_v22, 4  ;;  %v2909_v40 = vrot.slane %v7298_v27, 5  ;;  %v2912_v41 = vrot.slane %v7304_v36, 5  ;;  %v629_v42 = vshrl.u32 %v7532_v43, 16 }
  0xf5   : > { %5827 = vmatprep.mubr.msk.bf16.mxu1 %vm774_vm4, %v5122_v60  ;;  %v621_v24 = vor.u32 %v620_v33, %v616_v15  ;;  %v632_v14 = vshll.u32 %v7532_v43, 16  ;;  %v638_v57 = vshll.u32 %v7546_v32, 16  ;;  %v642_v19 = vshrl.u32 %v7546_v32, 16  ;;  %v5376_v60 = vld [vmem:[%s7181_s30 + $0x48] sm:$0xe] }
  0xf6   : > { %v617_v50 = vsel %vm7229_vm3, %v612_v39, %v616_v15  ;;  %v2910_v27 = vsel %vm7451_vm7, %v5390_v26, %v2909_v40  ;;  %v2911_v36 = vrot.slane %v2909_v40, 4  ;;  %v631_v51 = vrot.slane %v629_v42, 4  ;;  %v334_v26 = vld [vmem:[%s7181_s30 + $0xa4] sm:$0x1] }
  0xf7   : > { %v622_v47 = vrot.slane %v621_v24, 4  ;;  %v634_v54 = vrot.slane %v632_v14, 5  ;;  %v640_v56 = vrot.slane %v638_v57, 5  ;;  %v644_v62 = vrot.slane %v642_v19, 4  ;;  %v7594_v19 = vld [vmem:[%s7181_s30 + $0xac] sm:$0xf] }
  0xf8   : > { %v2913_v63 = vsel %vm7451_vm7, %v2911_v36, %v2912_v41  ;;  %v648_v46 = vshll.u32 %v333_v37, 16  ;;  %v5391_v7 = vrot.slane %v5375_v45, 9  ;;  %v2916_v9 = vrot.slane %v7321_v8, 5  ;;  %v7581_v37 = vld [vmem:[%s7181_s30 + $0xa8] sm:$0xf] }
  0xf9   : > { %v627_v10 = vsel %vm7229_vm3, %v622_v47, %v626_v34  ;;  %v5407_v61 = vcombine.low %v2910_v27, %v2913_v63  ;;  %v635_v16 = vor.u32 %v634_v54, %v631_v51  ;;  %v645_v25 = vor.u32 %v644_v62, %v640_v56  ;;  %v335_v51 = vld [vmem:[%s7181_s30 + $0xb0] sm:$0x1] }
  0xfa   : > { %v5123_v2 = vcombine.low %v617_v50, %v627_v10  ;;  %v650_v31 = vrot.slane %v648_v46, 5  ;;  %v2917_v21 = vsel %vm7451_vm7, %v5391_v7, %v2916_v9  ;;  %v2918_v22 = vrot.slane %v2916_v9, 4 }
  0xfb   : > { %5982 = vmatmul.mubr.msk.bf16.gmra.mrb[4].mxu0 %vm774_vm4, %v5407_v61  ;;  %v636_v15 = vrot.slane %v635_v16, 4  ;;  %v646_v8 = vrot.slane %v645_v25, 4  ;;  %v2919_v33 = vrot.slane %v7326_v18, 5  ;;  %v653_v34 = vshrl.u32 %v7563_v52, 16 }
  0xfc   : > { %5828 = vmatmul.mubr.msk.bf16.gmra.mrb[20].mxu1 %vm774_vm4, %v5123_v2  ;;  %v656_v39 = vshll.u32 %v7563_v52, 16  ;;  %v662_v40 = vshll.u32 %v7566_v0, 16  ;;  %v666_v41 = vshrl.u32 %v7566_v0, 16  ;;  %v672_v42 = vshll.u32 %v334_v26, 16 }
  0xfd   : > { %v641_v24 = vsel %vm7229_vm3, %v636_v15, %v640_v56  ;;  %v651_v18 = vsel %vm7229_vm3, %v646_v8, %v650_v31  ;;  %v2920_v14 = vsel %vm7451_vm7, %v2918_v22, %v2919_v33  ;;  %v655_v57 = vrot.slane %v653_v34, 4 }
  0xfe   : > { %v5124_v45 = vcombine.low %v641_v24, %v651_v18  ;;  %v5408_v50 = vcombine.low %v2917_v21, %v2920_v14  ;;  %v658_v27 = vrot.slane %v656_v39, 5  ;;  %v664_v36 = vrot.slane %v662_v40, 5  ;;  %v7613_v40 = vld [vmem:[%s7181_s30 + $0xb4] sm:$0xf]  ;;  %v7619_v14 = vld [vmem:[%s7181_s30 + $0xb8] sm:$0xf] }
  0xff   : > { %v668_v47 = vrot.slane %v666_v41, 4  ;;  %v674_v54 = vrot.slane %v672_v42, 5  ;;  %v5392_v62 = vrot.slane %v5376_v60, 9  ;;  %v2923_v56 = vrot.slane %v7350_v3, 5  ;;  %v5377_v3 = vld [vmem:[%s7181_s30 + $0x54] sm:$0xe] }
 0x100   : > { %5831 = vmatprep.mubr.msk.bf16.mxu1 %vm774_vm4, %v5124_v45  ;;  %5985 = vmatprep.mubr.msk.bf16.mxu0 %vm774_vm4, %v5408_v50  ;;  %v659_v63 = vor.u32 %v658_v27, %v655_v57  ;;  %v2926_v46 = vrot.slane %v7355_v13, 5  ;;  %v677_v7 = vshrl.u32 %v7581_v37, 16  ;;  %v680_v9 = vshll.u32 %v7581_v37, 16 }
 0x101   : > { %v669_v10 = vor.u32 %v668_v47, %v664_v36  ;;  %v2924_v61 = vsel %vm7451_vm7, %v5392_v62, %v2923_v56  ;;  %v2925_v16 = vrot.slane %v2923_v56, 4  ;;  %v686_v25 = vshll.u32 %v7594_v19, 16 }
 0x102   : > { %v660_v26 = vrot.slane %v659_v63, 4  ;;  %v679_v2 = vrot.slane %v677_v7, 4  ;;  %v682_v31 = vrot.slane %v680_v9, 5  ;;  %v690_v21 = vshrl.u32 %v7594_v19, 16 }
 0x103   : > { %v670_v13 = vrot.slane %v669_v10, 4  ;;  %v2927_v22 = vsel %vm7451_vm7, %v2925_v16, %v2926_v46  ;;  %v688_v60 = vrot.slane %v686_v25, 5  ;;  %v696_v15 = vshll.u32 %v335_v51, 16  ;;  %v5378_v46 = vld [vmem:[%s7181_s30 + $0x60] sm:$0xe] }
 0x104   : > { %v665_v8 = vsel %vm7229_vm3, %v660_v26, %v664_v36  ;;  %v5409_v33 = vcombine.low %v2924_v61, %v2927_v22  ;;  %v683_v34 = vor.u32 %v682_v31, %v679_v2  ;;  %v692_v39 = vrot.slane %v690_v21, 4  ;;  %v7624_v36 = vld [vmem:[%s7181_s30 + $0xbc] sm:$0x1]  ;;  %v5379_v16 = vld [vmem:[%s7181_s30 + $0x6c] sm:$0xe] }
 0x105   : > { %v675_v41 = vsel %vm7229_vm3, %v670_v13, %v674_v54  ;;  %v698_v42 = vrot.slane %v696_v15, 5  ;;  %v5393_v24 = vrot.slane %v5377_v3, 9  ;;  %v2930_v18 = vrot.slane %v7380_v53, 5  ;;  %v5315_v31 = vld [vmem:[%s7181_s30 + $0x70] sm:$0xf] }
 0x106   : > { %v5125_v57 = vcombine.low %v665_v8, %v675_v41  ;;  %5986 = vmatmul.mubr.msk.bf16.gmra.mrb[8].mxu0 %vm774_vm4, %v5409_v33  ;;  %v684_v45 = vrot.slane %v683_v34, 4  ;;  %v693_v50 = vor.u32 %v692_v39, %v688_v60  ;;  %v2933_v27 = vrot.slane %v7385_v1, 5  ;;  %v5316_v21 = vld [vmem:[%s7181_s30 + $0x74] sm:$0x1] }
 0x107   : > { %v2931_v51 = vsel %vm7451_vm7, %v5393_v24, %v2930_v18  ;;  %v2932_v47 = vrot.slane %v2930_v18, 4  ;;  %v701_v54 = vshrl.u32 %v7613_v40, 16  ;;  %v704_v53 = vshll.u32 %v7613_v40, 16 }
 0x108   : > { %5832 = vmatmul.mubr.msk.bf16.gmra.mrb[24].mxu1 %vm774_vm4, %v5125_v57  ;;  %v689_v62 = vsel %vm7229_vm3, %v684_v45, %v688_v60  ;;  %v694_v56 = vrot.slane %v693_v50, 4  ;;  %v710_v1 = vshll.u32 %v7619_v14, 16  ;;  %v714_v63 = vshrl.u32 %v7619_v14, 16 }
 0x109   : > { %v2934_v7 = vsel %vm7451_vm7, %v2932_v47, %v2933_v27  ;;  %v703_v9 = vrot.slane %v701_v54, 4  ;;  %v706_v10 = vrot.slane %v704_v53, 5  ;;  %v720_v61 = vshll.u32 %v7624_v36, 16  ;;  %v5380_v27 = vld [vmem:[%s7181_s30 + $0x78] sm:$0xe] }
 0x10a   : > { %v699_v25 = vsel %vm7229_vm3, %v694_v56, %v698_v42  ;;  %v5410_v3 = vcombine.low %v2931_v51, %v2934_v7  ;;  %v712_v26 = vrot.slane %v710_v1, 5  ;;  %v716_v2 = vrot.slane %v714_v63, 4  ;;  %v6575_v54 = vld [vmem:[%s7181_s30] sm:$0xf]  ;;  %v7661_v53 = vld [vmem:[%s7181_s30 + $0x4] sm:$0xf] }
 0x10b   : > { %v5126_v13 = vcombine.low %v689_v62, %v699_v25  ;;  %v707_v22 = vor.u32 %v706_v10, %v703_v9  ;;  %v722_v60 = vrot.slane %v720_v61, 5  ;;  %v5394_v15 = vrot.slane %v5378_v46, 9  ;;  %v7665_v56 = vld [vmem:[%s7181_s30 + $0x7c] sm:$0xf]  ;;  %v7668_v1 = vld [vmem:[%s7181_s30 + $0x80] sm:$0x1] }
 0x10c   : > { %5989 = vmatprep.mubr.msk.bf16.mxu0 %vm774_vm4, %v5410_v3  ;;  %v717_v8 = vor.u32 %v716_v2, %v712_v26  ;;  %v2937_v33 = vrot.slane %v7414_v55, 5  ;;  %v2940_v34 = vrot.slane %v7422_v5, 5  ;;  %v5395_v39 = vrot.slane %v5379_v16, 9  ;;  %v5381_v63 = vld [vmem:[%s7181_s30 + $0x84] sm:$0xe] }
 0x10d   : > { %5835 = vmatprep.mubr.msk.bf16.mxu1 %vm774_vm4, %v5126_v13  ;;  %v708_v41 = vrot.slane %v707_v22, 4  ;;  %v2944_v42 = vrot.slane %v5315_v31, 5  ;;  %v2947_v24 = vrot.slane %v5316_v21, 5  ;;  %v5144_v62 = vcombine.low %v6575_v54, %v7661_v53  ;;  %v5321_v10 = vld [vmem:[%s7181_s30 + $0x88] sm:$0xf] }
 0x10e   : > { %v718_v18 = vrot.slane %v717_v8, 4  ;;  %v2938_v57 = vsel %vm7451_vm7, %v5394_v15, %v2937_v33  ;;  %v2939_v45 = vrot.slane %v2937_v33, 4  ;;  %v5322_v61 = vld [vmem:[%s7181_s30 + $0x8c] sm:$0x1]  ;;  %v5396_v25 = vrot.slane %v5380_v27, 9 }
 0x10f   : > { %v713_v55 = vsel %vm7229_vm3, %v708_v41, %v712_v26  ;;  %v2945_v5 = vsel %vm7451_vm7, %v5395_v39, %v2944_v42  ;;  %v2946_v50 = vrot.slane %v2944_v42, 4  ;;  %v5324_v3 = vld [vmem:[%s7181_s30 + $0x94] sm:$0xf]  ;;  %v2951_v26 = vrot.slane %v7665_v56, 5  ;;  %v5325_v22 = vld [vmem:[%s7181_s30 + $0x98] sm:$0x1] }
 0x110   : > { %v723_v51 = vsel %vm7229_vm3, %v718_v18, %v722_v60  ;;  %v2941_v47 = vsel %vm7451_vm7, %v2939_v45, %v2940_v34  ;;  %v2954_v2 = vrot.slane %v7668_v1, 5  ;;  %v5397_v31 = vrot.slane %v5381_v63, 9  ;;  %v5382_v60 = vld [vmem:[%s7181_s30 + $0x90] sm:$0xe]  ;;  %v5327_v34 = vld [vmem:[%s7181_s30 + $0xa0] sm:$0xf] }
 0x111   : > { %v5127_v46 = vcombine.low %v713_v55, %v723_v51  ;;  %v5411_v7 = vcombine.low %v2938_v57, %v2941_v47  ;;  %v2948_v9 = vsel %vm7451_vm7, %v2946_v50, %v2947_v24  ;;  %v2958_v21 = vrot.slane %v5321_v10, 5  ;;  %v6577_v39 = vld [vmem:[%s7181_s30 + $0xc] sm:$0xf]  ;;  %v7689_v41 = vld [vmem:[%s7181_s30 + $0x10] sm:$0xf] }
 0x112   : > { %v5412_v16 = vcombine.low %v2945_v5, %v2948_v9  ;;  %v2961_v13 = vrot.slane %v5322_v61, 5  ;;  %v2952_v15 = vsel %vm7451_vm7, %v5396_v25, %v2951_v26  ;;  %v2953_v8 = vrot.slane %v2951_v26, 4  ;;  %v5328_v57 = vld [vmem:[%s7181_s30 + $0xa4] sm:$0x1]  ;;  %v5383_v45 = vld [vmem:[%s7181_s30 + $0x9c] sm:$0xe] }
 0x113   : > { %5836 = vmatmul.mubr.msk.bf16.gmra.mrb[28].mxu1 %vm774_vm4, %v5127_v46  ;;  %5990 = vmatmul.mubr.msk.bf16.gmra.mrb[12].mxu0 %vm774_vm4, %v5411_v7  ;;  %v2965_v33 = vrot.slane %v5324_v3, 5  ;;  %v5145_v42 = vcombine.low %v6577_v39, %v7689_v41  ;;  %v2959_v24 = vsel %vm7451_vm7, %v5397_v31, %v2958_v21  ;;  %v2960_v18 = vrot.slane %v2958_v21, 4  ;;  %v6579_v5 = vld [vmem:[%s7181_s30 + $0x18] sm:$0xf]  ;;  %v7700_v50 = vld [vmem:[%s7181_s30 + $0x1c] sm:$0xf] }
 0x114   : > { %5841 = vmatprep.mubr.msk.bf16.mxu1 %vm774_vm4, %v5144_v62  ;;  %5993 = vmatprep.mubr.msk.bf16.mxu0 %vm774_vm4, %v5412_v16  ;;  %v2955_v55 = vsel %vm7451_vm7, %v2953_v8, %v2954_v2  ;;  %v5146_v27 = vcombine.low %v6579_v5, %v7700_v50  ;;  %v5398_v51 = vrot.slane %v5382_v60, 9  ;;  %v2968_v47 = vrot.slane %v5325_v22, 5  ;;  %v5330_v7 = vld [vmem:[%s7181_s30 + $0xac] sm:$0xf]  ;;  %v5333_v9 = vld [vmem:[%s7181_s30 + $0xb8] sm:$0xf] }
 0x115   : > { %v5413_v54 = vcombine.low %v2952_v15, %v2955_v55  ;;  %v2962_v62 = vsel %vm7451_vm7, %v2960_v18, %v2961_v13  ;;  %v2967_v63 = vrot.slane %v2965_v33, 4  ;;  %v2972_v46 = vrot.slane %v5327_v34, 5  ;;  %v7710_v26 = vld [vmem:[%s7191_s9 + $0xc] sm:$0xf]  ;;  %v5331_v31 = vld [vmem:[%s7181_s30 + $0xb0] sm:$0x1] }
 0x116   : > { %v1542_v10 = vsel %vm823_vm0, %v7411_v49, 0  ;;  %v5414_v61 = vcombine.low %v2959_v24, %v2962_v62  ;;  %v5399_v16 = vrot.slane %v5383_v45, 9  ;;  %v2975_v25 = vrot.slane %v5328_v57, 5  ;;  %v5384_v60 = vld [vmem:[%s7181_s30 + $0xa8] sm:$0xe] }
 0x117   : > { %v2974_v3 = vrot.slane %v2972_v46, 4  ;;  %v2966_v49 = vsel %vm7451_vm7, %v5398_v51, %v2965_v33  ;;  %v2969_v2 = vsel %vm7451_vm7, %v2967_v63, %v2968_v47  ;;  %v2979_v21 = vrot.slane %v5330_v7, 5  ;;  %v5334_v8 = vld [vmem:[%s7181_s30 + $0xbc] sm:$0x1]  ;;  %v5385_v33 = vld [vmem:[%s7181_s30 + $0xb4] sm:$0xe] }
 0x118   : > { %v2973_v13 = vsel %vm7451_vm7, %v5399_v16, %v2972_v46  ;;  %v2986_v15 = vrot.slane %v5333_v9, 5  ;;  %v6581_v34 = vld [vmem:[%s7181_s30 + $0x24] sm:$0xf]  ;;  %v7732_v39 = vld [vmem:[%s7181_s30 + $0x28] sm:$0xf]  ;;  %v5415_v24 = vcombine.low %v2966_v49, %v2969_v2  ;;  %v2982_v47 = vrot.slane %v5331_v31, 5 }
 0x119   : > { %v2976_v22 = vsel %vm7451_vm7, %v2974_v3, %v2975_v25  ;;  %v6583_v18 = vld [vmem:[%s7181_s30 + $0x30] sm:$0xf]  ;;  %v7737_v57 = vld [vmem:[%s7181_s30 + $0x34] sm:$0xf]  ;;  %v5336_v55 = vld [vmem:[%s7181_s30 + $0xc4] sm:$0xf] }
 0x11a   : > { %v5148_v45 = vcombine.low %v6583_v18, %v7737_v57  ;;  %v5416_v5 = vcombine.low %v2973_v13, %v2976_v22  ;;  %v2981_v51 = vrot.slane %v2979_v21, 4  ;;  %v2988_v62 = vrot.slane %v2986_v15, 4  ;;  %v5337_v16 = vld [vmem:[%s7181_s30 + $0xc8] sm:$0x1]  ;;  %v5386_v25 = vld [vmem:[%s7181_s30 + $0xc0] sm:$0xe] }
 0x11b   : > { %5842 = vmatmul.mubr.msk.bf16.vlgmr.msra.gmra.mrb[0].mxu1 %vm774_vm4, %v5145_v42  ;;  %5994 = vmatmul.mubr.msk.bf16.gmra.mrb[16].mxu0 %vm774_vm4, %v5413_v54  ;;  %v5147_v42 = vcombine.low %v6581_v34, %v7732_v39  ;;  %v5401_v54 = vrot.slane %v5385_v33, 9  ;;  %v2989_v63 = vrot.slane %v5334_v8, 5  ;;  %v2993_v9 = vrot.slane %v5336_v55, 5  ;;  %v6585_v3 = vld [vmem:[%s7181_s30 + $0x3c] sm:$0xf] }
 0x11c   : > { %5874 = vmatpush3.bf16.msra.mxu1 %v1542_v10  ;;  %5845 = vmatprep.mubr.msk.bf16.mxu1 %vm774_vm4, %v5146_v27  ;;  %v5400_v27 = vrot.slane %v5384_v60, 9  ;;  %v2983_v7 = vsel %vm7451_vm7, %v2981_v51, %v2982_v47  ;;  %v7757_v49 = vld [vmem:[%s7181_s30 + $0x40] sm:$0xf]  ;;  %v5402_v22 = vrot.slane %v5386_v25, 9  ;;  %v2996_v8 = vrot.slane %v5337_v16, 5  ;;  %v6538_v25 = vld [vmem:[%s7181_s30 + $0x24] sm:$0xff]  }
 0x11d   : > { %5997 = vmatprep.mubr.msk.bf16.mxu0 %vm774_vm4, %v5414_v61  ;;  %6372 = vmatprep.subr.msk.bf16.mxu1 %vm823_vm0, %v7710_v26  ;;  %v2987_v10 = vsel %vm7451_vm7, %v5401_v54, %v2986_v15  ;;  %v2990_v61 = vsel %vm7451_vm7, %v2988_v62, %v2989_v63  ;;  %v5149_v2 = vcombine.low %v6585_v3, %v7757_v49  ;;  %v2995_v60 = vrot.slane %v2993_v9, 4  ;;  %v1281_v51 = vld [vmem:[%s7181_s30 + $0xc] sm:$0xe]  ;;  %v7786_v47 = vld [vmem:[%s7181_s30 + $0x8] sm:$0x1] }
 0x11e   : > { %v2980_v46 = vsel %vm7451_vm7, %v5400_v27, %v2979_v21  ;;  %v5150_v21 = vcombine.low %v7358_v11, %v7366_v35  ;;  %v5418_v13 = vcombine.low %v2987_v10, %v2990_v61  ;;  %v2370_v15 = vshll.u32 %v7665_v56, 16  ;;  %v1282_v63 = vld [vmem:[%s7181_s30 + $0x18] sm:$0xe]  ;;  %v1283_v61 = vld [vmem:[%s7181_s30 + $0x24] sm:$0xe] }
 0x11f   : > { %v5417_v31 = vcombine.low %v2980_v46, %v2983_v7  ;;  %v2374_v33 = vshrl.u32 %v7665_v56, 16  ;;  %v2994_v11 = vsel %vm7451_vm7, %v5402_v22, %v2993_v9  ;;  %v2997_v35 = vsel %vm7451_vm7, %v2995_v60, %v2996_v8  ;;  %v1284_v16 = vld [vmem:[%s7181_s30 + $0x30] sm:$0xe] }
 0x120   : > { %v7772_v34 = vrot.slane %v2370_v15, 5  ;;  %v5152_v18 = vcombine.low %v7428_v17, %v7431_v23  ;;  %v1340_v27 = vrot.slane %v7689_v41, 5  ;;  %v1280_v23 = vld [vmem:[%s7181_s30] sm:$0xe]  ;;  %v5153_v54 = vcombine.low %v7446_v59, %v7461_v28 }
 0x121   : > { %v2376_v56 = vrot.slane %v2374_v33, 4  ;;  %v1333_v62 = vrot.slane %v7661_v53, 5  ;;  %v4182_v46 = vsel %vm823_vm0, %v7520_v44, 0  ;;  %v5177_v7 = vrot.slane %v1281_v51, 9  ;;  %v1285_v53 = vld [vmem:[%s7181_s30 + $0x3c] sm:$0xe] }
 0x122   : > { %9147 = vst [vmem:[#allocation22_spill] sm:$0xff] %v7772_v34  ;;  %v1342_v9 = vrot.slane %v1340_v27, 4  ;;  %v1347_v10 = vrot.slane %v7700_v50, 5  ;;  %v5154_v3 = vcombine.low %v7481_v58, %v7484_v48  ;;  %v5155_v59 = vcombine.low %v7505_v12, %v7515_v38  ;;  %v7820_v58 = vld [vmem:[%s7191_s9 + $0x20] sm:$0xf] }
 0x123   : > { %5846 = vmatmul.mubr.msk.bf16.gmra.mrb[4].mxu1 %vm774_vm4, %v5147_v42  ;;  %5998 = vmatmul.mubr.msk.bf16.gmra.mrb[20].mxu0 %vm774_vm4, %v5415_v24  ;;  %v5151_v42 = vcombine.low %v7391_v20, %v7397_v29  ;;  %v5419_v24 = vcombine.low %v2994_v11, %v2997_v35  ;;  %v2377_v55 = vor.u32 %v2376_v56, %v7772_v34  ;;  %v1336_v20 = vrot.slane %v7786_v47, 5  ;;  %v6588_v29 = vld [vmem:[%s7181_s30 + $0x14] sm:$0x1]  ;;  %v6589_v33 = vld [vmem:[%s7181_s30 + $0x20] sm:$0x1] }
 0x124   : > { %5849 = vmatprep.mubr.msk.bf16.mxu1 %vm774_vm4, %v5148_v45  ;;  %6001 = vmatprep.mubr.msk.bf16.mxu0 %vm774_vm4, %v5416_v5  ;;  %v6536_v45 = vld [vmem:[%s7181_s30 + $0x18] sm:$0xff]   ;;  %v2380_v5 = vshll.u32 %v7668_v1, 16  ;;  %v1343_v17 = vrot.slane %v6588_v29, 5  ;;  %v5156_v28 = vcombine.low %v7532_v43, %v7546_v32  ;;  %v1354_v44 = vrot.slane %v7732_v39, 5  ;;  %v6590_v56 = vld [vmem:[%s7181_s30 + $0x2c] sm:$0x1] }
 0x125   : > { %v7793_v1 = vrot.slane %v2377_v55, 4  ;;  %v1335_v60 = vrot.slane %v1333_v62, 4  ;;  %v1368_v39 = vrot.slane %v7757_v49, 5  ;;  %v7829_v8 = vsel %vm7451_vm7, %v5177_v7, %v1340_v27  ;;  %v1286_v27 = vld [vmem:[%s7181_s30 + $0x48] sm:$0xe] }
 0x126   : > { %v7795_v41 = vrot.slane %v2380_v5, 5  ;;  %v7833_v15 = vsel %vm7451_vm7, %v1342_v9, %v1343_v17  ;;  %v1350_v11 = vrot.slane %v6589_v33, 5  ;;  %v5179_v49 = vrot.slane %v1283_v61, 9  ;;  %v6592_v51 = vld [vmem:[%s7181_s30 + $0x4c] sm:$0xf]  ;;  %v6542_v17 = vld [vmem:[%s7181_s30 + $0x3c] sm:$0xff]  }
 0x127   : > { %9148 = vst [vmem:[#allocation23_spill] sm:$0xff] %v7793_v1  ;;  %v1356_v35 = vrot.slane %v1354_v44, 4  ;;  %v5181_v5 = vrot.slane %v1285_v53, 9  ;;  %v1375_v29 = vrot.slane %v6592_v51, 5  ;;  %v7860_v9 = vsel %vm7451_vm7, %v1335_v60, %v1336_v20  ;;  %v6594_v60 = vld [vmem:[%s7181_s30 + $0x50] sm:$0x1] }
 0x128   : > { %9149 = vst [vmem:[#allocation24_spill] sm:$0xff] %v7795_v41  ;;  %v7877_v47 = vsel %vm7451_vm7, %v5179_v49, %v1354_v44  ;;  %v5182_v53 = vrot.slane %v1286_v27, 9  ;;  %v5504_v12 = vld [vmem:[%s7181_s30 + $0x24] sm:$0xf]  ;;  %v6596_v51 = vld [vmem:[%s7181_s30 + $0x5c] sm:$0x1] }
 0x129   : > { %v1377_v44 = vrot.slane %v1375_v29, 4  ;;  %v5503_v43 = vld [vmem:[%s7181_s30 + $0x20] sm:$0x1]  ;;  %v5505_v32 = vld [vmem:[%s7181_s30 + $0x28] sm:$0xf] }
 0x12a   : > { %v8138_v34 = vld [vmem:[%s7181_s30 + $0x64] sm:$0xf] }
 0x12b   : > { %5850 = vmatmul.mubr.msk.bf16.gmra.mrb[8].mxu1 %vm774_vm4, %v5149_v2  ;;  %6002 = vmatmul.mubr.msk.bf16.gmra.mrb[24].mxu0 %vm774_vm4, %v5417_v31  ;;  %v6540_v2 = vld [vmem:[%s7181_s30 + $0x30] sm:$0xff]   ;;  %v5176_v31 = vrot.slane %v1280_v23, 9  ;;  %9162 = vst [vmem:[#allocation31_spill] sm:$0xff] %v8138_v34 }
 0x12c   : > { %5853 = vmatprep.mubr.msk.bf16.mxu1 %vm774_vm4, %v5150_v21  ;;  %6005 = vmatprep.mubr.msk.bf16.mxu0 %vm774_vm4, %v5418_v13  ;;  %v5178_v21 = vrot.slane %v1282_v63, 9  ;;  %v1361_v13 = vrot.slane %v7737_v57, 5  ;;  %v1349_v57 = vrot.slane %v1347_v10, 4  ;;  %v1370_v63 = vrot.slane %v1368_v39, 4 }
 0x12d   : > { %v7847_v23 = vsel %vm7451_vm7, %v5176_v31, %v1333_v62 }
 0x12e   : > { %v7870_v61 = vsel %vm7451_vm7, %v1349_v57, %v1350_v11  ;;  %v1378_v57 = vrot.slane %v6594_v60, 5  ;;  %v3727_v60 = vshll.u32 %v5504_v12, 16 }
 0x130   : > { %v3729_v50 = vrot.slane %v3727_v60, 5  ;;  %v7994_v60 = vld [vmem:[%s7181_s30 + $0x38] sm:$0x1] }
 0x131   : > { %9153 = vst [vmem:[#allocation26_spill] sm:$0xff] %v7994_v60 }
 0x133   : > { %5854 = vmatmul.mubr.msk.bf16.gmra.mrb[12].mxu1 %vm774_vm4, %v5151_v42  ;;  %6006 = vmatmul.mubr.msk.bf16.gmra.mrb[28].mxu0 %vm774_vm4, %v5419_v24  ;;  %v1357_v42 = vrot.slane %v6590_v56, 5  ;;  %v5180_v24 = vrot.slane %v1284_v16, 9  ;;  %v1287_v16 = vld [vmem:[%s7181_s30 + $0x54] sm:$0xe] }
 0x134   : > { %5857 = vmatprep.mubr.msk.bf16.mxu1 %vm774_vm4, %v5152_v18  ;;  %6011 = vmatprep.mubr.msk.bf16.mxu0 %vm774_vm4, %v6536_v45  ;;  %v1363_v18 = vrot.slane %v1361_v13, 4  ;;  %v6591_v45 = vld [vmem:[%s7181_s30 + $0x38] sm:$0x1] }
 0x135   : > { %v1364_v55 = vrot.slane %v6591_v45, 5  ;;  %v7881_v20 = vsel %vm7451_vm7, %v1356_v35, %v1357_v42  ;;  %v3733_v45 = vshll.u32 %v5505_v32, 16 }
 0x137   : > { %v7890_v31 = vsel %vm7451_vm7, %v1363_v18, %v1364_v55  ;;  %v7919_v55 = vsel %vm7451_vm7, %v5182_v53, %v1375_v29  ;;  %v1385_v29 = vrot.slane %v6596_v51, 5  ;;  %v1289_v51 = vld [vmem:[%s7181_s30 + $0x6c] sm:$0xe]  ;;  %v6548_v18 = vld [vmem:[%s7181_s30 + $0x60] sm:$0xff]  }
 0x13b   : > { %5858 = vmatmul.mubr.msk.bf16.gmra.mrb[16].mxu1 %vm774_vm4, %v5153_v54  ;;  %6012 = vmatmul.mubr.msk.bf16.vlgmr.msra.gmra.mrb[0].mxu0 %vm774_vm4, %v6538_v25  ;;  %v7851_v54 = vsel %vm823_vm0, %v7710_v26, 0  ;;  %v7866_v26 = vsel %vm7451_vm7, %v5178_v21, %v1347_v10  ;;  %v5501_v25 = vld [vmem:[%s7181_s30 + $0x18] sm:$0xf]  ;;  %v7885_v10 = vsel %vm7451_vm7, %v5180_v24, %v1361_v13  ;;  %v7894_v21 = vsel %vm7451_vm7, %v5181_v5, %v1368_v39  ;;  %v7906_v39 = vld [vmem:[%s7181_s30 + $0x60] sm:$0xe] }
 0x13c   : > { %6044 = vmatpush3.bf16.msra.mxu0 %v4182_v46  ;;  %5861 = vmatprep.mubr.msk.bf16.mxu1 %vm774_vm4, %v5154_v3  ;;  %v6593_v46 = vld [vmem:[%s7181_s30 + $0x44] sm:$0x1]  ;;  %v6544_v3 = vld [vmem:[%s7181_s30 + $0x48] sm:$0xff]   ;;  %v5183_v13 = vrot.slane %v1287_v16, 9  ;;  %v3700_v11 = vshrl.u32 %v5501_v25, 16  ;;  %v3703_v49 = vshll.u32 %v5501_v25, 16  ;;  %v9165_v4 = vcombine.low %v7885_v10, %v7890_v31 }
 0x13d   : > { %6015 = vmatprep.mubr.msk.bf16.mxu0 %vm774_vm4, %v6540_v2  ;;  %v1371_v7 = vrot.slane %v6593_v46, 5  ;;  %6378 = vmatprep.subr.msk.bf16.mxu0 %vm823_vm0, %v7820_v58  ;;  %v5502_v2 = vld [vmem:[%s7181_s30 + $0x1c] sm:$0xf]  ;;  %v6595_v5 = vld [vmem:[%s7181_s30 + $0x58] sm:$0xf] }
 0x13e   : > { %v3709_v42 = vshll.u32 %v5502_v2, 16  ;;  %v3713_v24 = vshrl.u32 %v5502_v2, 16  ;;  %v1382_v27 = vrot.slane %v6595_v5, 5  ;;  %v6546_v46 = vld [vmem:[%s7181_s30 + $0x54] sm:$0xff]   ;;  %v3702_v16 = vrot.slane %v3700_v11, 4 }
 0x13f   : > { %v7899_v33 = vsel %vm7451_vm7, %v1370_v63, %v1371_v7  ;;  %v5184_v7 = vrot.slane %v7906_v39, 9  ;;  %v3705_v25 = vrot.slane %v3703_v49, 5  ;;  %v6599_v39 = vld [vmem:[%s7181_s30 + $0x68] sm:$0x1] }
 0x140   : > { %v7945_v53 = vrot.slane %v3709_v42, 5  ;;  %v3715_v2 = vrot.slane %v3713_v24, 4  ;;  %v1384_v5 = vrot.slane %v1382_v27, 4  ;;  %v1392_v11 = vrot.slane %v6599_v39, 5  ;;  %v6600_v39 = vld [vmem:[%s7181_s30 + $0x74] sm:$0x1] }
 0x141   : > { %v3706_v35 = vor.u32 %v3705_v25, %v3702_v16  ;;  %v3719_v42 = vshll.u32 %v5503_v43, 16  ;;  %v7959_v16 = vrot.slane %v3733_v45, 5  ;;  %v9151_v25 = vcombine.low %v7581_v37, %v7594_v19  ;;  %v7975_v45 = vld [vmem:[%s7181_s30 + $0x2c] sm:$0x1] }
 0x142   : > { %9152 = vst [vmem:[#allocation25_spill] sm:$0xff] %v7975_v45 }
 0x143   : > { %5862 = vmatmul.mubr.msk.bf16.gmra.mrb[20].mxu1 %vm774_vm4, %v5155_v59  ;;  %6016 = vmatmul.mubr.msk.bf16.gmra.mrb[4].mxu0 %vm774_vm4, %v6542_v17  ;;  %v7932_v59 = vsel %vm7451_vm7, %v1377_v44, %v1378_v57  ;;  %v6597_v17 = vld [vmem:[%s7181_s30 + $0x64] sm:$0xf]  ;;  %v3724_v44 = vshrl.u32 %v5504_v12, 16  ;;  %v5508_v57 = vld [vmem:[%s7181_s30 + $0x34] sm:$0xf]  ;;  %v3716_v12 = vor.u32 %v3715_v2, %v7945_v53 }
 0x144   : > { %5865 = vmatprep.mubr.msk.bf16.mxu1 %vm774_vm4, %v5156_v28  ;;  %6019 = vmatprep.mubr.msk.bf16.mxu0 %vm774_vm4, %v6544_v3  ;;  %v1389_v63 = vrot.slane %v6597_v17, 5  ;;  %v7941_v28 = vsel %vm7451_vm7, %v5183_v13, %v1382_v27  ;;  %v5507_v3 = vld [vmem:[%s7181_s30 + $0x30] sm:$0xf]  ;;  %v3737_v13 = vshrl.u32 %v5505_v32, 16  ;;  %v3757_v22 = vshll.u32 %v5508_v57, 16 }
 0x145   : > { %v6598_v17 = vld [vmem:[%s7181_s30 + $0x70] sm:$0xf]  ;;  %v3748_v62 = vshrl.u32 %v5507_v3, 16  ;;  %v3751_v49 = vshll.u32 %v5507_v3, 16  ;;  %v3761_v24 = vshrl.u32 %v5508_v57, 16  ;;  %v5185_v27 = vrot.slane %v1289_v51, 9 }
 0x146   : > { %v1396_v38 = vrot.slane %v6598_v17, 5  ;;  %v1391_v56 = vrot.slane %v1389_v63, 4  ;;  %v3726_v48 = vrot.slane %v3724_v44, 4  ;;  %v9150_v32 = vcombine.low %v7563_v52, %v7566_v0  ;;  %v6601_v51 = vld [vmem:[%s7181_s30 + $0x7c] sm:$0xf] }
 0x147   : > { %v1399_v3 = vrot.slane %v6600_v39, 5  ;;  %v3739_v43 = vrot.slane %v3737_v13, 4  ;;  %v7968_v52 = vsel %vm7451_vm7, %v1384_v5, %v1385_v29  ;;  %v7972_v0 = vsel %vm7451_vm7, %v5184_v7, %v1389_v63  ;;  %v1290_v5 = vld [vmem:[%s7181_s30 + $0x78] sm:$0xe]  ;;  %v5510_v39 = vld [vmem:[%s7181_s30 + $0x3c] sm:$0xf] }
 0x148   : > { %v1398_v17 = vrot.slane %v1396_v38, 4  ;;  %v3753_v37 = vrot.slane %v3751_v49, 5  ;;  %v7979_v19 = vsel %vm7451_vm7, %v1391_v56, %v1392_v11  ;;  %v7983_v2 = vrot.slane %v3757_v22, 5  ;;  %v6550_v56 = vld [vmem:[%s7181_s30 + $0x6c] sm:$0xff]  }
 0x149   : > { %v3763_v29 = vrot.slane %v3761_v24, 4  ;;  %v7985_v44 = vrot.slane %v3716_v12, 4  ;;  %v7987_v63 = vrot.slane %v3719_v42, 5  ;;  %v7991_v7 = vsel %vm7451_vm7, %v5185_v27, %v1396_v38  ;;  %v6551_v38 = vld [vmem:[%s7181_s30 + $0x78] sm:$0xff]   ;;  %v1291_v27 = vld [vmem:[%s7181_s30 + $0x84] sm:$0xe] }
 0x14a   : > { %v3740_v22 = vor.u32 %v3739_v43, %v7959_v16  ;;  %v3743_v57 = vshll.u32 %v7975_v45, 16  ;;  %v1403_v13 = vrot.slane %v6601_v51, 5  ;;  %v3767_v12 = vshll.u32 %v7994_v60, 16  ;;  %v6603_v51 = vld [vmem:[%s7181_s30 + $0x80] sm:$0x1] }
 0x14b   : > { %5866 = vmatmul.mubr.msk.bf16.gmra.mrb[24].mxu1 %vm774_vm4, %v9150_v32  ;;  %6020 = vmatmul.mubr.msk.bf16.gmra.mrb[8].mxu0 %vm774_vm4, %v6546_v46  ;;  %v3750_v46 = vrot.slane %v3748_v62, 4  ;;  %v3730_v62 = vor.u32 %v3729_v50, %v3726_v48  ;;  %v3764_v24 = vor.u32 %v3763_v29, %v7983_v2  ;;  %v6602_v32 = vld [vmem:[%s7181_s30 + $0x88] sm:$0xf]  ;;  %v6604_v43 = vld [vmem:[%s7181_s30 + $0x8c] sm:$0x1] }
 0x14c   : > { %5869 = vmatprep.mubr.msk.bf16.mxu1 %vm774_vm4, %v9151_v25  ;;  %6023 = vmatprep.mubr.msk.bf16.mxu0 %vm774_vm4, %v6548_v18  ;;  %v7981_v18 = vrot.slane %v3706_v35, 4  ;;  %v7999_v35 = vsel %vm7451_vm7, %v1398_v17, %v1399_v3  ;;  %v1410_v17 = vrot.slane %v6602_v32, 5  ;;  %v3722_v3 = vsel %vm7229_vm3, %v7985_v44, %v7987_v63  ;;  %v8034_v44 = vld [vmem:[%s7181_s30 + $0x40] sm:$0xf] }
 0x14d   : > { %v3754_v49 = vor.u32 %v3753_v37, %v3750_v46  ;;  %v3731_v25 = vrot.slane %v3730_v62, 4  ;;  %v9154_v46 = vcombine.low %v7613_v40, %v7619_v14  ;;  %v3741_v37 = vrot.slane %v3740_v22, 4  ;;  %9155 = vst [vmem:[#allocation27_spill] sm:$0xff] %v8034_v44 }
 0x14e   : > { %v3712_v42 = vsel %vm7229_vm3, %v7981_v18, %v7945_v53  ;;  %v5186_v53 = vrot.slane %v1290_v5, 9  ;;  %v3745_v18 = vrot.slane %v3743_v57, 5  ;;  %v1405_v29 = vrot.slane %v1403_v13, 4  ;;  %v5513_v5 = vld [vmem:[%s7181_s30 + $0x48] sm:$0xf] }
 0x14f   : > { %v1406_v32 = vrot.slane %v6603_v51, 5  ;;  %v9156_v63 = vcombine.low %v7847_v23, %v7860_v9  ;;  %v3755_v40 = vrot.slane %v3754_v49, 4  ;;  %v5187_v62 = vrot.slane %v1291_v27, 9  ;;  %v8053_v27 = vld [vmem:[%s7181_s30 + $0x4c] sm:$0xf] }
 0x150   : > { %v3775_v22 = vshll.u32 %v5510_v39, 16  ;;  %v3765_v57 = vrot.slane %v3764_v24, 4  ;;  %v1412_v51 = vrot.slane %v1410_v17, 4  ;;  %v1413_v11 = vrot.slane %v6604_v43, 5  ;;  %v6552_v24 = vld [vmem:[%s7181_s30 + $0x84] sm:$0xff]  }
 0x151   : > { %v3736_v23 = vsel %vm7229_vm3, %v3731_v25, %v7959_v16  ;;  %v8048_v9 = vsel %vm7451_vm7, %v5186_v53, %v1403_v13  ;;  %v3785_v49 = vshrl.u32 %v8034_v44, 16  ;;  %v3796_v43 = vshrl.u32 %v5513_v5, 16  ;;  %v8070_v53 = vld [vmem:[%s7181_s30 + $0x44] sm:$0x1] }
 0x152   : > { %v3799_v16 = vshll.u32 %v5513_v5, 16  ;;  %v3760_v13 = vsel %vm7229_vm3, %v3755_v40, %v7983_v2  ;;  %v8067_v25 = vsel %vm7451_vm7, %v5187_v62, %v1410_v17  ;;  %9157 = vst [vmem:[#allocation28_spill] sm:$0xff] %v8070_v53  ;;  %v3777_v48 = vrot.slane %v3775_v22, 5  ;;  %v5516_v22 = vld [vmem:[%s7181_s30 + $0x54] sm:$0xf] }
 0x153   : > { %5870 = vmatmul.mubr.msk.bf16.gmra.mrb[28].mxu1 %vm774_vm4, %v9154_v46  ;;  %6024 = vmatmul.mubr.msk.bf16.gmra.mrb[12].mxu0 %vm774_vm4, %v6550_v56  ;;  %v3772_v56 = vshrl.u32 %v5510_v39, 16  ;;  %v3769_v46 = vrot.slane %v3767_v12, 5  ;;  %v3746_v12 = vsel %vm7229_vm3, %v3741_v37, %v3745_v18  ;;  %v8060_v39 = vsel %vm7451_vm7, %v1405_v29, %v1406_v32  ;;  %v6553_v37 = vld [vmem:[%s7181_s30 + $0x90] sm:$0xff]  }
 0x154   : > { %5875 = vmatprep.mubr.msk.bf16.mxu1 %vm774_vm4, %v9156_v63  ;;  %6027 = vmatprep.mubr.msk.bf16.mxu0 %vm774_vm4, %v6551_v38  ;;  %v3781_v38 = vshll.u32 %v8034_v44, 16  ;;  %v8077_v29 = vsel %vm7451_vm7, %v1412_v51, %v1413_v11  ;;  %v3805_v32 = vshll.u32 %v8053_v27, 16  ;;  %v3809_v2 = vshrl.u32 %v8053_v27, 16  ;;  %v1293_v11 = vld [vmem:[%s7181_s30 + $0x9c] sm:$0xe] }
 0x155   : > { %v3774_v63 = vrot.slane %v3772_v56, 4  ;;  %v3770_v18 = vsel %vm7229_vm3, %v3765_v57, %v3769_v46  ;;  %v8081_v40 = vcombine.low %v3712_v42, %v3722_v3  ;;  %v8083_v17 = vcombine.low %v3736_v23, %v3746_v12  ;;  %v8097_v46 = vld [vmem:[%s7181_s30 + $0x58] sm:$0xf]  ;;  %v6605_v12 = vld [vmem:[%s7191_s9 + $0x10] sm:$0xf] }
 0x156   : > { %v8085_v62 = vrot.slane %v3781_v38, 5  ;;  %v3787_v56 = vrot.slane %v3785_v49, 4  ;;  %v9158_v5 = vcombine.low %v7829_v8, %v7833_v15  ;;  %v3791_v42 = vshll.u32 %v8070_v53, 16  ;;  %9159 = vst [vmem:[#allocation29_spill] sm:$0xff] %v8097_v46  ;;  %v1292_v49 = vld [vmem:[%s7181_s30 + $0x90] sm:$0xe] }
 0x157   : > { %v3798_v3 = vrot.slane %v3796_v43, 4  ;;  %v3801_v57 = vrot.slane %v3799_v16, 5  ;;  %v9160_v8 = vcombine.low %v7866_v26, %v7870_v61  ;;  %v8106_v15 = vsel %vm823_vm0, %v7820_v58, 0  ;;  %v5519_v58 = vld [vmem:[%s7181_s30 + $0x60] sm:$0xf] }
 0x158   : > { %v8108_v51 = vcombine.low %v3760_v13, %v3770_v18  ;;  %v3778_v38 = vor.u32 %v3777_v48, %v3774_v63  ;;  %v3811_v26 = vrot.slane %v3809_v2, 4  ;;  %v3820_v61 = vshrl.u32 %v5516_v22, 16  ;;  %v6606_v48 = vld [vmem:[%s7181_s30 + $0x94] sm:$0xf]  ;;  %v8122_v13 = vld [vmem:[%s7181_s30 + $0x50] sm:$0x1] }
 0x159   : > { %v3788_v43 = vor.u32 %v3787_v56, %v8085_v62  ;;  %v1417_v16 = vrot.slane %v6606_v48, 5  ;;  %9161 = vst [vmem:[#allocation30_spill] sm:$0xff] %v8122_v13  ;;  %v3829_v63 = vshll.u32 %v8097_v46, 16  ;;  %v6554_v18 = vld [vmem:[%s7181_s30 + $0x9c] sm:$0xff]   ;;  %v8128_v2 = vrot.slane %v3791_v42, 5 }
 0x15a   : > { %v8131_v56 = vrot.slane %v3778_v38, 4  ;;  %v6608_v23 = vld [vmem:[%s7181_s30 + $0x98] sm:$0x1]  ;;  %v3844_v50 = vshrl.u32 %v5519_v58, 16  ;;  %v3847_v53 = vshll.u32 %v5519_v58, 16  ;;  %v3815_v60 = vshll.u32 %v8122_v13, 16 }
 0x15b   : > { %5876 = vmatmul.mubr.msk.bf16.vlgmr.msra.gmra.mrb[0].mxu1 %vm774_vm4, %v9158_v5  ;;  %6028 = vmatmul.mubr.msk.bf16.gmra.mrb[16].mxu0 %vm774_vm4, %v6552_v24  ;;  %v3823_v24 = vshll.u32 %v5516_v22, 16  ;;  %v5188_v22 = vrot.slane %v1292_v49, 9  ;;  %v3802_v5 = vor.u32 %v3801_v57, %v3798_v3  ;;  %v1420_v48 = vrot.slane %v6608_v23, 5  ;;  %v8141_v49 = vld [vmem:[%s7181_s30 + $0x5c] sm:$0x1] }
 0x15c   : > { %5908 = vmatpush3.bf16.msra.mxu1 %v7851_v54  ;;  %5879 = vmatprep.mubr.msk.bf16.mxu1 %vm774_vm4, %v9160_v8  ;;  %v8114_v54 = vrot.slane %v3805_v32, 5  ;;  %v6555_v32 = vld [vmem:[%s7181_s30 + $0xa8] sm:$0xff]   ;;  %v6607_v8 = vld [vmem:[%s7181_s30 + $0xa0] sm:$0xf]  ;;  %v3822_v45 = vrot.slane %v3820_v61, 4  ;;  %v3789_v3 = vrot.slane %v3788_v43, 4  ;;  %v9164_v23 = vcombine.low %v7877_v47, %v7881_v20 }
 0x15d   : > { %6031 = vmatprep.mubr.msk.bf16.mxu0 %vm774_vm4, %v6553_v37  ;;  %6374 = vmatprep.subr.msk.bf16.mxu1 %vm823_vm0, %v6605_v12  ;;  %v3833_v37 = vshrl.u32 %v8097_v46, 16  ;;  %v1424_v12 = vrot.slane %v6607_v8, 5  ;;  %v3825_v42 = vrot.slane %v3823_v24, 5  ;;  %v1419_v57 = vrot.slane %v1417_v16, 4  ;;  %9163 = vst [vmem:[#allocation32_spill] sm:$0xff] %v8141_v49 }
 0x15e   : > { %v3812_v44 = vor.u32 %v3811_v26, %v8114_v54  ;;  %v8143_v38 = vrot.slane %v3829_v63, 5  ;;  %v3803_v26 = vrot.slane %v3802_v5, 4  ;;  %v5189_v58 = vrot.slane %v1293_v11, 9  ;;  %v6609_v24 = vld [vmem:[%s7181_s30 + $0xa4] sm:$0x1] }
 0x15f   : > { %v3835_v8 = vrot.slane %v3833_v37, 4  ;;  %v1426_v61 = vrot.slane %v1424_v12, 4  ;;  %v1427_v43 = vrot.slane %v6609_v24, 5  ;;  %v3846_v47 = vrot.slane %v3844_v50, 4  ;;  %v1294_v50 = vld [vmem:[%s7181_s30 + $0xa8] sm:$0xe] }
 0x160   : > { %v3849_v20 = vrot.slane %v3847_v53, 5  ;;  %v3853_v63 = vshll.u32 %v8138_v34, 16  ;;  %v3857_v37 = vshrl.u32 %v8138_v34, 16  ;;  %v3813_v11 = vrot.slane %v3812_v44, 4  ;;  %v6610_v53 = vld [vmem:[%s7181_s30 + $0xac] sm:$0xf] }
 0x161   : > { %v3826_v5 = vor.u32 %v3825_v42, %v3822_v45  ;;  %v8165_v10 = vsel %vm7451_vm7, %v5188_v22, %v1417_v16  ;;  %v3836_v31 = vor.u32 %v3835_v8, %v8143_v38  ;;  %v1431_v44 = vrot.slane %v6610_v53, 5  ;;  %v8186_v22 = vld [vmem:[%s7181_s30 + $0x68] sm:$0x1]  ;;  %v8320_v34 = vld [vmem:[%s7181_s30 + $0x98] sm:$0x1] }
 0x162   : > { %v3794_v45 = vsel %vm7229_vm3, %v3789_v3, %v8128_v2  ;;  %v8183_v16 = vsel %vm7451_vm7, %v5189_v58, %v1424_v12  ;;  %9167 = vst [vmem:[#allocation34_spill] sm:$0xff] %v8186_v22  ;;  %v8191_v42 = vsel %vm7451_vm7, %v1426_v61, %v1427_v43  ;;  %v3850_v2 = vor.u32 %v3849_v20, %v3846_v47  ;;  %v1295_v58 = vld [vmem:[%s7181_s30 + $0xb4] sm:$0xe]  ;;  %v6611_v61 = vld [vmem:[%s7181_s30 + $0xb0] sm:$0x1] }
 0x163   : > { %5880 = vmatmul.mubr.msk.bf16.gmra.mrb[4].mxu1 %vm774_vm4, %v9164_v23  ;;  %6032 = vmatmul.mubr.msk.bf16.gmra.mrb[20].mxu0 %vm774_vm4, %v6554_v18  ;;  %v3817_v18 = vrot.slane %v3815_v60, 5  ;;  %v3839_v23 = vshll.u32 %v8141_v49, 16  ;;  %v8176_v60 = vsel %vm7451_vm7, %v1419_v57, %v1420_v48  ;;  %9166 = vst [vmem:[#allocation33_spill] sm:$0xff] %v8183_v16  ;;  %9168 = vst [vmem:[#allocation35_spill] sm:$0xff] %v8191_v42  ;;  %v8193_v3 = vrot.slane %v3853_v63, 5 }
 0x164   : > { %5883 = vmatprep.mubr.msk.bf16.mxu1 %vm774_vm4, %v9165_v4  ;;  %6035 = vmatprep.mubr.msk.bf16.mxu0 %vm774_vm4, %v6555_v32  ;;  %v3784_v4 = vsel %vm7229_vm3, %v8131_v56, %v8085_v62  ;;  %v6556_v32 = vld [vmem:[%s7181_s30 + $0xb4] sm:$0xff]   ;;  %v3808_v62 = vsel %vm7229_vm3, %v3803_v26, %v8114_v54  ;;  %v6557_v56 = vld [vmem:[%s7181_s30 + $0xc0] sm:$0xff]   ;;  %v3859_v48 = vrot.slane %v3857_v37, 4  ;;  %v5522_v57 = vld [vmem:[%s7181_s30 + $0x6c] sm:$0xf]  ;;  %v8198_v8 = vrot.slane %v3826_v5, 4 }
 0x165   : > { %v3818_v54 = vsel %vm7229_vm3, %v3813_v11, %v3817_v18  ;;  %v8200_v26 = vrot.slane %v3839_v23, 5  ;;  %v5190_v12 = vrot.slane %v1294_v50, 9  ;;  %v8203_v24 = vrot.slane %v3836_v31, 4  ;;  %v8226_v31 = vld [vmem:[%s7181_s30 + $0x70] sm:$0xf] }
 0x166   : > { %v1433_v53 = vrot.slane %v1431_v44, 4  ;;  %v1434_v43 = vrot.slane %v6611_v61, 5  ;;  %v3863_v47 = vshll.u32 %v8186_v22, 16  ;;  %v9169_v20 = vcombine.low %v7894_v21, %v7899_v33  ;;  %9171 = vst [vmem:[#allocation36_spill] sm:$0xff] %v8226_v31  ;;  %v6558_v50 = vld [vmem:[%s7181_s30 + $0xcc] sm:$0xff]  }
 0x167   : > { %v8212_v63 = vcombine.low %v3784_v4, %v3794_v45  ;;  %v3868_v11 = vshrl.u32 %v5522_v57, 16  ;;  %v3871_v18 = vshll.u32 %v5522_v57, 16  ;;  %v9170_v5 = vcombine.low %v7919_v55, %v7932_v59  ;;  %v8254_v57 = vld [vmem:[%s7181_s30 + $0x7c] sm:$0xf] }
 0x168   : > { %v8221_v21 = vrot.slane %v3850_v2, 4  ;;  %v3860_v33 = vor.u32 %v3859_v48, %v8193_v3  ;;  %v5191_v23 = vrot.slane %v1295_v58, 9  ;;  %v1438_v4 = vrot.slane %v7619_v14, 5  ;;  %9172 = vst [vmem:[#allocation37_spill] sm:$0xff] %v8254_v57  ;;  %v8283_v48 = vld [vmem:[%s7181_s30 + $0x94] sm:$0xf] }
 0x169   : > { %v8239_v45 = vsel %vm7451_vm7, %v5190_v12, %v1431_v44  ;;  %v8250_v2 = vrot.slane %v3863_v47, 5  ;;  %v5528_v44 = vld [vmem:[%s7181_s30 + $0x84] sm:$0xf]  ;;  %v8259_v12 = vrot.slane %v3871_v18, 5  ;;  %v3877_v58 = vshll.u32 %v8226_v31, 16  ;;  %9175 = vst [vmem:[#allocation40_spill] sm:$0xff] %v8283_v48 }
 0x16a   : > { %v3881_v61 = vshrl.u32 %v8226_v31, 16  ;;  %v8274_v47 = vsel %vm7451_vm7, %v5191_v23, %v1438_v4  ;;  %v8277_v18 = vld [vmem:[%s7181_s30 + $0x74] sm:$0x1]  ;;  %v3901_v14 = vshll.u32 %v8254_v57, 16  ;;  %v3905_v37 = vshrl.u32 %v8254_v57, 16 }
 0x16b   : > { %5884 = vmatmul.mubr.msk.bf16.gmra.mrb[8].mxu1 %vm774_vm4, %v9169_v20  ;;  %6036 = vmatmul.mubr.msk.bf16.gmra.mrb[24].mxu0 %vm774_vm4, %v6556_v32  ;;  %v8229_v32 = vcombine.low %v3808_v62, %v3818_v54  ;;  %v8248_v62 = vsel %vm7451_vm7, %v1433_v53, %v1434_v43  ;;  %v8257_v54 = vrot.slane %v3868_v11, 4  ;;  %v8264_v20 = vld [vmem:[%s7181_s30 + $0x88] sm:$0xf]  ;;  %v8270_v43 = vrot.slane %v3860_v33, 4  ;;  %9174 = vst [vmem:[#allocation39_spill] sm:$0xff] %v8277_v18 }
 0x16c   : > { %5887 = vmatprep.mubr.msk.bf16.mxu1 %vm774_vm4, %v9170_v5  ;;  %6039 = vmatprep.mubr.msk.bf16.mxu0 %vm774_vm4, %v6557_v56  ;;  %v5525_v56 = vld [vmem:[%s7181_s30 + $0x78] sm:$0xf]  ;;  %9173 = vst [vmem:[#allocation38_spill] sm:$0xff] %v8264_v20  ;;  %v1440_v11 = vrot.slane %v1438_v4, 4  ;;  %v5531_v5 = vld [vmem:[%s7181_s30 + $0x90] sm:$0xf]  ;;  %v9176_v4 = vcombine.low %v7941_v28, %v7968_v52 }
 0x16d   : > { %v3892_v55 = vshrl.u32 %v5525_v56, 16  ;;  %v3895_v59 = vshll.u32 %v5525_v56, 16  ;;  %v3916_v53 = vshrl.u32 %v5528_v44, 16  ;;  %v3919_v33 = vshll.u32 %v5528_v44, 16  ;;  %v5534_v31 = vld [vmem:[%s7181_s30 + $0x9c] sm:$0xf] }
 0x16e   : > { %v3925_v1 = vshll.u32 %v8264_v20, 16  ;;  %v3929_v23 = vshrl.u32 %v8264_v20, 16  ;;  %v3874_v56 = vor.u32 %v8259_v12, %v8257_v54  ;;  %v8294_v41 = vrot.slane %v3877_v58, 5  ;;  %v8307_v12 = vld [vmem:[%s7181_s30 + $0xa0] sm:$0xf] }
 0x16f   : > { %v3883_v44 = vrot.slane %v3881_v61, 4  ;;  %v3887_v57 = vshll.u32 %v8277_v18, 16  ;;  %v9177_v20 = vcombine.low %v7972_v0, %v7979_v19  ;;  %v3940_v28 = vshrl.u32 %v5531_v5, 16  ;;  %9178 = vst [vmem:[#allocation41_spill] sm:$0xff] %v8307_v12  ;;  %v8310_v58 = vld [vmem:[%s7181_s30 + $0x80] sm:$0x1] }
 0x170   : > { %v3943_v52 = vshll.u32 %v5531_v5, 16  ;;  %v3953_v54 = vshrl.u32 %v8283_v48, 16  ;;  %v3894_v61 = vrot.slane %v3892_v55, 4  ;;  %v8312_v18 = vrot.slane %v3901_v14, 5  ;;  %v8315_v19 = vld [vmem:[%s7181_s30 + $0x8c] sm:$0x1] }
 0x171   : > { %v3907_v0 = vrot.slane %v3905_v37, 4  ;;  %v8317_v22 = vrot.slane %v3925_v1, 5  ;;  %v3931_v5 = vrot.slane %v3929_v23, 4  ;;  %v3964_v49 = vshrl.u32 %v5534_v31, 16 }
 0x172   : > { %v3973_v42 = vshll.u32 %v8307_v12, 16  ;;  %v3977_v16 = vshrl.u32 %v8307_v12, 16  ;;  %v3942_v55 = vrot.slane %v3940_v28, 4  ;;  %v3955_v37 = vrot.slane %v3953_v54, 4 }
 0x173   : > { %5888 = vmatmul.mubr.msk.bf16.gmra.mrb[12].mxu1 %vm774_vm4, %v9176_v4  ;;  %6040 = vmatmul.mubr.msk.bf16.gmra.mrb[28].mxu0 %vm774_vm4, %v6558_v50  ;;  %v3949_v50 = vshll.u32 %v8283_v48, 16  ;;  %v3897_v4 = vrot.slane %v3895_v59, 5  ;;  %v3967_v48 = vshll.u32 %v5534_v31, 16  ;;  %v3945_v59 = vrot.slane %v3943_v52, 5 }
 0x174   : > { %5891 = vmatprep.mubr.msk.bf16.mxu1 %vm774_vm4, %v9177_v20  ;;  %6045 = vmatprep.mubr.msk.bf16.mxu0 %vm774_vm4, %v8081_v40  ;;  %v3918_v20 = vrot.slane %v3916_v53, 4  ;;  %v3921_v40 = vrot.slane %v3919_v33, 5  ;;  %v3884_v46 = vor.u32 %v3883_v44, %v8294_v41  ;;  %v3908_v1 = vor.u32 %v3907_v0, %v8312_v18 }
 0x175   : > { %v8324_v14 = vrot.slane %v3949_v50, 5  ;;  %v3898_v53 = vor.u32 %v3897_v4, %v3894_v61  ;;  %v3911_v33 = vshll.u32 %v8310_v58, 16  ;;  %v3932_v31 = vor.u32 %v3931_v5, %v8317_v22  ;;  %v5537_v4 = vld [vmem:[%s7181_s30 + $0xa8] sm:$0xf] }
 0x176   : > { %v3922_v23 = vor.u32 %v3921_v40, %v3918_v20  ;;  %v3935_v13 = vshll.u32 %v8315_v19, 16  ;;  %v3959_v12 = vshll.u32 %v8320_v34, 16  ;;  %v9179_v28 = vcombine.low %v7991_v7, %v7999_v35 }
 0x177   : > { %v3966_v44 = vrot.slane %v3964_v49, 4  ;;  %v3969_v52 = vrot.slane %v3967_v48, 5  ;;  %v8338_v50 = vrot.slane %v3973_v42, 5  ;;  %v3979_v54 = vrot.slane %v3977_v16, 4  ;;  %v8353_v42 = vld [vmem:[%s7181_s30 + $0xa4] sm:$0x1] }
 0x178   : > { %v9180_v61 = vcombine.low %v8048_v9, %v8060_v39  ;;  %v9181_v7 = vrot.slane %v7624_v36, 5  ;;  %v3946_v49 = vor.u32 %v3945_v59, %v3942_v55  ;;  %v3956_v48 = vor.u32 %v3955_v37, %v8324_v14  ;;  %v8361_v59 = vld [vmem:[%s7181_s30 + $0xac] sm:$0xf] }
 0x179   : > { %v3885_v9 = vrot.slane %v3884_v46, 4  ;;  %v3899_v39 = vrot.slane %v3898_v53, 4  ;;  %v3913_v16 = vrot.slane %v3911_v33, 5  ;;  %v3909_v36 = vrot.slane %v3908_v1, 4 }
 0x17a   : > { %v8349_v35 = vsel %vm7451_vm7, %v1440_v11, %v9181_v7  ;;  %v3923_v0 = vrot.slane %v3922_v23, 4  ;;  %v3933_v20 = vrot.slane %v3932_v31, 4  ;;  %v3937_v11 = vrot.slane %v3935_v13, 5 }
 0x17b   : > { %5892 = vmatmul.mubr.msk.bf16.gmra.mrb[16].mxu1 %vm774_vm4, %v9179_v28  ;;  %6046 = vmatmul.mubr.msk.bf16.vlgmr.msra.gmra.mrb[0].mxu0 %vm774_vm4, %v8083_v17  ;;  %v3889_v17 = vrot.slane %v3887_v57, 5  ;;  %v3961_v40 = vrot.slane %v3959_v12, 5  ;;  %v3970_v57 = vor.u32 %v3969_v52, %v3966_v44  ;;  %v3980_v5 = vor.u32 %v3979_v54, %v8338_v50 }
 0x17c   : > { %6078 = vmatpush3.bf16.msra.mxu0 %v8106_v15  ;;  %5895 = vmatprep.mubr.msk.bf16.mxu1 %vm774_vm4, %v9180_v61  ;;  %v3875_v15 = vrot.slane %v3874_v56, 4  ;;  %v3983_v55 = vshll.u32 %v8353_v42, 16  ;;  %v3947_v37 = vrot.slane %v3946_v49, 4  ;;  %v3957_v28 = vrot.slane %v3956_v48, 4 }
 0x17d   : > { %6049 = vmatprep.mubr.msk.bf16.mxu0 %vm774_vm4, %v8108_v51  ;;  %v3988_v51 = vshrl.u32 %v5537_v4, 16  ;;  %v3991_v56 = vshll.u32 %v5537_v4, 16  ;;  %v3866_v46 = vsel %vm7229_vm3, %v8270_v43, %v8250_v2  ;;  %v3890_v12 = vsel %vm7229_vm3, %v3885_v9, %v3889_v17  ;;  %v5587_v9 = vld [vmem:[%s7181_s30 + $0x54] sm:$0xe] }
 0x17e   : > { %v3880_v13 = vsel %vm7229_vm3, %v3875_v15, %v8294_v41  ;;  %v3904_v53 = vsel %vm7229_vm3, %v3899_v39, %v8312_v18  ;;  %v3914_v1 = vsel %vm7229_vm3, %v3909_v36, %v3913_v16  ;;  %v3928_v33 = vsel %vm7229_vm3, %v3923_v0, %v8317_v22 }
 0x17f   : > { %v3997_v2 = vshll.u32 %v8361_v59, 16  ;;  %v4001_v43 = vshrl.u32 %v8361_v59, 16  ;;  %v9182_v41 = vcombine.low %v8067_v25, %v8077_v29  ;;  %v3938_v18 = vsel %vm7229_vm3, %v3933_v20, %v3937_v11 }
 0x180   : > { %v3971_v23 = vrot.slane %v3970_v57, 4  ;;  %v3981_v31 = vrot.slane %v3980_v5, 4  ;;  %v3985_v22 = vrot.slane %v3983_v55, 5  ;;  %v9183_v44 = vcombine.low %v8165_v10, %v8176_v60 }
 0x181   : > { %v3952_v25 = vsel %vm7229_vm3, %v3947_v37, %v8324_v14  ;;  %v3962_v29 = vsel %vm7229_vm3, %v3957_v28, %v3961_v40  ;;  %v8403_v52 = vrot.slane %v3991_v56, 5  ;;  %v9184_v10 = vsel %vm7229_vm3, %v8203_v24, %v8200_v26  ;;  %v8425_v26 = vld [vmem:[%s7181_s30 + $0xb0] sm:$0x1]  ;;  %v5540_v24 = vld [vmem:[%s7181_s30 + $0xb4] sm:$0xf]  ;;  %v9188_v28 = vld [vmem:[#allocation29_spill] sm:$0xff] }
 0x182   : > { %v9185_v60 = vsel %vm7229_vm3, %v8198_v8, %v8143_v38  ;;  %v5207_v14 = vcombine.low %v8239_v45, %v8248_v62  ;;  %v9186_v54 = vsel %vm7229_vm3, %v8221_v21, %v8193_v3  ;;  %v5208_v7 = vcombine.low %v8274_v47, %v8349_v35  ;;  %v8435_v45 = vld [vmem:[%s7181_s30 + $0xb8] sm:$0xf]  ;;  %v5586_v62 = vld [vmem:[%s7181_s30 + $0x48] sm:$0xe]  ;;  %v5589_v56 = vld [vmem:[%s7181_s30 + $0x6c] sm:$0xe] }
 0x183   : > { %5896 = vmatmul.mubr.msk.bf16.gmra.mrb[20].mxu1 %vm774_vm4, %v9182_v41  ;;  %6050 = vmatmul.mubr.msk.bf16.gmra.mrb[4].mxu0 %vm774_vm4, %v8212_v63  ;;  %v8401_v63 = vrot.slane %v3988_v51, 4  ;;  %v5556_v61 = vcombine.low %v9186_v54, %v3866_v46  ;;  %v8428_v17 = vcombine.low %v3880_v13, %v3890_v12  ;;  %v8430_v38 = vcombine.low %v3904_v53, %v3914_v1  ;;  %v9187_v40 = vld [vmem:[#allocation30_spill] sm:$0xff]  ;;  %v9189_v46 = vld [vmem:[#allocation33_spill] sm:$0xff]  ;;  %v9190_v13 = vld [vmem:[#allocation35_spill] sm:$0xff] }
 0x184   : > { %5899 = vmatprep.mubr.msk.bf16.mxu1 %vm774_vm4, %v9183_v44  ;;  %6053 = vmatprep.mubr.msk.bf16.mxu0 %vm774_vm4, %v8229_v32  ;;  %v5555_v32 = vcombine.low %v9185_v60, %v9184_v10  ;;  %v8432_v8 = vrot.slane %v3997_v2, 5  ;;  %v4003_v49 = vrot.slane %v4001_v43, 4  ;;  %v8438_v48 = vcombine.low %v3928_v33, %v3938_v18  ;;  %v9192_v33 = vld [vmem:[#allocation32_spill] sm:$0xff] }
 0x185   : > { %v8440_v3 = vcombine.low %v3952_v25, %v3962_v29  ;;  %v3976_v21 = vsel %vm7229_vm3, %v3971_v23, %v8338_v50  ;;  %v3986_v15 = vsel %vm7229_vm3, %v3981_v31, %v3985_v22  ;;  %v3994_v39 = vor.u32 %v8403_v52, %v8401_v63  ;;  %v5588_v50 = vld [vmem:[%s7181_s30 + $0x60] sm:$0xe]  ;;  %v9193_v23 = vld [vmem:[#allocation31_spill] sm:$0xff]  ;;  %v8547_v47 = vld [vmem:[%s7181_s30 + $0xbc] sm:$0x1] }
 0x186   : > { %v4007_v16 = vshll.u32 %v8425_v26, 16  ;;  %v4012_v4 = vshrl.u32 %v5540_v24, 16  ;;  %v4015_v36 = vshll.u32 %v5540_v24, 16  ;;  %v4021_v0 = vshll.u32 %v8435_v45, 16  ;;  %v5543_v22 = vld [vmem:[%s7181_s30 + $0xc0] sm:$0xf] }
 0x187   : > { %v5602_v20 = vrot.slane %v5586_v62, 9  ;;  %v4471_v11 = vrot.slane %v8053_v27, 5  ;;  %v4474_v57 = vrot.slane %v9187_v40, 5  ;;  %v8455_v5 = vcombine.low %v3976_v21, %v3986_v15  ;;  %v9194_v25 = vld [vmem:[#allocation34_spill] sm:$0xff]  ;;  %v9195_v52 = vld [vmem:[#allocation36_spill] sm:$0xff]  ;;  %v9196_v21 = vld [vmem:[#allocation39_spill] sm:$0xff] }
 0x188   : > { %v4004_v55 = vor.u32 %v4003_v49, %v8432_v8  ;;  %v5603_v37 = vrot.slane %v5587_v9, 9  ;;  %v4478_v51 = vrot.slane %v9188_v28, 5  ;;  %v9191_v12 = vcombine.low %v9189_v46, %v9190_v13  ;;  %v6559_v9 = vld [vmem:[%s7181_s30 + $0xc] sm:$0xff]  }
 0x189   : > { %v4025_v27 = vshrl.u32 %v8435_v45, 16  ;;  %v8468_v53 = vsel %vm7451_vm7, %v5602_v20, %v4471_v11  ;;  %v4473_v1 = vrot.slane %v4471_v11, 4  ;;  %v4481_v2 = vrot.slane %v9192_v33, 5  ;;  %v5591_v33 = vld [vmem:[%s7181_s30 + $0x84] sm:$0xe] }
 0x18a   : > { %v8475_v43 = vsel %vm7451_vm7, %v5603_v37, %v4478_v51  ;;  %v4480_v41 = vrot.slane %v4478_v51, 4  ;;  %v5604_v18 = vrot.slane %v5588_v50, 9  ;;  %v4485_v31 = vrot.slane %v9193_v23, 5  ;;  %v5590_v50 = vld [vmem:[%s7181_s30 + $0x78] sm:$0xe] }
 0x18b   : > { %5900 = vmatmul.mubr.msk.bf16.gmra.mrb[24].mxu1 %vm774_vm4, %v9191_v12  ;;  %6054 = vmatmul.mubr.msk.bf16.gmra.mrb[8].mxu0 %vm774_vm4, %v5555_v32  ;;  %v8481_v44 = vsel %vm7451_vm7, %v4473_v1, %v4474_v57  ;;  %v4488_v29 = vrot.slane %v9194_v25, 5  ;;  %v5605_v63 = vrot.slane %v5589_v56, 9  ;;  %v4492_v10 = vrot.slane %v9195_v52, 5  ;;  %v9197_v1 = vld [vmem:[#allocation37_spill] sm:$0xff]  ;;  %v9198_v23 = vld [vmem:[#allocation24_spill] sm:$0xff] }
 0x18c   : > { %5903 = vmatprep.mubr.msk.bf16.mxu1 %vm774_vm4, %v5207_v14  ;;  %6057 = vmatprep.mubr.msk.bf16.mxu0 %vm774_vm4, %v5556_v61  ;;  %v5619_v60 = vcombine.low %v8468_v53, %v8481_v44  ;;  %v8489_v32 = vsel %vm7451_vm7, %v4480_v41, %v4481_v2  ;;  %v8493_v14 = vsel %vm7451_vm7, %v5604_v18, %v4485_v31  ;;  %v4487_v54 = vrot.slane %v4485_v31, 4  ;;  %v8496_v61 = vld [vmem:[%s7181_s30 + $0xc4] sm:$0xf]  ;;  %v9199_v31 = vld [vmem:[#allocation23_spill] sm:$0xff] }
 0x18d   : > { %v5620_v24 = vcombine.low %v8475_v43, %v8489_v32  ;;  %v8502_v49 = vsel %vm7451_vm7, %v5605_v63, %v4492_v10  ;;  %v4494_v62 = vrot.slane %v4492_v10, 4  ;;  %v4495_v15 = vrot.slane %v9196_v21, 5  ;;  %v6560_v63 = vld [vmem:[%s7181_s30 + $0x18] sm:$0xff]  }
 0x18e   : > { %v8506_v20 = vrot.slane %v4007_v16, 5  ;;  %v8508_v11 = vrot.slane %v4012_v4, 4  ;;  %v4036_v40 = vshrl.u32 %v5543_v22, 16  ;;  %v8512_v57 = vsel %vm7451_vm7, %v4487_v54, %v4488_v29  ;;  %v5317_v4 = vld [vmem:[%s7181_s30 + $0x78] sm:$0xf]  ;;  %v9200_v54 = vld [vmem:[#allocation38_spill] sm:$0xff] }
 0x18f   : > { %v8515_v37 = vrot.slane %v3994_v39, 4  ;;  %v8517_v28 = vrot.slane %v4015_v36, 5  ;;  %v5621_v51 = vcombine.low %v8493_v14, %v8512_v57  ;;  %v8523_v16 = vsel %vm7451_vm7, %v4494_v62, %v4495_v15  ;;  %v6561_v15 = vld [vmem:[%s7181_s30 + $0x24] sm:$0xff]  }
 0x190   : > { %v8526_v56 = vrot.slane %v4004_v55, 4  ;;  %v8528_v46 = vrot.slane %v4021_v0, 5  ;;  %v4039_v13 = vshll.u32 %v5543_v22, 16  ;;  %v5622_v39 = vcombine.low %v8502_v49, %v8523_v16  ;;  %v5329_v57 = vld [vmem:[%s7181_s30 + $0xa8] sm:$0xf] }
 0x191   : > { %v8538_v36 = vrot.slane %v4025_v27, 4  ;;  %v4045_v12 = vshll.u32 %v8496_v61, 16  ;;  %v5606_v55 = vrot.slane %v5590_v50, 9  ;;  %v4499_v0 = vrot.slane %v9197_v1, 5  ;;  %v5546_v50 = vld [vmem:[%s7181_s30 + $0xcc] sm:$0xf] }
 0x192   : > { %v4038_v35 = vrot.slane %v4036_v40, 4  ;;  %v2364_v27 = vshll.u32 %v5317_v4, 16  ;;  %v4049_v2 = vshrl.u32 %v8496_v61, 16  ;;  %v4041_v22 = vrot.slane %v4039_v13, 5 }
 0x193   : > { %5904 = vmatmul.mubr.msk.bf16.gmra.mrb[28].mxu1 %vm774_vm4, %v5208_v7  ;;  %6058 = vmatmul.mubr.msk.bf16.gmra.mrb[12].mxu0 %vm774_vm4, %v8428_v17  ;;  %v4502_v7 = vrot.slane %v8310_v58, 5  ;;  %v2361_v17 = vshrl.u32 %v5317_v4, 16  ;;  %v8553_v41 = vsel %vm7451_vm7, %v5606_v55, %v4499_v0  ;;  %v4501_v18 = vrot.slane %v4499_v0, 4  ;;  %v8576_v4 = vld [vmem:[%s7181_s30 + $0xd0] sm:$0xf] }
 0x194   : > { %5909 = vmatprep.mubr.msk.bf16.mxu1 %vm774_vm4, %v6559_v9  ;;  %6061 = vmatprep.mubr.msk.bf16.mxu0 %vm774_vm4, %v8430_v38  ;;  %v2383_v38 = vsel %vm7229_vm3, %v9199_v31, %v9198_v23  ;;  %v2366_v58 = vrot.slane %v2364_v27, 5  ;;  %v5607_v29 = vrot.slane %v5591_v33, 9  ;;  %v4031_v52 = vshll.u32 %v8547_v47, 16 }
 0x195   : > { %v2363_v25 = vrot.slane %v2361_v17, 4  ;;  %v8563_v10 = vsel %vm7451_vm7, %v4501_v18, %v4502_v7  ;;  %v4506_v62 = vrot.slane %v9200_v54, 5  ;;  %v4509_v21 = vrot.slane %v8315_v19, 5  ;;  %v5592_v7 = vld [vmem:[%s7181_s30 + $0x90] sm:$0xe] }
 0x196   : > { %v4000_v9 = vsel %vm7229_vm3, %v8515_v37, %v8432_v8  ;;  %v4018_v40 = vor.u32 %v8517_v28, %v8508_v11  ;;  %v5623_v13 = vcombine.low %v8553_v41, %v8563_v10  ;;  %v8580_v1 = vrot.slane %v4045_v12, 5  ;;  %v8594_v37 = vld [vmem:[%s7181_s30 + $0xc8] sm:$0x1] }
 0x197   : > { %v2367_v55 = vor.u32 %v2366_v58, %v2363_v25  ;;  %v4051_v0 = vrot.slane %v4049_v2, 4  ;;  %v8584_v19 = vsel %vm7451_vm7, %v5607_v29, %v4506_v62  ;;  %v4508_v33 = vrot.slane %v4506_v62, 4  ;;  %v6562_v29 = vld [vmem:[%s7181_s30 + $0x30] sm:$0xff]  }
 0x198   : > { %v4010_v8 = vsel %vm7229_vm3, %v8526_v56, %v8506_v20  ;;  %v4028_v11 = vor.u32 %v8538_v36, %v8528_v46  ;;  %v4042_v28 = vor.u32 %v4041_v22, %v4038_v35  ;;  %v4060_v17 = vshrl.u32 %v5546_v50, 16  ;;  %v9201_v56 = vld [vmem:[#allocation21_spill] sm:$0xff]  ;;  %v9202_v35 = vld [vmem:[#allocation22_spill] sm:$0xff]  ;;  %v9203_v62 = vld [vmem:[#allocation40_spill] sm:$0xff] }
 0x199   : > { %v2368_v12 = vrot.slane %v2367_v55, 4  ;;  %v4063_v27 = vshll.u32 %v5546_v50, 16  ;;  %v4069_v2 = vshll.u32 %v8576_v4, 16  ;;  %v8602_v20 = vsel %vm7451_vm7, %v4508_v33, %v4509_v21 }
 0x19a   : > { %v4073_v36 = vshrl.u32 %v8576_v4, 16  ;;  %v5608_v23 = vrot.slane %v5592_v7, 9  ;;  %v4033_v31 = vrot.slane %v4031_v52, 5  ;;  %v4052_v22 = vor.u32 %v4051_v0, %v8580_v1  ;;  %v8624_v52 = vld [vmem:[%s7181_s30 + $0xd4] sm:$0x1] }
 0x19b   : > { %5910 = vmatmul.mubr.msk.bf16.vlgmr.msra.gmra.mrb[0].mxu1 %vm774_vm4, %v6560_v63  ;;  %6062 = vmatmul.mubr.msk.bf16.gmra.mrb[16].mxu0 %vm774_vm4, %v8438_v48  ;;  %v2373_v18 = vsel %vm7229_vm3, %v2368_v12, %v9202_v35  ;;  %v5624_v48 = vcombine.low %v8584_v19, %v8602_v20  ;;  %v4055_v25 = vshll.u32 %v8594_v37, 16  ;;  %v5562_v63 = vcombine.low %v4000_v9, %v4010_v8  ;;  %v6563_v12 = vld [vmem:[%s7181_s30 + $0x3c] sm:$0xff]   ;;  %v6627_v19 = vld [vmem:[%s7181_s30 + $0xc4] sm:$0xf] }
 0x19c   : > { %6112 = vmatpush3.bf16.msra.mxu1 %v9201_v56  ;;  %5913 = vmatprep.mubr.msk.bf16.mxu1 %vm774_vm4, %v6561_v15  ;;  %v8616_v58 = vcombine.low %v2373_v18, %v2383_v38  ;;  %v4019_v54 = vrot.slane %v4018_v40, 4  ;;  %v4513_v21 = vrot.slane %v9203_v62, 5  ;;  %v4516_v15 = vrot.slane %v8320_v34, 5  ;;  %v5594_v62 = vld [vmem:[%s7181_s30 + $0xa8] sm:$0xe] }
 0x19d   : > { %6065 = vmatprep.mubr.msk.bf16.mxu0 %vm774_vm4, %v8440_v3  ;;  %v4029_v50 = vrot.slane %v4028_v11, 4  ;;  %v4043_v55 = vrot.slane %v4042_v28, 4  ;;  %v4062_v33 = vrot.slane %v4060_v17, 4  ;;  %v4065_v7 = vrot.slane %v4063_v27, 5  ;;  %v5593_v3 = vld [vmem:[%s7181_s30 + $0x9c] sm:$0xe] }
 0x19e   : > { %v8626_v0 = vrot.slane %v4069_v2, 5  ;;  %v4075_v56 = vrot.slane %v4073_v36, 4  ;;  %v8630_v38 = vsel %vm7451_vm7, %v5608_v23, %v4513_v21  ;;  %v4515_v9 = vrot.slane %v4513_v21, 4  ;;  %v9204_v2 = vld [vmem:[#allocation41_spill] sm:$0xff] }
 0x19f   : > { %v4053_v40 = vrot.slane %v4052_v22, 4  ;;  %v4057_v8 = vrot.slane %v4055_v25, 5  ;;  %v4024_v34 = vsel %vm7229_vm3, %v4019_v54, %v8528_v46  ;;  %v5609_v28 = vrot.slane %v5593_v3, 9  ;;  %v5582_v23 = vld [vmem:[%s7181_s30 + $0x18] sm:$0xe] }
 0x1a0   : > { %v8637_v11 = vsel %vm7451_vm7, %v4515_v9, %v4516_v15  ;;  %v4034_v17 = vsel %vm7229_vm3, %v4029_v50, %v4033_v31  ;;  %v4079_v27 = vshll.u32 %v8624_v52, 16  ;;  %v4520_v36 = vrot.slane %v9204_v2, 5  ;;  %v6612_v25 = vld [vmem:[%s7181_s30 + $0x1c] sm:$0xf]  ;;  %v6613_v9 = vld [vmem:[%s7181_s30 + $0x20] sm:$0x1] }
 0x1a1   : > { %v5625_v46 = vcombine.low %v8630_v38, %v8637_v11  ;;  %v4066_v35 = vor.u32 %v4065_v7, %v4062_v33  ;;  %v4076_v18 = vor.u32 %v4075_v56, %v8626_v0  ;;  %v4523_v31 = vrot.slane %v8353_v42, 5 }
 0x1a2   : > { %v4058_v22 = vsel %vm7229_vm3, %v4053_v40, %v4057_v8  ;;  %v4522_v54 = vrot.slane %v4520_v36, 4  ;;  %v5563_v21 = vcombine.low %v4024_v34, %v4034_v17  ;;  %v4081_v15 = vrot.slane %v4079_v27, 5  ;;  %v5583_v17 = vld [vmem:[%s7181_s30 + $0x24] sm:$0xe] }
 0x1a3   : > { %5914 = vmatmul.mubr.msk.bf16.gmra.mrb[4].mxu1 %vm774_vm4, %v6562_v29  ;;  %6066 = vmatmul.mubr.msk.bf16.gmra.mrb[20].mxu0 %vm774_vm4, %v8455_v5  ;;  %v4048_v5 = vsel %vm7229_vm3, %v4043_v55, %v8580_v1  ;;  %v4443_v29 = vrot.slane %v6612_v25, 5  ;;  %v6564_v1 = vld [vmem:[%s7181_s30 + $0x48] sm:$0xff]   ;;  %v5598_v50 = vrot.slane %v5582_v23, 9  ;;  %v6565_v55 = vld [vmem:[%s7181_s30 + $0x54] sm:$0xff]   ;;  %v4067_v7 = vrot.slane %v4066_v35, 4 }
 0x1a4   : > { %5917 = vmatprep.mubr.msk.bf16.mxu1 %vm774_vm4, %v6563_v12  ;;  %6069 = vmatprep.mubr.msk.bf16.mxu0 %vm774_vm4, %v5562_v63  ;;  %v8661_v63 = vsel %vm7451_vm7, %v5609_v28, %v4520_v36  ;;  %v8667_v42 = vsel %vm7451_vm7, %v4522_v54, %v4523_v31  ;;  %v5564_v33 = vcombine.low %v4048_v5, %v4058_v22  ;;  %v4077_v3 = vrot.slane %v4076_v18, 4  ;;  %v6614_v36 = vld [vmem:[%s7181_s30 + $0x28] sm:$0xf]  ;;  %v5595_v35 = vld [vmem:[%s7181_s30 + $0xb4] sm:$0xe] }
 0x1a5   : > { %v5626_v12 = vcombine.low %v8661_v63, %v8667_v42  ;;  %v4445_v56 = vrot.slane %v4443_v29, 4  ;;  %v4446_v40 = vrot.slane %v6613_v9, 5  ;;  %v5610_v8 = vrot.slane %v5594_v62, 9  ;;  %v5584_v31 = vld [vmem:[%s7181_s30 + $0x30] sm:$0xe] }
 0x1a6   : > { %v4527_v34 = vrot.slane %v8361_v59, 5  ;;  %v4530_v28 = vrot.slane %v8425_v26, 5  ;;  %v4072_v59 = vsel %vm7229_vm3, %v4067_v7, %v8626_v0  ;;  %v4082_v26 = vsel %vm7229_vm3, %v4077_v3, %v4081_v15  ;;  %v6615_v22 = vld [vmem:[%s7181_s30 + $0x34] sm:$0xf]  ;;  %v9205_v15 = vld [vmem:[#allocation25_spill] sm:$0xff] }
 0x1a7   : > { %v4450_v5 = vrot.slane %v6614_v36, 5  ;;  %v4444_v18 = vsel %vm7451_vm7, %v5598_v50, %v4443_v29  ;;  %v4447_v23 = vsel %vm7451_vm7, %v4445_v56, %v4446_v40  ;;  %v4457_v25 = vrot.slane %v6615_v22, 5 }
 0x1a8   : > { %v8680_v27 = vsel %vm7451_vm7, %v5610_v8, %v4527_v34  ;;  %v4529_v2 = vrot.slane %v4527_v34, 4  ;;  %v5599_v0 = vrot.slane %v5583_v17, 9  ;;  %v5611_v29 = vrot.slane %v5595_v35, 9  ;;  %v9206_v8 = vld [vmem:[#allocation26_spill] sm:$0xff]  ;;  %v5585_v35 = vld [vmem:[%s7181_s30 + $0x3c] sm:$0xe] }
 0x1a9   : > { %v4534_v50 = vrot.slane %v8435_v45, 5  ;;  %v5615_v7 = vcombine.low %v4444_v18, %v4447_v23  ;;  %v4452_v3 = vrot.slane %v4450_v5, 4  ;;  %v5600_v56 = vrot.slane %v5584_v31, 9  ;;  %v9207_v45 = vld [vmem:[#allocation27_spill] sm:$0xff] }
 0x1aa   : > { %v8699_v54 = vsel %vm7451_vm7, %v4529_v2, %v4530_v28  ;;  %v4537_v9 = vrot.slane %v8547_v47, 5  ;;  %v4459_v40 = vrot.slane %v4457_v25, 4  ;;  %v4460_v34 = vrot.slane %v9206_v8, 5  ;;  %v5596_v2 = vld [vmem:[%s7181_s30 + $0xc0] sm:$0xe] }
 0x1ab   : > { %5918 = vmatmul.mubr.msk.bf16.gmra.mrb[8].mxu1 %vm774_vm4, %v6564_v1  ;;  %6070 = vmatmul.mubr.msk.bf16.gmra.mrb[24].mxu0 %vm774_vm4, %v5563_v21  ;;  %v5627_v62 = vcombine.low %v8680_v27, %v8699_v54  ;;  %v6566_v1 = vld [vmem:[%s7181_s30 + $0x60] sm:$0xff]   ;;  %v5565_v21 = vcombine.low %v4072_v59, %v4082_v26  ;;  %v8711_v28 = vsel %vm7451_vm7, %v5611_v29, %v4534_v50  ;;  %v4536_v17 = vrot.slane %v4534_v50, 4  ;;  %v5597_v50 = vld [vmem:[%s7181_s30 + $0xcc] sm:$0xe] }
 0x1ac   : > { %5921 = vmatprep.mubr.msk.bf16.mxu1 %vm774_vm4, %v6565_v55  ;;  %6073 = vmatprep.mubr.msk.bf16.mxu0 %vm774_vm4, %v5564_v33  ;;  %v4453_v55 = vrot.slane %v9205_v15, 5  ;;  %v6567_v33 = vld [vmem:[%s7181_s30 + $0x6c] sm:$0xff]   ;;  %v4464_v59 = vrot.slane %v9207_v45, 5  ;;  %v4451_v26 = vsel %vm7451_vm7, %v5599_v0, %v4450_v5  ;;  %v4458_v23 = vsel %vm7451_vm7, %v5600_v56, %v4457_v25  ;;  %v6568_v5 = vld [vmem:[%s7181_s30 + $0x78] sm:$0xff]  }
 0x1ad   : > { %v8719_v47 = vsel %vm7451_vm7, %v4536_v17, %v4537_v9  ;;  %v4461_v31 = vsel %vm7451_vm7, %v4459_v40, %v4460_v34  ;;  %v5612_v22 = vrot.slane %v5596_v2, 9  ;;  %v4544_v15 = vrot.slane %v8594_v37, 5  ;;  %v6616_v34 = vld [vmem:[%s7181_s30 + $0x70] sm:$0xf] }
 0x1ae   : > { %v4454_v36 = vsel %vm7451_vm7, %v4452_v3, %v4453_v55  ;;  %v5628_v18 = vcombine.low %v8711_v28, %v8719_v47  ;;  %v5601_v55 = vrot.slane %v5585_v35, 9  ;;  %v4466_v29 = vrot.slane %v4464_v59, 4  ;;  %v9208_v3 = vld [vmem:[#allocation28_spill] sm:$0xff] }
 0x1af   : > { %v5616_v0 = vcombine.low %v4451_v26, %v4454_v36  ;;  %v4467_v9 = vrot.slane %v9208_v3, 5  ;;  %v5613_v37 = vrot.slane %v5597_v50, 9  ;;  %v2346_v17 = vshll.u32 %v6616_v34, 16 }
 0x1b0   : > { %v2350_v2 = vshrl.u32 %v6616_v34, 16  ;;  %v4548_v26 = vrot.slane %v8576_v4, 5  ;;  %v4465_v36 = vsel %vm7451_vm7, %v5601_v55, %v4464_v59  ;;  %v6571_v55 = vld [vmem:[%s7181_s30 + $0x9c] sm:$0xff]   ;;  %v5323_v34 = vld [vmem:[%s7181_s30 + $0x90] sm:$0xf]  ;;  %v2514_v20 = vshll.u32 %v6627_v19, 16 }
 0x1b1   : > { %v4468_v35 = vsel %vm7451_vm7, %v4466_v29, %v4467_v9  ;;  %v5320_v29 = vld [vmem:[%s7181_s30 + $0x84] sm:$0xf]  ;;  %v2409_v44 = vshrl.u32 %v5323_v34, 16 }
 0x1b2   : > { %v4550_v4 = vrot.slane %v4548_v26, 4  ;;  %v2385_v6 = vshrl.u32 %v5320_v29, 16  ;;  %v2388_v9 = vshll.u32 %v5320_v29, 16  ;;  %v2516_v38 = vrot.slane %v2514_v20, 5 }
 0x1b3   : > { %5922 = vmatmul.mubr.msk.bf16.gmra.mrb[12].mxu1 %vm774_vm4, %v6566_v1  ;;  %6074 = vmatmul.mubr.msk.bf16.gmra.mrb[28].mxu0 %vm774_vm4, %v5565_v21  ;;  %v5314_v1 = vld [vmem:[%s7181_s30 + $0x6c] sm:$0xf]  ;;  %v4541_v21 = vrot.slane %v8496_v61, 5 }
 0x1b4   : > { %5925 = vmatprep.mubr.msk.bf16.mxu1 %vm774_vm4, %v6567_v33  ;;  %6079 = vmatprep.mubr.msk.bf16.mxu0 %vm774_vm4, %v5615_v7  ;;  %v6569_v33 = vld [vmem:[%s7181_s30 + $0x84] sm:$0xff]   ;;  %v5617_v7 = vcombine.low %v4458_v23, %v4461_v31  ;;  %v2337_v40 = vshrl.u32 %v5314_v1, 16  ;;  %v2340_v8 = vshll.u32 %v5314_v1, 16  ;;  %v4551_v23 = vrot.slane %v8624_v52, 5 }
 0x1b5   : > { %v8743_v25 = vsel %vm7451_vm7, %v5612_v22, %v4541_v21  ;;  %v4543_v56 = vrot.slane %v4541_v21, 4  ;;  %v8764_v1 = vsel %vm7451_vm7, %v5613_v37, %v4548_v26  ;;  %v6570_v21 = vld [vmem:[%s7181_s30 + $0x90] sm:$0xff]  }
 0x1b6   : > { %v2339_v31 = vrot.slane %v2337_v40, 4  ;;  %v2342_v22 = vrot.slane %v2340_v8, 5  ;;  %v8769_v59 = vsel %vm7451_vm7, %v4550_v4, %v4551_v23  ;;  %v5326_v23 = vld [vmem:[%s7181_s30 + $0x9c] sm:$0xf] }
 0x1b7   : > { %v8747_v61 = vsel %vm7451_vm7, %v4543_v56, %v4544_v15  ;;  %v5618_v15 = vcombine.low %v4465_v36, %v4468_v35  ;;  %v5630_v52 = vcombine.low %v8764_v1, %v8769_v59  ;;  %v6618_v56 = vld [vmem:[%s7181_s30 + $0x88] sm:$0xf]  ;;  %v2387_v36 = vrot.slane %v2385_v6, 4 }
 0x1b8   : > { %v5629_v45 = vcombine.low %v8743_v25, %v8747_v61  ;;  %v2343_v50 = vor.u32 %v2342_v22, %v2339_v31  ;;  %v2394_v40 = vshll.u32 %v6618_v56, 16  ;;  %v2398_v8 = vshrl.u32 %v6618_v56, 16  ;;  %v6573_v31 = vld [vmem:[%s7181_s30 + $0xb4] sm:$0xff]  }
 0x1b9   : > { %v2390_v35 = vrot.slane %v2388_v9, 5  ;;  %v2436_v29 = vshll.u32 %v5326_v23, 16 }
 0x1ba   : > { %v2344_v37 = vrot.slane %v2343_v50, 4  ;;  %v8788_v22 = vrot.slane %v2394_v40, 5  ;;  %v2400_v53 = vrot.slane %v2398_v8, 4 }
 0x1bb   : > { %5926 = vmatmul.mubr.msk.bf16.gmra.mrb[16].mxu1 %vm774_vm4, %v6568_v5  ;;  %6080 = vmatmul.mubr.msk.bf16.vlgmr.msra.gmra.mrb[0].mxu0 %vm774_vm4, %v5616_v0  ;;  %v2348_v5 = vrot.slane %v2346_v17, 5  ;;  %v2352_v0 = vrot.slane %v2350_v2, 4  ;;  %v6572_v17 = vld [vmem:[%s7181_s30 + $0xa8] sm:$0xff]   ;;  %v2391_v43 = vor.u32 %v2390_v35, %v2387_v36 }
 0x1bc   : > { %5929 = vmatprep.mubr.msk.bf16.mxu1 %vm774_vm4, %v6569_v33  ;;  %6083 = vmatprep.mubr.msk.bf16.mxu0 %vm774_vm4, %v5617_v7  ;;  %v6617_v7 = vld [vmem:[%s7181_s30 + $0x74] sm:$0x1]  ;;  %v2401_v32 = vor.u32 %v2400_v53, %v8788_v22 }
 0x1bd   : > { %v2353_v33 = vor.u32 %v2352_v0, %v2348_v5  ;;  %v2356_v3 = vshll.u32 %v6617_v7, 16  ;;  %v2349_v4 = vsel %vm7229_vm3, %v2344_v37, %v2348_v5  ;;  %v2438_v37 = vrot.slane %v2436_v29, 5  ;;  %v6624_v29 = vld [vmem:[%s7181_s30 + $0xac] sm:$0xf] }
 0x1be   : > { %v2402_v36 = vrot.slane %v2401_v32, 4 }
 0x1bf   : > { %v2354_v2 = vrot.slane %v2353_v33, 4  ;;  %v2358_v26 = vrot.slane %v2356_v3, 5  ;;  %v6620_v33 = vld [vmem:[%s7181_s30 + $0x8c] sm:$0x1]  ;;  %v6621_v3 = vld [vmem:[%s7181_s30 + $0xa0] sm:$0xf] }
 0x1c0   : > { %v2404_v7 = vshll.u32 %v6620_v33, 16  ;;  %v2442_v5 = vshll.u32 %v6621_v3, 16  ;;  %v2446_v6 = vshrl.u32 %v6621_v3, 16  ;;  %v2470_v33 = vshrl.u32 %v6624_v29, 16 }
 0x1c1   : > { %v2359_v50 = vsel %vm7229_vm3, %v2354_v2, %v2358_v26 }
 0x1c2   : > { %v2406_v2 = vrot.slane %v2404_v7, 5  ;;  %v8811_v26 = vrot.slane %v2442_v5, 5  ;;  %v2448_v14 = vrot.slane %v2446_v6, 4  ;;  %v6625_v6 = vld [vmem:[%s7181_s30 + $0xb8] sm:$0xf] }
 0x1c3   : > { %5930 = vmatmul.mubr.msk.bf16.gmra.mrb[20].mxu1 %vm774_vm4, %v6570_v21  ;;  %6084 = vmatmul.mubr.msk.bf16.gmra.mrb[4].mxu0 %vm774_vm4, %v5618_v15  ;;  %v6619_v21 = vld [vmem:[%s7181_s30 + $0x94] sm:$0xf]  ;;  %v2494_v32 = vshrl.u32 %v6625_v6, 16 }
 0x1c4   : > { %5933 = vmatprep.mubr.msk.bf16.mxu1 %vm774_vm4, %v6571_v55  ;;  %6087 = vmatprep.mubr.msk.bf16.mxu0 %vm774_vm4, %v5619_v60  ;;  %v2412_v60 = vshll.u32 %v5323_v34, 16  ;;  %v2418_v15 = vshll.u32 %v6619_v21, 16  ;;  %v2422_v0 = vshrl.u32 %v6619_v21, 16  ;;  %v2433_v55 = vshrl.u32 %v5326_v23, 16  ;;  %v6574_v34 = vld [vmem:[%s7181_s30 + $0xc0] sm:$0xff]  }
 0x1c5   : > { %v6622_v23 = vld [vmem:[%s7181_s30 + $0x98] sm:$0x1]  ;;  %v2407_v49 = vsel %vm7229_vm3, %v2402_v36, %v2406_v2 }
 0x1c6   : > { %v2414_v9 = vrot.slane %v2412_v60, 5  ;;  %v8808_v56 = vrot.slane %v2418_v15, 5  ;;  %v2424_v40 = vrot.slane %v2422_v0, 4  ;;  %v2435_v8 = vrot.slane %v2433_v55, 4  ;;  %v6623_v60 = vld [vmem:[%s7181_s30 + $0xa4] sm:$0x1] }
 0x1c7   : > { %v2452_v21 = vshll.u32 %v6623_v60, 16  ;;  %v2457_v15 = vshrl.u32 %v5329_v57, 16  ;;  %v5332_v0 = vld [vmem:[%s7181_s30 + $0xb4] sm:$0xf]  ;;  %v2460_v55 = vshll.u32 %v5329_v57, 16  ;;  %v2518_v60 = vshrl.u32 %v6627_v19, 16 }
 0x1c8   : > { %v2425_v53 = vor.u32 %v2424_v40, %v8808_v56  ;;  %v2481_v3 = vshrl.u32 %v5332_v0, 16  ;;  %v2484_v5 = vshll.u32 %v5332_v0, 16  ;;  %v5335_v57 = vld [vmem:[%s7181_s30 + $0xc0] sm:$0xf] }
 0x1c9   : > { %v2454_v41 = vrot.slane %v2452_v21, 5  ;;  %v2459_v10 = vrot.slane %v2457_v15, 4  ;;  %v2462_v40 = vrot.slane %v2460_v55, 5  ;;  %v6628_v15 = vld [vmem:[%s7181_s30 + $0xbc] sm:$0x1]  ;;  %v2520_v11 = vrot.slane %v2518_v60, 4 }
 0x1ca   : > { %v2500_v0 = vshll.u32 %v6628_v15, 16 }
 0x1cb   : > { %5934 = vmatmul.mubr.msk.bf16.gmra.mrb[24].mxu1 %vm774_vm4, %v6572_v17  ;;  %6088 = vmatmul.mubr.msk.bf16.gmra.mrb[8].mxu0 %vm774_vm4, %v5620_v24  ;;  %v2411_v24 = vrot.slane %v2409_v44, 4  ;;  %v5347_v17 = vcombine.low %v2349_v4, %v2359_v50  ;;  %v2439_v44 = vor.u32 %v2438_v37, %v2435_v8  ;;  %v2449_v4 = vor.u32 %v2448_v14, %v8811_v26 }
 0x1cc   : > { %5937 = vmatprep.mubr.msk.bf16.mxu1 %vm774_vm4, %v6573_v31  ;;  %6091 = vmatprep.mubr.msk.bf16.mxu0 %vm774_vm4, %v5621_v51  ;;  %v2392_v51 = vrot.slane %v2391_v43, 4  ;;  %v2428_v31 = vshll.u32 %v6622_v23, 16  ;;  %v2466_v50 = vshll.u32 %v6624_v29, 16  ;;  %v2490_v43 = vshll.u32 %v6625_v6, 16 }
 0x1cd   : > { %v2415_v35 = vor.u32 %v2414_v9, %v2411_v24  ;;  %v2426_v24 = vrot.slane %v2425_v53, 4  ;;  %v2440_v9 = vrot.slane %v2439_v44, 4  ;;  %v2496_v14 = vrot.slane %v2494_v32, 4  ;;  %v6626_v53 = vld [vmem:[%s7181_s30 + $0xb0] sm:$0x1] }
 0x1ce   : > { %v2397_v7 = vsel %vm7229_vm3, %v2392_v51, %v8788_v22  ;;  %v2468_v8 = vrot.slane %v2466_v50, 5  ;;  %v2472_v22 = vrot.slane %v2470_v33, 4  ;;  %v2492_v2 = vrot.slane %v2490_v43, 5  ;;  %v6629_v32 = vld [vmem:[%s7181_s30 + $0xc8] sm:$0x1]  ;;  %s6720_s30 = scalar_lea.vmem %s8989_s3, 4096 }
 0x1cf   : > { %v2416_v16 = vrot.slane %v2415_v35, 4  ;;  %v5349_v37 = vcombine.low %v2397_v7, %v2407_v49  ;;  %v2445_v35 = vsel %vm7229_vm3, %v2440_v9, %v8811_v26  ;;  %v2476_v44 = vshll.u32 %v6626_v53, 16  ;;  %p6721_p13 = scmp.ne.s32.totalorder %s8989_s3, %s6720_s30  ;;  %p6728_p11 = scmp.lt.s32.totalorder %s6726_s29, %s6720_s30 }
 0x1d0   : > { %v2508_v26 = vshll.u32 %v5335_v57, 16  ;;  %v2497_v21 = vor.u32 %v2496_v14, %v2492_v2  ;;  %v2521_v43 = vor.u32 %v2520_v11, %v2516_v38  ;;  %v8910_v14 = vld [vmem:[%s254_s4] ss:$0 sm:$0xff] }
 0x1d1   : > { %v2421_v51 = vsel %vm7229_vm3, %v2416_v16, %v8808_v56  ;;  %v2463_v56 = vor.u32 %v2462_v40, %v2459_v10  ;;  %v2478_v33 = vrot.slane %v2476_v44, 5  ;;  %p6722_p1 = pnand %p6721_p13, %p9211_p10  ;;  %p6729_p8 = por %p6728_p11, %p6727_p9 }
 0x1d2   : > { %v2510_v49 = vrot.slane %v2508_v26, 5  ;;  %v2498_v16 = vrot.slane %v2497_v21, 4  ;;  %v2522_v10 = vrot.slane %v2521_v43, 4 }
 0x1d3   : > { %5938 = vmatmul.mubr.msk.bf16.gmra.mrb[28].mxu1 %vm774_vm4, %v6574_v34  ;;  %6092 = vmatmul.mubr.msk.bf16.gmra.mrb[12].mxu0 %vm774_vm4, %v5622_v39  ;;  %v2430_v39 = vrot.slane %v2428_v31, 5  ;;  %v2483_v34 = vrot.slane %v2481_v3, 4  ;;  %v2473_v31 = vor.u32 %v2472_v22, %v2468_v8  ;;  %v2464_v29 = vrot.slane %v2463_v56, 4  ;;  %p6723_p7 = pneg %p6722_p1 }
 0x1d4   : > { %5959 = vmatprep.mubr.msk.bf16.mxu1 %vm774_vm4, %v5347_v17  ;;  %6095 = vmatprep.mubr.msk.bf16.mxu0 %vm774_vm4, %v5623_v13  ;;  %v2450_v13 = vrot.slane %v2449_v4, 4  ;;  %v2486_v17 = vrot.slane %v2484_v5, 5 }
 0x1d5   : > { %v2431_v36 = vsel %vm7229_vm3, %v2426_v24, %v2430_v39  ;;  %v2474_v50 = vrot.slane %v2473_v31, 4  ;;  %v2502_v39 = vrot.slane %v2500_v0, 5  ;;  %v2469_v3 = vsel %vm7229_vm3, %v2464_v29, %v2468_v8  ;;  %p6730_p2 = pnand %p6729_p8, %p6723_p7 }
 0x1d6   : > { %v2455_v23 = vsel %vm7229_vm3, %v2450_v13, %v2454_v41  ;;  %v5350_v4 = vcombine.low %v2421_v51, %v2431_v36  ;;  %v2524_v24 = vshll.u32 %v6629_v32, 16 }
 0x1d7   : > { %v5351_v55 = vcombine.low %v2445_v35, %v2455_v23  ;;  %v2479_v5 = vsel %vm7229_vm3, %v2474_v50, %v2478_v33  ;;  %v2503_v42 = vsel %vm7229_vm3, %v2498_v16, %v2502_v39 }
 0x1d8   : > { %v2526_v27 = vrot.slane %v2524_v24, 5 }
 0x1db   : > { %5960 = vmatmul.mubr.msk.bf16.vlgmr.msra.gmra.mrb[16].mxu1 %vm774_vm4, %v8616_v58  ;;  %6096 = vmatmul.mubr.msk.bf16.gmra.mrb[16].mxu0 %vm774_vm4, %v5624_v48  ;;  %v2505_v58 = vshrl.u32 %v5335_v57, 16  ;;  %v2487_v48 = vor.u32 %v2486_v17, %v2483_v34 }
 0x1dc   : > { %5963 = vmatprep.mubr.msk.bf16.mxu1 %vm774_vm4, %v5349_v37  ;;  %6099 = vmatprep.mubr.msk.bf16.mxu0 %vm774_vm4, %v5625_v46 }
 0x1dd   : > { %v2507_v7 = vrot.slane %v2505_v58, 4  ;;  %v2488_v46 = vrot.slane %v2487_v48, 4 }
 0x1df   : > { %v2511_v6 = vor.u32 %v2510_v49, %v2507_v7  ;;  %v2493_v63 = vsel %vm7229_vm3, %v2488_v46, %v2492_v2 }
 0x1e0   : > { %v5353_v9 = vcombine.low %v2493_v63, %v2503_v42 }
 0x1e1   : > { %v2512_v41 = vrot.slane %v2511_v6, 4 }
 0x1e3   : > { %5964 = vmatmul.mubr.msk.bf16.gmra.mrb[20].mxu1 %vm774_vm4, %v5350_v4  ;;  %6100 = vmatmul.mubr.msk.bf16.gmra.mrb[20].mxu0 %vm774_vm4, %v5626_v12  ;;  %v5352_v12 = vcombine.low %v2469_v3, %v2479_v5  ;;  %v2517_v54 = vsel %vm7229_vm3, %v2512_v41, %v2516_v38 }
 0x1e4   : > { %5967 = vmatprep.mubr.msk.bf16.mxu1 %vm774_vm4, %v5351_v55  ;;  %6103 = vmatprep.mubr.msk.bf16.mxu0 %vm774_vm4, %v5627_v62  ;;  %v2527_v62 = vsel %vm7229_vm3, %v2522_v10, %v2526_v27 }
 0x1e5   : > { %v5354_v13 = vcombine.low %v2517_v54, %v2527_v62 }
 0x1eb   : > { %5968 = vmatmul.mubr.msk.bf16.gmra.mrb[24].mxu1 %vm774_vm4, %v5352_v12  ;;  %6104 = vmatmul.mubr.msk.bf16.gmra.mrb[24].mxu0 %vm774_vm4, %v5628_v18 }
 0x1ec   : > { %5971 = vmatprep.mubr.msk.bf16.mxu1 %vm774_vm4, %v5353_v9  ;;  %6107 = vmatprep.mubr.msk.bf16.mxu0 %vm774_vm4, %v5629_v45 }
 0x1f3   : > { %5972 = vmatmul.mubr.msk.bf16.gmra.mrb[28].mxu1 %vm774_vm4, %v5354_v13  ;;  %6108 = vmatmul.mubr.msk.bf16.gmra.mrb[28].mxu0 %vm774_vm4, %v5630_v52 }
 0x26e   : > { %v5911_v28 = vpop.f32.mrb[0].mxu1 }
 0x26f   : > { %v1937_v47 = vpop.f32.mrb[1].mxu1 }
 0x270   : > { %v5912_v18 = vpop.f32.mrb[2].mxu1 }
 0x271   : > { %v1940_v25 = vpop.f32.mrb[3].mxu1 }
 0x276   : > { %v5915_v61 = vpop.f32.mrb[4].mxu1 }
 0x277   : > { %v1953_v45 = vpop.f32.mrb[5].mxu1 }
 0x278   : > { %v5916_v40 = vpop.f32.mrb[6].mxu1 }
 0x279   : > { %v1956_v30 = vpop.f32.mrb[7].mxu1 }
 0x27e   : > { %v5919_v8 = vpop.f32.mrb[8].mxu1 }
 0x27f   : > { %v1969_v22 = vpop.f32.mrb[9].mxu1 }
 0x280   : > { %v5920_v37 = vpop.f32.mrb[10].mxu1 }
 0x281   : > { %v1972_v34 = vpop.f32.mrb[11].mxu1 }
 0x286   : > { %v8899_v17 = vpop.f32.mrb[12].mxu1 }
 0x287   : > { %v8901_v1 = vpop.f32.mrb[13].mxu1 }
 0x288   : > { %v8903_v59 = vpop.f32.mrb[14].mxu1 }
 0x289   : > { %v8905_v52 = vpop.f32.mrb[15].mxu1 }
 0x28e   : > { %v6081_v2 = vpop.f32.mrb[0].mxu0 }
 0x28f   : > { %v6113_v57 = vadd.f32 %v6081_v2, %v5911_v28  ;;  %v4688_v51 = vpop.f32.mrb[1].mxu0 }
 0x290   : > { %v6114_v36 = vadd.f32 %v4688_v51, %v1937_v47  ;;  %v6082_v35 = vpop.f32.mrb[2].mxu0 }
 0x291   : > { %v4856_v23 = vadd.f32 %v6113_v57, %v8910_v14  ;;  %v6115_v56 = vadd.f32 %v6082_v35, %v5912_v18  ;;  %v4691_v31 = vpop.f32.mrb[3].mxu0 }
 0x292   : > { %v4854_v53 = vadd.f32 %v6114_v36, %v8910_v14  ;;  %v6116_v44 = vadd.f32 %v4691_v31, %v1940_v25 }
 0x293   : > { %v4888_v58 = vmax.f32 %v4856_v23, 0.0  ;;  %v4857_v26 = vadd.f32 %v6115_v56, %v8910_v14 }
 0x294   : > { %v4886_v19 = vmax.f32 %v4854_v53, 0.0  ;;  %v4855_v20 = vadd.f32 %v6116_v44, %v8910_v14 }
 0x295   : > { %4920 = vst [vmem:[%s8918_s22 + $0x10] sm:$0xff] %v4888_v58  ;;  %v4889_v60 = vmax.f32 %v4857_v26, 0.0 }
 0x296   : > { %4918 = vst [vmem:[%s8918_s22] sm:$0xff] %v4886_v19  ;;  %v4887_v48 = vmax.f32 %v4855_v20, 0.0  ;;  %v6085_v21 = vpop.f32.mrb[4].mxu0 }
 0x297   : > { %4921 = vst [vmem:[%s8918_s22 + $0x18] sm:$0xff] %v4889_v60  ;;  %v6117_v15 = vadd.f32 %v6085_v21, %v5915_v61  ;;  %v4704_v0 = vpop.f32.mrb[5].mxu0 }
 0x298   : > { %4919 = vst [vmem:[%s8918_s22 + $0x8] sm:$0xff] %v4887_v48  ;;  %v6118_v4 = vadd.f32 %v4704_v0, %v1953_v45  ;;  %v6086_v55 = vpop.f32.mrb[6].mxu0 }
 0x299   : > { %v4860_v29 = vadd.f32 %v6117_v15, %v8910_v14  ;;  %v6119_v50 = vadd.f32 %v6086_v55, %v5916_v40  ;;  %v4707_v33 = vpop.f32.mrb[7].mxu0 }
 0x29a   : > { %v4858_v7 = vadd.f32 %v6118_v4, %v8910_v14  ;;  %v6120_v49 = vadd.f32 %v4707_v33, %v1956_v30 }
 0x29b   : > { %v4892_v38 = vmax.f32 %v4860_v29, 0.0  ;;  %v4861_v11 = vadd.f32 %v6119_v50, %v8910_v14 }
 0x29c   : > { %v4890_v46 = vmax.f32 %v4858_v7, 0.0  ;;  %v4859_v16 = vadd.f32 %v6120_v49, %v8910_v14 }
 0x29d   : > { %4924 = vst [vmem:[%s8918_s22 + $0x30] sm:$0xff] %v4892_v38  ;;  %v4893_v39 = vmax.f32 %v4861_v11, 0.0 }
 0x29e   : > { %4922 = vst [vmem:[%s8918_s22 + $0x20] sm:$0xff] %v4890_v46  ;;  %v4891_v3 = vmax.f32 %v4859_v16, 0.0  ;;  %v6089_v5 = vpop.f32.mrb[8].mxu0 }
 0x29f   : > { %4925 = vst [vmem:[%s8918_s22 + $0x38] sm:$0xff] %v4893_v39  ;;  %v6121_v6 = vadd.f32 %v6089_v5, %v5919_v8  ;;  %v4720_v43 = vpop.f32.mrb[9].mxu0 }
 0x2a0   : > { %4923 = vst [vmem:[%s8918_s22 + $0x28] sm:$0xff] %v4891_v3  ;;  %v6122_v32 = vadd.f32 %v4720_v43, %v1969_v22  ;;  %v6090_v24 = vpop.f32.mrb[10].mxu0 }
 0x2a1   : > { %v4864_v63 = vadd.f32 %v6121_v6, %v8910_v14  ;;  %v6123_v42 = vadd.f32 %v6090_v24, %v5920_v37  ;;  %v4723_v12 = vpop.f32.mrb[11].mxu0 }
 0x2a2   : > { %v4862_v9 = vadd.f32 %v6122_v32, %v8910_v14  ;;  %v6124_v41 = vadd.f32 %v4723_v12, %v1972_v34 }
 0x2a3   : > { %v4896_v10 = vmax.f32 %v4864_v63, 0.0  ;;  %v4865_v27 = vadd.f32 %v6123_v42, %v8910_v14 }
 0x2a4   : > { %v4894_v54 = vmax.f32 %v4862_v9, 0.0  ;;  %v4863_v62 = vadd.f32 %v6124_v41, %v8910_v14 }
 0x2a5   : > { %4928 = vst [vmem:[%s8918_s22 + $0x50] sm:$0xff] %v4896_v10  ;;  %v4897_v13 = vmax.f32 %v4865_v27, 0.0 }
 0x2a6   : > { %4926 = vst [vmem:[%s8918_s22 + $0x40] sm:$0xff] %v4894_v54  ;;  %v4895_v28 = vmax.f32 %v4863_v62, 0.0  ;;  %v6093_v47 = vpop.f32.mrb[12].mxu0 }
 0x2a7   : > { %4929 = vst [vmem:[%s8918_s22 + $0x58] sm:$0xff] %v4897_v13  ;;  %v6125_v18 = vadd.f32 %v6093_v47, %v8899_v17  ;;  %v4736_v25 = vpop.f32.mrb[13].mxu0 }
 0x2a8   : > { %4927 = vst [vmem:[%s8918_s22 + $0x48] sm:$0xff] %v4895_v28  ;;  %v6126_v61 = vadd.f32 %v4736_v25, %v8901_v1  ;;  %v6094_v45 = vpop.f32.mrb[14].mxu0 }
 0x2a9   : > { %v4868_v40 = vadd.f32 %v6125_v18, %v8910_v14  ;;  %v6127_v30 = vadd.f32 %v6094_v45, %v8903_v59  ;;  %v4739_v8 = vpop.f32.mrb[15].mxu0 }
 0x2aa   : > { %v4866_v22 = vadd.f32 %v6126_v61, %v8910_v14  ;;  %v6128_v37 = vadd.f32 %v4739_v8, %v8905_v52 }
 0x2ab   : > { %v4900_v34 = vmax.f32 %v4868_v40, 0.0  ;;  %v4869_v17 = vadd.f32 %v6127_v30, %v8910_v14 }
 0x2ac   : > { %v4898_v2 = vmax.f32 %v4866_v22, 0.0  ;;  %v4867_v57 = vadd.f32 %v6128_v37, %v8910_v14 }
 0x2ad   : > { %4932 = vst [vmem:[%s8918_s22 + $0x70] sm:$0xff] %v4900_v34  ;;  %v4901_v1 = vmax.f32 %v4869_v17, 0.0 }
 0x2ae   : > { %4930 = vst [vmem:[%s8918_s22 + $0x60] sm:$0xff] %v4898_v2  ;;  %v4899_v51 = vmax.f32 %v4867_v57, 0.0  ;;  %v5961_v36 = vpop.f32.mrb[16].mxu1  ;;  %v6097_v35 = vpop.f32.mrb[16].mxu0 }
 0x2af   : > { %4933 = vst [vmem:[%s8918_s22 + $0x78] sm:$0xff] %v4901_v1  ;;  %v6129_v59 = vadd.f32 %v6097_v35, %v5961_v36  ;;  %v2727_v23 = vpop.f32.mrb[17].mxu1  ;;  %v4752_v56 = vpop.f32.mrb[17].mxu0 }
 0x2b0   : > { %4931 = vst [vmem:[%s8918_s22 + $0x68] sm:$0xff] %v4899_v51  ;;  %v6130_v52 = vadd.f32 %v4752_v56, %v2727_v23  ;;  %v5962_v31 = vpop.f32.mrb[18].mxu1  ;;  %v6098_v53 = vpop.f32.mrb[18].mxu0 }
 0x2b1   : > { %v4872_v44 = vadd.f32 %v6129_v59, %v8910_v14  ;;  %v6131_v58 = vadd.f32 %v6098_v53, %v5962_v31  ;;  %v2730_v26 = vpop.f32.mrb[19].mxu1  ;;  %v4755_v19 = vpop.f32.mrb[19].mxu0 }
 0x2b2   : > { %v4870_v20 = vadd.f32 %v6130_v52, %v8910_v14  ;;  %v6132_v60 = vadd.f32 %v4755_v19, %v2730_v26 }
 0x2b3   : > { %v4904_v48 = vmax.f32 %v4872_v44, 0.0  ;;  %v4873_v21 = vadd.f32 %v6131_v58, %v8910_v14 }
 0x2b4   : > { %v4902_v15 = vmax.f32 %v4870_v20, 0.0  ;;  %v4871_v0 = vadd.f32 %v6132_v60, %v8910_v14 }
 0x2b5   : > { %4936 = vst [vmem:[%s8918_s22 + $0x90] sm:$0xff] %v4904_v48  ;;  %v4905_v4 = vmax.f32 %v4873_v21, 0.0 }
 0x2b6   : > { %4934 = vst [vmem:[%s8918_s22 + $0x80] sm:$0xff] %v4902_v15  ;;  %v4903_v55 = vmax.f32 %v4871_v0, 0.0  ;;  %v5965_v29 = vpop.f32.mrb[20].mxu1  ;;  %v6101_v50 = vpop.f32.mrb[20].mxu0 }
 0x2b7   : > { %4937 = vst [vmem:[%s8918_s22 + $0x98] sm:$0xff] %v4905_v4  ;;  %v6133_v33 = vadd.f32 %v6101_v50, %v5965_v29  ;;  %v2743_v7 = vpop.f32.mrb[21].mxu1  ;;  %v4768_v49 = vpop.f32.mrb[21].mxu0 }
 0x2b8   : > { %4935 = vst [vmem:[%s8918_s22 + $0x88] sm:$0xff] %v4903_v55  ;;  %v6134_v38 = vadd.f32 %v4768_v49, %v2743_v7  ;;  %v5966_v11 = vpop.f32.mrb[22].mxu1  ;;  %v6102_v46 = vpop.f32.mrb[22].mxu0 }
 0x2b9   : > { %v4876_v16 = vadd.f32 %v6133_v33, %v8910_v14  ;;  %v6135_v39 = vadd.f32 %v6102_v46, %v5966_v11  ;;  %v2746_v3 = vpop.f32.mrb[23].mxu1  ;;  %v4771_v5 = vpop.f32.mrb[23].mxu0 }
 0x2ba   : > { %v4874_v6 = vadd.f32 %v6134_v38, %v8910_v14  ;;  %v6136_v43 = vadd.f32 %v4771_v5, %v2746_v3 }
 0x2bb   : > { %v4908_v32 = vmax.f32 %v4876_v16, 0.0  ;;  %v4877_v24 = vadd.f32 %v6135_v39, %v8910_v14 }
 0x2bc   : > { %v4906_v63 = vmax.f32 %v4874_v6, 0.0  ;;  %v4875_v42 = vadd.f32 %v6136_v43, %v8910_v14 }
 0x2bd   : > { %4940 = vst [vmem:[%s8918_s22 + $0xb0] sm:$0xff] %v4908_v32  ;;  %v4909_v12 = vmax.f32 %v4877_v24, 0.0 }
 0x2be   : > { %4938 = vst [vmem:[%s8918_s22 + $0xa0] sm:$0xff] %v4906_v63  ;;  %v4907_v9 = vmax.f32 %v4875_v42, 0.0  ;;  %v5969_v41 = vpop.f32.mrb[24].mxu1  ;;  %v6105_v10 = vpop.f32.mrb[24].mxu0 }
 0x2bf   : > { %4941 = vst [vmem:[%s8918_s22 + $0xb8] sm:$0xff] %v4909_v12  ;;  %v6137_v27 = vadd.f32 %v6105_v10, %v5969_v41  ;;  %v2759_v54 = vpop.f32.mrb[25].mxu1  ;;  %v4784_v62 = vpop.f32.mrb[25].mxu0 }
 0x2c0   : > { %4939 = vst [vmem:[%s8918_s22 + $0xa8] sm:$0xff] %v4907_v9  ;;  %v6138_v13 = vadd.f32 %v4784_v62, %v2759_v54  ;;  %v5970_v28 = vpop.f32.mrb[26].mxu1  ;;  %v6106_v47 = vpop.f32.mrb[26].mxu0 }
 0x2c1   : > { %v4880_v18 = vadd.f32 %v6137_v27, %v8910_v14  ;;  %v6139_v25 = vadd.f32 %v6106_v47, %v5970_v28  ;;  %v2762_v61 = vpop.f32.mrb[27].mxu1  ;;  %v4787_v45 = vpop.f32.mrb[27].mxu0 }
 0x2c2   : > { %v4878_v40 = vadd.f32 %v6138_v13, %v8910_v14  ;;  %v6140_v30 = vadd.f32 %v4787_v45, %v2762_v61 }
 0x2c3   : > { %v4912_v8 = vmax.f32 %v4880_v18, 0.0  ;;  %v4881_v22 = vadd.f32 %v6139_v25, %v8910_v14 }
 0x2c4   : > { %v4910_v37 = vmax.f32 %v4878_v40, 0.0  ;;  %v4879_v34 = vadd.f32 %v6140_v30, %v8910_v14 }
 0x2c5   : > { %4944 = vst [vmem:[%s8918_s22 + $0xd0] sm:$0xff] %v4912_v8  ;;  %v4913_v17 = vmax.f32 %v4881_v22, 0.0 }
 0x2c6   : > { %4942 = vst [vmem:[%s8918_s22 + $0xc0] sm:$0xff] %v4910_v37  ;;  %v4911_v2 = vmax.f32 %v4879_v34, 0.0  ;;  %v5973_v57 = vpop.f32.mrb[28].mxu1  ;;  %v6109_v1 = vpop.f32.mrb[28].mxu0 }
 0x2c7   : > { %4945 = vst [vmem:[%s8918_s22 + $0xd8] sm:$0xff] %v4913_v17  ;;  %v6141_v51 = vadd.f32 %v6109_v1, %v5973_v57  ;;  %v2775_v36 = vpop.f32.mrb[29].mxu1  ;;  %v4800_v35 = vpop.f32.mrb[29].mxu0 }
 0x2c8   : > { %4943 = vst [vmem:[%s8918_s22 + $0xc8] sm:$0xff] %v4911_v2  ;;  %v6142_v59 = vadd.f32 %v4800_v35, %v2775_v36  ;;  %v5974_v23 = vpop.f32.mrb[30].mxu1  ;;  %v6110_v56 = vpop.f32.mrb[30].mxu0 }
 0x2c9   : > { %v4884_v52 = vadd.f32 %v6141_v51, %v8910_v14  ;;  %v6143_v31 = vadd.f32 %v6110_v56, %v5974_v23  ;;  %v2778_v53 = vpop.f32.mrb[31].mxu1  ;;  %v4803_v44 = vpop.f32.mrb[31].mxu0 }
 0x2ca   : > { %v4882_v58 = vadd.f32 %v6142_v59, %v8910_v14  ;;  %v6144_v26 = vadd.f32 %v4803_v44, %v2778_v53 }
 0x2cb   : > { %v4916_v19 = vmax.f32 %v4884_v52, 0.0  ;;  %v4885_v20 = vadd.f32 %v6143_v31, %v8910_v14 }
 0x2cc   : > { %v4914_v60 = vmax.f32 %v4882_v58, 0.0  ;;  %v4883_v48 = vadd.f32 %v6144_v26, %v8910_v14 }
 0x2cd   : > { %4948 = vst [vmem:[%s8918_s22 + $0xf0] sm:$0xff] %v4916_v19  ;;  %v4917_v21 = vmax.f32 %v4885_v20, 0.0 }
 0x2ce   : > { %4946 = vst [vmem:[%s8918_s22 + $0xe0] sm:$0xff] %v4914_v60  ;;  %v4915_v15 = vmax.f32 %v4883_v48, 0.0 }
 0x2cf   : > { %4949 = vst [vmem:[%s8918_s22 + $0xf8] sm:$0xff] %v4917_v21 }
 0x2d0   : > { %4947 = vst [vmem:[%s8918_s22 + $0xe8] sm:$0xff] %v4915_v15 }
 0x2d1   : > { %6733 = shalt.err (!%p6730_p2)
}
 0x2d2   : > { %s6734_s5 = scalar_lea.hbm %s8986_s14, 4096  ;;  %s6738_s4 = scalar_lea.hbm %s9210_s8, 24576 }
 0x2d3   : > { %p6735_p12 = scmp.ne.s32.totalorder %s8986_s14, %s6734_s5  ;;  %p6739_p3 = scmp.lt.u32.totalorder %s8986_s14, %s9210_s8 }
 0x2d4   : > { %p6740_p4 = scmp.lt.u32.totalorder %s6738_s4, %s6734_s5  ;;  %p6742_p13 = scmp.lt.u32.totalorder %s6734_s5, %s8986_s14 }
 0x2d5   : > { %p6736_p0 = pnand %p6735_p12, %p9211_p10 }
 0x2d6   : > { %p6741_p5 = por %p6740_p4, %p6739_p3 }
 0x2d7   : > { %p6737_p6 = pneg %p6736_p0 }
 0x2d8   : > { %p6743_p1 = por %p6742_p13, %p6741_p5 }
 0x2da   : > { %p6744_p7 = pnand %p6743_p1, %p6737_p6 }
 0x2dc   : > { %6747 = shalt.err (!%p6744_p7)
}
 0x2dd   : > { %s6879_s20 = smov 128   ;;  %s6880_s26 = smov 384  }
 0x2de   : > { %s6881_s6 = smov 8  }
 0x2df   : > { %6391 = dma.vmem_to_hbm [thread:$0]  (%p9211_p10), %s8989_s3, 4096, %s8986_s14, %s8996_s23, %s6879_s20, %s6880_s26, %s6881_s6  }
 0x2e0 PF: > { %p6408_p9 = scmp.ge.s32.totalorder %s6870_s25, 2  ;;  %s4983_s21 = sand.u32 1, %s6818_s12  }
 0x2e1   : > { %p9212_p11 = scmp.ne.s32.totalorder %s9131_s28, 0  ;;  %s4984_s11 = scalar_lea.sflag [#allocation4], %s4983_s21 }
 0x2e3   : > { %p6404_p8 = pnand %p6408_p9, %p9212_p11 }
 0x2e5   : > { %6813 = dma.done.wait (!%p6404_p8), %s4984_s11, 4096  }
 0x2e6   : > { %6815 = vsyncadd (!%p6404_p8), %s4984_s11, 4294963200  ;;  %s22_s25 = sadd.s32 1, %s6870_s25   ;;  %s9214_s15 = sld [smem:[#allocation12_spill]] }
 0x2e7   : > { %p9025_p2 = scmp.ge.s32.totalorder %s22_s25, 8   ;;  %s9215_s14 = sld [smem:[#allocation20_spill]] }
 0x2e8   : > { %s9216_s3 = sld [smem:[#allocation19_spill]]  ;;  %s9217_s23 = sld [smem:[#allocation13_spill]] }
 0x2e9   : > { %s9218_s20 = sld [smem:[#allocation18_spill]]  ;;  %s9219_s21 = sld [smem:[#allocation15_spill]] }
 0x2ea   : > { %s9220_s28 = sld [smem:[#allocation16_spill]]  ;;  %s9221_s30 = sld [smem:[#allocation17_spill]] }
 0x2eb   : > { %s9223_s12 = smov %s6822_s13  ;;  %s9228_s18 = smov %s6846_s19 }
 0x2ec   : > { %s9224_s13 = smov %s9214_s15  ;;  %s9225_s15 = smov %s6834_s16 }
 0x2ed   : > { %s9226_s16 = smov %s6838_s17  ;;  %s9230_s22 = smov %s6866_s24 }
 0x2ee   : > { %s9227_s17 = smov %s9216_s3  ;;  %s9229_s19 = smov %s9217_s23 }
 0x2ef   :  { %21 = sbr.rel (!%p9025_p2) target bundleno = 15 (0xf), region = 111 }
 0x2f0   : > { %s9231_s23 = smov %s9220_s28  ;;  %s9232_s24 = smov %s9221_s30 }
 0x2f6   :  { %4989 = vsyncpa [#allocation3], 1 }
 0x2f7   :  { %4991 = vsyncpa [#allocation3 + $0x1], 1 }
 0x2f8   :  { %4992 = vsyncpa [#allocation6], 1 }
 0x2f9   :  { %4994 = vsyncpa [#allocation6 + $0x1], 1 }
 0x2fa   :  { %4995 = vsyncpa [#allocation4], 1 }
 0x2fb   :  { %4997 = vsyncpa [#allocation4 + $0x1], 1 }

// kernel: _hwconv2d_forward.1
= control target key start
LH: loop header
LB: loop body
LE: loop exit
PB: predicated region body
PF: predicated region fallthrough
CT: control target
= control target key end

     0   :  { %s9072_s0 = inlined_call_operand.hbm [shape: bf16[2,1,18,18,8], index: 0, kind: input, shape index: {}]   ;;  %s9073_s1 = inlined_call_operand.hbm [shape: bf16[3,3,8,384], index: 1, kind: input, shape index: {}]   ;;  %s9074_s2 = inlined_call_operand.hbm [shape: f32[1,384], index: 2, kind: input, shape index: {}]   ;;  %s9075_s3 = inlined_call_operand.hbm [shape: f32[2,256,384], index: 3, kind: output, shape index: {}]  }
   0x1   :  { %9110 = sst [smem:[#allocation42_spill]] %s9073_s1 }
   0x2   :  { %9111 = sst [smem:[#allocation43_spill]] %s9075_s3 }
   0x3   :  { %8 = vsyncpa [#allocation3], 0 }
   0x4   :  { %10 = vsyncpa [#allocation3 + $0x1], 0 }
   0x5   :  { %11 = vsyncpa [#allocation6], 0 }
   0x6   :  { %13 = vsyncpa [#allocation6 + $0x1], 0 }
   0x7   :  { %14 = vsyncpa [#allocation4], 0 }
   0x8   :  { %16 = vsyncpa [#allocation4 + $0x1], 0  ;;  %s6902_s12 = smov 0   ;;  %s6904_s13 = smov 0  }
   0x9   :  { %s6906_s14 = smov 0   ;;  %s6908_s15 = smov 0  }
   0xa   :  { %s6910_s16 = smov 0   ;;  %s6912_s17 = smov 0  }
   0xb   :  { %s6914_s18 = smov 0   ;;  %s6916_s19 = smov 0  }
   0xc   :  { %s6918_s20 = smov 0   ;;  %s6920_s21 = smov 0  }
   0xd   :  { %s6922_s22 = smov 0   ;;  %s6924_s23 = smov 0  }
   0xe   :  { %s6926_s24 = smov 0   ;;  %s6928_s25 = smov 0  }
   0xf LB: > { %9112 = sst [smem:[#allocation12_spill]] %s6826_s14  ;;  %p9078_p0 = scmp.eq.s32.totalorder %s6870_s25, 0  ;;  %s6870_s25 = sphi %s6928_s25, %s22_s25   ;;  %s6866_s24 = sphi %s6926_s24, %s9232_s24   ;;  %s6862_s23 = sphi %s6924_s23, %s9231_s23   ;;  %s6858_s22 = sphi %s6922_s22, %s9230_s22   ;;  %s6854_s21 = sphi %s6920_s21, %s9219_s21   ;;  %s6850_s20 = sphi %s6918_s20, %s9218_s20   ;;  %s6846_s19 = sphi %s6916_s19, %s9229_s19   ;;  %s6842_s18 = sphi %s6914_s18, %s9228_s18   ;;  %s6838_s17 = sphi %s6912_s17, %s9227_s17   ;;  %s6834_s16 = sphi %s6910_s16, %s9226_s16   ;;  %s6830_s15 = sphi %s6908_s15, %s9225_s15   ;;  %s6826_s14 = sphi %s6906_s14, %s9215_s14   ;;  %s6822_s13 = sphi %s6904_s13, %s9224_s13   ;;  %s6818_s12 = sphi %s6902_s12, %s9223_s12  }
  0x10   : > { %9113 = sst [smem:[#allocation13_spill]] %s6850_s20  ;;  %p83_p1 = scmp.ne.s32.totalorder %s6838_s17, %s6834_s16 }
  0x11   : > { %9114 = sst [smem:[#allocation14_spill]] %s6858_s22  ;;  %p9077_p3 = scmp.lt.s32.totalorder %s6870_s25, 6 }
  0x12   : > { %9115 = sst [smem:[#allocation15_spill]] %s6862_s23  ;;  %p85_p4 = por %p83_p1, %p9078_p0 }
  0x13   : > { %s192_s27 = sand.u32 1, %s6870_s25   ;;  %s9076_s28 = sand.u32 1, %s6838_s17  }
  0x14   : > { %s6381_s29 = smul.u32 36, %s9076_s28  ;;  %s5107_s30 = sshll.u32 %s6866_s24, 6 }
  0x15   : > { %s9116_s1 = sld [smem:[#allocation42_spill]]  ;;  %p6993_p5 = pnand %p9077_p3, %p85_p4 }
  0x16   : > { %s196_s8 = scalar_lea.vmem [#allocation5], %s6381_s29  ;;  %p5109_p6 = scmp.ge.s32.totalorder %s6870_s25, 1 }
  0x17   : > { %s202_s9 = sshll.u32 %s196_s8, 4  ;;  %s7000_s10 = scalar_lea.sflag [#allocation6], %s192_s27  ;;  %s6997_s9 = int_to_ptr.vmem [resolvable:$true] %s202_s9 }
  0x18   : > { %p9083_p8 = pneg %p6993_p5 }
  0x1b   : > { %s6989_s6 = scalar_lea.hbm %s9116_s1, %s5107_s30  ;;  %s6635_s5 = scalar_lea.hbm %s9116_s1, 1728 }
  0x1c   : > { %s6630_s11 = scalar_lea.hbm %s6989_s6, 576  ;;  %p6636_p11 = scmp.lt.u32.totalorder %s6989_s6, %s9116_s1 }
  0x1d   : > { %p6631_p7 = scmp.ne.s32.totalorder %s6989_s6, %s6630_s11  ;;  %p6637_p12 = scmp.lt.u32.totalorder %s6635_s5, %s6630_s11 }
  0x1e   : > { %p6639_p1 = scmp.lt.u32.totalorder %s6630_s11, %s6989_s6 }
  0x1f   : > { %p6633_p9 = pnand %p9083_p8, %p6631_p7  ;;  %p6638_p13 = por %p6637_p12, %p6636_p11 }
  0x21   : > { %p6634_p10 = pneg %p6633_p9  ;;  %p6640_p4 = por %p6639_p1, %p6638_p13 }
  0x23   : > { %p6641_p3 = pnand %p6640_p4, %p6634_p10 }
  0x25   : > { %6644 = shalt.err (!%p6641_p3)
}
  0x26   : > { %s6645_s27 = scalar_lea.vmem %s6997_s9, 576  ;;  %s6872_s8 = smov [#allocation5]  }
  0x27   : > { %p6646_p7 = scmp.ne.s32.totalorder %s6997_s9, %s6645_s27  ;;  %s6650_s30 = sshll.u32 %s6872_s8, 4  ;;  %s6651_s30 = int_to_ptr.vmem [resolvable:$false] %s6650_s30 }
  0x28   : > { %s6652_s28 = scalar_lea.vmem %s6651_s30, 1152  ;;  %p6653_p0 = scmp.lt.s32.totalorder %s6997_s9, %s6651_s30 }
  0x29   : > { %p6648_p9 = pnand %p6646_p7, %p9083_p8  ;;  %p6654_p11 = scmp.lt.s32.totalorder %s6652_s28, %s6645_s27 }
  0x2b   : > { %p6649_p2 = pneg %p6648_p9  ;;  %p6655_p12 = por %p6654_p11, %p6653_p0 }
  0x2d   : > { %p6656_p13 = pnand %p6655_p12, %p6649_p2 }
  0x2f   : > { %6659 = shalt.err (!%p6656_p13)
}
  0x30   : > { %s6873_s11 = smov 192   ;;  %s9079_s4 = smov 64  }
  0x31   : > { %s9080_s5 = smov 4   ;;  %p227_p0 = scmp.lt.s32.totalorder %s6870_s25, 7 }
  0x32   : > { %6399 = dma.hbm_to_vmem [thread:$0]  (!%p6993_p5), %s6989_s6, 576, %s6997_s9, %s7000_s10, %s6873_s11, %s9079_s4, %s9080_s5  }
  0x33   : > { %p7033_p2 = pnand %p5109_p6, %p227_p0  ;;  %s7038_s27 = sadd.s32 4294967295, %s6870_s25  }
  0x34   : > { %s5103_s8 = sadd.s32 4294967294, %s6870_s25   ;;  %s37_s30 = sadd.s32 1, %s6862_s23 }
  0x35   : > { %s9118_s29 = scalar_select %p7033_p2, 1, 0 }
  0x36   : > { %s41_s28 = sadd.s32 1, %s6866_s24  ;;  %p39_p3 = scmp.ge.s32.totalorder %s37_s30, 2 }
  0x37   : > { %s50_s26 = sadd.s32 1, %s6850_s20  ;;  %p57_p10 = scmp.ne.s32.totalorder %s6850_s20, %s6846_s19 }
  0x38   : > { %p63_p1 = scmp.ne.s32.totalorder %s6846_s19, %s6842_s18  ;;  %s9234_s30 = smov (%p39_p3, %s37_s30), 0 }
  0x39   : > { %9119 = sst [smem:[#allocation16_spill]] %s9234_s30  ;;  %s9236_s28 = smov (!%p39_p3, %s41_s28), %s6866_s24 }
  0x3a   : > { %s45_s6 = ssub.s32 %s6862_s23, %s9234_s30  ;;  %p9120_p6 = scmp.eq.s32.totalorder %s6870_s25, 0 }
  0x3b   : > { %p43_p7 = scmp.ge.s32.totalorder %s9236_s28, 3  ;;  %p48_p9 = scmp.eq.s32.totalorder %s45_s6, 0 }
  0x3c   : > { %p7055_p4 = por %p9120_p6, %p57_p10  ;;  %p64_p11 = scmp.eq.s32.totalorder %s7038_s27, 0 }
  0x3d   : > { %s132_s18 = sadd.s32 1, %s6826_s14  ;;  %s9238_s28 = smov (%p43_p7, %s9236_s28), 0 }
  0x3e   : > { %9122 = sst [smem:[#allocation17_spill]] %s9238_s28  ;;  %p7066_p12 = por %p64_p11, %p63_p1 }
  0x3f   : > { %s7064_s11 = scalar_select %p48_p9, %s6850_s20, %s50_s26  }
  0x40   : > { %s9124_s4 = scalar_select %p7066_p12, 1, 0 }
  0x41   : > { %9123 = sst [smem:[#allocation18_spill]] %s7064_s11  ;;  %s73_s5 = ssub.s32 %s6866_s24, %s9238_s28 }
  0x42   : > { %p74_p13 = scmp.eq.s32.totalorder %s73_s5, 0  ;;  %p9125_p0 = scmp.ne.s32.totalorder %s6834_s16, %s6830_s15 }
  0x43   : > { %s129_s30 = sor.u32 %s73_s5, %s45_s6  ;;  %p142_p10 = scmp.ne.s32.totalorder %s6826_s14, %s6822_s13 }
  0x44   : > { %p7075_p3 = por %p9125_p0, %p64_p11  ;;  %s9127_s3 = sadd.s32 1, %s6838_s17 }
  0x45   : > { %s7084_s22 = scalar_select %p74_p13, %s6838_s17, %s9127_s3  }
  0x46   : > { %s9126_s1 = scalar_select %p7075_p3, 1, 0 }
  0x47   : > { %9128 = sst [smem:[#allocation19_spill]] %s7084_s22  ;;  %p130_p6 = scmp.eq.s32.totalorder %s129_s30, 0 }
  0x48   : > { %p143_p1 = scmp.eq.s32.totalorder %s7038_s27, 5  ;;  %p148_p7 = scmp.ne.s32.totalorder %s6822_s13, %s6818_s12 }
  0x49   : > { %p149_p9 = scmp.eq.s32.totalorder %s5103_s8, 5  ;;  %s169_s5 = sand.u32 1, %s6850_s20  }
  0x4a   : > { %s7090_s26 = scalar_select %p130_p6, %s6826_s14, %s132_s18  }
  0x4b   : > { %p7092_p8 = por %p143_p1, %p142_p10  ;;  %p7096_p11 = por %p149_p9, %p148_p7 }
  0x4c   : > { %9129 = sst [smem:[#allocation20_spill]] %s7090_s26  ;;  %s6380_s6 = smul.u32 3456, %s6862_s23 }
  0x4d   : > { %s9130_s15 = scalar_select %p7092_p8, 1, 0 }
  0x4e   : > { %s9131_s28 = scalar_select %p7096_p11, 1, 0 }
  0x4f   : > { %s6379_s11 = smul.u32 216, %s169_s5  ;;  %s7105_s30 = scalar_lea.hbm %s9072_s0, %s6380_s6 }
  0x50   : > { %p9132_p13 = scmp.lt.s32.totalorder %s6870_s25, 6  ;;  %s5108_s20 = sshll.u32 %s6866_s24, 4 }
  0x51   : > { %s173_s18 = scalar_lea.vmem [#allocation2], %s6379_s11  ;;  %s7118_s22 = scalar_lea.sflag [#allocation3], %s169_s5 }
  0x52   : > { %p7111_p0 = pnand %p9132_p13, %p7055_p4  ;;  %s182_s23 = sshll.u32 %s173_s18, 4  ;;  %s7115_s23 = int_to_ptr.vmem [resolvable:$true] %s182_s23 }
  0x53   : > { %s6660_s6 = scalar_lea.hbm %s7105_s30, 3456  ;;  %s6665_s26 = scalar_lea.hbm %s9072_s0, 6912 }
  0x54   : > { %p6661_p10 = scmp.ne.s32.totalorder %s7105_s30, %s6660_s6  ;;  %p6662_p6 = pneg %p7111_p0 }
  0x55   : > { %p6666_p7 = scmp.lt.u32.totalorder %s7105_s30, %s9072_s0  ;;  %p6667_p9 = scmp.lt.u32.totalorder %s6665_s26, %s6660_s6 }
  0x56   : > { %p6663_p1 = pnand %p6662_p6, %p6661_p10  ;;  %p6669_p11 = scmp.lt.u32.totalorder %s6660_s6, %s7105_s30 }
  0x57   : > { %p6668_p13 = por %p6667_p9, %p6666_p7 }
  0x58   : > { %p6664_p4 = pneg %p6663_p1 }
  0x59   : > { %p6670_p8 = por %p6669_p11, %p6668_p13 }
  0x5b   : > { %p6671_p3 = pnand %p6670_p8, %p6664_p4 }
  0x5d   : > { %6674 = shalt.err (!%p6671_p3)
}
  0x5e   : > { %s6675_s5 = scalar_lea.vmem %s7115_s23, 3456  ;;  %s6876_s18 = smov [#allocation2]  }
  0x5f   : > { %p6676_p10 = scmp.ne.s32.totalorder %s7115_s23, %s6675_s5  ;;  %s6680_s9 = sshll.u32 %s6876_s18, 4  ;;  %s6681_s9 = int_to_ptr.vmem [resolvable:$false] %s6680_s9 }
  0x60   : > { %s6682_s14 = scalar_lea.vmem %s6681_s9, 6912  ;;  %p6683_p2 = scmp.lt.s32.totalorder %s7115_s23, %s6681_s9 }
  0x61   : > { %p6678_p1 = pnand %p6676_p10, %p6662_p6  ;;  %p6684_p7 = scmp.lt.s32.totalorder %s6682_s14, %s6675_s5 }
  0x63   : > { %p6679_p12 = pneg %p6678_p1  ;;  %p6685_p9 = por %p6684_p7, %p6683_p2 }
  0x65   : > { %p6686_p11 = pnand %p6685_p9, %p6679_p12 }
  0x67   : > { %6689 = shalt.err (!%p6686_p11)
}
  0x68   : > { %s9134_s26 = smov 4   ;;  %s9135_s6 = smov 64  }
  0x69   : > { %6396 = dma.hbm_to_vmem [thread:$0]  (!%p7111_p0), %s7105_s30, 3456, %s7115_s23, %s7118_s22, %s9135_s6, %s9135_s6, %s9134_s26  }
  0x6a   : > { %s7154_s5 = scalar_lea.hbm %s9074_s2, %s5108_s20  ;;  %s9136_s18 = sand.u32 1, %s6838_s17  }
  0x6b   : > { %s215_s8 = scalar_lea.vmem [#allocation7], %s9136_s18  ;;  %s6690_s14 = scalar_lea.hbm %s7154_s5, 16 }
  0x6c   : > { %s222_s9 = sshll.u32 %s215_s8, 4  ;;  %p6691_p8 = scmp.ne.s32.totalorder %s7154_s5, %s6690_s14  ;;  %s223_s9 = int_to_ptr.vmem [resolvable:$true] %s222_s9 }
  0x6d   : > { %p9137_p2 = pneg %p6993_p5  ;;  %s6695_s22 = scalar_lea.hbm %s9074_s2, 48 }
  0x6e   : > { %p6696_p0 = scmp.lt.u32.totalorder %s7154_s5, %s9074_s2  ;;  %p6697_p6 = scmp.lt.u32.totalorder %s6695_s22, %s6690_s14 }
  0x6f   : > { %p6693_p12 = pnand %p6691_p8, %p9137_p2  ;;  %p6699_p13 = scmp.lt.u32.totalorder %s6690_s14, %s7154_s5 }
  0x70   : > { %p6698_p4 = por %p6697_p6, %p6696_p0 }
  0x71   : > { %p6694_p3 = pneg %p6693_p12 }
  0x72   : > { %p6700_p10 = por %p6699_p13, %p6698_p4 }
  0x74   : > { %p6701_p1 = pnand %p6700_p10, %p6694_p3 }
  0x76   : > { %6704 = shalt.err (!%p6701_p1)
}
  0x77   : > { %s6705_s6 = scalar_lea.vmem %s223_s9, 16  ;;  %p9138_p9 = pmov %p9137_p2 }
  0x78   : > { %p6706_p7 = scmp.ne.s32.totalorder %s223_s9, %s6705_s6  ;;  %s6877_s3 = smov [#allocation7]  }
  0x79   : > { %s6710_s11 = sshll.u32 %s6877_s3, 4  ;;  %s6711_s11 = int_to_ptr.vmem [resolvable:$false] %s6710_s11 }
  0x7a   : > { %p6708_p11 = pnand %p6706_p7, %p9138_p9  ;;  %s6712_s18 = scalar_lea.vmem %s6711_s11, 32 }
  0x7b   : > { %p6713_p2 = scmp.lt.s32.totalorder %s223_s9, %s6711_s11  ;;  %p6714_p12 = scmp.lt.s32.totalorder %s6712_s18, %s6705_s6 }
  0x7c   : > { %p6709_p8 = pneg %p6708_p11 }
  0x7d   : > { %p6715_p0 = por %p6714_p12, %p6713_p2 }
  0x7f   : > { %p6716_p6 = pnand %p6715_p0, %p6709_p8 }
  0x81   : > { %6719 = shalt.err (!%p6716_p6)
}
  0x82   : > { %6402 = dma.hbm_to_vmem [thread:$0]  (!%p6993_p5), %s7154_s5, 16, %s223_s9, %s7000_s10  }
  0x83   : > { %p9139_p3 = scmp.ne.s32.totalorder %s9118_s29, 0 }
  0x85   : > { %231 = sbr.rel (%p9139_p3) target bundleno = 736 (0x2e0), region = 32 }
  0x8c   : > { %s233_s8 = sand.u32 1, %s6846_s19   ;;  %p9140_p4 = scmp.ne.s32.totalorder %s9124_s4, 0 }
  0x8d   : > { %s6382_s14 = smul.u32 216, %s233_s8  ;;  %s234_s23 = scalar_lea.sflag [#allocation3], %s233_s8 }
  0x8f   : > { %s7181_s30 = scalar_lea.vmem [#allocation2], %s6382_s14 }
  0x90   : > { %6805 = dma.done.wait (%p9140_p4), %s234_s23, 3456  }
  0x91   : > { %6807 = vsyncadd (%p9140_p4), %s234_s23, 4294963840  ;;  %s242_s7 = sand.u32 1, %s7038_s27   ;;  %s244_s10 = sand.u32 1, %s6834_s16  }
  0x92   : > { %s6383_s29 = smul.u32 36, %s244_s10  ;;  %s243_s5 = scalar_lea.sflag [#allocation6], %s242_s7 }
  0x93   : > { %p9141_p5 = scmp.ne.s32.totalorder %s9126_s1, 0 }
  0x94   : > { %s7191_s9 = scalar_lea.vmem [#allocation5], %s6383_s29 }
  0x95   : > { %6809 = dma.done.wait (%p9141_p5), %s243_s5, 592  }
  0x96   : > { %6811 = vsyncadd (%p9141_p5), %s243_s5, 4294966704  ;;  %vm823_vm0 = vcmask 1043456   ;;  %vm337_vm1 = vsmask.f32 3328  ;;  %vm338_vm2 = vsmask.f32 7440 }
  0x97   : > { %v5111_v0 = vld [vmem:[%s7191_s9 + $0x4] sm:$0xf]  ;;  %v5338_v1 = vld [vmem:[%s7191_s9 + $0x10] sm:$0xf]  ;;  %v289_v5 = vld [vmem:[%s7181_s30 + $0x4] sm:$0xf] }
  0x98   : > { %v288_v2 = vld [vmem:[%s7181_s30] sm:$0xf]  ;;  %6369 = vmatprep.subr.msk.bf16.mxu1 %vm823_vm0, %v5111_v0  ;;  %6373 = vmatprep.subr.msk.bf16.mxu0 %vm823_vm0, %v5338_v1  ;;  %v825_v3 = vsel %vm823_vm0, %v5111_v0, 0  ;;  %v7204_v4 = vsel %vm823_vm0, %v5338_v1, 0  ;;  %v321_v6 = vld [vmem:[%s7181_s30 + $0x8] sm:$0x1]  ;;  %vm7229_vm3 = vmor %vm337_vm1, %vm338_vm2 }
  0x99   : > { %9142 = vst [vmem:[#allocation21_spill] sm:$0xff] %v7204_v4  ;;  %5806 = vmatpush3.bf16.msra.mxu1 %v825_v3  ;;  %5942 = vmatpush3.bf16.msra.mxu0 %v7204_v4  ;;  %v341_v7 = vshrl.u32 %v288_v2, 16  ;;  %v344_v8 = vshll.u32 %v288_v2, 16  ;;  %v350_v9 = vshll.u32 %v289_v5, 16  ;;  %v354_v10 = vshrl.u32 %v289_v5, 16  ;;  %s283_s1 = sand.u32 1, %s6822_s13  }
  0x9a   : > { %v320_v11 = vld [vmem:[%s7191_s9] sm:$0xf]  ;;  %v360_v12 = vshll.u32 %v321_v6, 16  ;;  %v5290_v13 = vld [vmem:[%s7181_s30 + $0xc] sm:$0xf]  ;;  %vm774_vm4 = vcmask 64512  }
  0x9b   : > { %6370 = vmatprep.subr.msk.bf16.mxu1 %vm823_vm0, %v320_v11  ;;  %v7213_v14 = vld [vmem:[%s7181_s30 + $0x10] sm:$0xf]  ;;  %v343_v15 = vrot.slane %v341_v7, 4  ;;  %v346_v16 = vrot.slane %v344_v8, 5  ;;  %v352_v17 = vrot.slane %v350_v9, 5  ;;  %v356_v18 = vrot.slane %v354_v10, 4 }
  0x9c   : > { %v7216_v19 = vld [vmem:[%s7181_s30 + $0x14] sm:$0x1]  ;;  %v362_v20 = vrot.slane %v360_v12, 5  ;;  %v2145_v21 = vshrl.u32 %v5290_v13, 16  ;;  %v2148_v22 = vshll.u32 %v5290_v13, 16  ;;  %v2154_v23 = vshll.u32 %v7213_v14, 16 }
  0x9d   : > { %v7220_v24 = vld [vmem:[%s7191_s9 + $0x14] sm:$0xf]  ;;  %v347_v25 = vor.u32 %v346_v16, %v343_v15  ;;  %v357_v26 = vor.u32 %v356_v18, %v352_v17  ;;  %v2158_v27 = vshrl.u32 %v7213_v14, 16  ;;  %v2164_v28 = vshll.u32 %v7216_v19, 16  ;;  %v290_v29 = vld [vmem:[%s7181_s30 + $0xc] sm:$0xf] }
  0x9e   : > { %6375 = vmatprep.subr.msk.bf16.mxu0 %vm823_vm0, %v7220_v24  ;;  %v2147_v31 = vrot.slane %v2145_v21, 4  ;;  %v2150_v32 = vrot.slane %v2148_v22, 5  ;;  %v2156_v33 = vrot.slane %v2154_v23, 5  ;;  %v291_v34 = vld [vmem:[%s7181_s30 + $0x10] sm:$0xf]  ;;  %v365_v41 = vshrl.u32 %v290_v29, 16 }
  0x9f   : > { %v348_v35 = vrot.slane %v347_v25, 4  ;;  %v358_v36 = vrot.slane %v357_v26, 4  ;;  %v2160_v37 = vrot.slane %v2158_v27, 4  ;;  %v2166_v39 = vrot.slane %v2164_v28, 5  ;;  %v322_v40 = vld [vmem:[%s7181_s30 + $0x14] sm:$0x1] }
  0xa0   : > { %v2151_v38 = vor.u32 %v2150_v32, %v2147_v31  ;;  %v368_v42 = vshll.u32 %v290_v29, 16  ;;  %v374_v46 = vshll.u32 %v291_v34, 16  ;;  %v367_v49 = vrot.slane %v365_v41, 4  ;;  %v5293_v55 = vld [vmem:[%s7181_s30 + $0x18] sm:$0xf]  ;;  %s254_s4 = scalar_lea.vmem [#allocation7], %s244_s10 }
  0xa1   : > { %v353_v43 = vsel %vm7229_vm3, %v348_v35, %v352_v17  ;;  %v363_v44 = vsel %vm7229_vm3, %v358_v36, %v362_v20  ;;  %v2161_v45 = vor.u32 %v2160_v37, %v2156_v33  ;;  %v378_v53 = vshrl.u32 %v291_v34, 16  ;;  %v7246_v60 = vld [vmem:[%s7181_s30 + $0x1c] sm:$0xf]  ;;  %v7249_v61 = vld [vmem:[%s7181_s30 + $0x20] sm:$0x1]  ;;  %s5110_s27 = sshll.u32 %s283_s1, 8 }
  0xa2   : > { %v5112_v47 = vcombine.low %v353_v43, %v363_v44  ;;  %v2152_v48 = vrot.slane %v2151_v38, 4  ;;  %v370_v50 = vrot.slane %v368_v42, 5  ;;  %v376_v52 = vrot.slane %v374_v46, 5  ;;  %v292_v16 = vld [vmem:[%s7181_s30 + $0x18] sm:$0xf]  ;;  %s8918_s22 = scalar_lea.vmem [#allocation8], %s5110_s27 }
  0xa3   : > { %v2162_v51 = vrot.slane %v2161_v45, 4  ;;  %v384_v54 = vshll.u32 %v322_v40, 16  ;;  %v2888_v57 = vrot.slane %v7213_v14, 5  ;;  %v2891_v58 = vrot.slane %v7216_v19, 5  ;;  %v293_v22 = vld [vmem:[%s7181_s30 + $0x1c] sm:$0xf] }
  0xa4   : > { %5807 = vmatprep.mubr.msk.bf16.mxu1 %vm774_vm4, %v5112_v47  ;;  %v2157_v56 = vsel %vm7229_vm3, %v2152_v48, %v2156_v33  ;;  %v371_v59 = vor.u32 %v370_v50, %v367_v49  ;;  %v380_v63 = vrot.slane %v378_v53, 4  ;;  %v1117_v1 = vsel %vm823_vm0, %v320_v11, 0  ;;  %v323_v28 = vld [vmem:[%s7181_s30 + $0x20] sm:$0x1]  ;;  %v5296_v34 = vld [vmem:[%s7181_s30 + $0x24] sm:$0xf] }
  0xa5   : > { %v2167_v62 = vsel %vm7229_vm3, %v2162_v51, %v2166_v39  ;;  %v386_v0 = vrot.slane %v384_v54, 5  ;;  %v2169_v5 = vshrl.u32 %v5293_v55, 16  ;;  %v2172_v6 = vshll.u32 %v5293_v55, 16  ;;  %v7275_v43 = vld [vmem:[%s7181_s30 + $0x28] sm:$0xf]  ;;  %s9209_s20 = sld [smem:[#allocation14_spill]] }
  0xa6   : > { %v5339_v2 = vcombine.low %v2157_v56, %v2167_v62  ;;  %v372_v3 = vrot.slane %v371_v59, 4  ;;  %v381_v7 = vor.u32 %v380_v63, %v376_v52  ;;  %v2178_v8 = vshll.u32 %v7246_v60, 16  ;;  %v7281_v46 = vld [vmem:[%s7181_s30 + $0x2c] sm:$0x1]  ;;  %s6384_s26 = smul.u32 96, %s6854_s21  ;;  %s4968_s3 = sshll.u32 %s8918_s22, 4  ;;  %s8989_s3 = int_to_ptr.vmem [resolvable:$true] %s4968_s3 }
  0xa7   : > { %v2182_v9 = vshrl.u32 %v7246_v60, 16  ;;  %v2188_v10 = vshll.u32 %v7249_v61, 16  ;;  %v2171_v13 = vrot.slane %v2169_v5, 4  ;;  %v2174_v11 = vrot.slane %v2172_v6, 5  ;;  %s9210_s8 = sld [smem:[#allocation43_spill]]  ;;  %s8996_s23 = scalar_lea.sflag [#allocation4], %s283_s1 }
  0xa8   : > { %5943 = vmatprep.mubr.msk.bf16.mxu0 %vm774_vm4, %v5339_v2  ;;  %v377_v12 = vsel %vm7229_vm3, %v372_v3, %v376_v52  ;;  %v2895_v15 = vrot.slane %v7246_v60, 5  ;;  %v382_v17 = vrot.slane %v381_v7, 4  ;;  %v2180_v18 = vrot.slane %v2178_v8, 5  ;;  %v294_v52 = vld [vmem:[%s7181_s30 + $0x24] sm:$0xf]  ;;  %p9211_p10 = scmp.ne.s32.totalorder %s9130_s15, 0 }
  0xa9   : > { %v2184_v20 = vrot.slane %v2182_v9, 4  ;;  %v2190_v21 = vrot.slane %v2188_v10, 5  ;;  %v2175_v23 = vor.u32 %v2174_v11, %v2171_v13  ;;  %v2898_v26 = vrot.slane %v7249_v61, 5  ;;  %v5299_v13 = vld [vmem:[%s7181_s30 + $0x30] sm:$0xf]  ;;  %s6878_s7 = smov [#allocation8]  }
  0xaa   : > { %v7265_v25 = vrot.slane %v2895_v15, 4  ;;  %v3097_v27 = vsel %vm823_vm0, %v7220_v24, 0  ;;  %v387_v29 = vsel %vm7229_vm3, %v382_v17, %v386_v0  ;;  %v389_v32 = vshrl.u32 %v292_v16, 16  ;;  %s6724_s10 = sshll.u32 %s6878_s7, 4  ;;  %s6725_s10 = int_to_ptr.vmem [resolvable:$false] %s6724_s10 }
  0xab   : > { %v2185_v31 = vor.u32 %v2184_v20, %v2180_v18  ;;  %v392_v33 = vshll.u32 %v292_v16, 16  ;;  %v5113_v35 = vcombine.low %v377_v12, %v387_v29  ;;  %v2176_v36 = vrot.slane %v2175_v23, 4  ;;  %v324_v12 = vld [vmem:[%s7181_s30 + $0x2c] sm:$0x1]  ;;  %s4965_s6 = sadd.s32 %s9209_s20, %s6384_s26  ;;  %s6726_s29 = scalar_lea.vmem %s6725_s10, 8192 }
  0xac   : > { %v398_v37 = vshll.u32 %v293_v22, 16  ;;  %v402_v38 = vshrl.u32 %v293_v22, 16  ;;  %v391_v40 = vrot.slane %v389_v32, 4  ;;  %v408_v42 = vshll.u32 %v323_v28, 16  ;;  %s5649_s21 = sshll.u32 %s4965_s6, 7  ;;  %p6727_p9 = scmp.lt.s32.totalorder %s8989_s3, %s6725_s10 }
  0xad   : > { %v2186_v39 = vrot.slane %v2185_v31, 4  ;;  %v394_v41 = vrot.slane %v392_v33, 5  ;;  %5808 = vmatmul.mubr.msk.bf16.vlgmr.msra.gmra.mrb[0].mxu1 %vm774_vm4, %v5113_v35  ;;  %v2181_v24 = vsel %vm7229_vm3, %v2176_v36, %v2180_v18  ;;  %v2193_v47 = vshrl.u32 %v5296_v34, 16  ;;  %v7304_v36 = vld [vmem:[%s7181_s30 + $0x38] sm:$0x1]  ;;  %s8986_s14 = scalar_lea.hbm %s9210_s8, %s5649_s21 }
  0xae   : > { %v400_v44 = vrot.slane %v398_v37, 5  ;;  %v404_v45 = vrot.slane %v402_v38, 4  ;;  %5840 = vmatpush3.bf16.msra.mxu1 %v1117_v1  ;;  %v410_v50 = vrot.slane %v408_v42, 5  ;;  %v2196_v51 = vshll.u32 %v5296_v34, 16  ;;  %v295_v1 = vld [vmem:[%s7181_s30 + $0x28] sm:$0xf] }
  0xaf   : > { %v2191_v48 = vsel %vm7229_vm3, %v2186_v39, %v2190_v21  ;;  %v395_v49 = vor.u32 %v394_v41, %v391_v40  ;;  %v2195_v55 = vrot.slane %v2193_v47, 4  ;;  %v2202_v56 = vshll.u32 %v7275_v43, 16  ;;  %v296_v42 = vld [vmem:[%s7181_s30 + $0x30] sm:$0xf] }
  0xb0   : > { %v5340_v53 = vcombine.low %v2181_v24, %v2191_v48  ;;  %v405_v54 = vor.u32 %v404_v45, %v400_v44  ;;  %v2198_v62 = vrot.slane %v2196_v51, 5  ;;  %v2206_v63 = vshrl.u32 %v7275_v43, 16  ;;  %v297_v48 = vld [vmem:[%s7181_s30 + $0x34] sm:$0xf] }
  0xb1   : > { %v396_v59 = vrot.slane %v395_v49, 4  ;;  %v2212_v0 = vshll.u32 %v7281_v46, 16  ;;  %v2204_v3 = vrot.slane %v2202_v56, 5  ;;  %v413_v5 = vshrl.u32 %v294_v52, 16  ;;  %v325_v56 = vld [vmem:[%s7181_s30 + $0x38] sm:$0x1] }
  0xb2   : > { %5944 = vmatmul.mubr.msk.bf16.vlgmr.msra.gmra.mrb[0].mxu0 %vm774_vm4, %v5340_v53  ;;  %v406_v2 = vrot.slane %v405_v54, 4  ;;  %v416_v6 = vshll.u32 %v294_v52, 16  ;;  %v2199_v8 = vor.u32 %v2198_v62, %v2195_v55  ;;  %v2208_v9 = vrot.slane %v2206_v63, 4 }
  0xb3   : > { %5976 = vmatpush3.bf16.msra.mxu0 %v3097_v27  ;;  %v401_v7 = vsel %vm7229_vm3, %v396_v59, %v400_v44  ;;  %v2214_v10 = vrot.slane %v2212_v0, 5  ;;  %v415_v16 = vrot.slane %v413_v5, 4  ;;  %v422_v18 = vshll.u32 %v295_v1, 16  ;;  %v7298_v27 = vld [vmem:[%s7181_s30 + $0x34] sm:$0xf] }
  0xb4   : > { %v411_v11 = vsel %vm7229_vm3, %v406_v2, %v410_v50  ;;  %v418_v17 = vrot.slane %v416_v6, 5  ;;  %v2200_v21 = vrot.slane %v2199_v8, 4  ;;  %v2209_v22 = vor.u32 %v2208_v9, %v2204_v3  ;;  %v5302_v2 = vld [vmem:[%s7181_s30 + $0x3c] sm:$0xf]  ;;  %v7321_v8 = vld [vmem:[%s7181_s30 + $0x40] sm:$0xf] }
  0xb5   : > { %v5114_v20 = vcombine.low %v401_v7, %v411_v11  ;;  %v426_v23 = vshrl.u32 %v295_v1, 16  ;;  %v424_v29 = vrot.slane %v422_v18, 5  ;;  %v432_v31 = vshll.u32 %v324_v12, 16  ;;  %v7326_v18 = vld [vmem:[%s7181_s30 + $0x44] sm:$0x1] }
  0xb6   : > { %v419_v28 = vor.u32 %v418_v17, %v415_v16  ;;  %v2217_v32 = vshrl.u32 %v5299_v13, 16  ;;  %v2205_v33 = vsel %vm7229_vm3, %v2200_v21, %v2204_v3  ;;  %v2210_v34 = vrot.slane %v2209_v22, 4 }
  0xb7   : > { %5811 = vmatprep.mubr.msk.bf16.mxu1 %vm774_vm4, %v5114_v20  ;;  %v428_v35 = vrot.slane %v426_v23, 4  ;;  %v2220_v37 = vshll.u32 %v5299_v13, 16  ;;  %v434_v39 = vrot.slane %v432_v31, 5  ;;  %v2226_v41 = vshll.u32 %v7298_v27, 16  ;;  %v7332_v31 = vld [vmem:[%s7191_s9 + $0x18] sm:$0xf] }
  0xb8   : > { %v420_v38 = vrot.slane %v419_v28, 4  ;;  %v2219_v40 = vrot.slane %v2217_v32, 4  ;;  %v2215_v24 = vsel %vm7229_vm3, %v2210_v34, %v2214_v10  ;;  %v2230_v47 = vshrl.u32 %v7298_v27, 16  ;;  %6376 = vmatprep.subr.msk.bf16.mxu0 %vm823_vm0, %v7332_v31 }
  0xb9   : > { %v429_v44 = vor.u32 %v428_v35, %v424_v29  ;;  %v2222_v45 = vrot.slane %v2220_v37, 5  ;;  %v5341_v49 = vcombine.low %v2205_v33, %v2215_v24  ;;  %v2228_v51 = vrot.slane %v2226_v41, 5 }
  0xba   : > { %v425_v50 = vsel %vm7229_vm3, %v420_v38, %v424_v29  ;;  %v2236_v52 = vshll.u32 %v7304_v36, 16  ;;  %v2232_v55 = vrot.slane %v2230_v47, 4  ;;  %v437_v59 = vshrl.u32 %v296_v42, 16  ;;  %v298_v29 = vld [vmem:[%s7181_s30 + $0x3c] sm:$0xf] }
  0xbb   : > { %v430_v53 = vrot.slane %v429_v44, 4  ;;  %v2223_v54 = vor.u32 %v2222_v45, %v2219_v40  ;;  %5947 = vmatprep.mubr.msk.bf16.mxu0 %vm774_vm4, %v5341_v49  ;;  %v440_v63 = vshll.u32 %v296_v42, 16  ;;  %v446_v0 = vshll.u32 %v297_v48, 16  ;;  %v299_v44 = vld [vmem:[%s7181_s30 + $0x40] sm:$0xf] }
  0xbc   : > { %v2238_v62 = vrot.slane %v2236_v52, 5  ;;  %v450_v1 = vshrl.u32 %v297_v48, 16  ;;  %v2233_v6 = vor.u32 %v2232_v55, %v2228_v51  ;;  %v439_v7 = vrot.slane %v437_v59, 4  ;;  %v5305_v52 = vld [vmem:[%s7181_s30 + $0x48] sm:$0xf] }
  0xbd   : > { %v435_v3 = vsel %vm7229_vm3, %v430_v53, %v434_v39  ;;  %v2224_v5 = vrot.slane %v2223_v54, 4  ;;  %v442_v10 = vrot.slane %v440_v63, 5  ;;  %v448_v12 = vrot.slane %v446_v0, 5 }
  0xbe   : > { %v5115_v9 = vcombine.low %v425_v50, %v435_v3  ;;  %v452_v13 = vrot.slane %v450_v1, 4  ;;  %v2234_v16 = vrot.slane %v2233_v6, 4  ;;  %v456_v17 = vshll.u32 %v325_v56, 16  ;;  %v326_v50 = vld [vmem:[%s7181_s30 + $0x44] sm:$0x1] }
  0xbf   : > { %v2229_v11 = vsel %vm7229_vm3, %v2224_v5, %v2228_v51  ;;  %v2241_v20 = vshrl.u32 %v5302_v2, 16  ;;  %v443_v21 = vor.u32 %v442_v10, %v439_v7  ;;  %v2244_v23 = vshll.u32 %v5302_v2, 16  ;;  %v7350_v3 = vld [vmem:[%s7181_s30 + $0x4c] sm:$0xf] }
  0xc0   : > { %5812 = vmatmul.mubr.msk.bf16.gmra.mrb[4].mxu1 %vm774_vm4, %v5115_v9  ;;  %v453_v22 = vor.u32 %v452_v13, %v448_v12  ;;  %v2250_v28 = vshll.u32 %v7321_v8, 16  ;;  %v2239_v32 = vsel %vm7229_vm3, %v2234_v16, %v2238_v62  ;;  %v458_v33 = vrot.slane %v456_v17, 5  ;;  %v7355_v13 = vld [vmem:[%s7181_s30 + $0x50] sm:$0x1] }
  0xc1   : > { %v2243_v34 = vrot.slane %v2241_v20, 4  ;;  %v2254_v35 = vshrl.u32 %v7321_v8, 16  ;;  %v5342_v37 = vcombine.low %v2229_v11, %v2239_v32  ;;  %v444_v38 = vrot.slane %v443_v21, 4  ;;  %v7358_v11 = vld [vmem:[%s7181_s30 + $0x48] sm:$0xf] }
  0xc2   : > { %v454_v39 = vrot.slane %v453_v22, 4  ;;  %v2246_v40 = vrot.slane %v2244_v23, 5  ;;  %v2252_v41 = vrot.slane %v2250_v28, 5  ;;  %v2260_v24 = vshll.u32 %v7326_v18, 16 }
  0xc3   : > { %v2256_v42 = vrot.slane %v2254_v35, 4  ;;  %v461_v45 = vshrl.u32 %v298_v29, 16  ;;  %5948 = vmatmul.mubr.msk.bf16.gmra.mrb[4].mxu0 %vm774_vm4, %v5342_v37  ;;  %v449_v47 = vsel %vm7229_vm3, %v444_v38, %v448_v12  ;;  %v464_v51 = vshll.u32 %v298_v29, 16  ;;  %v7366_v35 = vld [vmem:[%s7181_s30 + $0x4c] sm:$0xf] }
  0xc4   : > { %v459_v48 = vsel %vm7229_vm3, %v454_v39, %v458_v33  ;;  %v2247_v49 = vor.u32 %v2246_v40, %v2243_v34  ;;  %v2262_v55 = vrot.slane %v2260_v24, 5  ;;  %v470_v63 = vshll.u32 %v299_v44, 16 }
  0xc5   : > { %v5116_v53 = vcombine.low %v449_v47, %v459_v48  ;;  %v2257_v54 = vor.u32 %v2256_v42, %v2252_v41  ;;  %v463_v56 = vrot.slane %v461_v45, 4  ;;  %v466_v62 = vrot.slane %v464_v51, 5  ;;  %v5308_v48 = vld [vmem:[%s7181_s30 + $0x54] sm:$0xf] }
  0xc6   : > { %v2248_v59 = vrot.slane %v2247_v49, 4  ;;  %v474_v0 = vshrl.u32 %v299_v44, 16  ;;  %v480_v2 = vshll.u32 %v326_v50, 16  ;;  %v2265_v5 = vshrl.u32 %v5305_v52, 16 }
  0xc7   : > { %5815 = vmatprep.mubr.msk.bf16.mxu1 %vm774_vm4, %v5116_v53  ;;  %v2258_v1 = vrot.slane %v2257_v54, 4  ;;  %v2268_v6 = vshll.u32 %v5305_v52, 16  ;;  %v467_v9 = vor.u32 %v466_v62, %v463_v56  ;;  %v472_v10 = vrot.slane %v470_v63, 5  ;;  %v7380_v53 = vld [vmem:[%s7181_s30 + $0x58] sm:$0xf] }
  0xc8   : > { %v2253_v7 = vsel %vm7229_vm3, %v2248_v59, %v2252_v41  ;;  %v476_v12 = vrot.slane %v474_v0, 4  ;;  %v482_v17 = vrot.slane %v480_v2, 5  ;;  %v2267_v20 = vrot.slane %v2265_v5, 4  ;;  %v327_v41 = vld [vmem:[%s7181_s30 + $0x50] sm:$0x1] }
  0xc9   : > { %v2263_v16 = vsel %vm7229_vm3, %v2258_v1, %v2262_v55  ;;  %v2270_v21 = vrot.slane %v2268_v6, 5  ;;  %v468_v23 = vrot.slane %v467_v9, 4  ;;  %v2274_v29 = vshll.u32 %v7350_v3, 16  ;;  %v7385_v1 = vld [vmem:[%s7181_s30 + $0x5c] sm:$0x1] }
  0xca   : > { %v5343_v22 = vcombine.low %v2253_v7, %v2263_v16  ;;  %v477_v28 = vor.u32 %v476_v12, %v472_v10  ;;  %v2278_v33 = vshrl.u32 %v7350_v3, 16  ;;  %v2284_v34 = vshll.u32 %v7355_v13, 16 }
  0xcb   : > { %v2271_v32 = vor.u32 %v2270_v21, %v2267_v20  ;;  %v485_v37 = vshrl.u32 %v7358_v11, 16  ;;  %v473_v38 = vsel %vm7229_vm3, %v468_v23, %v472_v10  ;;  %v2276_v40 = vrot.slane %v2274_v29, 5  ;;  %v7391_v20 = vld [vmem:[%s7181_s30 + $0x54] sm:$0xf]  ;;  %v7397_v29 = vld [vmem:[%s7181_s30 + $0x58] sm:$0xf] }
  0xcc   : > { %5951 = vmatprep.mubr.msk.bf16.mxu0 %vm774_vm4, %v5343_v22  ;;  %v478_v39 = vrot.slane %v477_v28, 4  ;;  %v488_v42 = vshll.u32 %v7358_v11, 16  ;;  %v2280_v44 = vrot.slane %v2278_v33, 4  ;;  %v2286_v45 = vrot.slane %v2284_v34, 5 }
  0xcd   : > { %v2272_v24 = vrot.slane %v2271_v32, 4  ;;  %v487_v47 = vrot.slane %v485_v37, 4  ;;  %v494_v51 = vshll.u32 %v7366_v35, 16  ;;  %v498_v52 = vshrl.u32 %v7366_v35, 16 }
  0xce   : > { %v483_v49 = vsel %vm7229_vm3, %v478_v39, %v482_v17  ;;  %v490_v50 = vrot.slane %v488_v42, 5  ;;  %v2281_v56 = vor.u32 %v2280_v44, %v2276_v40  ;;  %v504_v59 = vshll.u32 %v327_v41, 16 }
  0xcf   : > { %v5117_v54 = vcombine.low %v473_v38, %v483_v49  ;;  %v2277_v55 = vsel %vm7229_vm3, %v2272_v24, %v2276_v40  ;;  %v496_v63 = vrot.slane %v494_v51, 5  ;;  %v500_v0 = vrot.slane %v498_v52, 4  ;;  %v328_v40 = vld [vmem:[%s7181_s30 + $0x5c] sm:$0x1]  ;;  %v7411_v49 = vld [vmem:[%s7191_s9 + $0x8] sm:$0xf] }
  0xd0   : > { %v491_v62 = vor.u32 %v490_v50, %v487_v47  ;;  %v2289_v2 = vshrl.u32 %v5308_v48, 16  ;;  %v2282_v5 = vrot.slane %v2281_v56, 4  ;;  %v506_v6 = vrot.slane %v504_v59, 5  ;;  %6371 = vmatprep.subr.msk.bf16.mxu1 %vm823_vm0, %v7411_v49 }
  0xd1   : > { %5816 = vmatmul.mubr.msk.bf16.gmra.mrb[8].mxu1 %vm774_vm4, %v5117_v54  ;;  %v2292_v7 = vshll.u32 %v5308_v48, 16  ;;  %v2298_v9 = vshll.u32 %v7380_v53, 16  ;;  %v501_v12 = vor.u32 %v500_v0, %v496_v63  ;;  %v2302_v17 = vshrl.u32 %v7380_v53, 16  ;;  %v5311_v48 = vld [vmem:[%s7181_s30 + $0x60] sm:$0xf] }
  0xd2   : > { %v492_v10 = vrot.slane %v491_v62, 4  ;;  %v2291_v16 = vrot.slane %v2289_v2, 4  ;;  %v2287_v21 = vsel %vm7229_vm3, %v2282_v5, %v2286_v45  ;;  %v2308_v28 = vshll.u32 %v7385_v1, 16  ;;  %v7422_v5 = vld [vmem:[%s7181_s30 + $0x68] sm:$0x1] }
  0xd3   : > { %v2294_v22 = vrot.slane %v2292_v7, 5  ;;  %v2300_v23 = vrot.slane %v2298_v9, 5  ;;  %v5344_v32 = vcombine.low %v2277_v55, %v2287_v21  ;;  %v502_v34 = vrot.slane %v501_v12, 4  ;;  %v7414_v55 = vld [vmem:[%s7181_s30 + $0x64] sm:$0xf] }
  0xd4   : > { %v497_v33 = vsel %vm7229_vm3, %v492_v10, %v496_v63  ;;  %v2304_v37 = vrot.slane %v2302_v17, 4  ;;  %v2310_v39 = vrot.slane %v2308_v28, 5  ;;  %v509_v41 = vshrl.u32 %v7391_v20, 16  ;;  %v7428_v17 = vld [vmem:[%s7181_s30 + $0x60] sm:$0xf] }
  0xd5   : > { %v2295_v38 = vor.u32 %v2294_v22, %v2291_v16  ;;  %v512_v42 = vshll.u32 %v7391_v20, 16  ;;  %vm1328_vm5 = vcmask 1042432   ;;  %vm1329_vm6 = vcmask 1046532   ;;  %5952 = vmatmul.mubr.msk.bf16.gmra.mrb[8].mxu0 %vm774_vm4, %v5344_v32 }
  0xd6   : > { %v507_v24 = vsel %vm7229_vm3, %v502_v34, %v506_v6  ;;  %v2305_v44 = vor.u32 %v2304_v37, %v2300_v23  ;;  %v518_v45 = vshll.u32 %v7397_v29, 16  ;;  %v522_v47 = vshrl.u32 %v7397_v29, 16  ;;  %vm7451_vm7 = vmor %vm1328_vm5, %vm1329_vm6 }
  0xd7   : > { %v5118_v50 = vcombine.low %v497_v33, %v507_v24  ;;  %v2296_v51 = vrot.slane %v2295_v38, 4  ;;  %v511_v52 = vrot.slane %v509_v41, 4  ;;  %v514_v54 = vrot.slane %v512_v42, 5  ;;  %v329_v41 = vld [vmem:[%s7181_s30 + $0x68] sm:$0x1] }
  0xd8   : > { %v2306_v56 = vrot.slane %v2305_v44, 4  ;;  %v520_v59 = vrot.slane %v518_v45, 5  ;;  %v524_v62 = vrot.slane %v522_v47, 4  ;;  %v528_v63 = vshll.u32 %v328_v40, 16 }
  0xd9   : > { %5819 = vmatprep.mubr.msk.bf16.mxu1 %vm774_vm4, %v5118_v50  ;;  %v2301_v0 = vsel %vm7229_vm3, %v2296_v51, %v2300_v23  ;;  %v515_v2 = vor.u32 %v514_v54, %v511_v52  ;;  %v2313_v6 = vshrl.u32 %v5311_v48, 16  ;;  %v2316_v7 = vshll.u32 %v5311_v48, 16  ;;  %v7431_v23 = vld [vmem:[%s7181_s30 + $0x64] sm:$0xf]  ;;  %v5371_v50 = vld [vmem:[%s7181_s30 + $0xc] sm:$0xe] }
  0xda   : > { %v2311_v9 = vsel %vm7229_vm3, %v2306_v56, %v2310_v39  ;;  %v525_v10 = vor.u32 %v524_v62, %v520_v59  ;;  %v530_v12 = vrot.slane %v528_v63, 5  ;;  %v2322_v16 = vshll.u32 %v7414_v55, 16 }
  0xdb   : > { %v5345_v21 = vcombine.low %v2301_v0, %v2311_v9  ;;  %v516_v22 = vrot.slane %v515_v2, 4  ;;  %v2315_v28 = vrot.slane %v2313_v6, 4  ;;  %v2318_v32 = vrot.slane %v2316_v7, 5 }
  0xdc   : > { %v526_v33 = vrot.slane %v525_v10, 4  ;;  %v2324_v34 = vrot.slane %v2322_v16, 5  ;;  %v2326_v37 = vshrl.u32 %v7414_v55, 16  ;;  %v2332_v38 = vshll.u32 %v7422_v5, 16 }
  0xdd   : > { %5955 = vmatprep.mubr.msk.bf16.mxu0 %vm774_vm4, %v5345_v21  ;;  %v521_v39 = vsel %vm7229_vm3, %v516_v22, %v520_v59  ;;  %v2319_v40 = vor.u32 %v2318_v32, %v2315_v28  ;;  %v533_v42 = vshrl.u32 %v7428_v17, 16  ;;  %v536_v24 = vshll.u32 %v7428_v17, 16  ;;  %v7446_v59 = vld [vmem:[%s7181_s30 + $0x6c] sm:$0xf]  ;;  %v7461_v28 = vld [vmem:[%s7181_s30 + $0x70] sm:$0xf] }
  0xde   : > { %v531_v44 = vsel %vm7229_vm3, %v526_v33, %v530_v12  ;;  %v2328_v45 = vrot.slane %v2326_v37, 4  ;;  %v2334_v47 = vrot.slane %v2332_v38, 5  ;;  %v542_v48 = vshll.u32 %v7431_v23, 16  ;;  %v330_v38 = vld [vmem:[%s7181_s30 + $0x74] sm:$0x1] }
  0xdf   : > { %v5119_v51 = vcombine.low %v521_v39, %v531_v44  ;;  %v2320_v52 = vrot.slane %v2319_v40, 4  ;;  %v535_v54 = vrot.slane %v533_v42, 4  ;;  %v538_v56 = vrot.slane %v536_v24, 5  ;;  %v5372_v40 = vld [vmem:[%s7181_s30 + $0x18] sm:$0xe] }
  0xe0   : > { %v2329_v62 = vor.u32 %v2328_v45, %v2324_v34  ;;  %v544_v63 = vrot.slane %v542_v48, 5  ;;  %v546_v0 = vshrl.u32 %v7431_v23, 16  ;;  %v552_v2 = vshll.u32 %v329_v41, 16  ;;  %v7484_v48 = vld [vmem:[%s7181_s30 + $0x7c] sm:$0xf] }
  0xe1   : > { %5820 = vmatmul.mubr.msk.bf16.gmra.mrb[12].mxu1 %vm774_vm4, %v5119_v51  ;;  %v2325_v7 = vsel %vm7229_vm3, %v2320_v52, %v2324_v34  ;;  %v539_v9 = vor.u32 %v538_v56, %v535_v54  ;;  %v5387_v10 = vrot.slane %v5371_v50, 9  ;;  %v2890_v12 = vrot.slane %v2888_v57, 4  ;;  %v331_v54 = vld [vmem:[%s7181_s30 + $0x80] sm:$0x1]  ;;  %v5373_v56 = vld [vmem:[%s7181_s30 + $0x24] sm:$0xe] }
  0xe2   : > { %v2330_v16 = vrot.slane %v2329_v62, 4  ;;  %v548_v21 = vrot.slane %v546_v0, 4  ;;  %v554_v22 = vrot.slane %v552_v2, 5  ;;  %v557_v32 = vshrl.u32 %v7446_v59, 16 }
  0xe3   : > { %v540_v33 = vrot.slane %v539_v9, 4  ;;  %v2889_v34 = vsel %vm7451_vm7, %v5387_v10, %v2888_v57  ;;  %v2892_v37 = vsel %vm7451_vm7, %v2890_v12, %v2891_v58  ;;  %v560_v39 = vshll.u32 %v7446_v59, 16  ;;  %v7481_v58 = vld [vmem:[%s7181_s30 + $0x78] sm:$0xf]  ;;  %v7505_v12 = vld [vmem:[%s7181_s30 + $0x84] sm:$0xf] }
  0xe4   : > { %v2335_v41 = vsel %vm7229_vm3, %v2330_v16, %v2334_v47  ;;  %v549_v42 = vor.u32 %v548_v21, %v544_v63  ;;  %v5404_v24 = vcombine.low %v2889_v34, %v2892_v37  ;;  %v559_v14 = vrot.slane %v557_v32, 4 }
  0xe5   : > { %v5346_v44 = vcombine.low %v2325_v7, %v2335_v41  ;;  %v545_v57 = vsel %vm7229_vm3, %v540_v33, %v544_v63  ;;  %v562_v19 = vrot.slane %v560_v39, 5  ;;  %v566_v45 = vshll.u32 %v7461_v28, 16 }
  0xe6   : > { %v550_v50 = vrot.slane %v549_v42, 4  ;;  %v570_v51 = vshrl.u32 %v7461_v28, 16  ;;  %v576_v52 = vshll.u32 %v330_v38, 16  ;;  %v5388_v47 = vrot.slane %v5372_v40, 9  ;;  %v7515_v38 = vld [vmem:[%s7181_s30 + $0x88] sm:$0xf] }
  0xe7   : > { %5956 = vmatmul.mubr.msk.bf16.gmra.mrb[12].mxu0 %vm774_vm4, %v5346_v44  ;;  %v563_v62 = vor.u32 %v562_v19, %v559_v14  ;;  %v568_v0 = vrot.slane %v566_v45, 5  ;;  %v2899_v63 = vsel %vm7451_vm7, %v7265_v25, %v2898_v26  ;;  %v3456_v2 = vsel %vm823_vm0, %v7332_v31, 0  ;;  %v5374_v14 = vld [vmem:[%s7181_s30 + $0x30] sm:$0xe]  ;;  %v7520_v44 = vld [vmem:[%s7191_s9 + $0x1c] sm:$0xf] }
  0xe8   : > { %v555_v7 = vsel %vm7229_vm3, %v550_v50, %v554_v22  ;;  %5977 = vmatprep.mubr.msk.bf16.mxu0 %vm774_vm4, %v5404_v24  ;;  %v572_v9 = vrot.slane %v570_v51, 4  ;;  %v578_v10 = vrot.slane %v576_v52, 5  ;;  %v2896_v61 = vsel %vm7451_vm7, %v5388_v47, %v2895_v15  ;;  %v332_v24 = vld [vmem:[%s7181_s30 + $0x8c] sm:$0x1] }
  0xe9   : > { %v5120_v16 = vcombine.low %v545_v57, %v555_v7  ;;  %v564_v25 = vrot.slane %v563_v62, 4  ;;  %v5405_v26 = vcombine.low %v2896_v61, %v2899_v63  ;;  %v581_v31 = vshrl.u32 %v7481_v58, 16 }
  0xea   : > { %v573_v21 = vor.u32 %v572_v9, %v568_v0  ;;  %v584_v22 = vshll.u32 %v7481_v58, 16  ;;  %v590_v32 = vshll.u32 %v7484_v48, 16  ;;  %v594_v60 = vshrl.u32 %v7484_v48, 16 }
  0xeb   : > { %5823 = vmatprep.mubr.msk.bf16.mxu1 %vm774_vm4, %v5120_v16  ;;  %v569_v15 = vsel %vm7229_vm3, %v564_v25, %v568_v0  ;;  %v583_v33 = vrot.slane %v581_v31, 4  ;;  %v600_v34 = vshll.u32 %v331_v54, 16  ;;  %v5389_v37 = vrot.slane %v5373_v56, 9 }
  0xec   : > { %v574_v39 = vrot.slane %v573_v21, 4  ;;  %v586_v40 = vrot.slane %v584_v22, 5  ;;  %v592_v41 = vrot.slane %v590_v32, 5  ;;  %v596_v42 = vrot.slane %v594_v60, 4  ;;  %v7546_v32 = vld [vmem:[%s7181_s30 + $0x94] sm:$0xf] }
  0xed   : > { %v602_v57 = vrot.slane %v600_v34, 5  ;;  %v2902_v19 = vrot.slane %v7275_v43, 5  ;;  %v2905_v45 = vrot.slane %v7281_v46, 5  ;;  %v605_v50 = vshrl.u32 %v7505_v12, 16  ;;  %v7532_v43 = vld [vmem:[%s7181_s30 + $0x90] sm:$0xf] }
  0xee   : > { %v579_v51 = vsel %vm7229_vm3, %v574_v39, %v578_v10  ;;  %v587_v52 = vor.u32 %v586_v40, %v583_v33  ;;  %v597_v47 = vor.u32 %v596_v42, %v592_v41  ;;  %v608_v54 = vshll.u32 %v7505_v12, 16 }
  0xef   : > { %v5121_v56 = vcombine.low %v569_v15, %v579_v51  ;;  %5978 = vmatmul.mubr.msk.bf16.vlgmr.msra.gmra.mrb[0].mxu0 %vm774_vm4, %v5405_v26  ;;  %v2903_v62 = vsel %vm7451_vm7, %v5389_v37, %v2902_v19  ;;  %v2904_v0 = vrot.slane %v2902_v19, 4  ;;  %v607_v63 = vrot.slane %v605_v50, 4  ;;  %v333_v37 = vld [vmem:[%s7181_s30 + $0x98] sm:$0x1] }
  0xf0   : > { %6010 = vmatpush3.bf16.msra.mxu0 %v3456_v2  ;;  %v588_v46 = vrot.slane %v587_v52, 4  ;;  %v598_v7 = vrot.slane %v597_v47, 4  ;;  %v610_v9 = vrot.slane %v608_v54, 5  ;;  %v614_v10 = vshll.u32 %v7515_v38, 16  ;;  %v7563_v52 = vld [vmem:[%s7181_s30 + $0x9c] sm:$0xf] }
  0xf1   : > { %5824 = vmatmul.mubr.msk.bf16.gmra.mrb[16].mxu1 %vm774_vm4, %v5121_v56  ;;  %v2906_v61 = vsel %vm7451_vm7, %v2904_v0, %v2905_v45  ;;  %v618_v16 = vshrl.u32 %v7515_v38, 16  ;;  %v624_v25 = vshll.u32 %v332_v24, 16  ;;  %v5390_v26 = vrot.slane %v5374_v14, 9  ;;  %6377 = vmatprep.subr.msk.bf16.mxu0 %vm823_vm0, %v7520_v44  ;;  %v5375_v45 = vld [vmem:[%s7181_s30 + $0x3c] sm:$0xe] }
  0xf2   : > { %v593_v2 = vsel %vm7229_vm3, %v588_v46, %v592_v41  ;;  %v603_v31 = vsel %vm7229_vm3, %v598_v7, %v602_v57  ;;  %v5406_v21 = vcombine.low %v2903_v62, %v2906_v61  ;;  %v611_v22 = vor.u32 %v610_v9, %v607_v63  ;;  %v7566_v0 = vld [vmem:[%s7181_s30 + $0xa0] sm:$0xf] }
  0xf3   : > { %v5122_v60 = vcombine.low %v593_v2, %v603_v31  ;;  %v616_v15 = vrot.slane %v614_v10, 5  ;;  %v620_v33 = vrot.slane %v618_v16, 4  ;;  %v626_v34 = vrot.slane %v624_v25, 5 }
  0xf4   : > { %5981 = vmatprep.mubr.msk.bf16.mxu0 %vm774_vm4, %v5406_v21  ;;  %v612_v39 = vrot.slane %v611_v22, 4  ;;  %v2909_v40 = vrot.slane %v7298_v27, 5  ;;  %v2912_v41 = vrot.slane %v7304_v36, 5  ;;  %v629_v42 = vshrl.u32 %v7532_v43, 16 }
  0xf5   : > { %5827 = vmatprep.mubr.msk.bf16.mxu1 %vm774_vm4, %v5122_v60  ;;  %v621_v24 = vor.u32 %v620_v33, %v616_v15  ;;  %v632_v14 = vshll.u32 %v7532_v43, 16  ;;  %v638_v57 = vshll.u32 %v7546_v32, 16  ;;  %v642_v19 = vshrl.u32 %v7546_v32, 16  ;;  %v5376_v60 = vld [vmem:[%s7181_s30 + $0x48] sm:$0xe] }
  0xf6   : > { %v617_v50 = vsel %vm7229_vm3, %v612_v39, %v616_v15  ;;  %v2910_v27 = vsel %vm7451_vm7, %v5390_v26, %v2909_v40  ;;  %v2911_v36 = vrot.slane %v2909_v40, 4  ;;  %v631_v51 = vrot.slane %v629_v42, 4  ;;  %v334_v26 = vld [vmem:[%s7181_s30 + $0xa4] sm:$0x1] }
  0xf7   : > { %v622_v47 = vrot.slane %v621_v24, 4  ;;  %v634_v54 = vrot.slane %v632_v14, 5  ;;  %v640_v56 = vrot.slane %v638_v57, 5  ;;  %v644_v62 = vrot.slane %v642_v19, 4  ;;  %v7594_v19 = vld [vmem:[%s7181_s30 + $0xac] sm:$0xf] }
  0xf8   : > { %v2913_v63 = vsel %vm7451_vm7, %v2911_v36, %v2912_v41  ;;  %v648_v46 = vshll.u32 %v333_v37, 16  ;;  %v5391_v7 = vrot.slane %v5375_v45, 9  ;;  %v2916_v9 = vrot.slane %v7321_v8, 5  ;;  %v7581_v37 = vld [vmem:[%s7181_s30 + $0xa8] sm:$0xf] }
  0xf9   : > { %v627_v10 = vsel %vm7229_vm3, %v622_v47, %v626_v34  ;;  %v5407_v61 = vcombine.low %v2910_v27, %v2913_v63  ;;  %v635_v16 = vor.u32 %v634_v54, %v631_v51  ;;  %v645_v25 = vor.u32 %v644_v62, %v640_v56  ;;  %v335_v51 = vld [vmem:[%s7181_s30 + $0xb0] sm:$0x1] }
  0xfa   : > { %v5123_v2 = vcombine.low %v617_v50, %v627_v10  ;;  %v650_v31 = vrot.slane %v648_v46, 5  ;;  %v2917_v21 = vsel %vm7451_vm7, %v5391_v7, %v2916_v9  ;;  %v2918_v22 = vrot.slane %v2916_v9, 4 }
  0xfb   : > { %5982 = vmatmul.mubr.msk.bf16.gmra.mrb[4].mxu0 %vm774_vm4, %v5407_v61  ;;  %v636_v15 = vrot.slane %v635_v16, 4  ;;  %v646_v8 = vrot.slane %v645_v25, 4  ;;  %v2919_v33 = vrot.slane %v7326_v18, 5  ;;  %v653_v34 = vshrl.u32 %v7563_v52, 16 }
  0xfc   : > { %5828 = vmatmul.mubr.msk.bf16.gmra.mrb[20].mxu1 %vm774_vm4, %v5123_v2  ;;  %v656_v39 = vshll.u32 %v7563_v52, 16  ;;  %v662_v40 = vshll.u32 %v7566_v0, 16  ;;  %v666_v41 = vshrl.u32 %v7566_v0, 16  ;;  %v672_v42 = vshll.u32 %v334_v26, 16 }
  0xfd   : > { %v641_v24 = vsel %vm7229_vm3, %v636_v15, %v640_v56  ;;  %v651_v18 = vsel %vm7229_vm3, %v646_v8, %v650_v31  ;;  %v2920_v14 = vsel %vm7451_vm7, %v2918_v22, %v2919_v33  ;;  %v655_v57 = vrot.slane %v653_v34, 4 }
  0xfe   : > { %v5124_v45 = vcombine.low %v641_v24, %v651_v18  ;;  %v5408_v50 = vcombine.low %v2917_v21, %v2920_v14  ;;  %v658_v27 = vrot.slane %v656_v39, 5  ;;  %v664_v36 = vrot.slane %v662_v40, 5  ;;  %v7613_v40 = vld [vmem:[%s7181_s30 + $0xb4] sm:$0xf]  ;;  %v7619_v14 = vld [vmem:[%s7181_s30 + $0xb8] sm:$0xf] }
  0xff   : > { %v668_v47 = vrot.slane %v666_v41, 4  ;;  %v674_v54 = vrot.slane %v672_v42, 5  ;;  %v5392_v62 = vrot.slane %v5376_v60, 9  ;;  %v2923_v56 = vrot.slane %v7350_v3, 5  ;;  %v5377_v3 = vld [vmem:[%s7181_s30 + $0x54] sm:$0xe] }
 0x100   : > { %5831 = vmatprep.mubr.msk.bf16.mxu1 %vm774_vm4, %v5124_v45  ;;  %5985 = vmatprep.mubr.msk.bf16.mxu0 %vm774_vm4, %v5408_v50  ;;  %v659_v63 = vor.u32 %v658_v27, %v655_v57  ;;  %v2926_v46 = vrot.slane %v7355_v13, 5  ;;  %v677_v7 = vshrl.u32 %v7581_v37, 16  ;;  %v680_v9 = vshll.u32 %v7581_v37, 16 }
 0x101   : > { %v669_v10 = vor.u32 %v668_v47, %v664_v36  ;;  %v2924_v61 = vsel %vm7451_vm7, %v5392_v62, %v2923_v56  ;;  %v2925_v16 = vrot.slane %v2923_v56, 4  ;;  %v686_v25 = vshll.u32 %v7594_v19, 16 }
 0x102   : > { %v660_v26 = vrot.slane %v659_v63, 4  ;;  %v679_v2 = vrot.slane %v677_v7, 4  ;;  %v682_v31 = vrot.slane %v680_v9, 5  ;;  %v690_v21 = vshrl.u32 %v7594_v19, 16 }
 0x103   : > { %v670_v13 = vrot.slane %v669_v10, 4  ;;  %v2927_v22 = vsel %vm7451_vm7, %v2925_v16, %v2926_v46  ;;  %v688_v60 = vrot.slane %v686_v25, 5  ;;  %v696_v15 = vshll.u32 %v335_v51, 16  ;;  %v5378_v46 = vld [vmem:[%s7181_s30 + $0x60] sm:$0xe] }
 0x104   : > { %v665_v8 = vsel %vm7229_vm3, %v660_v26, %v664_v36  ;;  %v5409_v33 = vcombine.low %v2924_v61, %v2927_v22  ;;  %v683_v34 = vor.u32 %v682_v31, %v679_v2  ;;  %v692_v39 = vrot.slane %v690_v21, 4  ;;  %v7624_v36 = vld [vmem:[%s7181_s30 + $0xbc] sm:$0x1]  ;;  %v5379_v16 = vld [vmem:[%s7181_s30 + $0x6c] sm:$0xe] }
 0x105   : > { %v675_v41 = vsel %vm7229_vm3, %v670_v13, %v674_v54  ;;  %v698_v42 = vrot.slane %v696_v15, 5  ;;  %v5393_v24 = vrot.slane %v5377_v3, 9  ;;  %v2930_v18 = vrot.slane %v7380_v53, 5  ;;  %v5315_v31 = vld [vmem:[%s7181_s30 + $0x70] sm:$0xf] }
 0x106   : > { %v5125_v57 = vcombine.low %v665_v8, %v675_v41  ;;  %5986 = vmatmul.mubr.msk.bf16.gmra.mrb[8].mxu0 %vm774_vm4, %v5409_v33  ;;  %v684_v45 = vrot.slane %v683_v34, 4  ;;  %v693_v50 = vor.u32 %v692_v39, %v688_v60  ;;  %v2933_v27 = vrot.slane %v7385_v1, 5  ;;  %v5316_v21 = vld [vmem:[%s7181_s30 + $0x74] sm:$0x1] }
 0x107   : > { %v2931_v51 = vsel %vm7451_vm7, %v5393_v24, %v2930_v18  ;;  %v2932_v47 = vrot.slane %v2930_v18, 4  ;;  %v701_v54 = vshrl.u32 %v7613_v40, 16  ;;  %v704_v53 = vshll.u32 %v7613_v40, 16 }
 0x108   : > { %5832 = vmatmul.mubr.msk.bf16.gmra.mrb[24].mxu1 %vm774_vm4, %v5125_v57  ;;  %v689_v62 = vsel %vm7229_vm3, %v684_v45, %v688_v60  ;;  %v694_v56 = vrot.slane %v693_v50, 4  ;;  %v710_v1 = vshll.u32 %v7619_v14, 16  ;;  %v714_v63 = vshrl.u32 %v7619_v14, 16 }
 0x109   : > { %v2934_v7 = vsel %vm7451_vm7, %v2932_v47, %v2933_v27  ;;  %v703_v9 = vrot.slane %v701_v54, 4  ;;  %v706_v10 = vrot.slane %v704_v53, 5  ;;  %v720_v61 = vshll.u32 %v7624_v36, 16  ;;  %v5380_v27 = vld [vmem:[%s7181_s30 + $0x78] sm:$0xe] }
 0x10a   : > { %v699_v25 = vsel %vm7229_vm3, %v694_v56, %v698_v42  ;;  %v5410_v3 = vcombine.low %v2931_v51, %v2934_v7  ;;  %v712_v26 = vrot.slane %v710_v1, 5  ;;  %v716_v2 = vrot.slane %v714_v63, 4  ;;  %v6575_v54 = vld [vmem:[%s7181_s30] sm:$0xf]  ;;  %v7661_v53 = vld [vmem:[%s7181_s30 + $0x4] sm:$0xf] }
 0x10b   : > { %v5126_v13 = vcombine.low %v689_v62, %v699_v25  ;;  %v707_v22 = vor.u32 %v706_v10, %v703_v9  ;;  %v722_v60 = vrot.slane %v720_v61, 5  ;;  %v5394_v15 = vrot.slane %v5378_v46, 9  ;;  %v7665_v56 = vld [vmem:[%s7181_s30 + $0x7c] sm:$0xf]  ;;  %v7668_v1 = vld [vmem:[%s7181_s30 + $0x80] sm:$0x1] }
 0x10c   : > { %5989 = vmatprep.mubr.msk.bf16.mxu0 %vm774_vm4, %v5410_v3  ;;  %v717_v8 = vor.u32 %v716_v2, %v712_v26  ;;  %v2937_v33 = vrot.slane %v7414_v55, 5  ;;  %v2940_v34 = vrot.slane %v7422_v5, 5  ;;  %v5395_v39 = vrot.slane %v5379_v16, 9  ;;  %v5381_v63 = vld [vmem:[%s7181_s30 + $0x84] sm:$0xe] }
 0x10d   : > { %5835 = vmatprep.mubr.msk.bf16.mxu1 %vm774_vm4, %v5126_v13  ;;  %v708_v41 = vrot.slane %v707_v22, 4  ;;  %v2944_v42 = vrot.slane %v5315_v31, 5  ;;  %v2947_v24 = vrot.slane %v5316_v21, 5  ;;  %v5144_v62 = vcombine.low %v6575_v54, %v7661_v53  ;;  %v5321_v10 = vld [vmem:[%s7181_s30 + $0x88] sm:$0xf] }
 0x10e   : > { %v718_v18 = vrot.slane %v717_v8, 4  ;;  %v2938_v57 = vsel %vm7451_vm7, %v5394_v15, %v2937_v33  ;;  %v2939_v45 = vrot.slane %v2937_v33, 4  ;;  %v5322_v61 = vld [vmem:[%s7181_s30 + $0x8c] sm:$0x1]  ;;  %v5396_v25 = vrot.slane %v5380_v27, 9 }
 0x10f   : > { %v713_v55 = vsel %vm7229_vm3, %v708_v41, %v712_v26  ;;  %v2945_v5 = vsel %vm7451_vm7, %v5395_v39, %v2944_v42  ;;  %v2946_v50 = vrot.slane %v2944_v42, 4  ;;  %v5324_v3 = vld [vmem:[%s7181_s30 + $0x94] sm:$0xf]  ;;  %v2951_v26 = vrot.slane %v7665_v56, 5  ;;  %v5325_v22 = vld [vmem:[%s7181_s30 + $0x98] sm:$0x1] }
 0x110   : > { %v723_v51 = vsel %vm7229_vm3, %v718_v18, %v722_v60  ;;  %v2941_v47 = vsel %vm7451_vm7, %v2939_v45, %v2940_v34  ;;  %v2954_v2 = vrot.slane %v7668_v1, 5  ;;  %v5397_v31 = vrot.slane %v5381_v63, 9  ;;  %v5382_v60 = vld [vmem:[%s7181_s30 + $0x90] sm:$0xe]  ;;  %v5327_v34 = vld [vmem:[%s7181_s30 + $0xa0] sm:$0xf] }
 0x111   : > { %v5127_v46 = vcombine.low %v713_v55, %v723_v51  ;;  %v5411_v7 = vcombine.low %v2938_v57, %v2941_v47  ;;  %v2948_v9 = vsel %vm7451_vm7, %v2946_v50, %v2947_v24  ;;  %v2958_v21 = vrot.slane %v5321_v10, 5  ;;  %v6577_v39 = vld [vmem:[%s7181_s30 + $0xc] sm:$0xf]  ;;  %v7689_v41 = vld [vmem:[%s7181_s30 + $0x10] sm:$0xf] }
 0x112   : > { %v5412_v16 = vcombine.low %v2945_v5, %v2948_v9  ;;  %v2961_v13 = vrot.slane %v5322_v61, 5  ;;  %v2952_v15 = vsel %vm7451_vm7, %v5396_v25, %v2951_v26  ;;  %v2953_v8 = vrot.slane %v2951_v26, 4  ;;  %v5328_v57 = vld [vmem:[%s7181_s30 + $0xa4] sm:$0x1]  ;;  %v5383_v45 = vld [vmem:[%s7181_s30 + $0x9c] sm:$0xe] }
 0x113   : > { %5836 = vmatmul.mubr.msk.bf16.gmra.mrb[28].mxu1 %vm774_vm4, %v5127_v46  ;;  %5990 = vmatmul.mubr.msk.bf16.gmra.mrb[12].mxu0 %vm774_vm4, %v5411_v7  ;;  %v2965_v33 = vrot.slane %v5324_v3, 5  ;;  %v5145_v42 = vcombine.low %v6577_v39, %v7689_v41  ;;  %v2959_v24 = vsel %vm7451_vm7, %v5397_v31, %v2958_v21  ;;  %v2960_v18 = vrot.slane %v2958_v21, 4  ;;  %v6579_v5 = vld [vmem:[%s7181_s30 + $0x18] sm:$0xf]  ;;  %v7700_v50 = vld [vmem:[%s7181_s30 + $0x1c] sm:$0xf] }
 0x114   : > { %5841 = vmatprep.mubr.msk.bf16.mxu1 %vm774_vm4, %v5144_v62  ;;  %5993 = vmatprep.mubr.msk.bf16.mxu0 %vm774_vm4, %v5412_v16  ;;  %v2955_v55 = vsel %vm7451_vm7, %v2953_v8, %v2954_v2  ;;  %v5146_v27 = vcombine.low %v6579_v5, %v7700_v50  ;;  %v5398_v51 = vrot.slane %v5382_v60, 9  ;;  %v2968_v47 = vrot.slane %v5325_v22, 5  ;;  %v5330_v7 = vld [vmem:[%s7181_s30 + $0xac] sm:$0xf]  ;;  %v5333_v9 = vld [vmem:[%s7181_s30 + $0xb8] sm:$0xf] }
 0x115   : > { %v5413_v54 = vcombine.low %v2952_v15, %v2955_v55  ;;  %v2962_v62 = vsel %vm7451_vm7, %v2960_v18, %v2961_v13  ;;  %v2967_v63 = vrot.slane %v2965_v33, 4  ;;  %v2972_v46 = vrot.slane %v5327_v34, 5  ;;  %v7710_v26 = vld [vmem:[%s7191_s9 + $0xc] sm:$0xf]  ;;  %v5331_v31 = vld [vmem:[%s7181_s30 + $0xb0] sm:$0x1] }
 0x116   : > { %v1542_v10 = vsel %vm823_vm0, %v7411_v49, 0  ;;  %v5414_v61 = vcombine.low %v2959_v24, %v2962_v62  ;;  %v5399_v16 = vrot.slane %v5383_v45, 9  ;;  %v2975_v25 = vrot.slane %v5328_v57, 5  ;;  %v5384_v60 = vld [vmem:[%s7181_s30 + $0xa8] sm:$0xe] }
 0x117   : > { %v2974_v3 = vrot.slane %v2972_v46, 4  ;;  %v2966_v49 = vsel %vm7451_vm7, %v5398_v51, %v2965_v33  ;;  %v2969_v2 = vsel %vm7451_vm7, %v2967_v63, %v2968_v47  ;;  %v2979_v21 = vrot.slane %v5330_v7, 5  ;;  %v5334_v8 = vld [vmem:[%s7181_s30 + $0xbc] sm:$0x1]  ;;  %v5385_v33 = vld [vmem:[%s7181_s30 + $0xb4] sm:$0xe] }
 0x118   : > { %v2973_v13 = vsel %vm7451_vm7, %v5399_v16, %v2972_v46  ;;  %v2986_v15 = vrot.slane %v5333_v9, 5  ;;  %v6581_v34 = vld [vmem:[%s7181_s30 + $0x24] sm:$0xf]  ;;  %v7732_v39 = vld [vmem:[%s7181_s30 + $0x28] sm:$0xf]  ;;  %v5415_v24 = vcombine.low %v2966_v49, %v2969_v2  ;;  %v2982_v47 = vrot.slane %v5331_v31, 5 }
 0x119   : > { %v2976_v22 = vsel %vm7451_vm7, %v2974_v3, %v2975_v25  ;;  %v6583_v18 = vld [vmem:[%s7181_s30 + $0x30] sm:$0xf]  ;;  %v7737_v57 = vld [vmem:[%s7181_s30 + $0x34] sm:$0xf]  ;;  %v5336_v55 = vld [vmem:[%s7181_s30 + $0xc4] sm:$0xf] }
 0x11a   : > { %v5148_v45 = vcombine.low %v6583_v18, %v7737_v57  ;;  %v5416_v5 = vcombine.low %v2973_v13, %v2976_v22  ;;  %v2981_v51 = vrot.slane %v2979_v21, 4  ;;  %v2988_v62 = vrot.slane %v2986_v15, 4  ;;  %v5337_v16 = vld [vmem:[%s7181_s30 + $0xc8] sm:$0x1]  ;;  %v5386_v25 = vld [vmem:[%s7181_s30 + $0xc0] sm:$0xe] }
 0x11b   : > { %5842 = vmatmul.mubr.msk.bf16.vlgmr.msra.gmra.mrb[0].mxu1 %vm774_vm4, %v5145_v42  ;;  %5994 = vmatmul.mubr.msk.bf16.gmra.mrb[16].mxu0 %vm774_vm4, %v5413_v54  ;;  %v5147_v42 = vcombine.low %v6581_v34, %v7732_v39  ;;  %v5401_v54 = vrot.slane %v5385_v33, 9  ;;  %v2989_v63 = vrot.slane %v5334_v8, 5  ;;  %v2993_v9 = vrot.slane %v5336_v55, 5  ;;  %v6585_v3 = vld [vmem:[%s7181_s30 + $0x3c] sm:$0xf] }
 0x11c   : > { %5874 = vmatpush3.bf16.msra.mxu1 %v1542_v10  ;;  %5845 = vmatprep.mubr.msk.bf16.mxu1 %vm774_vm4, %v5146_v27  ;;  %v5400_v27 = vrot.slane %v5384_v60, 9  ;;  %v2983_v7 = vsel %vm7451_vm7, %v2981_v51, %v2982_v47  ;;  %v7757_v49 = vld [vmem:[%s7181_s30 + $0x40] sm:$0xf]  ;;  %v5402_v22 = vrot.slane %v5386_v25, 9  ;;  %v2996_v8 = vrot.slane %v5337_v16, 5  ;;  %v6538_v25 = vld [vmem:[%s7181_s30 + $0x24] sm:$0xff]  }
 0x11d   : > { %5997 = vmatprep.mubr.msk.bf16.mxu0 %vm774_vm4, %v5414_v61  ;;  %6372 = vmatprep.subr.msk.bf16.mxu1 %vm823_vm0, %v7710_v26  ;;  %v2987_v10 = vsel %vm7451_vm7, %v5401_v54, %v2986_v15  ;;  %v2990_v61 = vsel %vm7451_vm7, %v2988_v62, %v2989_v63  ;;  %v5149_v2 = vcombine.low %v6585_v3, %v7757_v49  ;;  %v2995_v60 = vrot.slane %v2993_v9, 4  ;;  %v1281_v51 = vld [vmem:[%s7181_s30 + $0xc] sm:$0xe]  ;;  %v7786_v47 = vld [vmem:[%s7181_s30 + $0x8] sm:$0x1] }
 0x11e   : > { %v2980_v46 = vsel %vm7451_vm7, %v5400_v27, %v2979_v21  ;;  %v5150_v21 = vcombine.low %v7358_v11, %v7366_v35  ;;  %v5418_v13 = vcombine.low %v2987_v10, %v2990_v61  ;;  %v2370_v15 = vshll.u32 %v7665_v56, 16  ;;  %v1282_v63 = vld [vmem:[%s7181_s30 + $0x18] sm:$0xe]  ;;  %v1283_v61 = vld [vmem:[%s7181_s30 + $0x24] sm:$0xe] }
 0x11f   : > { %v5417_v31 = vcombine.low %v2980_v46, %v2983_v7  ;;  %v2374_v33 = vshrl.u32 %v7665_v56, 16  ;;  %v2994_v11 = vsel %vm7451_vm7, %v5402_v22, %v2993_v9  ;;  %v2997_v35 = vsel %vm7451_vm7, %v2995_v60, %v2996_v8  ;;  %v1284_v16 = vld [vmem:[%s7181_s30 + $0x30] sm:$0xe] }
 0x120   : > { %v7772_v34 = vrot.slane %v2370_v15, 5  ;;  %v5152_v18 = vcombine.low %v7428_v17, %v7431_v23  ;;  %v1340_v27 = vrot.slane %v7689_v41, 5  ;;  %v1280_v23 = vld [vmem:[%s7181_s30] sm:$0xe]  ;;  %v5153_v54 = vcombine.low %v7446_v59, %v7461_v28 }
 0x121   : > { %v2376_v56 = vrot.slane %v2374_v33, 4  ;;  %v1333_v62 = vrot.slane %v7661_v53, 5  ;;  %v4182_v46 = vsel %vm823_vm0, %v7520_v44, 0  ;;  %v5177_v7 = vrot.slane %v1281_v51, 9  ;;  %v1285_v53 = vld [vmem:[%s7181_s30 + $0x3c] sm:$0xe] }
 0x122   : > { %9147 = vst [vmem:[#allocation22_spill] sm:$0xff] %v7772_v34  ;;  %v1342_v9 = vrot.slane %v1340_v27, 4  ;;  %v1347_v10 = vrot.slane %v7700_v50, 5  ;;  %v5154_v3 = vcombine.low %v7481_v58, %v7484_v48  ;;  %v5155_v59 = vcombine.low %v7505_v12, %v7515_v38  ;;  %v7820_v58 = vld [vmem:[%s7191_s9 + $0x20] sm:$0xf] }
 0x123   : > { %5846 = vmatmul.mubr.msk.bf16.gmra.mrb[4].mxu1 %vm774_vm4, %v5147_v42  ;;  %5998 = vmatmul.mubr.msk.bf16.gmra.mrb[20].mxu0 %vm774_vm4, %v5415_v24  ;;  %v5151_v42 = vcombine.low %v7391_v20, %v7397_v29  ;;  %v5419_v24 = vcombine.low %v2994_v11, %v2997_v35  ;;  %v2377_v55 = vor.u32 %v2376_v56, %v7772_v34  ;;  %v1336_v20 = vrot.slane %v7786_v47, 5  ;;  %v6588_v29 = vld [vmem:[%s7181_s30 + $0x14] sm:$0x1]  ;;  %v6589_v33 = vld [vmem:[%s7181_s30 + $0x20] sm:$0x1] }
 0x124   : > { %5849 = vmatprep.mubr.msk.bf16.mxu1 %vm774_vm4, %v5148_v45  ;;  %6001 = vmatprep.mubr.msk.bf16.mxu0 %vm774_vm4, %v5416_v5  ;;  %v6536_v45 = vld [vmem:[%s7181_s30 + $0x18] sm:$0xff]   ;;  %v2380_v5 = vshll.u32 %v7668_v1, 16  ;;  %v1343_v17 = vrot.slane %v6588_v29, 5  ;;  %v5156_v28 = vcombine.low %v7532_v43, %v7546_v32  ;;  %v1354_v44 = vrot.slane %v7732_v39, 5  ;;  %v6590_v56 = vld [vmem:[%s7181_s30 + $0x2c] sm:$0x1] }
 0x125   : > { %v7793_v1 = vrot.slane %v2377_v55, 4  ;;  %v1335_v60 = vrot.slane %v1333_v62, 4  ;;  %v1368_v39 = vrot.slane %v7757_v49, 5  ;;  %v7829_v8 = vsel %vm7451_vm7, %v5177_v7, %v1340_v27  ;;  %v1286_v27 = vld [vmem:[%s7181_s30 + $0x48] sm:$0xe] }
 0x126   : > { %v7795_v41 = vrot.slane %v2380_v5, 5  ;;  %v7833_v15 = vsel %vm7451_vm7, %v1342_v9, %v1343_v17  ;;  %v1350_v11 = vrot.slane %v6589_v33, 5  ;;  %v5179_v49 = vrot.slane %v1283_v61, 9  ;;  %v6592_v51 = vld [vmem:[%s7181_s30 + $0x4c] sm:$0xf]  ;;  %v6542_v17 = vld [vmem:[%s7181_s30 + $0x3c] sm:$0xff]  }
 0x127   : > { %9148 = vst [vmem:[#allocation23_spill] sm:$0xff] %v7793_v1  ;;  %v1356_v35 = vrot.slane %v1354_v44, 4  ;;  %v5181_v5 = vrot.slane %v1285_v53, 9  ;;  %v1375_v29 = vrot.slane %v6592_v51, 5  ;;  %v7860_v9 = vsel %vm7451_vm7, %v1335_v60, %v1336_v20  ;;  %v6594_v60 = vld [vmem:[%s7181_s30 + $0x50] sm:$0x1] }
 0x128   : > { %9149 = vst [vmem:[#allocation24_spill] sm:$0xff] %v7795_v41  ;;  %v7877_v47 = vsel %vm7451_vm7, %v5179_v49, %v1354_v44  ;;  %v5182_v53 = vrot.slane %v1286_v27, 9  ;;  %v5504_v12 = vld [vmem:[%s7181_s30 + $0x24] sm:$0xf]  ;;  %v6596_v51 = vld [vmem:[%s7181_s30 + $0x5c] sm:$0x1] }
 0x129   : > { %v1377_v44 = vrot.slane %v1375_v29, 4  ;;  %v5503_v43 = vld [vmem:[%s7181_s30 + $0x20] sm:$0x1]  ;;  %v5505_v32 = vld [vmem:[%s7181_s30 + $0x28] sm:$0xf] }
 0x12a   : > { %v8138_v34 = vld [vmem:[%s7181_s30 + $0x64] sm:$0xf] }
 0x12b   : > { %5850 = vmatmul.mubr.msk.bf16.gmra.mrb[8].mxu1 %vm774_vm4, %v5149_v2  ;;  %6002 = vmatmul.mubr.msk.bf16.gmra.mrb[24].mxu0 %vm774_vm4, %v5417_v31  ;;  %v6540_v2 = vld [vmem:[%s7181_s30 + $0x30] sm:$0xff]   ;;  %v5176_v31 = vrot.slane %v1280_v23, 9  ;;  %9162 = vst [vmem:[#allocation31_spill] sm:$0xff] %v8138_v34 }
 0x12c   : > { %5853 = vmatprep.mubr.msk.bf16.mxu1 %vm774_vm4, %v5150_v21  ;;  %6005 = vmatprep.mubr.msk.bf16.mxu0 %vm774_vm4, %v5418_v13  ;;  %v5178_v21 = vrot.slane %v1282_v63, 9  ;;  %v1361_v13 = vrot.slane %v7737_v57, 5  ;;  %v1349_v57 = vrot.slane %v1347_v10, 4  ;;  %v1370_v63 = vrot.slane %v1368_v39, 4 }
 0x12d   : > { %v7847_v23 = vsel %vm7451_vm7, %v5176_v31, %v1333_v62 }
 0x12e   : > { %v7870_v61 = vsel %vm7451_vm7, %v1349_v57, %v1350_v11  ;;  %v1378_v57 = vrot.slane %v6594_v60, 5  ;;  %v3727_v60 = vshll.u32 %v5504_v12, 16 }
 0x130   : > { %v3729_v50 = vrot.slane %v3727_v60, 5  ;;  %v7994_v60 = vld [vmem:[%s7181_s30 + $0x38] sm:$0x1] }
 0x131   : > { %9153 = vst [vmem:[#allocation26_spill] sm:$0xff] %v7994_v60 }
 0x133   : > { %5854 = vmatmul.mubr.msk.bf16.gmra.mrb[12].mxu1 %vm774_vm4, %v5151_v42  ;;  %6006 = vmatmul.mubr.msk.bf16.gmra.mrb[28].mxu0 %vm774_vm4, %v5419_v24  ;;  %v1357_v42 = vrot.slane %v6590_v56, 5  ;;  %v5180_v24 = vrot.slane %v1284_v16, 9  ;;  %v1287_v16 = vld [vmem:[%s7181_s30 + $0x54] sm:$0xe] }
 0x134   : > { %5857 = vmatprep.mubr.msk.bf16.mxu1 %vm774_vm4, %v5152_v18  ;;  %6011 = vmatprep.mubr.msk.bf16.mxu0 %vm774_vm4, %v6536_v45  ;;  %v1363_v18 = vrot.slane %v1361_v13, 4  ;;  %v6591_v45 = vld [vmem:[%s7181_s30 + $0x38] sm:$0x1] }
 0x135   : > { %v1364_v55 = vrot.slane %v6591_v45, 5  ;;  %v7881_v20 = vsel %vm7451_vm7, %v1356_v35, %v1357_v42  ;;  %v3733_v45 = vshll.u32 %v5505_v32, 16 }
 0x137   : > { %v7890_v31 = vsel %vm7451_vm7, %v1363_v18, %v1364_v55  ;;  %v7919_v55 = vsel %vm7451_vm7, %v5182_v53, %v1375_v29  ;;  %v1385_v29 = vrot.slane %v6596_v51, 5  ;;  %v1289_v51 = vld [vmem:[%s7181_s30 + $0x6c] sm:$0xe]  ;;  %v6548_v18 = vld [vmem:[%s7181_s30 + $0x60] sm:$0xff]  }
 0x13b   : > { %5858 = vmatmul.mubr.msk.bf16.gmra.mrb[16].mxu1 %vm774_vm4, %v5153_v54  ;;  %6012 = vmatmul.mubr.msk.bf16.vlgmr.msra.gmra.mrb[0].mxu0 %vm774_vm4, %v6538_v25  ;;  %v7851_v54 = vsel %vm823_vm0, %v7710_v26, 0  ;;  %v7866_v26 = vsel %vm7451_vm7, %v5178_v21, %v1347_v10  ;;  %v5501_v25 = vld [vmem:[%s7181_s30 + $0x18] sm:$0xf]  ;;  %v7885_v10 = vsel %vm7451_vm7, %v5180_v24, %v1361_v13  ;;  %v7894_v21 = vsel %vm7451_vm7, %v5181_v5, %v1368_v39  ;;  %v7906_v39 = vld [vmem:[%s7181_s30 + $0x60] sm:$0xe] }
 0x13c   : > { %6044 = vmatpush3.bf16.msra.mxu0 %v4182_v46  ;;  %5861 = vmatprep.mubr.msk.bf16.mxu1 %vm774_vm4, %v5154_v3  ;;  %v6593_v46 = vld [vmem:[%s7181_s30 + $0x44] sm:$0x1]  ;;  %v6544_v3 = vld [vmem:[%s7181_s30 + $0x48] sm:$0xff]   ;;  %v5183_v13 = vrot.slane %v1287_v16, 9  ;;  %v3700_v11 = vshrl.u32 %v5501_v25, 16  ;;  %v3703_v49 = vshll.u32 %v5501_v25, 16  ;;  %v9165_v4 = vcombine.low %v7885_v10, %v7890_v31 }
 0x13d   : > { %6015 = vmatprep.mubr.msk.bf16.mxu0 %vm774_vm4, %v6540_v2  ;;  %v1371_v7 = vrot.slane %v6593_v46, 5  ;;  %6378 = vmatprep.subr.msk.bf16.mxu0 %vm823_vm0, %v7820_v58  ;;  %v5502_v2 = vld [vmem:[%s7181_s30 + $0x1c] sm:$0xf]  ;;  %v6595_v5 = vld [vmem:[%s7181_s30 + $0x58] sm:$0xf] }
 0x13e   : > { %v3709_v42 = vshll.u32 %v5502_v2, 16  ;;  %v3713_v24 = vshrl.u32 %v5502_v2, 16  ;;  %v1382_v27 = vrot.slane %v6595_v5, 5  ;;  %v6546_v46 = vld [vmem:[%s7181_s30 + $0x54] sm:$0xff]   ;;  %v3702_v16 = vrot.slane %v3700_v11, 4 }
 0x13f   : > { %v7899_v33 = vsel %vm7451_vm7, %v1370_v63, %v1371_v7  ;;  %v5184_v7 = vrot.slane %v7906_v39, 9  ;;  %v3705_v25 = vrot.slane %v3703_v49, 5  ;;  %v6599_v39 = vld [vmem:[%s7181_s30 + $0x68] sm:$0x1] }
 0x140   : > { %v7945_v53 = vrot.slane %v3709_v42, 5  ;;  %v3715_v2 = vrot.slane %v3713_v24, 4  ;;  %v1384_v5 = vrot.slane %v1382_v27, 4  ;;  %v1392_v11 = vrot.slane %v6599_v39, 5  ;;  %v6600_v39 = vld [vmem:[%s7181_s30 + $0x74] sm:$0x1] }
 0x141   : > { %v3706_v35 = vor.u32 %v3705_v25, %v3702_v16  ;;  %v3719_v42 = vshll.u32 %v5503_v43, 16  ;;  %v7959_v16 = vrot.slane %v3733_v45, 5  ;;  %v9151_v25 = vcombine.low %v7581_v37, %v7594_v19  ;;  %v7975_v45 = vld [vmem:[%s7181_s30 + $0x2c] sm:$0x1] }
 0x142   : > { %9152 = vst [vmem:[#allocation25_spill] sm:$0xff] %v7975_v45 }
 0x143   : > { %5862 = vmatmul.mubr.msk.bf16.gmra.mrb[20].mxu1 %vm774_vm4, %v5155_v59  ;;  %6016 = vmatmul.mubr.msk.bf16.gmra.mrb[4].mxu0 %vm774_vm4, %v6542_v17  ;;  %v7932_v59 = vsel %vm7451_vm7, %v1377_v44, %v1378_v57  ;;  %v6597_v17 = vld [vmem:[%s7181_s30 + $0x64] sm:$0xf]  ;;  %v3724_v44 = vshrl.u32 %v5504_v12, 16  ;;  %v5508_v57 = vld [vmem:[%s7181_s30 + $0x34] sm:$0xf]  ;;  %v3716_v12 = vor.u32 %v3715_v2, %v7945_v53 }
 0x144   : > { %5865 = vmatprep.mubr.msk.bf16.mxu1 %vm774_vm4, %v5156_v28  ;;  %6019 = vmatprep.mubr.msk.bf16.mxu0 %vm774_vm4, %v6544_v3  ;;  %v1389_v63 = vrot.slane %v6597_v17, 5  ;;  %v7941_v28 = vsel %vm7451_vm7, %v5183_v13, %v1382_v27  ;;  %v5507_v3 = vld [vmem:[%s7181_s30 + $0x30] sm:$0xf]  ;;  %v3737_v13 = vshrl.u32 %v5505_v32, 16  ;;  %v3757_v22 = vshll.u32 %v5508_v57, 16 }
 0x145   : > { %v6598_v17 = vld [vmem:[%s7181_s30 + $0x70] sm:$0xf]  ;;  %v3748_v62 = vshrl.u32 %v5507_v3, 16  ;;  %v3751_v49 = vshll.u32 %v5507_v3, 16  ;;  %v3761_v24 = vshrl.u32 %v5508_v57, 16  ;;  %v5185_v27 = vrot.slane %v1289_v51, 9 }
 0x146   : > { %v1396_v38 = vrot.slane %v6598_v17, 5  ;;  %v1391_v56 = vrot.slane %v1389_v63, 4  ;;  %v3726_v48 = vrot.slane %v3724_v44, 4  ;;  %v9150_v32 = vcombine.low %v7563_v52, %v7566_v0  ;;  %v6601_v51 = vld [vmem:[%s7181_s30 + $0x7c] sm:$0xf] }
 0x147   : > { %v1399_v3 = vrot.slane %v6600_v39, 5  ;;  %v3739_v43 = vrot.slane %v3737_v13, 4  ;;  %v7968_v52 = vsel %vm7451_vm7, %v1384_v5, %v1385_v29  ;;  %v7972_v0 = vsel %vm7451_vm7, %v5184_v7, %v1389_v63  ;;  %v1290_v5 = vld [vmem:[%s7181_s30 + $0x78] sm:$0xe]  ;;  %v5510_v39 = vld [vmem:[%s7181_s30 + $0x3c] sm:$0xf] }
 0x148   : > { %v1398_v17 = vrot.slane %v1396_v38, 4  ;;  %v3753_v37 = vrot.slane %v3751_v49, 5  ;;  %v7979_v19 = vsel %vm7451_vm7, %v1391_v56, %v1392_v11  ;;  %v7983_v2 = vrot.slane %v3757_v22, 5  ;;  %v6550_v56 = vld [vmem:[%s7181_s30 + $0x6c] sm:$0xff]  }
 0x149   : > { %v3763_v29 = vrot.slane %v3761_v24, 4  ;;  %v7985_v44 = vrot.slane %v3716_v12, 4  ;;  %v7987_v63 = vrot.slane %v3719_v42, 5  ;;  %v7991_v7 = vsel %vm7451_vm7, %v5185_v27, %v1396_v38  ;;  %v6551_v38 = vld [vmem:[%s7181_s30 + $0x78] sm:$0xff]   ;;  %v1291_v27 = vld [vmem:[%s7181_s30 + $0x84] sm:$0xe] }
 0x14a   : > { %v3740_v22 = vor.u32 %v3739_v43, %v7959_v16  ;;  %v3743_v57 = vshll.u32 %v7975_v45, 16  ;;  %v1403_v13 = vrot.slane %v6601_v51, 5  ;;  %v3767_v12 = vshll.u32 %v7994_v60, 16  ;;  %v6603_v51 = vld [vmem:[%s7181_s30 + $0x80] sm:$0x1] }
 0x14b   : > { %5866 = vmatmul.mubr.msk.bf16.gmra.mrb[24].mxu1 %vm774_vm4, %v9150_v32  ;;  %6020 = vmatmul.mubr.msk.bf16.gmra.mrb[8].mxu0 %vm774_vm4, %v6546_v46  ;;  %v3750_v46 = vrot.slane %v3748_v62, 4  ;;  %v3730_v62 = vor.u32 %v3729_v50, %v3726_v48  ;;  %v3764_v24 = vor.u32 %v3763_v29, %v7983_v2  ;;  %v6602_v32 = vld [vmem:[%s7181_s30 + $0x88] sm:$0xf]  ;;  %v6604_v43 = vld [vmem:[%s7181_s30 + $0x8c] sm:$0x1] }
 0x14c   : > { %5869 = vmatprep.mubr.msk.bf16.mxu1 %vm774_vm4, %v9151_v25  ;;  %6023 = vmatprep.mubr.msk.bf16.mxu0 %vm774_vm4, %v6548_v18  ;;  %v7981_v18 = vrot.slane %v3706_v35, 4  ;;  %v7999_v35 = vsel %vm7451_vm7, %v1398_v17, %v1399_v3  ;;  %v1410_v17 = vrot.slane %v6602_v32, 5  ;;  %v3722_v3 = vsel %vm7229_vm3, %v7985_v44, %v7987_v63  ;;  %v8034_v44 = vld [vmem:[%s7181_s30 + $0x40] sm:$0xf] }
 0x14d   : > { %v3754_v49 = vor.u32 %v3753_v37, %v3750_v46  ;;  %v3731_v25 = vrot.slane %v3730_v62, 4  ;;  %v9154_v46 = vcombine.low %v7613_v40, %v7619_v14  ;;  %v3741_v37 = vrot.slane %v3740_v22, 4  ;;  %9155 = vst [vmem:[#allocation27_spill] sm:$0xff] %v8034_v44 }
 0x14e   : > { %v3712_v42 = vsel %vm7229_vm3, %v7981_v18, %v7945_v53  ;;  %v5186_v53 = vrot.slane %v1290_v5, 9  ;;  %v3745_v18 = vrot.slane %v3743_v57, 5  ;;  %v1405_v29 = vrot.slane %v1403_v13, 4  ;;  %v5513_v5 = vld [vmem:[%s7181_s30 + $0x48] sm:$0xf] }
 0x14f   : > { %v1406_v32 = vrot.slane %v6603_v51, 5  ;;  %v9156_v63 = vcombine.low %v7847_v23, %v7860_v9  ;;  %v3755_v40 = vrot.slane %v3754_v49, 4  ;;  %v5187_v62 = vrot.slane %v1291_v27, 9  ;;  %v8053_v27 = vld [vmem:[%s7181_s30 + $0x4c] sm:$0xf] }
 0x150   : > { %v3775_v22 = vshll.u32 %v5510_v39, 16  ;;  %v3765_v57 = vrot.slane %v3764_v24, 4  ;;  %v1412_v51 = vrot.slane %v1410_v17, 4  ;;  %v1413_v11 = vrot.slane %v6604_v43, 5  ;;  %v6552_v24 = vld [vmem:[%s7181_s30 + $0x84] sm:$0xff]  }
 0x151   : > { %v3736_v23 = vsel %vm7229_vm3, %v3731_v25, %v7959_v16  ;;  %v8048_v9 = vsel %vm7451_vm7, %v5186_v53, %v1403_v13  ;;  %v3785_v49 = vshrl.u32 %v8034_v44, 16  ;;  %v3796_v43 = vshrl.u32 %v5513_v5, 16  ;;  %v8070_v53 = vld [vmem:[%s7181_s30 + $0x44] sm:$0x1] }
 0x152   : > { %v3799_v16 = vshll.u32 %v5513_v5, 16  ;;  %v3760_v13 = vsel %vm7229_vm3, %v3755_v40, %v7983_v2  ;;  %v8067_v25 = vsel %vm7451_vm7, %v5187_v62, %v1410_v17  ;;  %9157 = vst [vmem:[#allocation28_spill] sm:$0xff] %v8070_v53  ;;  %v3777_v48 = vrot.slane %v3775_v22, 5  ;;  %v5516_v22 = vld [vmem:[%s7181_s30 + $0x54] sm:$0xf] }
 0x153   : > { %5870 = vmatmul.mubr.msk.bf16.gmra.mrb[28].mxu1 %vm774_vm4, %v9154_v46  ;;  %6024 = vmatmul.mubr.msk.bf16.gmra.mrb[12].mxu0 %vm774_vm4, %v6550_v56  ;;  %v3772_v56 = vshrl.u32 %v5510_v39, 16  ;;  %v3769_v46 = vrot.slane %v3767_v12, 5  ;;  %v3746_v12 = vsel %vm7229_vm3, %v3741_v37, %v3745_v18  ;;  %v8060_v39 = vsel %vm7451_vm7, %v1405_v29, %v1406_v32  ;;  %v6553_v37 = vld [vmem:[%s7181_s30 + $0x90] sm:$0xff]  }
 0x154   : > { %5875 = vmatprep.mubr.msk.bf16.mxu1 %vm774_vm4, %v9156_v63  ;;  %6027 = vmatprep.mubr.msk.bf16.mxu0 %vm774_vm4, %v6551_v38  ;;  %v3781_v38 = vshll.u32 %v8034_v44, 16  ;;  %v8077_v29 = vsel %vm7451_vm7, %v1412_v51, %v1413_v11  ;;  %v3805_v32 = vshll.u32 %v8053_v27, 16  ;;  %v3809_v2 = vshrl.u32 %v8053_v27, 16  ;;  %v1293_v11 = vld [vmem:[%s7181_s30 + $0x9c] sm:$0xe] }
 0x155   : > { %v3774_v63 = vrot.slane %v3772_v56, 4  ;;  %v3770_v18 = vsel %vm7229_vm3, %v3765_v57, %v3769_v46  ;;  %v8081_v40 = vcombine.low %v3712_v42, %v3722_v3  ;;  %v8083_v17 = vcombine.low %v3736_v23, %v3746_v12  ;;  %v8097_v46 = vld [vmem:[%s7181_s30 + $0x58] sm:$0xf]  ;;  %v6605_v12 = vld [vmem:[%s7191_s9 + $0x10] sm:$0xf] }
 0x156   : > { %v8085_v62 = vrot.slane %v3781_v38, 5  ;;  %v3787_v56 = vrot.slane %v3785_v49, 4  ;;  %v9158_v5 = vcombine.low %v7829_v8, %v7833_v15  ;;  %v3791_v42 = vshll.u32 %v8070_v53, 16  ;;  %9159 = vst [vmem:[#allocation29_spill] sm:$0xff] %v8097_v46  ;;  %v1292_v49 = vld [vmem:[%s7181_s30 + $0x90] sm:$0xe] }
 0x157   : > { %v3798_v3 = vrot.slane %v3796_v43, 4  ;;  %v3801_v57 = vrot.slane %v3799_v16, 5  ;;  %v9160_v8 = vcombine.low %v7866_v26, %v7870_v61  ;;  %v8106_v15 = vsel %vm823_vm0, %v7820_v58, 0  ;;  %v5519_v58 = vld [vmem:[%s7181_s30 + $0x60] sm:$0xf] }
 0x158   : > { %v8108_v51 = vcombine.low %v3760_v13, %v3770_v18  ;;  %v3778_v38 = vor.u32 %v3777_v48, %v3774_v63  ;;  %v3811_v26 = vrot.slane %v3809_v2, 4  ;;  %v3820_v61 = vshrl.u32 %v5516_v22, 16  ;;  %v6606_v48 = vld [vmem:[%s7181_s30 + $0x94] sm:$0xf]  ;;  %v8122_v13 = vld [vmem:[%s7181_s30 + $0x50] sm:$0x1] }
 0x159   : > { %v3788_v43 = vor.u32 %v3787_v56, %v8085_v62  ;;  %v1417_v16 = vrot.slane %v6606_v48, 5  ;;  %9161 = vst [vmem:[#allocation30_spill] sm:$0xff] %v8122_v13  ;;  %v3829_v63 = vshll.u32 %v8097_v46, 16  ;;  %v6554_v18 = vld [vmem:[%s7181_s30 + $0x9c] sm:$0xff]   ;;  %v8128_v2 = vrot.slane %v3791_v42, 5 }
 0x15a   : > { %v8131_v56 = vrot.slane %v3778_v38, 4  ;;  %v6608_v23 = vld [vmem:[%s7181_s30 + $0x98] sm:$0x1]  ;;  %v3844_v50 = vshrl.u32 %v5519_v58, 16  ;;  %v3847_v53 = vshll.u32 %v5519_v58, 16  ;;  %v3815_v60 = vshll.u32 %v8122_v13, 16 }
 0x15b   : > { %5876 = vmatmul.mubr.msk.bf16.vlgmr.msra.gmra.mrb[0].mxu1 %vm774_vm4, %v9158_v5  ;;  %6028 = vmatmul.mubr.msk.bf16.gmra.mrb[16].mxu0 %vm774_vm4, %v6552_v24  ;;  %v3823_v24 = vshll.u32 %v5516_v22, 16  ;;  %v5188_v22 = vrot.slane %v1292_v49, 9  ;;  %v3802_v5 = vor.u32 %v3801_v57, %v3798_v3  ;;  %v1420_v48 = vrot.slane %v6608_v23, 5  ;;  %v8141_v49 = vld [vmem:[%s7181_s30 + $0x5c] sm:$0x1] }
 0x15c   : > { %5908 = vmatpush3.bf16.msra.mxu1 %v7851_v54  ;;  %5879 = vmatprep.mubr.msk.bf16.mxu1 %vm774_vm4, %v9160_v8  ;;  %v8114_v54 = vrot.slane %v3805_v32, 5  ;;  %v6555_v32 = vld [vmem:[%s7181_s30 + $0xa8] sm:$0xff]   ;;  %v6607_v8 = vld [vmem:[%s7181_s30 + $0xa0] sm:$0xf]  ;;  %v3822_v45 = vrot.slane %v3820_v61, 4  ;;  %v3789_v3 = vrot.slane %v3788_v43, 4  ;;  %v9164_v23 = vcombine.low %v7877_v47, %v7881_v20 }
 0x15d   : > { %6031 = vmatprep.mubr.msk.bf16.mxu0 %vm774_vm4, %v6553_v37  ;;  %6374 = vmatprep.subr.msk.bf16.mxu1 %vm823_vm0, %v6605_v12  ;;  %v3833_v37 = vshrl.u32 %v8097_v46, 16  ;;  %v1424_v12 = vrot.slane %v6607_v8, 5  ;;  %v3825_v42 = vrot.slane %v3823_v24, 5  ;;  %v1419_v57 = vrot.slane %v1417_v16, 4  ;;  %9163 = vst [vmem:[#allocation32_spill] sm:$0xff] %v8141_v49 }
 0x15e   : > { %v3812_v44 = vor.u32 %v3811_v26, %v8114_v54  ;;  %v8143_v38 = vrot.slane %v3829_v63, 5  ;;  %v3803_v26 = vrot.slane %v3802_v5, 4  ;;  %v5189_v58 = vrot.slane %v1293_v11, 9  ;;  %v6609_v24 = vld [vmem:[%s7181_s30 + $0xa4] sm:$0x1] }
 0x15f   : > { %v3835_v8 = vrot.slane %v3833_v37, 4  ;;  %v1426_v61 = vrot.slane %v1424_v12, 4  ;;  %v1427_v43 = vrot.slane %v6609_v24, 5  ;;  %v3846_v47 = vrot.slane %v3844_v50, 4  ;;  %v1294_v50 = vld [vmem:[%s7181_s30 + $0xa8] sm:$0xe] }
 0x160   : > { %v3849_v20 = vrot.slane %v3847_v53, 5  ;;  %v3853_v63 = vshll.u32 %v8138_v34, 16  ;;  %v3857_v37 = vshrl.u32 %v8138_v34, 16  ;;  %v3813_v11 = vrot.slane %v3812_v44, 4  ;;  %v6610_v53 = vld [vmem:[%s7181_s30 + $0xac] sm:$0xf] }
 0x161   : > { %v3826_v5 = vor.u32 %v3825_v42, %v3822_v45  ;;  %v8165_v10 = vsel %vm7451_vm7, %v5188_v22, %v1417_v16  ;;  %v3836_v31 = vor.u32 %v3835_v8, %v8143_v38  ;;  %v1431_v44 = vrot.slane %v6610_v53, 5  ;;  %v8186_v22 = vld [vmem:[%s7181_s30 + $0x68] sm:$0x1]  ;;  %v8320_v34 = vld [vmem:[%s7181_s30 + $0x98] sm:$0x1] }
 0x162   : > { %v3794_v45 = vsel %vm7229_vm3, %v3789_v3, %v8128_v2  ;;  %v8183_v16 = vsel %vm7451_vm7, %v5189_v58, %v1424_v12  ;;  %9167 = vst [vmem:[#allocation34_spill] sm:$0xff] %v8186_v22  ;;  %v8191_v42 = vsel %vm7451_vm7, %v1426_v61, %v1427_v43  ;;  %v3850_v2 = vor.u32 %v3849_v20, %v3846_v47  ;;  %v1295_v58 = vld [vmem:[%s7181_s30 + $0xb4] sm:$0xe]  ;;  %v6611_v61 = vld [vmem:[%s7181_s30 + $0xb0] sm:$0x1] }
 0x163   : > { %5880 = vmatmul.mubr.msk.bf16.gmra.mrb[4].mxu1 %vm774_vm4, %v9164_v23  ;;  %6032 = vmatmul.mubr.msk.bf16.gmra.mrb[20].mxu0 %vm774_vm4, %v6554_v18  ;;  %v3817_v18 = vrot.slane %v3815_v60, 5  ;;  %v3839_v23 = vshll.u32 %v8141_v49, 16  ;;  %v8176_v60 = vsel %vm7451_vm7, %v1419_v57, %v1420_v48  ;;  %9166 = vst [vmem:[#allocation33_spill] sm:$0xff] %v8183_v16  ;;  %9168 = vst [vmem:[#allocation35_spill] sm:$0xff] %v8191_v42  ;;  %v8193_v3 = vrot.slane %v3853_v63, 5 }
 0x164   : > { %5883 = vmatprep.mubr.msk.bf16.mxu1 %vm774_vm4, %v9165_v4  ;;  %6035 = vmatprep.mubr.msk.bf16.mxu0 %vm774_vm4, %v6555_v32  ;;  %v3784_v4 = vsel %vm7229_vm3, %v8131_v56, %v8085_v62  ;;  %v6556_v32 = vld [vmem:[%s7181_s30 + $0xb4] sm:$0xff]   ;;  %v3808_v62 = vsel %vm7229_vm3, %v3803_v26, %v8114_v54  ;;  %v6557_v56 = vld [vmem:[%s7181_s30 + $0xc0] sm:$0xff]   ;;  %v3859_v48 = vrot.slane %v3857_v37, 4  ;;  %v5522_v57 = vld [vmem:[%s7181_s30 + $0x6c] sm:$0xf]  ;;  %v8198_v8 = vrot.slane %v3826_v5, 4 }
 0x165   : > { %v3818_v54 = vsel %vm7229_vm3, %v3813_v11, %v3817_v18  ;;  %v8200_v26 = vrot.slane %v3839_v23, 5  ;;  %v5190_v12 = vrot.slane %v1294_v50, 9  ;;  %v8203_v24 = vrot.slane %v3836_v31, 4  ;;  %v8226_v31 = vld [vmem:[%s7181_s30 + $0x70] sm:$0xf] }
 0x166   : > { %v1433_v53 = vrot.slane %v1431_v44, 4  ;;  %v1434_v43 = vrot.slane %v6611_v61, 5  ;;  %v3863_v47 = vshll.u32 %v8186_v22, 16  ;;  %v9169_v20 = vcombine.low %v7894_v21, %v7899_v33  ;;  %9171 = vst [vmem:[#allocation36_spill] sm:$0xff] %v8226_v31  ;;  %v6558_v50 = vld [vmem:[%s7181_s30 + $0xcc] sm:$0xff]  }
 0x167   : > { %v8212_v63 = vcombine.low %v3784_v4, %v3794_v45  ;;  %v3868_v11 = vshrl.u32 %v5522_v57, 16  ;;  %v3871_v18 = vshll.u32 %v5522_v57, 16  ;;  %v9170_v5 = vcombine.low %v7919_v55, %v7932_v59  ;;  %v8254_v57 = vld [vmem:[%s7181_s30 + $0x7c] sm:$0xf] }
 0x168   : > { %v8221_v21 = vrot.slane %v3850_v2, 4  ;;  %v3860_v33 = vor.u32 %v3859_v48, %v8193_v3  ;;  %v5191_v23 = vrot.slane %v1295_v58, 9  ;;  %v1438_v4 = vrot.slane %v7619_v14, 5  ;;  %9172 = vst [vmem:[#allocation37_spill] sm:$0xff] %v8254_v57  ;;  %v8283_v48 = vld [vmem:[%s7181_s30 + $0x94] sm:$0xf] }
 0x169   : > { %v8239_v45 = vsel %vm7451_vm7, %v5190_v12, %v1431_v44  ;;  %v8250_v2 = vrot.slane %v3863_v47, 5  ;;  %v5528_v44 = vld [vmem:[%s7181_s30 + $0x84] sm:$0xf]  ;;  %v8259_v12 = vrot.slane %v3871_v18, 5  ;;  %v3877_v58 = vshll.u32 %v8226_v31, 16  ;;  %9175 = vst [vmem:[#allocation40_spill] sm:$0xff] %v8283_v48 }
 0x16a   : > { %v3881_v61 = vshrl.u32 %v8226_v31, 16  ;;  %v8274_v47 = vsel %vm7451_vm7, %v5191_v23, %v1438_v4  ;;  %v8277_v18 = vld [vmem:[%s7181_s30 + $0x74] sm:$0x1]  ;;  %v3901_v14 = vshll.u32 %v8254_v57, 16  ;;  %v3905_v37 = vshrl.u32 %v8254_v57, 16 }
 0x16b   : > { %5884 = vmatmul.mubr.msk.bf16.gmra.mrb[8].mxu1 %vm774_vm4, %v9169_v20  ;;  %6036 = vmatmul.mubr.msk.bf16.gmra.mrb[24].mxu0 %vm774_vm4, %v6556_v32  ;;  %v8229_v32 = vcombine.low %v3808_v62, %v3818_v54  ;;  %v8248_v62 = vsel %vm7451_vm7, %v1433_v53, %v1434_v43  ;;  %v8257_v54 = vrot.slane %v3868_v11, 4  ;;  %v8264_v20 = vld [vmem:[%s7181_s30 + $0x88] sm:$0xf]  ;;  %v8270_v43 = vrot.slane %v3860_v33, 4  ;;  %9174 = vst [vmem:[#allocation39_spill] sm:$0xff] %v8277_v18 }
 0x16c   : > { %5887 = vmatprep.mubr.msk.bf16.mxu1 %vm774_vm4, %v9170_v5  ;;  %6039 = vmatprep.mubr.msk.bf16.mxu0 %vm774_vm4, %v6557_v56  ;;  %v5525_v56 = vld [vmem:[%s7181_s30 + $0x78] sm:$0xf]  ;;  %9173 = vst [vmem:[#allocation38_spill] sm:$0xff] %v8264_v20  ;;  %v1440_v11 = vrot.slane %v1438_v4, 4  ;;  %v5531_v5 = vld [vmem:[%s7181_s30 + $0x90] sm:$0xf]  ;;  %v9176_v4 = vcombine.low %v7941_v28, %v7968_v52 }
 0x16d   : > { %v3892_v55 = vshrl.u32 %v5525_v56, 16  ;;  %v3895_v59 = vshll.u32 %v5525_v56, 16  ;;  %v3916_v53 = vshrl.u32 %v5528_v44, 16  ;;  %v3919_v33 = vshll.u32 %v5528_v44, 16  ;;  %v5534_v31 = vld [vmem:[%s7181_s30 + $0x9c] sm:$0xf] }
 0x16e   : > { %v3925_v1 = vshll.u32 %v8264_v20, 16  ;;  %v3929_v23 = vshrl.u32 %v8264_v20, 16  ;;  %v3874_v56 = vor.u32 %v8259_v12, %v8257_v54  ;;  %v8294_v41 = vrot.slane %v3877_v58, 5  ;;  %v8307_v12 = vld [vmem:[%s7181_s30 + $0xa0] sm:$0xf] }
 0x16f   : > { %v3883_v44 = vrot.slane %v3881_v61, 4  ;;  %v3887_v57 = vshll.u32 %v8277_v18, 16  ;;  %v9177_v20 = vcombine.low %v7972_v0, %v7979_v19  ;;  %v3940_v28 = vshrl.u32 %v5531_v5, 16  ;;  %9178 = vst [vmem:[#allocation41_spill] sm:$0xff] %v8307_v12  ;;  %v8310_v58 = vld [vmem:[%s7181_s30 + $0x80] sm:$0x1] }
 0x170   : > { %v3943_v52 = vshll.u32 %v5531_v5, 16  ;;  %v3953_v54 = vshrl.u32 %v8283_v48, 16  ;;  %v3894_v61 = vrot.slane %v3892_v55, 4  ;;  %v8312_v18 = vrot.slane %v3901_v14, 5  ;;  %v8315_v19 = vld [vmem:[%s7181_s30 + $0x8c] sm:$0x1] }
 0x171   : > { %v3907_v0 = vrot.slane %v3905_v37, 4  ;;  %v8317_v22 = vrot.slane %v3925_v1, 5  ;;  %v3931_v5 = vrot.slane %v3929_v23, 4  ;;  %v3964_v49 = vshrl.u32 %v5534_v31, 16 }
 0x172   : > { %v3973_v42 = vshll.u32 %v8307_v12, 16  ;;  %v3977_v16 = vshrl.u32 %v8307_v12, 16  ;;  %v3942_v55 = vrot.slane %v3940_v28, 4  ;;  %v3955_v37 = vrot.slane %v3953_v54, 4 }
 0x173   : > { %5888 = vmatmul.mubr.msk.bf16.gmra.mrb[12].mxu1 %vm774_vm4, %v9176_v4  ;;  %6040 = vmatmul.mubr.msk.bf16.gmra.mrb[28].mxu0 %vm774_vm4, %v6558_v50  ;;  %v3949_v50 = vshll.u32 %v8283_v48, 16  ;;  %v3897_v4 = vrot.slane %v3895_v59, 5  ;;  %v3967_v48 = vshll.u32 %v5534_v31, 16  ;;  %v3945_v59 = vrot.slane %v3943_v52, 5 }
 0x174   : > { %5891 = vmatprep.mubr.msk.bf16.mxu1 %vm774_vm4, %v9177_v20  ;;  %6045 = vmatprep.mubr.msk.bf16.mxu0 %vm774_vm4, %v8081_v40  ;;  %v3918_v20 = vrot.slane %v3916_v53, 4  ;;  %v3921_v40 = vrot.slane %v3919_v33, 5  ;;  %v3884_v46 = vor.u32 %v3883_v44, %v8294_v41  ;;  %v3908_v1 = vor.u32 %v3907_v0, %v8312_v18 }
 0x175   : > { %v8324_v14 = vrot.slane %v3949_v50, 5  ;;  %v3898_v53 = vor.u32 %v3897_v4, %v3894_v61  ;;  %v3911_v33 = vshll.u32 %v8310_v58, 16  ;;  %v3932_v31 = vor.u32 %v3931_v5, %v8317_v22  ;;  %v5537_v4 = vld [vmem:[%s7181_s30 + $0xa8] sm:$0xf] }
 0x176   : > { %v3922_v23 = vor.u32 %v3921_v40, %v3918_v20  ;;  %v3935_v13 = vshll.u32 %v8315_v19, 16  ;;  %v3959_v12 = vshll.u32 %v8320_v34, 16  ;;  %v9179_v28 = vcombine.low %v7991_v7, %v7999_v35 }
 0x177   : > { %v3966_v44 = vrot.slane %v3964_v49, 4  ;;  %v3969_v52 = vrot.slane %v3967_v48, 5  ;;  %v8338_v50 = vrot.slane %v3973_v42, 5  ;;  %v3979_v54 = vrot.slane %v3977_v16, 4  ;;  %v8353_v42 = vld [vmem:[%s7181_s30 + $0xa4] sm:$0x1] }
 0x178   : > { %v9180_v61 = vcombine.low %v8048_v9, %v8060_v39  ;;  %v9181_v7 = vrot.slane %v7624_v36, 5  ;;  %v3946_v49 = vor.u32 %v3945_v59, %v3942_v55  ;;  %v3956_v48 = vor.u32 %v3955_v37, %v8324_v14  ;;  %v8361_v59 = vld [vmem:[%s7181_s30 + $0xac] sm:$0xf] }
 0x179   : > { %v3885_v9 = vrot.slane %v3884_v46, 4  ;;  %v3899_v39 = vrot.slane %v3898_v53, 4  ;;  %v3913_v16 = vrot.slane %v3911_v33, 5  ;;  %v3909_v36 = vrot.slane %v3908_v1, 4 }
 0x17a   : > { %v8349_v35 = vsel %vm7451_vm7, %v1440_v11, %v9181_v7  ;;  %v3923_v0 = vrot.slane %v3922_v23, 4  ;;  %v3933_v20 = vrot.slane %v3932_v31, 4  ;;  %v3937_v11 = vrot.slane %v3935_v13, 5 }
 0x17b   : > { %5892 = vmatmul.mubr.msk.bf16.gmra.mrb[16].mxu1 %vm774_vm4, %v9179_v28  ;;  %6046 = vmatmul.mubr.msk.bf16.vlgmr.msra.gmra.mrb[0].mxu0 %vm774_vm4, %v8083_v17  ;;  %v3889_v17 = vrot.slane %v3887_v57, 5  ;;  %v3961_v40 = vrot.slane %v3959_v12, 5  ;;  %v3970_v57 = vor.u32 %v3969_v52, %v3966_v44  ;;  %v3980_v5 = vor.u32 %v3979_v54, %v8338_v50 }
 0x17c   : > { %6078 = vmatpush3.bf16.msra.mxu0 %v8106_v15  ;;  %5895 = vmatprep.mubr.msk.bf16.mxu1 %vm774_vm4, %v9180_v61  ;;  %v3875_v15 = vrot.slane %v3874_v56, 4  ;;  %v3983_v55 = vshll.u32 %v8353_v42, 16  ;;  %v3947_v37 = vrot.slane %v3946_v49, 4  ;;  %v3957_v28 = vrot.slane %v3956_v48, 4 }
 0x17d   : > { %6049 = vmatprep.mubr.msk.bf16.mxu0 %vm774_vm4, %v8108_v51  ;;  %v3988_v51 = vshrl.u32 %v5537_v4, 16  ;;  %v3991_v56 = vshll.u32 %v5537_v4, 16  ;;  %v3866_v46 = vsel %vm7229_vm3, %v8270_v43, %v8250_v2  ;;  %v3890_v12 = vsel %vm7229_vm3, %v3885_v9, %v3889_v17  ;;  %v5587_v9 = vld [vmem:[%s7181_s30 + $0x54] sm:$0xe] }
 0x17e   : > { %v3880_v13 = vsel %vm7229_vm3, %v3875_v15, %v8294_v41  ;;  %v3904_v53 = vsel %vm7229_vm3, %v3899_v39, %v8312_v18  ;;  %v3914_v1 = vsel %vm7229_vm3, %v3909_v36, %v3913_v16  ;;  %v3928_v33 = vsel %vm7229_vm3, %v3923_v0, %v8317_v22 }
 0x17f   : > { %v3997_v2 = vshll.u32 %v8361_v59, 16  ;;  %v4001_v43 = vshrl.u32 %v8361_v59, 16  ;;  %v9182_v41 = vcombine.low %v8067_v25, %v8077_v29  ;;  %v3938_v18 = vsel %vm7229_vm3, %v3933_v20, %v3937_v11 }
 0x180   : > { %v3971_v23 = vrot.slane %v3970_v57, 4  ;;  %v3981_v31 = vrot.slane %v3980_v5, 4  ;;  %v3985_v22 = vrot.slane %v3983_v55, 5  ;;  %v9183_v44 = vcombine.low %v8165_v10, %v8176_v60 }
 0x181   : > { %v3952_v25 = vsel %vm7229_vm3, %v3947_v37, %v8324_v14  ;;  %v3962_v29 = vsel %vm7229_vm3, %v3957_v28, %v3961_v40  ;;  %v8403_v52 = vrot.slane %v3991_v56, 5  ;;  %v9184_v10 = vsel %vm7229_vm3, %v8203_v24, %v8200_v26  ;;  %v8425_v26 = vld [vmem:[%s7181_s30 + $0xb0] sm:$0x1]  ;;  %v5540_v24 = vld [vmem:[%s7181_s30 + $0xb4] sm:$0xf]  ;;  %v9188_v28 = vld [vmem:[#allocation29_spill] sm:$0xff] }
 0x182   : > { %v9185_v60 = vsel %vm7229_vm3, %v8198_v8, %v8143_v38  ;;  %v5207_v14 = vcombine.low %v8239_v45, %v8248_v62  ;;  %v9186_v54 = vsel %vm7229_vm3, %v8221_v21, %v8193_v3  ;;  %v5208_v7 = vcombine.low %v8274_v47, %v8349_v35  ;;  %v8435_v45 = vld [vmem:[%s7181_s30 + $0xb8] sm:$0xf]  ;;  %v5586_v62 = vld [vmem:[%s7181_s30 + $0x48] sm:$0xe]  ;;  %v5589_v56 = vld [vmem:[%s7181_s30 + $0x6c] sm:$0xe] }
 0x183   : > { %5896 = vmatmul.mubr.msk.bf16.gmra.mrb[20].mxu1 %vm774_vm4, %v9182_v41  ;;  %6050 = vmatmul.mubr.msk.bf16.gmra.mrb[4].mxu0 %vm774_vm4, %v8212_v63  ;;  %v8401_v63 = vrot.slane %v3988_v51, 4  ;;  %v5556_v61 = vcombine.low %v9186_v54, %v3866_v46  ;;  %v8428_v17 = vcombine.low %v3880_v13, %v3890_v12  ;;  %v8430_v38 = vcombine.low %v3904_v53, %v3914_v1  ;;  %v9187_v40 = vld [vmem:[#allocation30_spill] sm:$0xff]  ;;  %v9189_v46 = vld [vmem:[#allocation33_spill] sm:$0xff]  ;;  %v9190_v13 = vld [vmem:[#allocation35_spill] sm:$0xff] }
 0x184   : > { %5899 = vmatprep.mubr.msk.bf16.mxu1 %vm774_vm4, %v9183_v44  ;;  %6053 = vmatprep.mubr.msk.bf16.mxu0 %vm774_vm4, %v8229_v32  ;;  %v5555_v32 = vcombine.low %v9185_v60, %v9184_v10  ;;  %v8432_v8 = vrot.slane %v3997_v2, 5  ;;  %v4003_v49 = vrot.slane %v4001_v43, 4  ;;  %v8438_v48 = vcombine.low %v3928_v33, %v3938_v18  ;;  %v9192_v33 = vld [vmem:[#allocation32_spill] sm:$0xff] }
 0x185   : > { %v8440_v3 = vcombine.low %v3952_v25, %v3962_v29  ;;  %v3976_v21 = vsel %vm7229_vm3, %v3971_v23, %v8338_v50  ;;  %v3986_v15 = vsel %vm7229_vm3, %v3981_v31, %v3985_v22  ;;  %v3994_v39 = vor.u32 %v8403_v52, %v8401_v63  ;;  %v5588_v50 = vld [vmem:[%s7181_s30 + $0x60] sm:$0xe]  ;;  %v9193_v23 = vld [vmem:[#allocation31_spill] sm:$0xff]  ;;  %v8547_v47 = vld [vmem:[%s7181_s30 + $0xbc] sm:$0x1] }
 0x186   : > { %v4007_v16 = vshll.u32 %v8425_v26, 16  ;;  %v4012_v4 = vshrl.u32 %v5540_v24, 16  ;;  %v4015_v36 = vshll.u32 %v5540_v24, 16  ;;  %v4021_v0 = vshll.u32 %v8435_v45, 16  ;;  %v5543_v22 = vld [vmem:[%s7181_s30 + $0xc0] sm:$0xf] }
 0x187   : > { %v5602_v20 = vrot.slane %v5586_v62, 9  ;;  %v4471_v11 = vrot.slane %v8053_v27, 5  ;;  %v4474_v57 = vrot.slane %v9187_v40, 5  ;;  %v8455_v5 = vcombine.low %v3976_v21, %v3986_v15  ;;  %v9194_v25 = vld [vmem:[#allocation34_spill] sm:$0xff]  ;;  %v9195_v52 = vld [vmem:[#allocation36_spill] sm:$0xff]  ;;  %v9196_v21 = vld [vmem:[#allocation39_spill] sm:$0xff] }
 0x188   : > { %v4004_v55 = vor.u32 %v4003_v49, %v8432_v8  ;;  %v5603_v37 = vrot.slane %v5587_v9, 9  ;;  %v4478_v51 = vrot.slane %v9188_v28, 5  ;;  %v9191_v12 = vcombine.low %v9189_v46, %v9190_v13  ;;  %v6559_v9 = vld [vmem:[%s7181_s30 + $0xc] sm:$0xff]  }
 0x189   : > { %v4025_v27 = vshrl.u32 %v8435_v45, 16  ;;  %v8468_v53 = vsel %vm7451_vm7, %v5602_v20, %v4471_v11  ;;  %v4473_v1 = vrot.slane %v4471_v11, 4  ;;  %v4481_v2 = vrot.slane %v9192_v33, 5  ;;  %v5591_v33 = vld [vmem:[%s7181_s30 + $0x84] sm:$0xe] }
 0x18a   : > { %v8475_v43 = vsel %vm7451_vm7, %v5603_v37, %v4478_v51  ;;  %v4480_v41 = vrot.slane %v4478_v51, 4  ;;  %v5604_v18 = vrot.slane %v5588_v50, 9  ;;  %v4485_v31 = vrot.slane %v9193_v23, 5  ;;  %v5590_v50 = vld [vmem:[%s7181_s30 + $0x78] sm:$0xe] }
 0x18b   : > { %5900 = vmatmul.mubr.msk.bf16.gmra.mrb[24].mxu1 %vm774_vm4, %v9191_v12  ;;  %6054 = vmatmul.mubr.msk.bf16.gmra.mrb[8].mxu0 %vm774_vm4, %v5555_v32  ;;  %v8481_v44 = vsel %vm7451_vm7, %v4473_v1, %v4474_v57  ;;  %v4488_v29 = vrot.slane %v9194_v25, 5  ;;  %v5605_v63 = vrot.slane %v5589_v56, 9  ;;  %v4492_v10 = vrot.slane %v9195_v52, 5  ;;  %v9197_v1 = vld [vmem:[#allocation37_spill] sm:$0xff]  ;;  %v9198_v23 = vld [vmem:[#allocation24_spill] sm:$0xff] }
 0x18c   : > { %5903 = vmatprep.mubr.msk.bf16.mxu1 %vm774_vm4, %v5207_v14  ;;  %6057 = vmatprep.mubr.msk.bf16.mxu0 %vm774_vm4, %v5556_v61  ;;  %v5619_v60 = vcombine.low %v8468_v53, %v8481_v44  ;;  %v8489_v32 = vsel %vm7451_vm7, %v4480_v41, %v4481_v2  ;;  %v8493_v14 = vsel %vm7451_vm7, %v5604_v18, %v4485_v31  ;;  %v4487_v54 = vrot.slane %v4485_v31, 4  ;;  %v8496_v61 = vld [vmem:[%s7181_s30 + $0xc4] sm:$0xf]  ;;  %v9199_v31 = vld [vmem:[#allocation23_spill] sm:$0xff] }
 0x18d   : > { %v5620_v24 = vcombine.low %v8475_v43, %v8489_v32  ;;  %v8502_v49 = vsel %vm7451_vm7, %v5605_v63, %v4492_v10  ;;  %v4494_v62 = vrot.slane %v4492_v10, 4  ;;  %v4495_v15 = vrot.slane %v9196_v21, 5  ;;  %v6560_v63 = vld [vmem:[%s7181_s30 + $0x18] sm:$0xff]  }
 0x18e   : > { %v8506_v20 = vrot.slane %v4007_v16, 5  ;;  %v8508_v11 = vrot.slane %v4012_v4, 4  ;;  %v4036_v40 = vshrl.u32 %v5543_v22, 16  ;;  %v8512_v57 = vsel %vm7451_vm7, %v4487_v54, %v4488_v29  ;;  %v5317_v4 = vld [vmem:[%s7181_s30 + $0x78] sm:$0xf]  ;;  %v9200_v54 = vld [vmem:[#allocation38_spill] sm:$0xff] }
 0x18f   : > { %v8515_v37 = vrot.slane %v3994_v39, 4  ;;  %v8517_v28 = vrot.slane %v4015_v36, 5  ;;  %v5621_v51 = vcombine.low %v8493_v14, %v8512_v57  ;;  %v8523_v16 = vsel %vm7451_vm7, %v4494_v62, %v4495_v15  ;;  %v6561_v15 = vld [vmem:[%s7181_s30 + $0x24] sm:$0xff]  }
 0x190   : > { %v8526_v56 = vrot.slane %v4004_v55, 4  ;;  %v8528_v46 = vrot.slane %v4021_v0, 5  ;;  %v4039_v13 = vshll.u32 %v5543_v22, 16  ;;  %v5622_v39 = vcombine.low %v8502_v49, %v8523_v16  ;;  %v5329_v57 = vld [vmem:[%s7181_s30 + $0xa8] sm:$0xf] }
 0x191   : > { %v8538_v36 = vrot.slane %v4025_v27, 4  ;;  %v4045_v12 = vshll.u32 %v8496_v61, 16  ;;  %v5606_v55 = vrot.slane %v5590_v50, 9  ;;  %v4499_v0 = vrot.slane %v9197_v1, 5  ;;  %v5546_v50 = vld [vmem:[%s7181_s30 + $0xcc] sm:$0xf] }
 0x192   : > { %v4038_v35 = vrot.slane %v4036_v40, 4  ;;  %v2364_v27 = vshll.u32 %v5317_v4, 16  ;;  %v4049_v2 = vshrl.u32 %v8496_v61, 16  ;;  %v4041_v22 = vrot.slane %v4039_v13, 5 }
 0x193   : > { %5904 = vmatmul.mubr.msk.bf16.gmra.mrb[28].mxu1 %vm774_vm4, %v5208_v7  ;;  %6058 = vmatmul.mubr.msk.bf16.gmra.mrb[12].mxu0 %vm774_vm4, %v8428_v17  ;;  %v4502_v7 = vrot.slane %v8310_v58, 5  ;;  %v2361_v17 = vshrl.u32 %v5317_v4, 16  ;;  %v8553_v41 = vsel %vm7451_vm7, %v5606_v55, %v4499_v0  ;;  %v4501_v18 = vrot.slane %v4499_v0, 4  ;;  %v8576_v4 = vld [vmem:[%s7181_s30 + $0xd0] sm:$0xf] }
 0x194   : > { %5909 = vmatprep.mubr.msk.bf16.mxu1 %vm774_vm4, %v6559_v9  ;;  %6061 = vmatprep.mubr.msk.bf16.mxu0 %vm774_vm4, %v8430_v38  ;;  %v2383_v38 = vsel %vm7229_vm3, %v9199_v31, %v9198_v23  ;;  %v2366_v58 = vrot.slane %v2364_v27, 5  ;;  %v5607_v29 = vrot.slane %v5591_v33, 9  ;;  %v4031_v52 = vshll.u32 %v8547_v47, 16 }
 0x195   : > { %v2363_v25 = vrot.slane %v2361_v17, 4  ;;  %v8563_v10 = vsel %vm7451_vm7, %v4501_v18, %v4502_v7  ;;  %v4506_v62 = vrot.slane %v9200_v54, 5  ;;  %v4509_v21 = vrot.slane %v8315_v19, 5  ;;  %v5592_v7 = vld [vmem:[%s7181_s30 + $0x90] sm:$0xe] }
 0x196   : > { %v4000_v9 = vsel %vm7229_vm3, %v8515_v37, %v8432_v8  ;;  %v4018_v40 = vor.u32 %v8517_v28, %v8508_v11  ;;  %v5623_v13 = vcombine.low %v8553_v41, %v8563_v10  ;;  %v8580_v1 = vrot.slane %v4045_v12, 5  ;;  %v8594_v37 = vld [vmem:[%s7181_s30 + $0xc8] sm:$0x1] }
 0x197   : > { %v2367_v55 = vor.u32 %v2366_v58, %v2363_v25  ;;  %v4051_v0 = vrot.slane %v4049_v2, 4  ;;  %v8584_v19 = vsel %vm7451_vm7, %v5607_v29, %v4506_v62  ;;  %v4508_v33 = vrot.slane %v4506_v62, 4  ;;  %v6562_v29 = vld [vmem:[%s7181_s30 + $0x30] sm:$0xff]  }
 0x198   : > { %v4010_v8 = vsel %vm7229_vm3, %v8526_v56, %v8506_v20  ;;  %v4028_v11 = vor.u32 %v8538_v36, %v8528_v46  ;;  %v4042_v28 = vor.u32 %v4041_v22, %v4038_v35  ;;  %v4060_v17 = vshrl.u32 %v5546_v50, 16  ;;  %v9201_v56 = vld [vmem:[#allocation21_spill] sm:$0xff]  ;;  %v9202_v35 = vld [vmem:[#allocation22_spill] sm:$0xff]  ;;  %v9203_v62 = vld [vmem:[#allocation40_spill] sm:$0xff] }
 0x199   : > { %v2368_v12 = vrot.slane %v2367_v55, 4  ;;  %v4063_v27 = vshll.u32 %v5546_v50, 16  ;;  %v4069_v2 = vshll.u32 %v8576_v4, 16  ;;  %v8602_v20 = vsel %vm7451_vm7, %v4508_v33, %v4509_v21 }
 0x19a   : > { %v4073_v36 = vshrl.u32 %v8576_v4, 16  ;;  %v5608_v23 = vrot.slane %v5592_v7, 9  ;;  %v4033_v31 = vrot.slane %v4031_v52, 5  ;;  %v4052_v22 = vor.u32 %v4051_v0, %v8580_v1  ;;  %v8624_v52 = vld [vmem:[%s7181_s30 + $0xd4] sm:$0x1] }
 0x19b   : > { %5910 = vmatmul.mubr.msk.bf16.vlgmr.msra.gmra.mrb[0].mxu1 %vm774_vm4, %v6560_v63  ;;  %6062 = vmatmul.mubr.msk.bf16.gmra.mrb[16].mxu0 %vm774_vm4, %v8438_v48  ;;  %v2373_v18 = vsel %vm7229_vm3, %v2368_v12, %v9202_v35  ;;  %v5624_v48 = vcombine.low %v8584_v19, %v8602_v20  ;;  %v4055_v25 = vshll.u32 %v8594_v37, 16  ;;  %v5562_v63 = vcombine.low %v4000_v9, %v4010_v8  ;;  %v6563_v12 = vld [vmem:[%s7181_s30 + $0x3c] sm:$0xff]   ;;  %v6627_v19 = vld [vmem:[%s7181_s30 + $0xc4] sm:$0xf] }
 0x19c   : > { %6112 = vmatpush3.bf16.msra.mxu1 %v9201_v56  ;;  %5913 = vmatprep.mubr.msk.bf16.mxu1 %vm774_vm4, %v6561_v15  ;;  %v8616_v58 = vcombine.low %v2373_v18, %v2383_v38  ;;  %v4019_v54 = vrot.slane %v4018_v40, 4  ;;  %v4513_v21 = vrot.slane %v9203_v62, 5  ;;  %v4516_v15 = vrot.slane %v8320_v34, 5  ;;  %v5594_v62 = vld [vmem:[%s7181_s30 + $0xa8] sm:$0xe] }
 0x19d   : > { %6065 = vmatprep.mubr.msk.bf16.mxu0 %vm774_vm4, %v8440_v3  ;;  %v4029_v50 = vrot.slane %v4028_v11, 4  ;;  %v4043_v55 = vrot.slane %v4042_v28, 4  ;;  %v4062_v33 = vrot.slane %v4060_v17, 4  ;;  %v4065_v7 = vrot.slane %v4063_v27, 5  ;;  %v5593_v3 = vld [vmem:[%s7181_s30 + $0x9c] sm:$0xe] }
 0x19e   : > { %v8626_v0 = vrot.slane %v4069_v2, 5  ;;  %v4075_v56 = vrot.slane %v4073_v36, 4  ;;  %v8630_v38 = vsel %vm7451_vm7, %v5608_v23, %v4513_v21  ;;  %v4515_v9 = vrot.slane %v4513_v21, 4  ;;  %v9204_v2 = vld [vmem:[#allocation41_spill] sm:$0xff] }
 0x19f   : > { %v4053_v40 = vrot.slane %v4052_v22, 4  ;;  %v4057_v8 = vrot.slane %v4055_v25, 5  ;;  %v4024_v34 = vsel %vm7229_vm3, %v4019_v54, %v8528_v46  ;;  %v5609_v28 = vrot.slane %v5593_v3, 9  ;;  %v5582_v23 = vld [vmem:[%s7181_s30 + $0x18] sm:$0xe] }
 0x1a0   : > { %v8637_v11 = vsel %vm7451_vm7, %v4515_v9, %v4516_v15  ;;  %v4034_v17 = vsel %vm7229_vm3, %v4029_v50, %v4033_v31  ;;  %v4079_v27 = vshll.u32 %v8624_v52, 16  ;;  %v4520_v36 = vrot.slane %v9204_v2, 5  ;;  %v6612_v25 = vld [vmem:[%s7181_s30 + $0x1c] sm:$0xf]  ;;  %v6613_v9 = vld [vmem:[%s7181_s30 + $0x20] sm:$0x1] }
 0x1a1   : > { %v5625_v46 = vcombine.low %v8630_v38, %v8637_v11  ;;  %v4066_v35 = vor.u32 %v4065_v7, %v4062_v33  ;;  %v4076_v18 = vor.u32 %v4075_v56, %v8626_v0  ;;  %v4523_v31 = vrot.slane %v8353_v42, 5 }
 0x1a2   : > { %v4058_v22 = vsel %vm7229_vm3, %v4053_v40, %v4057_v8  ;;  %v4522_v54 = vrot.slane %v4520_v36, 4  ;;  %v5563_v21 = vcombine.low %v4024_v34, %v4034_v17  ;;  %v4081_v15 = vrot.slane %v4079_v27, 5  ;;  %v5583_v17 = vld [vmem:[%s7181_s30 + $0x24] sm:$0xe] }
 0x1a3   : > { %5914 = vmatmul.mubr.msk.bf16.gmra.mrb[4].mxu1 %vm774_vm4, %v6562_v29  ;;  %6066 = vmatmul.mubr.msk.bf16.gmra.mrb[20].mxu0 %vm774_vm4, %v8455_v5  ;;  %v4048_v5 = vsel %vm7229_vm3, %v4043_v55, %v8580_v1  ;;  %v4443_v29 = vrot.slane %v6612_v25, 5  ;;  %v6564_v1 = vld [vmem:[%s7181_s30 + $0x48] sm:$0xff]   ;;  %v5598_v50 = vrot.slane %v5582_v23, 9  ;;  %v6565_v55 = vld [vmem:[%s7181_s30 + $0x54] sm:$0xff]   ;;  %v4067_v7 = vrot.slane %v4066_v35, 4 }
 0x1a4   : > { %5917 = vmatprep.mubr.msk.bf16.mxu1 %vm774_vm4, %v6563_v12  ;;  %6069 = vmatprep.mubr.msk.bf16.mxu0 %vm774_vm4, %v5562_v63  ;;  %v8661_v63 = vsel %vm7451_vm7, %v5609_v28, %v4520_v36  ;;  %v8667_v42 = vsel %vm7451_vm7, %v4522_v54, %v4523_v31  ;;  %v5564_v33 = vcombine.low %v4048_v5, %v4058_v22  ;;  %v4077_v3 = vrot.slane %v4076_v18, 4  ;;  %v6614_v36 = vld [vmem:[%s7181_s30 + $0x28] sm:$0xf]  ;;  %v5595_v35 = vld [vmem:[%s7181_s30 + $0xb4] sm:$0xe] }
 0x1a5   : > { %v5626_v12 = vcombine.low %v8661_v63, %v8667_v42  ;;  %v4445_v56 = vrot.slane %v4443_v29, 4  ;;  %v4446_v40 = vrot.slane %v6613_v9, 5  ;;  %v5610_v8 = vrot.slane %v5594_v62, 9  ;;  %v5584_v31 = vld [vmem:[%s7181_s30 + $0x30] sm:$0xe] }
 0x1a6   : > { %v4527_v34 = vrot.slane %v8361_v59, 5  ;;  %v4530_v28 = vrot.slane %v8425_v26, 5  ;;  %v4072_v59 = vsel %vm7229_vm3, %v4067_v7, %v8626_v0  ;;  %v4082_v26 = vsel %vm7229_vm3, %v4077_v3, %v4081_v15  ;;  %v6615_v22 = vld [vmem:[%s7181_s30 + $0x34] sm:$0xf]  ;;  %v9205_v15 = vld [vmem:[#allocation25_spill] sm:$0xff] }
 0x1a7   : > { %v4450_v5 = vrot.slane %v6614_v36, 5  ;;  %v4444_v18 = vsel %vm7451_vm7, %v5598_v50, %v4443_v29  ;;  %v4447_v23 = vsel %vm7451_vm7, %v4445_v56, %v4446_v40  ;;  %v4457_v25 = vrot.slane %v6615_v22, 5 }
 0x1a8   : > { %v8680_v27 = vsel %vm7451_vm7, %v5610_v8, %v4527_v34  ;;  %v4529_v2 = vrot.slane %v4527_v34, 4  ;;  %v5599_v0 = vrot.slane %v5583_v17, 9  ;;  %v5611_v29 = vrot.slane %v5595_v35, 9  ;;  %v9206_v8 = vld [vmem:[#allocation26_spill] sm:$0xff]  ;;  %v5585_v35 = vld [vmem:[%s7181_s30 + $0x3c] sm:$0xe] }
 0x1a9   : > { %v4534_v50 = vrot.slane %v8435_v45, 5  ;;  %v5615_v7 = vcombine.low %v4444_v18, %v4447_v23  ;;  %v4452_v3 = vrot.slane %v4450_v5, 4  ;;  %v5600_v56 = vrot.slane %v5584_v31, 9  ;;  %v9207_v45 = vld [vmem:[#allocation27_spill] sm:$0xff] }
 0x1aa   : > { %v8699_v54 = vsel %vm7451_vm7, %v4529_v2, %v4530_v28  ;;  %v4537_v9 = vrot.slane %v8547_v47, 5  ;;  %v4459_v40 = vrot.slane %v4457_v25, 4  ;;  %v4460_v34 = vrot.slane %v9206_v8, 5  ;;  %v5596_v2 = vld [vmem:[%s7181_s30 + $0xc0] sm:$0xe] }
 0x1ab   : > { %5918 = vmatmul.mubr.msk.bf16.gmra.mrb[8].mxu1 %vm774_vm4, %v6564_v1  ;;  %6070 = vmatmul.mubr.msk.bf16.gmra.mrb[24].mxu0 %vm774_vm4, %v5563_v21  ;;  %v5627_v62 = vcombine.low %v8680_v27, %v8699_v54  ;;  %v6566_v1 = vld [vmem:[%s7181_s30 + $0x60] sm:$0xff]   ;;  %v5565_v21 = vcombine.low %v4072_v59, %v4082_v26  ;;  %v8711_v28 = vsel %vm7451_vm7, %v5611_v29, %v4534_v50  ;;  %v4536_v17 = vrot.slane %v4534_v50, 4  ;;  %v5597_v50 = vld [vmem:[%s7181_s30 + $0xcc] sm:$0xe] }
 0x1ac   : > { %5921 = vmatprep.mubr.msk.bf16.mxu1 %vm774_vm4, %v6565_v55  ;;  %6073 = vmatprep.mubr.msk.bf16.mxu0 %vm774_vm4, %v5564_v33  ;;  %v4453_v55 = vrot.slane %v9205_v15, 5  ;;  %v6567_v33 = vld [vmem:[%s7181_s30 + $0x6c] sm:$0xff]   ;;  %v4464_v59 = vrot.slane %v9207_v45, 5  ;;  %v4451_v26 = vsel %vm7451_vm7, %v5599_v0, %v4450_v5  ;;  %v4458_v23 = vsel %vm7451_vm7, %v5600_v56, %v4457_v25  ;;  %v6568_v5 = vld [vmem:[%s7181_s30 + $0x78] sm:$0xff]  }
 0x1ad   : > { %v8719_v47 = vsel %vm7451_vm7, %v4536_v17, %v4537_v9  ;;  %v4461_v31 = vsel %vm7451_vm7, %v4459_v40, %v4460_v34  ;;  %v5612_v22 = vrot.slane %v5596_v2, 9  ;;  %v4544_v15 = vrot.slane %v8594_v37, 5  ;;  %v6616_v34 = vld [vmem:[%s7181_s30 + $0x70] sm:$0xf] }
 0x1ae   : > { %v4454_v36 = vsel %vm7451_vm7, %v4452_v3, %v4453_v55  ;;  %v5628_v18 = vcombine.low %v8711_v28, %v8719_v47  ;;  %v5601_v55 = vrot.slane %v5585_v35, 9  ;;  %v4466_v29 = vrot.slane %v4464_v59, 4  ;;  %v9208_v3 = vld [vmem:[#allocation28_spill] sm:$0xff] }
 0x1af   : > { %v5616_v0 = vcombine.low %v4451_v26, %v4454_v36  ;;  %v4467_v9 = vrot.slane %v9208_v3, 5  ;;  %v5613_v37 = vrot.slane %v5597_v50, 9  ;;  %v2346_v17 = vshll.u32 %v6616_v34, 16 }
 0x1b0   : > { %v2350_v2 = vshrl.u32 %v6616_v34, 16  ;;  %v4548_v26 = vrot.slane %v8576_v4, 5  ;;  %v4465_v36 = vsel %vm7451_vm7, %v5601_v55, %v4464_v59  ;;  %v6571_v55 = vld [vmem:[%s7181_s30 + $0x9c] sm:$0xff]   ;;  %v5323_v34 = vld [vmem:[%s7181_s30 + $0x90] sm:$0xf]  ;;  %v2514_v20 = vshll.u32 %v6627_v19, 16 }
 0x1b1   : > { %v4468_v35 = vsel %vm7451_vm7, %v4466_v29, %v4467_v9  ;;  %v5320_v29 = vld [vmem:[%s7181_s30 + $0x84] sm:$0xf]  ;;  %v2409_v44 = vshrl.u32 %v5323_v34, 16 }
 0x1b2   : > { %v4550_v4 = vrot.slane %v4548_v26, 4  ;;  %v2385_v6 = vshrl.u32 %v5320_v29, 16  ;;  %v2388_v9 = vshll.u32 %v5320_v29, 16  ;;  %v2516_v38 = vrot.slane %v2514_v20, 5 }
 0x1b3   : > { %5922 = vmatmul.mubr.msk.bf16.gmra.mrb[12].mxu1 %vm774_vm4, %v6566_v1  ;;  %6074 = vmatmul.mubr.msk.bf16.gmra.mrb[28].mxu0 %vm774_vm4, %v5565_v21  ;;  %v5314_v1 = vld [vmem:[%s7181_s30 + $0x6c] sm:$0xf]  ;;  %v4541_v21 = vrot.slane %v8496_v61, 5 }
 0x1b4   : > { %5925 = vmatprep.mubr.msk.bf16.mxu1 %vm774_vm4, %v6567_v33  ;;  %6079 = vmatprep.mubr.msk.bf16.mxu0 %vm774_vm4, %v5615_v7  ;;  %v6569_v33 = vld [vmem:[%s7181_s30 + $0x84] sm:$0xff]   ;;  %v5617_v7 = vcombine.low %v4458_v23, %v4461_v31  ;;  %v2337_v40 = vshrl.u32 %v5314_v1, 16  ;;  %v2340_v8 = vshll.u32 %v5314_v1, 16  ;;  %v4551_v23 = vrot.slane %v8624_v52, 5 }
 0x1b5   : > { %v8743_v25 = vsel %vm7451_vm7, %v5612_v22, %v4541_v21  ;;  %v4543_v56 = vrot.slane %v4541_v21, 4  ;;  %v8764_v1 = vsel %vm7451_vm7, %v5613_v37, %v4548_v26  ;;  %v6570_v21 = vld [vmem:[%s7181_s30 + $0x90] sm:$0xff]  }
 0x1b6   : > { %v2339_v31 = vrot.slane %v2337_v40, 4  ;;  %v2342_v22 = vrot.slane %v2340_v8, 5  ;;  %v8769_v59 = vsel %vm7451_vm7, %v4550_v4, %v4551_v23  ;;  %v5326_v23 = vld [vmem:[%s7181_s30 + $0x9c] sm:$0xf] }
 0x1b7   : > { %v8747_v61 = vsel %vm7451_vm7, %v4543_v56, %v4544_v15  ;;  %v5618_v15 = vcombine.low %v4465_v36, %v4468_v35  ;;  %v5630_v52 = vcombine.low %v8764_v1, %v8769_v59  ;;  %v6618_v56 = vld [vmem:[%s7181_s30 + $0x88] sm:$0xf]  ;;  %v2387_v36 = vrot.slane %v2385_v6, 4 }
 0x1b8   : > { %v5629_v45 = vcombine.low %v8743_v25, %v8747_v61  ;;  %v2343_v50 = vor.u32 %v2342_v22, %v2339_v31  ;;  %v2394_v40 = vshll.u32 %v6618_v56, 16  ;;  %v2398_v8 = vshrl.u32 %v6618_v56, 16  ;;  %v6573_v31 = vld [vmem:[%s7181_s30 + $0xb4] sm:$0xff]  }
 0x1b9   : > { %v2390_v35 = vrot.slane %v2388_v9, 5  ;;  %v2436_v29 = vshll.u32 %v5326_v23, 16 }
 0x1ba   : > { %v2344_v37 = vrot.slane %v2343_v50, 4  ;;  %v8788_v22 = vrot.slane %v2394_v40, 5  ;;  %v2400_v53 = vrot.slane %v2398_v8, 4 }
 0x1bb   : > { %5926 = vmatmul.mubr.msk.bf16.gmra.mrb[16].mxu1 %vm774_vm4, %v6568_v5  ;;  %6080 = vmatmul.mubr.msk.bf16.vlgmr.msra.gmra.mrb[0].mxu0 %vm774_vm4, %v5616_v0  ;;  %v2348_v5 = vrot.slane %v2346_v17, 5  ;;  %v2352_v0 = vrot.slane %v2350_v2, 4  ;;  %v6572_v17 = vld [vmem:[%s7181_s30 + $0xa8] sm:$0xff]   ;;  %v2391_v43 = vor.u32 %v2390_v35, %v2387_v36 }
 0x1bc   : > { %5929 = vmatprep.mubr.msk.bf16.mxu1 %vm774_vm4, %v6569_v33  ;;  %6083 = vmatprep.mubr.msk.bf16.mxu0 %vm774_vm4, %v5617_v7  ;;  %v6617_v7 = vld [vmem:[%s7181_s30 + $0x74] sm:$0x1]  ;;  %v2401_v32 = vor.u32 %v2400_v53, %v8788_v22 }
 0x1bd   : > { %v2353_v33 = vor.u32 %v2352_v0, %v2348_v5  ;;  %v2356_v3 = vshll.u32 %v6617_v7, 16  ;;  %v2349_v4 = vsel %vm7229_vm3, %v2344_v37, %v2348_v5  ;;  %v2438_v37 = vrot.slane %v2436_v29, 5  ;;  %v6624_v29 = vld [vmem:[%s7181_s30 + $0xac] sm:$0xf] }
 0x1be   : > { %v2402_v36 = vrot.slane %v2401_v32, 4 }
 0x1bf   : > { %v2354_v2 = vrot.slane %v2353_v33, 4  ;;  %v2358_v26 = vrot.slane %v2356_v3, 5  ;;  %v6620_v33 = vld [vmem:[%s7181_s30 + $0x8c] sm:$0x1]  ;;  %v6621_v3 = vld [vmem:[%s7181_s30 + $0xa0] sm:$0xf] }
 0x1c0   : > { %v2404_v7 = vshll.u32 %v6620_v33, 16  ;;  %v2442_v5 = vshll.u32 %v6621_v3, 16  ;;  %v2446_v6 = vshrl.u32 %v6621_v3, 16  ;;  %v2470_v33 = vshrl.u32 %v6624_v29, 16 }
 0x1c1   : > { %v2359_v50 = vsel %vm7229_vm3, %v2354_v2, %v2358_v26 }
 0x1c2   : > { %v2406_v2 = vrot.slane %v2404_v7, 5  ;;  %v8811_v26 = vrot.slane %v2442_v5, 5  ;;  %v2448_v14 = vrot.slane %v2446_v6, 4  ;;  %v6625_v6 = vld [vmem:[%s7181_s30 + $0xb8] sm:$0xf] }
 0x1c3   : > { %5930 = vmatmul.mubr.msk.bf16.gmra.mrb[20].mxu1 %vm774_vm4, %v6570_v21  ;;  %6084 = vmatmul.mubr.msk.bf16.gmra.mrb[4].mxu0 %vm774_vm4, %v5618_v15  ;;  %v6619_v21 = vld [vmem:[%s7181_s30 + $0x94] sm:$0xf]  ;;  %v2494_v32 = vshrl.u32 %v6625_v6, 16 }
 0x1c4   : > { %5933 = vmatprep.mubr.msk.bf16.mxu1 %vm774_vm4, %v6571_v55  ;;  %6087 = vmatprep.mubr.msk.bf16.mxu0 %vm774_vm4, %v5619_v60  ;;  %v2412_v60 = vshll.u32 %v5323_v34, 16  ;;  %v2418_v15 = vshll.u32 %v6619_v21, 16  ;;  %v2422_v0 = vshrl.u32 %v6619_v21, 16  ;;  %v2433_v55 = vshrl.u32 %v5326_v23, 16  ;;  %v6574_v34 = vld [vmem:[%s7181_s30 + $0xc0] sm:$0xff]  }
 0x1c5   : > { %v6622_v23 = vld [vmem:[%s7181_s30 + $0x98] sm:$0x1]  ;;  %v2407_v49 = vsel %vm7229_vm3, %v2402_v36, %v2406_v2 }
 0x1c6   : > { %v2414_v9 = vrot.slane %v2412_v60, 5  ;;  %v8808_v56 = vrot.slane %v2418_v15, 5  ;;  %v2424_v40 = vrot.slane %v2422_v0, 4  ;;  %v2435_v8 = vrot.slane %v2433_v55, 4  ;;  %v6623_v60 = vld [vmem:[%s7181_s30 + $0xa4] sm:$0x1] }
 0x1c7   : > { %v2452_v21 = vshll.u32 %v6623_v60, 16  ;;  %v2457_v15 = vshrl.u32 %v5329_v57, 16  ;;  %v5332_v0 = vld [vmem:[%s7181_s30 + $0xb4] sm:$0xf]  ;;  %v2460_v55 = vshll.u32 %v5329_v57, 16  ;;  %v2518_v60 = vshrl.u32 %v6627_v19, 16 }
 0x1c8   : > { %v2425_v53 = vor.u32 %v2424_v40, %v8808_v56  ;;  %v2481_v3 = vshrl.u32 %v5332_v0, 16  ;;  %v2484_v5 = vshll.u32 %v5332_v0, 16  ;;  %v5335_v57 = vld [vmem:[%s7181_s30 + $0xc0] sm:$0xf] }
 0x1c9   : > { %v2454_v41 = vrot.slane %v2452_v21, 5  ;;  %v2459_v10 = vrot.slane %v2457_v15, 4  ;;  %v2462_v40 = vrot.slane %v2460_v55, 5  ;;  %v6628_v15 = vld [vmem:[%s7181_s30 + $0xbc] sm:$0x1]  ;;  %v2520_v11 = vrot.slane %v2518_v60, 4 }
 0x1ca   : > { %v2500_v0 = vshll.u32 %v6628_v15, 16 }
 0x1cb   : > { %5934 = vmatmul.mubr.msk.bf16.gmra.mrb[24].mxu1 %vm774_vm4, %v6572_v17  ;;  %6088 = vmatmul.mubr.msk.bf16.gmra.mrb[8].mxu0 %vm774_vm4, %v5620_v24  ;;  %v2411_v24 = vrot.slane %v2409_v44, 4  ;;  %v5347_v17 = vcombine.low %v2349_v4, %v2359_v50  ;;  %v2439_v44 = vor.u32 %v2438_v37, %v2435_v8  ;;  %v2449_v4 = vor.u32 %v2448_v14, %v8811_v26 }
 0x1cc   : > { %5937 = vmatprep.mubr.msk.bf16.mxu1 %vm774_vm4, %v6573_v31  ;;  %6091 = vmatprep.mubr.msk.bf16.mxu0 %vm774_vm4, %v5621_v51  ;;  %v2392_v51 = vrot.slane %v2391_v43, 4  ;;  %v2428_v31 = vshll.u32 %v6622_v23, 16  ;;  %v2466_v50 = vshll.u32 %v6624_v29, 16  ;;  %v2490_v43 = vshll.u32 %v6625_v6, 16 }
 0x1cd   : > { %v2415_v35 = vor.u32 %v2414_v9, %v2411_v24  ;;  %v2426_v24 = vrot.slane %v2425_v53, 4  ;;  %v2440_v9 = vrot.slane %v2439_v44, 4  ;;  %v2496_v14 = vrot.slane %v2494_v32, 4  ;;  %v6626_v53 = vld [vmem:[%s7181_s30 + $0xb0] sm:$0x1] }
 0x1ce   : > { %v2397_v7 = vsel %vm7229_vm3, %v2392_v51, %v8788_v22  ;;  %v2468_v8 = vrot.slane %v2466_v50, 5  ;;  %v2472_v22 = vrot.slane %v2470_v33, 4  ;;  %v2492_v2 = vrot.slane %v2490_v43, 5  ;;  %v6629_v32 = vld [vmem:[%s7181_s30 + $0xc8] sm:$0x1]  ;;  %s6720_s30 = scalar_lea.vmem %s8989_s3, 4096 }
 0x1cf   : > { %v2416_v16 = vrot.slane %v2415_v35, 4  ;;  %v5349_v37 = vcombine.low %v2397_v7, %v2407_v49  ;;  %v2445_v35 = vsel %vm7229_vm3, %v2440_v9, %v8811_v26  ;;  %v2476_v44 = vshll.u32 %v6626_v53, 16  ;;  %p6721_p13 = scmp.ne.s32.totalorder %s8989_s3, %s6720_s30  ;;  %p6728_p11 = scmp.lt.s32.totalorder %s6726_s29, %s6720_s30 }
 0x1d0   : > { %v2508_v26 = vshll.u32 %v5335_v57, 16  ;;  %v2497_v21 = vor.u32 %v2496_v14, %v2492_v2  ;;  %v2521_v43 = vor.u32 %v2520_v11, %v2516_v38  ;;  %v8910_v14 = vld [vmem:[%s254_s4] ss:$0 sm:$0xff] }
 0x1d1   : > { %v2421_v51 = vsel %vm7229_vm3, %v2416_v16, %v8808_v56  ;;  %v2463_v56 = vor.u32 %v2462_v40, %v2459_v10  ;;  %v2478_v33 = vrot.slane %v2476_v44, 5  ;;  %p6722_p1 = pnand %p6721_p13, %p9211_p10  ;;  %p6729_p8 = por %p6728_p11, %p6727_p9 }
 0x1d2   : > { %v2510_v49 = vrot.slane %v2508_v26, 5  ;;  %v2498_v16 = vrot.slane %v2497_v21, 4  ;;  %v2522_v10 = vrot.slane %v2521_v43, 4 }
 0x1d3   : > { %5938 = vmatmul.mubr.msk.bf16.gmra.mrb[28].mxu1 %vm774_vm4, %v6574_v34  ;;  %6092 = vmatmul.mubr.msk.bf16.gmra.mrb[12].mxu0 %vm774_vm4, %v5622_v39  ;;  %v2430_v39 = vrot.slane %v2428_v31, 5  ;;  %v2483_v34 = vrot.slane %v2481_v3, 4  ;;  %v2473_v31 = vor.u32 %v2472_v22, %v2468_v8  ;;  %v2464_v29 = vrot.slane %v2463_v56, 4  ;;  %p6723_p7 = pneg %p6722_p1 }
 0x1d4   : > { %5959 = vmatprep.mubr.msk.bf16.mxu1 %vm774_vm4, %v5347_v17  ;;  %6095 = vmatprep.mubr.msk.bf16.mxu0 %vm774_vm4, %v5623_v13  ;;  %v2450_v13 = vrot.slane %v2449_v4, 4  ;;  %v2486_v17 = vrot.slane %v2484_v5, 5 }
 0x1d5   : > { %v2431_v36 = vsel %vm7229_vm3, %v2426_v24, %v2430_v39  ;;  %v2474_v50 = vrot.slane %v2473_v31, 4  ;;  %v2502_v39 = vrot.slane %v2500_v0, 5  ;;  %v2469_v3 = vsel %vm7229_vm3, %v2464_v29, %v2468_v8  ;;  %p6730_p2 = pnand %p6729_p8, %p6723_p7 }
 0x1d6   : > { %v2455_v23 = vsel %vm7229_vm3, %v2450_v13, %v2454_v41  ;;  %v5350_v4 = vcombine.low %v2421_v51, %v2431_v36  ;;  %v2524_v24 = vshll.u32 %v6629_v32, 16 }
 0x1d7   : > { %v5351_v55 = vcombine.low %v2445_v35, %v2455_v23  ;;  %v2479_v5 = vsel %vm7229_vm3, %v2474_v50, %v2478_v33  ;;  %v2503_v42 = vsel %vm7229_vm3, %v2498_v16, %v2502_v39 }
 0x1d8   : > { %v2526_v27 = vrot.slane %v2524_v24, 5 }
 0x1db   : > { %5960 = vmatmul.mubr.msk.bf16.vlgmr.msra.gmra.mrb[16].mxu1 %vm774_vm4, %v8616_v58  ;;  %6096 = vmatmul.mubr.msk.bf16.gmra.mrb[16].mxu0 %vm774_vm4, %v5624_v48  ;;  %v2505_v58 = vshrl.u32 %v5335_v57, 16  ;;  %v2487_v48 = vor.u32 %v2486_v17, %v2483_v34 }
 0x1dc   : > { %5963 = vmatprep.mubr.msk.bf16.mxu1 %vm774_vm4, %v5349_v37  ;;  %6099 = vmatprep.mubr.msk.bf16.mxu0 %vm774_vm4, %v5625_v46 }
 0x1dd   : > { %v2507_v7 = vrot.slane %v2505_v58, 4  ;;  %v2488_v46 = vrot.slane %v2487_v48, 4 }
 0x1df   : > { %v2511_v6 = vor.u32 %v2510_v49, %v2507_v7  ;;  %v2493_v63 = vsel %vm7229_vm3, %v2488_v46, %v2492_v2 }
 0x1e0   : > { %v5353_v9 = vcombine.low %v2493_v63, %v2503_v42 }
 0x1e1   : > { %v2512_v41 = vrot.slane %v2511_v6, 4 }
 0x1e3   : > { %5964 = vmatmul.mubr.msk.bf16.gmra.mrb[20].mxu1 %vm774_vm4, %v5350_v4  ;;  %6100 = vmatmul.mubr.msk.bf16.gmra.mrb[20].mxu0 %vm774_vm4, %v5626_v12  ;;  %v5352_v12 = vcombine.low %v2469_v3, %v2479_v5  ;;  %v2517_v54 = vsel %vm7229_vm3, %v2512_v41, %v2516_v38 }
 0x1e4   : > { %5967 = vmatprep.mubr.msk.bf16.mxu1 %vm774_vm4, %v5351_v55  ;;  %6103 = vmatprep.mubr.msk.bf16.mxu0 %vm774_vm4, %v5627_v62  ;;  %v2527_v62 = vsel %vm7229_vm3, %v2522_v10, %v2526_v27 }
 0x1e5   : > { %v5354_v13 = vcombine.low %v2517_v54, %v2527_v62 }
 0x1eb   : > { %5968 = vmatmul.mubr.msk.bf16.gmra.mrb[24].mxu1 %vm774_vm4, %v5352_v12  ;;  %6104 = vmatmul.mubr.msk.bf16.gmra.mrb[24].mxu0 %vm774_vm4, %v5628_v18 }
 0x1ec   : > { %5971 = vmatprep.mubr.msk.bf16.mxu1 %vm774_vm4, %v5353_v9  ;;  %6107 = vmatprep.mubr.msk.bf16.mxu0 %vm774_vm4, %v5629_v45 }
 0x1f3   : > { %5972 = vmatmul.mubr.msk.bf16.gmra.mrb[28].mxu1 %vm774_vm4, %v5354_v13  ;;  %6108 = vmatmul.mubr.msk.bf16.gmra.mrb[28].mxu0 %vm774_vm4, %v5630_v52 }
 0x26e   : > { %v5911_v28 = vpop.f32.mrb[0].mxu1 }
 0x26f   : > { %v1937_v47 = vpop.f32.mrb[1].mxu1 }
 0x270   : > { %v5912_v18 = vpop.f32.mrb[2].mxu1 }
 0x271   : > { %v1940_v25 = vpop.f32.mrb[3].mxu1 }
 0x276   : > { %v5915_v61 = vpop.f32.mrb[4].mxu1 }
 0x277   : > { %v1953_v45 = vpop.f32.mrb[5].mxu1 }
 0x278   : > { %v5916_v40 = vpop.f32.mrb[6].mxu1 }
 0x279   : > { %v1956_v30 = vpop.f32.mrb[7].mxu1 }
 0x27e   : > { %v5919_v8 = vpop.f32.mrb[8].mxu1 }
 0x27f   : > { %v1969_v22 = vpop.f32.mrb[9].mxu1 }
 0x280   : > { %v5920_v37 = vpop.f32.mrb[10].mxu1 }
 0x281   : > { %v1972_v34 = vpop.f32.mrb[11].mxu1 }
 0x286   : > { %v8899_v17 = vpop.f32.mrb[12].mxu1 }
 0x287   : > { %v8901_v1 = vpop.f32.mrb[13].mxu1 }
 0x288   : > { %v8903_v59 = vpop.f32.mrb[14].mxu1 }
 0x289   : > { %v8905_v52 = vpop.f32.mrb[15].mxu1 }
 0x28e   : > { %v6081_v2 = vpop.f32.mrb[0].mxu0 }
 0x28f   : > { %v6113_v57 = vadd.f32 %v6081_v2, %v5911_v28  ;;  %v4688_v51 = vpop.f32.mrb[1].mxu0 }
 0x290   : > { %v6114_v36 = vadd.f32 %v4688_v51, %v1937_v47  ;;  %v6082_v35 = vpop.f32.mrb[2].mxu0 }
 0x291   : > { %v4856_v23 = vadd.f32 %v6113_v57, %v8910_v14  ;;  %v6115_v56 = vadd.f32 %v6082_v35, %v5912_v18  ;;  %v4691_v31 = vpop.f32.mrb[3].mxu0 }
 0x292   : > { %v4854_v53 = vadd.f32 %v6114_v36, %v8910_v14  ;;  %v6116_v44 = vadd.f32 %v4691_v31, %v1940_v25 }
 0x293   : > { %v4888_v58 = vmax.f32 %v4856_v23, 0.0  ;;  %v4857_v26 = vadd.f32 %v6115_v56, %v8910_v14 }
 0x294   : > { %v4886_v19 = vmax.f32 %v4854_v53, 0.0  ;;  %v4855_v20 = vadd.f32 %v6116_v44, %v8910_v14 }
 0x295   : > { %4920 = vst [vmem:[%s8918_s22 + $0x10] sm:$0xff] %v4888_v58  ;;  %v4889_v60 = vmax.f32 %v4857_v26, 0.0 }
 0x296   : > { %4918 = vst [vmem:[%s8918_s22] sm:$0xff] %v4886_v19  ;;  %v4887_v48 = vmax.f32 %v4855_v20, 0.0  ;;  %v6085_v21 = vpop.f32.mrb[4].mxu0 }
 0x297   : > { %4921 = vst [vmem:[%s8918_s22 + $0x18] sm:$0xff] %v4889_v60  ;;  %v6117_v15 = vadd.f32 %v6085_v21, %v5915_v61  ;;  %v4704_v0 = vpop.f32.mrb[5].mxu0 }
 0x298   : > { %4919 = vst [vmem:[%s8918_s22 + $0x8] sm:$0xff] %v4887_v48  ;;  %v6118_v4 = vadd.f32 %v4704_v0, %v1953_v45  ;;  %v6086_v55 = vpop.f32.mrb[6].mxu0 }
 0x299   : > { %v4860_v29 = vadd.f32 %v6117_v15, %v8910_v14  ;;  %v6119_v50 = vadd.f32 %v6086_v55, %v5916_v40  ;;  %v4707_v33 = vpop.f32.mrb[7].mxu0 }
 0x29a   : > { %v4858_v7 = vadd.f32 %v6118_v4, %v8910_v14  ;;  %v6120_v49 = vadd.f32 %v4707_v33, %v1956_v30 }
 0x29b   : > { %v4892_v38 = vmax.f32 %v4860_v29, 0.0  ;;  %v4861_v11 = vadd.f32 %v6119_v50, %v8910_v14 }
 0x29c   : > { %v4890_v46 = vmax.f32 %v4858_v7, 0.0  ;;  %v4859_v16 = vadd.f32 %v6120_v49, %v8910_v14 }
 0x29d   : > { %4924 = vst [vmem:[%s8918_s22 + $0x30] sm:$0xff] %v4892_v38  ;;  %v4893_v39 = vmax.f32 %v4861_v11, 0.0 }
 0x29e   : > { %4922 = vst [vmem:[%s8918_s22 + $0x20] sm:$0xff] %v4890_v46  ;;  %v4891_v3 = vmax.f32 %v4859_v16, 0.0  ;;  %v6089_v5 = vpop.f32.mrb[8].mxu0 }
 0x29f   : > { %4925 = vst [vmem:[%s8918_s22 + $0x38] sm:$0xff] %v4893_v39  ;;  %v6121_v6 = vadd.f32 %v6089_v5, %v5919_v8  ;;  %v4720_v43 = vpop.f32.mrb[9].mxu0 }
 0x2a0   : > { %4923 = vst [vmem:[%s8918_s22 + $0x28] sm:$0xff] %v4891_v3  ;;  %v6122_v32 = vadd.f32 %v4720_v43, %v1969_v22  ;;  %v6090_v24 = vpop.f32.mrb[10].mxu0 }
 0x2a1   : > { %v4864_v63 = vadd.f32 %v6121_v6, %v8910_v14  ;;  %v6123_v42 = vadd.f32 %v6090_v24, %v5920_v37  ;;  %v4723_v12 = vpop.f32.mrb[11].mxu0 }
 0x2a2   : > { %v4862_v9 = vadd.f32 %v6122_v32, %v8910_v14  ;;  %v6124_v41 = vadd.f32 %v4723_v12, %v1972_v34 }
 0x2a3   : > { %v4896_v10 = vmax.f32 %v4864_v63, 0.0  ;;  %v4865_v27 = vadd.f32 %v6123_v42, %v8910_v14 }
 0x2a4   : > { %v4894_v54 = vmax.f32 %v4862_v9, 0.0  ;;  %v4863_v62 = vadd.f32 %v6124_v41, %v8910_v14 }
 0x2a5   : > { %4928 = vst [vmem:[%s8918_s22 + $0x50] sm:$0xff] %v4896_v10  ;;  %v4897_v13 = vmax.f32 %v4865_v27, 0.0 }
 0x2a6   : > { %4926 = vst [vmem:[%s8918_s22 + $0x40] sm:$0xff] %v4894_v54  ;;  %v4895_v28 = vmax.f32 %v4863_v62, 0.0  ;;  %v6093_v47 = vpop.f32.mrb[12].mxu0 }
 0x2a7   : > { %4929 = vst [vmem:[%s8918_s22 + $0x58] sm:$0xff] %v4897_v13  ;;  %v6125_v18 = vadd.f32 %v6093_v47, %v8899_v17  ;;  %v4736_v25 = vpop.f32.mrb[13].mxu0 }
 0x2a8   : > { %4927 = vst [vmem:[%s8918_s22 + $0x48] sm:$0xff] %v4895_v28  ;;  %v6126_v61 = vadd.f32 %v4736_v25, %v8901_v1  ;;  %v6094_v45 = vpop.f32.mrb[14].mxu0 }
 0x2a9   : > { %v4868_v40 = vadd.f32 %v6125_v18, %v8910_v14  ;;  %v6127_v30 = vadd.f32 %v6094_v45, %v8903_v59  ;;  %v4739_v8 = vpop.f32.mrb[15].mxu0 }
 0x2aa   : > { %v4866_v22 = vadd.f32 %v6126_v61, %v8910_v14  ;;  %v6128_v37 = vadd.f32 %v4739_v8, %v8905_v52 }
 0x2ab   : > { %v4900_v34 = vmax.f32 %v4868_v40, 0.0  ;;  %v4869_v17 = vadd.f32 %v6127_v30, %v8910_v14 }
 0x2ac   : > { %v4898_v2 = vmax.f32 %v4866_v22, 0.0  ;;  %v4867_v57 = vadd.f32 %v6128_v37, %v8910_v14 }
 0x2ad   : > { %4932 = vst [vmem:[%s8918_s22 + $0x70] sm:$0xff] %v4900_v34  ;;  %v4901_v1 = vmax.f32 %v4869_v17, 0.0 }
 0x2ae   : > { %4930 = vst [vmem:[%s8918_s22 + $0x60] sm:$0xff] %v4898_v2  ;;  %v4899_v51 = vmax.f32 %v4867_v57, 0.0  ;;  %v5961_v36 = vpop.f32.mrb[16].mxu1  ;;  %v6097_v35 = vpop.f32.mrb[16].mxu0 }
 0x2af   : > { %4933 = vst [vmem:[%s8918_s22 + $0x78] sm:$0xff] %v4901_v1  ;;  %v6129_v59 = vadd.f32 %v6097_v35, %v5961_v36  ;;  %v2727_v23 = vpop.f32.mrb[17].mxu1  ;;  %v4752_v56 = vpop.f32.mrb[17].mxu0 }
 0x2b0   : > { %4931 = vst [vmem:[%s8918_s22 + $0x68] sm:$0xff] %v4899_v51  ;;  %v6130_v52 = vadd.f32 %v4752_v56, %v2727_v23  ;;  %v5962_v31 = vpop.f32.mrb[18].mxu1  ;;  %v6098_v53 = vpop.f32.mrb[18].mxu0 }
 0x2b1   : > { %v4872_v44 = vadd.f32 %v6129_v59, %v8910_v14  ;;  %v6131_v58 = vadd.f32 %v6098_v53, %v5962_v31  ;;  %v2730_v26 = vpop.f32.mrb[19].mxu1  ;;  %v4755_v19 = vpop.f32.mrb[19].mxu0 }
 0x2b2   : > { %v4870_v20 = vadd.f32 %v6130_v52, %v8910_v14  ;;  %v6132_v60 = vadd.f32 %v4755_v19, %v2730_v26 }
 0x2b3   : > { %v4904_v48 = vmax.f32 %v4872_v44, 0.0  ;;  %v4873_v21 = vadd.f32 %v6131_v58, %v8910_v14 }
 0x2b4   : > { %v4902_v15 = vmax.f32 %v4870_v20, 0.0  ;;  %v4871_v0 = vadd.f32 %v6132_v60, %v8910_v14 }
 0x2b5   : > { %4936 = vst [vmem:[%s8918_s22 + $0x90] sm:$0xff] %v4904_v48  ;;  %v4905_v4 = vmax.f32 %v4873_v21, 0.0 }
 0x2b6   : > { %4934 = vst [vmem:[%s8918_s22 + $0x80] sm:$0xff] %v4902_v15  ;;  %v4903_v55 = vmax.f32 %v4871_v0, 0.0  ;;  %v5965_v29 = vpop.f32.mrb[20].mxu1  ;;  %v6101_v50 = vpop.f32.mrb[20].mxu0 }
 0x2b7   : > { %4937 = vst [vmem:[%s8918_s22 + $0x98] sm:$0xff] %v4905_v4  ;;  %v6133_v33 = vadd.f32 %v6101_v50, %v5965_v29  ;;  %v2743_v7 = vpop.f32.mrb[21].mxu1  ;;  %v4768_v49 = vpop.f32.mrb[21].mxu0 }
 0x2b8   : > { %4935 = vst [vmem:[%s8918_s22 + $0x88] sm:$0xff] %v4903_v55  ;;  %v6134_v38 = vadd.f32 %v4768_v49, %v2743_v7  ;;  %v5966_v11 = vpop.f32.mrb[22].mxu1  ;;  %v6102_v46 = vpop.f32.mrb[22].mxu0 }
 0x2b9   : > { %v4876_v16 = vadd.f32 %v6133_v33, %v8910_v14  ;;  %v6135_v39 = vadd.f32 %v6102_v46, %v5966_v11  ;;  %v2746_v3 = vpop.f32.mrb[23].mxu1  ;;  %v4771_v5 = vpop.f32.mrb[23].mxu0 }
 0x2ba   : > { %v4874_v6 = vadd.f32 %v6134_v38, %v8910_v14  ;;  %v6136_v43 = vadd.f32 %v4771_v5, %v2746_v3 }
 0x2bb   : > { %v4908_v32 = vmax.f32 %v4876_v16, 0.0  ;;  %v4877_v24 = vadd.f32 %v6135_v39, %v8910_v14 }
 0x2bc   : > { %v4906_v63 = vmax.f32 %v4874_v6, 0.0  ;;  %v4875_v42 = vadd.f32 %v6136_v43, %v8910_v14 }
 0x2bd   : > { %4940 = vst [vmem:[%s8918_s22 + $0xb0] sm:$0xff] %v4908_v32  ;;  %v4909_v12 = vmax.f32 %v4877_v24, 0.0 }
 0x2be   : > { %4938 = vst [vmem:[%s8918_s22 + $0xa0] sm:$0xff] %v4906_v63  ;;  %v4907_v9 = vmax.f32 %v4875_v42, 0.0  ;;  %v5969_v41 = vpop.f32.mrb[24].mxu1  ;;  %v6105_v10 = vpop.f32.mrb[24].mxu0 }
 0x2bf   : > { %4941 = vst [vmem:[%s8918_s22 + $0xb8] sm:$0xff] %v4909_v12  ;;  %v6137_v27 = vadd.f32 %v6105_v10, %v5969_v41  ;;  %v2759_v54 = vpop.f32.mrb[25].mxu1  ;;  %v4784_v62 = vpop.f32.mrb[25].mxu0 }
 0x2c0   : > { %4939 = vst [vmem:[%s8918_s22 + $0xa8] sm:$0xff] %v4907_v9  ;;  %v6138_v13 = vadd.f32 %v4784_v62, %v2759_v54  ;;  %v5970_v28 = vpop.f32.mrb[26].mxu1  ;;  %v6106_v47 = vpop.f32.mrb[26].mxu0 }
 0x2c1   : > { %v4880_v18 = vadd.f32 %v6137_v27, %v8910_v14  ;;  %v6139_v25 = vadd.f32 %v6106_v47, %v5970_v28  ;;  %v2762_v61 = vpop.f32.mrb[27].mxu1  ;;  %v4787_v45 = vpop.f32.mrb[27].mxu0 }
 0x2c2   : > { %v4878_v40 = vadd.f32 %v6138_v13, %v8910_v14  ;;  %v6140_v30 = vadd.f32 %v4787_v45, %v2762_v61 }
 0x2c3   : > { %v4912_v8 = vmax.f32 %v4880_v18, 0.0  ;;  %v4881_v22 = vadd.f32 %v6139_v25, %v8910_v14 }
 0x2c4   : > { %v4910_v37 = vmax.f32 %v4878_v40, 0.0  ;;  %v4879_v34 = vadd.f32 %v6140_v30, %v8910_v14 }
 0x2c5   : > { %4944 = vst [vmem:[%s8918_s22 + $0xd0] sm:$0xff] %v4912_v8  ;;  %v4913_v17 = vmax.f32 %v4881_v22, 0.0 }
 0x2c6   : > { %4942 = vst [vmem:[%s8918_s22 + $0xc0] sm:$0xff] %v4910_v37  ;;  %v4911_v2 = vmax.f32 %v4879_v34, 0.0  ;;  %v5973_v57 = vpop.f32.mrb[28].mxu1  ;;  %v6109_v1 = vpop.f32.mrb[28].mxu0 }
 0x2c7   : > { %4945 = vst [vmem:[%s8918_s22 + $0xd8] sm:$0xff] %v4913_v17  ;;  %v6141_v51 = vadd.f32 %v6109_v1, %v5973_v57  ;;  %v2775_v36 = vpop.f32.mrb[29].mxu1  ;;  %v4800_v35 = vpop.f32.mrb[29].mxu0 }
 0x2c8   : > { %4943 = vst [vmem:[%s8918_s22 + $0xc8] sm:$0xff] %v4911_v2  ;;  %v6142_v59 = vadd.f32 %v4800_v35, %v2775_v36  ;;  %v5974_v23 = vpop.f32.mrb[30].mxu1  ;;  %v6110_v56 = vpop.f32.mrb[30].mxu0 }
 0x2c9   : > { %v4884_v52 = vadd.f32 %v6141_v51, %v8910_v14  ;;  %v6143_v31 = vadd.f32 %v6110_v56, %v5974_v23  ;;  %v2778_v53 = vpop.f32.mrb[31].mxu1  ;;  %v4803_v44 = vpop.f32.mrb[31].mxu0 }
 0x2ca   : > { %v4882_v58 = vadd.f32 %v6142_v59, %v8910_v14  ;;  %v6144_v26 = vadd.f32 %v4803_v44, %v2778_v53 }
 0x2cb   : > { %v4916_v19 = vmax.f32 %v4884_v52, 0.0  ;;  %v4885_v20 = vadd.f32 %v6143_v31, %v8910_v14 }
 0x2cc   : > { %v4914_v60 = vmax.f32 %v4882_v58, 0.0  ;;  %v4883_v48 = vadd.f32 %v6144_v26, %v8910_v14 }
 0x2cd   : > { %4948 = vst [vmem:[%s8918_s22 + $0xf0] sm:$0xff] %v4916_v19  ;;  %v4917_v21 = vmax.f32 %v4885_v20, 0.0 }
 0x2ce   : > { %4946 = vst [vmem:[%s8918_s22 + $0xe0] sm:$0xff] %v4914_v60  ;;  %v4915_v15 = vmax.f32 %v4883_v48, 0.0 }
 0x2cf   : > { %4949 = vst [vmem:[%s8918_s22 + $0xf8] sm:$0xff] %v4917_v21 }
 0x2d0   : > { %4947 = vst [vmem:[%s8918_s22 + $0xe8] sm:$0xff] %v4915_v15 }
 0x2d1   : > { %6733 = shalt.err (!%p6730_p2)
}
 0x2d2   : > { %s6734_s5 = scalar_lea.hbm %s8986_s14, 4096  ;;  %s6738_s4 = scalar_lea.hbm %s9210_s8, 24576 }
 0x2d3   : > { %p6735_p12 = scmp.ne.s32.totalorder %s8986_s14, %s6734_s5  ;;  %p6739_p3 = scmp.lt.u32.totalorder %s8986_s14, %s9210_s8 }
 0x2d4   : > { %p6740_p4 = scmp.lt.u32.totalorder %s6738_s4, %s6734_s5  ;;  %p6742_p13 = scmp.lt.u32.totalorder %s6734_s5, %s8986_s14 }
 0x2d5   : > { %p6736_p0 = pnand %p6735_p12, %p9211_p10 }
 0x2d6   : > { %p6741_p5 = por %p6740_p4, %p6739_p3 }
 0x2d7   : > { %p6737_p6 = pneg %p6736_p0 }
 0x2d8   : > { %p6743_p1 = por %p6742_p13, %p6741_p5 }
 0x2da   : > { %p6744_p7 = pnand %p6743_p1, %p6737_p6 }
 0x2dc   : > { %6747 = shalt.err (!%p6744_p7)
}
 0x2dd   : > { %s6879_s20 = smov 128   ;;  %s6880_s26 = smov 384  }
 0x2de   : > { %s6881_s6 = smov 8  }
 0x2df   : > { %6391 = dma.vmem_to_hbm [thread:$0]  (%p9211_p10), %s8989_s3, 4096, %s8986_s14, %s8996_s23, %s6879_s20, %s6880_s26, %s6881_s6  }
 0x2e0 PF: > { %p6408_p9 = scmp.ge.s32.totalorder %s6870_s25, 2  ;;  %s4983_s21 = sand.u32 1, %s6818_s12  }
 0x2e1   : > { %p9212_p11 = scmp.ne.s32.totalorder %s9131_s28, 0  ;;  %s4984_s11 = scalar_lea.sflag [#allocation4], %s4983_s21 }
 0x2e3   : > { %p6404_p8 = pnand %p6408_p9, %p9212_p11 }
 0x2e5   : > { %6813 = dma.done.wait (!%p6404_p8), %s4984_s11, 4096  }
 0x2e6   : > { %6815 = vsyncadd (!%p6404_p8), %s4984_s11, 4294963200  ;;  %s22_s25 = sadd.s32 1, %s6870_s25   ;;  %s9214_s15 = sld [smem:[#allocation12_spill]] }
 0x2e7   : > { %p9025_p2 = scmp.ge.s32.totalorder %s22_s25, 8   ;;  %s9215_s14 = sld [smem:[#allocation20_spill]] }
 0x2e8   : > { %s9216_s3 = sld [smem:[#allocation19_spill]]  ;;  %s9217_s23 = sld [smem:[#allocation13_spill]] }
 0x2e9   : > { %s9218_s20 = sld [smem:[#allocation18_spill]]  ;;  %s9219_s21 = sld [smem:[#allocation15_spill]] }
 0x2ea   : > { %s9220_s28 = sld [smem:[#allocation16_spill]]  ;;  %s9221_s30 = sld [smem:[#allocation17_spill]] }
 0x2eb   : > { %s9223_s12 = smov %s6822_s13  ;;  %s9228_s18 = smov %s6846_s19 }
 0x2ec   : > { %s9224_s13 = smov %s9214_s15  ;;  %s9225_s15 = smov %s6834_s16 }
 0x2ed   : > { %s9226_s16 = smov %s6838_s17  ;;  %s9230_s22 = smov %s6866_s24 }
 0x2ee   : > { %s9227_s17 = smov %s9216_s3  ;;  %s9229_s19 = smov %s9217_s23 }
 0x2ef   :  { %21 = sbr.rel (!%p9025_p2) target bundleno = 15 (0xf), region = 111 }
 0x2f0   : > { %s9231_s23 = smov %s9220_s28  ;;  %s9232_s24 = smov %s9221_s30 }
 0x2f6   :  { %4989 = vsyncpa [#allocation3], 1 }
 0x2f7   :  { %4991 = vsyncpa [#allocation3 + $0x1], 1 }
 0x2f8   :  { %4992 = vsyncpa [#allocation6], 1 }
 0x2f9   :  { %4994 = vsyncpa [#allocation6 + $0x1], 1 }
 0x2fa   :  { %4995 = vsyncpa [#allocation4], 1 }
 0x2fb   :  { %4997 = vsyncpa [#allocation4 + $0x1], 1 }

</bundles_post_ra>
